<compile_context>
chip_gen: v7x
topology: tpu7x:2x2x1
jax: 0.10.0
libtpu: 0.0.40
codegen_flags: <defaults>
</compile_context>

<pallas_src>
import jax
import jax.numpy as jnp
from jax.experimental import pallas as pl
from jax.experimental.pallas import tpu as pltpu


_VMEM_LIMIT = 32 * 1024 * 1024   # chip-safe explicit VMEM budget (v5e/v6e/v7x)
_TM_MAX = 1024                   # M-tile rows (multiple of 8 sublanes)


# ----------------------------- Pallas kernels ------------------------------ #

def _conv_mm_kernel(p_ref, w_ref, b_ref, o_ref):
    """Fused conv-as-matmul + folded-BN bias + ReLU.

    p_ref: (TM, K)    bf16 im2col patch tile
    w_ref: (K, Cout)  bf16 weights (BN scale pre-folded)
    b_ref: (1, Cout)  f32 folded bias
    o_ref: (TM, Cout) bf16 output tile
    """
    acc = jnp.dot(p_ref[...], w_ref[...], preferred_element_type=jnp.float32)
    o_ref[...] = jnp.maximum(acc + b_ref[...], 0.0).astype(o_ref.dtype)


def _dual_conv_mm_kernel(p1_ref, p2_ref, w1_ref, w2_ref, b_ref, o_ref):
    """Two fused conv-matmuls whose outputs are channel-concatenated in-kernel.

    p1_ref: (TM, K1) bf16   p2_ref: (TM, K2) bf16
    w1_ref: (K1, C1) bf16   w2_ref: (K2, C2) bf16
    b_ref:  (1, C1+C2) f32
    o_ref:  (TM, C1+C2) bf16   (lane-dense concatenated store)
    """
    acc1 = jnp.dot(p1_ref[...], w1_ref[...], preferred_element_type=jnp.float32)
    acc2 = jnp.dot(p2_ref[...], w2_ref[...], preferred_element_type=jnp.float32)
    acc = jnp.concatenate([acc1, acc2], axis=-1)
    o_ref[...] = jnp.maximum(acc + b_ref[...], 0.0).astype(o_ref.dtype)


def _maxpool_kernel(p00_ref, p01_ref, p10_ref, p11_ref, o_ref):
    """3x3 stride-2 max-pool from 4 stride-2 phases of the input.

    p00: (1, Ho+1, Wo+1, C)   x[0::2, 0::2]
    p01: (1, Ho+1, Wo,   C)   x[0::2, 1::2]
    p10: (1, Ho,   Wo+1, C)   x[1::2, 0::2]
    p11: (1, Ho,   Wo,   C)   x[1::2, 1::2]
    o  : (1, Ho,   Wo,   C)
    """
    Ho, Wo = o_ref.shape[1], o_ref.shape[2]
    m = p11_ref[...]
    m = jnp.maximum(m, p00_ref[:, 0:Ho, 0:Wo, :])
    m = jnp.maximum(m, p00_ref[:, 0:Ho, 1:Wo + 1, :])
    m = jnp.maximum(m, p00_ref[:, 1:Ho + 1, 0:Wo, :])
    m = jnp.maximum(m, p00_ref[:, 1:Ho + 1, 1:Wo + 1, :])
    m = jnp.maximum(m, p01_ref[:, 0:Ho, :, :])
    m = jnp.maximum(m, p01_ref[:, 1:Ho + 1, :, :])
    m = jnp.maximum(m, p10_ref[:, :, 0:Wo, :])
    m = jnp.maximum(m, p10_ref[:, :, 1:Wo + 1, :])
    o_ref[...] = m


# --------------------------- layer building blocks -------------------------- #

def _mm_compiler_params():
    return pltpu.CompilerParams(
        dimension_semantics=("parallel",),
        vmem_limit_bytes=_VMEM_LIMIT,
    )


def _im2col(x, KH, KW, sh, sw, ph, pw):
    """x: (N,H,W,Cin) bf16 -> (N*Ho*Wo, KH*KW*Cin) bf16, plus (Ho, Wo)."""
    N, H, W, Cin = x.shape
    if ph or pw:
        x = jnp.pad(x, ((0, 0), (ph, ph), (pw, pw), (0, 0)))
    Hp, Wp = H + 2 * ph, W + 2 * pw
    Ho = (Hp - KH) // sh + 1
    Wo = (Wp - KW) // sw + 1

    if (KH, KW, sh, sw) == (1, 1, 1, 1):
        return x.reshape(N * Ho * Wo, Cin), Ho, Wo

    # im2col (bf16, so the KH*KW blow-up is halved); order (kh, kw, cin) matches
    # the (KH,KW,Cin,Cout) -> (K,Cout) weight reshape used by the callers.
    cols = []
    for kh in range(KH):
        for kw in range(KW):
            cols.append(
                x[:, kh:kh + sh * (Ho - 1) + 1:sh, kw:kw + sw * (Wo - 1) + 1:sw, :]
            )
    p = jnp.concatenate(cols, axis=-1).reshape(N * Ho * Wo, KH * KW * Cin)
    return p, Ho, Wo


def conv_bn_relu(x, w, bias, stride=(1, 1), padding=(0, 0)):
    """x: (N,H,W,Cin) bf16; w: (KH,KW,Cin,Cout) bf16 (scale folded); bias: (1,Cout) f32."""
    N = x.shape[0]
    Cin = x.shape[3]
    KH, KW, _, Cout = w.shape
    sh, sw = stride
    ph, pw = padding

    # Pad a ragged innermost channel dim (e.g. RGB Cin=3) up to 8 lanes;
    # zero channels contribute nothing to the matmul.
    if Cin < 8:
        x = jnp.pad(x, ((0, 0), (0, 0), (0, 0), (0, 8 - Cin)))
        w = jnp.pad(w, ((0, 0), (0, 0), (0, 8 - Cin), (0, 0)))
        Cin = 8

    p, Ho, Wo = _im2col(x, KH, KW, sh, sw, ph, pw)
    wm = w.reshape(KH * KW * Cin, Cout)
    M, K = p.shape

    # M-tiled, double-buffered matmul; weights/bias are grid-invariant blocks.
    TM = M if M <= _TM_MAX else _TM_MAX
    grid = (pl.cdiv(M, TM),)

    out = pl.pallas_call(
        _conv_mm_kernel,
        out_shape=jax.ShapeDtypeStruct((M, Cout), jnp.bfloat16),
        grid=grid,
        in_specs=[
            pl.BlockSpec((TM, K), lambda i: (i, 0)),
            pl.BlockSpec((K, Cout), lambda i: (0, 0)),
            pl.BlockSpec((1, Cout), lambda i: (0, 0)),
        ],
        out_specs=pl.BlockSpec((TM, Cout), lambda i: (i, 0)),
        compiler_params=_mm_compiler_params(),
    )(p, wm, bias)
    return out.reshape(N, Ho, Wo, Cout)


def dual_conv3x3_bn_relu_concat(x1, params1, x2, params2):
    """Two 3x3 stride-1 valid Conv+BN+ReLU with identical output spatial dims,
    fused into one kernel; result is channel-concatenated ([x1-branch, x2-branch])."""
    N = x1.shape[0]
    w1, bias1 = params1["w"], params1["bias"]
    w2, bias2 = params2["w"], params2["bias"]
    KH, KW, Cin1, Co1 = w1.shape
    _, _, Cin2, Co2 = w2.shape

    p1, Ho, Wo = _im2col(x1, KH, KW, 1, 1, 0, 0)
    p2, Ho2, Wo2 = _im2col(x2, KH, KW, 1, 1, 0, 0)
    assert (Ho, Wo) == (Ho2, Wo2)

    wm1 = w1.reshape(KH * KW * Cin1, Co1)
    wm2 = w2.reshape(KH * KW * Cin2, Co2)
    bias = jnp.concatenate([bias1, bias2], axis=-1)

    M, K1 = p1.shape
    _, K2 = p2.shape
    Cout = Co1 + Co2

    TM = M if M <= _TM_MAX else _TM_MAX
    grid = (pl.cdiv(M, TM),)

    out = pl.pallas_call(
        _dual_conv_mm_kernel,
        out_shape=jax.ShapeDtypeStruct((M, Cout), jnp.bfloat16),
        grid=grid,
        in_specs=[
            pl.BlockSpec((TM, K1), lambda i: (i, 0)),
            pl.BlockSpec((TM, K2), lambda i: (i, 0)),
            pl.BlockSpec((K1, Co1), lambda i: (0, 0)),
            pl.BlockSpec((K2, Co2), lambda i: (0, 0)),
            pl.BlockSpec((1, Cout), lambda i: (0, 0)),
        ],
        out_specs=pl.BlockSpec((TM, Cout), lambda i: (i, 0)),
        compiler_params=_mm_compiler_params(),
    )(p1, p2, wm1, wm2, bias)
    return out.reshape(N, Ho, Wo, Cout)


def maxpool_3x3_s2(x):
    """MaxPool2d(kernel_size=3, stride=2), no padding.  x: (N,H,W,C) bf16."""
    N, H, W, C = x.shape
    Ho = (H - 3) // 2 + 1
    Wo = (W - 3) // 2 + 1

    # Even/odd stride-2 phase decomposition: total HBM bytes ~= |x| (no 9x stack).
    p00 = x[:, 0:2 * Ho + 1:2, 0:2 * Wo + 1:2, :]   # (N, Ho+1, Wo+1, C)
    p01 = x[:, 0:2 * Ho + 1:2, 1:2 * Wo:2, :]       # (N, Ho+1, Wo,   C)
    p10 = x[:, 1:2 * Ho:2, 0:2 * Wo + 1:2, :]       # (N, Ho,   Wo+1, C)
    p11 = x[:, 1:2 * Ho:2, 1:2 * Wo:2, :]           # (N, Ho,   Wo,   C)

    def spec(a):
        return pl.BlockSpec((1,) + a.shape[1:], lambda n: (n, 0, 0, 0))

    return pl.pallas_call(
        _maxpool_kernel,
        out_shape=jax.ShapeDtypeStruct((N, Ho, Wo, C), x.dtype),
        grid=(N,),
        in_specs=[spec(p00), spec(p01), spec(p10), spec(p11)],
        out_specs=pl.BlockSpec((1, Ho, Wo, C), lambda n: (n, 0, 0, 0)),
        compiler_params=pltpu.CompilerParams(
            dimension_semantics=("parallel",),
            vmem_limit_bytes=_VMEM_LIMIT,
        ),
    )(p00, p01, p10, p11)


# ------------------------------ parameter init ------------------------------ #

def make_basic_conv_params(key, in_c, out_c, kh, kw):
    k_w, k_b = jax.random.split(key)
    fan_in = in_c * kh * kw
    # PyTorch Conv2d weight layout (Cout, Cin, KH, KW) -> kernel layout (KH, KW, Cin, Cout)
    w_torch = jax.random.normal(k_w, (out_c, in_c, kh, kw), jnp.float32) / jnp.sqrt(fan_in)
    w = jnp.transpose(w_torch, (2, 3, 1, 0))
    conv_b = 0.01 * jax.random.normal(k_b, (out_c,), jnp.float32)
    # BatchNorm2d (eval-mode defaults): gamma=1, beta=0, running_mean=0, running_var=1
    gamma = jnp.ones((out_c,), jnp.float32)
    beta = jnp.zeros((out_c,), jnp.float32)
    rmean = jnp.zeros((out_c,), jnp.float32)
    rvar = jnp.ones((out_c,), jnp.float32)
    eps = 1e-5
    scale = gamma / jnp.sqrt(rvar + eps)
    bias = beta + scale * (conv_b - rmean)                 # conv bias folded into BN bias
    w_folded = (w * scale[None, None, None, :]).astype(jnp.bfloat16)   # BN scale into weights
    return dict(w=w_folded, bias=bias.reshape(1, out_c).astype(jnp.float32))


def init_params(key, in_channels):
    ks = jax.random.split(key, 11)
    # Fuse the two sibling 1x1 convs (branch7x7_1[0] and branch7x7_2[0], both
    # 160->64) into one lane-dense Cout=128 matmul.
    p_b7_1_0 = make_basic_conv_params(ks[4], 160, 64, 1, 1)
    p_b7_2_0 = make_basic_conv_params(ks[6], 160, 64, 1, 1)
    b7_0_fused = dict(
        w=jnp.concatenate([p_b7_1_0["w"], p_b7_2_0["w"]], axis=-1),
        bias=jnp.concatenate([p_b7_1_0["bias"], p_b7_2_0["bias"]], axis=-1),
    )
    return {
        "conv1_0": make_basic_conv_params(ks[0], in_channels, 32, 3, 3),
        "conv1_1": make_basic_conv_params(ks[1], 32, 32, 3, 3),
        "conv1_2": make_basic_conv_params(ks[2], 32, 64, 3, 3),
        "branch3x3_conv": make_basic_conv_params(ks[3], 64, 96, 3, 3),
        "b7_0_fused": b7_0_fused,
        "b7_1_1": make_basic_conv_params(ks[5], 64, 96, 3, 3),
        "b7_2_1": make_basic_conv_params(ks[7], 64, 64, 7, 1),
        "b7_2_2": make_basic_conv_params(ks[8], 64, 64, 1, 7),
        "b7_2_3": make_basic_conv_params(ks[9], 64, 96, 3, 3),
        "branch_pool1": make_basic_conv_params(ks[10], 192, 192, 3, 3),
    }


# ------------------------------- stem forward ------------------------------- #

def inception_stem(x_nchw, params):
    p = params
    x = jnp.transpose(x_nchw, (0, 2, 3, 1)).astype(jnp.bfloat16)   # NCHW -> NHWC, bf16

    # conv1 sequential
    x = conv_bn_relu(x, **p["conv1_0"], stride=(2, 2))             # 3x3 s2
    x = conv_bn_relu(x, **p["conv1_1"])                            # 3x3
    x = conv_bn_relu(x, **p["conv1_2"], padding=(1, 1))            # 3x3 pad 1

    # 3x3 branch: maxpool || conv, concat on channels (64 + 96 = 160)
    a = maxpool_3x3_s2(x)
    b = conv_bn_relu(x, **p["branch3x3_conv"], stride=(2, 2))
    x = jnp.concatenate([a, b], axis=-1)

    # 7x7 branches: fused 1x1 (Cout=128), per-branch middles, and the two tail
    # 3x3 convs fused into one dual-matmul kernel with a concatenated store
    # (96 + 96 = 192 channels, lane-dense).
    y = conv_bn_relu(x, **p["b7_0_fused"])                         # 1x1, lane-dense
    b2 = conv_bn_relu(y[..., 64:], **p["b7_2_1"], padding=(3, 0))  # 7x1
    b2 = conv_bn_relu(b2, **p["b7_2_2"], padding=(0, 3))           # 1x7
    x = dual_conv3x3_bn_relu_concat(y[..., :64], p["b7_1_1"],      # [branch1 | branch2]
                                    b2, p["b7_2_3"])

    # pool branch: conv s2 || maxpool s2, concat (192 + 192 = 384)
    c1 = conv_bn_relu(x, **p["branch_pool1"], stride=(2, 2))
    c2 = maxpool_3x3_s2(x)
    x = jnp.concatenate([c1, c2], axis=-1)

    return jnp.transpose(x, (0, 3, 1, 2)).astype(jnp.float32)      # NHWC -> NCHW, f32


# ----------------------------------- main ----------------------------------- #

if __name__ == "__main__":
    key = jax.random.PRNGKey(0)
    k_x, k_p = jax.random.split(key)

    # Smallest convenient shapes: the stem needs >=27x27 spatial input to be valid.
    N, C_in, S = 2, 3, 32
    x = jax.random.normal(k_x, (N, C_in, S, S), jnp.float32)
    params = init_params(k_p, C_in)

    out = jax.jit(inception_stem)(x, params)
    out = jax.block_until_ready(out)

    assert out.shape == (N, 384, 1, 1), out.shape
    assert out.dtype == jnp.float32
    assert bool(jnp.all(jnp.isfinite(out)))
    print("KERNEL_OK")
</pallas_src>

<mosaic_0001>
module attributes {stable_mosaic.version = 11 : i64} {
  func.func @_conv_mm_kernel(%arg0: i32, %arg1: memref<450x72xbf16, #tpu.memory_space<vmem>>, %arg2: memref<72x32xbf16, #tpu.memory_space<vmem>>, %arg3: memref<1x32xf32, #tpu.memory_space<vmem>>, %arg4: memref<450x32xbf16, #tpu.memory_space<vmem>>) attributes {dimension_semantics = [#tpu.dimension_semantics<parallel>], iteration_bounds = array<i64: 1>, scalar_prefetch = 0 : i64, scratch_operands = 0 : i64, tpu.core_type = #tpu.core_type<tc>, window_params = [{transform_indices = @transform_0, window_bounds = array<i64: 450, 72>}, {pipeline_mode = #tpu.pipeline_mode<synchronous>, transform_indices = @transform_1, window_bounds = array<i64: 72, 32>}, {pipeline_mode = #tpu.pipeline_mode<synchronous>, transform_indices = @transform_2, window_bounds = array<i64: 1, 32>}, {transform_indices = @transform_3, window_bounds = array<i64: 450, 32>}]} {
    %c0 = arith.constant 0 : index
    %c0_0 = arith.constant 0 : index
    %0 = vector.load %arg1[%c0, %c0_0] : memref<450x72xbf16, #tpu.memory_space<vmem>>, vector<450x72xbf16>
    %c0_1 = arith.constant 0 : index
    %c0_2 = arith.constant 0 : index
    %1 = vector.load %arg2[%c0_1, %c0_2] : memref<72x32xbf16, #tpu.memory_space<vmem>>, vector<72x32xbf16>
    %cst = arith.constant dense<0.000000e+00> : vector<450x32xf32>
    %2 = tpu.matmul %0, %1, %cst {dimension_numbers = #tpu.dot_dimension_numbers<[1], [0], [0], [1], [0, 0, 1, 1], [], []>} : vector<450x72xbf16>, vector<72x32xbf16>, vector<450x32xf32> -> vector<450x32xf32>
    %c0_3 = arith.constant 0 : index
    %c0_4 = arith.constant 0 : index
    %3 = vector.load %arg3[%c0_3, %c0_4] : memref<1x32xf32, #tpu.memory_space<vmem>>, vector<1x32xf32>
    %4 = vector.broadcast %3 : vector<1x32xf32> to vector<450x32xf32>
    %5 = arith.addf %2, %4 : vector<450x32xf32>
    %cst_5 = arith.constant 0.000000e+00 : f32
    %6 = vector.broadcast %cst_5 : f32 to vector<450x32xf32>
    %7 = arith.maximumf %5, %6 : vector<450x32xf32>
    %8 = arith.truncf %7 : vector<450x32xf32> to vector<450x32xbf16>
    %c0_6 = arith.constant 0 : index
    %c0_7 = arith.constant 0 : index
    %9 = vector.load %arg4[%c0_6, %c0_7] : memref<450x32xbf16, #tpu.memory_space<vmem>>, vector<450x32xbf16>
    tpu.vector_store %arg4[%c0_6, %c0_7], %8 {strides = array<i32>} : memref<450x32xbf16, #tpu.memory_space<vmem>>, vector<450x32xbf16>,
    return
  }
  func.func @transform_0(%arg0: i32) -> (i32, i32) {
    %c0_i32 = arith.constant 0 : i32
    %c0_i32_0 = arith.constant 0 : i32
    return %arg0, %c0_i32 : i32, i32
  }
  func.func @transform_1(%arg0: i32) -> (i32, i32) {
    %c0_i32 = arith.constant 0 : i32
    %c0_i32_0 = arith.constant 0 : i32
    %c0_i32_1 = arith.constant 0 : i32
    return %c0_i32, %c0_i32_0 : i32, i32
  }
  func.func @transform_2(%arg0: i32) -> (i32, i32) {
    %c0_i32 = arith.constant 0 : i32
    %c0_i32_0 = arith.constant 0 : i32
    %c0_i32_1 = arith.constant 0 : i32
    return %c0_i32, %c0_i32_0 : i32, i32
  }
  func.func @transform_3(%arg0: i32) -> (i32, i32) {
    %c0_i32 = arith.constant 0 : i32
    %c0_i32_0 = arith.constant 0 : i32
    return %arg0, %c0_i32 : i32, i32
  }
}

module attributes {stable_mosaic.version = 11 : i64} {
  func.func @_conv_mm_kernel(%arg0: i32, %arg1: memref<338x288xbf16, #tpu.memory_space<vmem>>, %arg2: memref<288x32xbf16, #tpu.memory_space<vmem>>, %arg3: memref<1x32xf32, #tpu.memory_space<vmem>>, %arg4: memref<338x32xbf16, #tpu.memory_space<vmem>>) attributes {dimension_semantics = [#tpu.dimension_semantics<parallel>], iteration_bounds = array<i64: 1>, scalar_prefetch = 0 : i64, scratch_operands = 0 : i64, tpu.core_type = #tpu.core_type<tc>, window_params = [{transform_indices = @transform_0, window_bounds = array<i64: 338, 288>}, {pipeline_mode = #tpu.pipeline_mode<synchronous>, transform_indices = @transform_1, window_bounds = array<i64: 288, 32>}, {pipeline_mode = #tpu.pipeline_mode<synchronous>, transform_indices = @transform_2, window_bounds = array<i64: 1, 32>}, {transform_indices = @transform_3, window_bounds = array<i64: 338, 32>}]} {
    %c0 = arith.constant 0 : index
    %c0_0 = arith.constant 0 : index
    %0 = vector.load %arg1[%c0, %c0_0] : memref<338x288xbf16, #tpu.memory_space<vmem>>, vector<338x288xbf16>
    %c0_1 = arith.constant 0 : index
    %c0_2 = arith.constant 0 : index
    %1 = vector.load %arg2[%c0_1, %c0_2] : memref<288x32xbf16, #tpu.memory_space<vmem>>, vector<288x32xbf16>
    %cst = arith.constant dense<0.000000e+00> : vector<338x32xf32>
    %2 = tpu.matmul %0, %1, %cst {dimension_numbers = #tpu.dot_dimension_numbers<[1], [0], [0], [1], [0, 0, 1, 1], [], []>} : vector<338x288xbf16>, vector<288x32xbf16>, vector<338x32xf32> -> vector<338x32xf32>
    %c0_3 = arith.constant 0 : index
    %c0_4 = arith.constant 0 : index
    %3 = vector.load %arg3[%c0_3, %c0_4] : memref<1x32xf32, #tpu.memory_space<vmem>>, vector<1x32xf32>
    %4 = vector.broadcast %3 : vector<1x32xf32> to vector<338x32xf32>
    %5 = arith.addf %2, %4 : vector<338x32xf32>
    %cst_5 = arith.constant 0.000000e+00 : f32
    %6 = vector.broadcast %cst_5 : f32 to vector<338x32xf32>
    %7 = arith.maximumf %5, %6 : vector<338x32xf32>
    %8 = arith.truncf %7 : vector<338x32xf32> to vector<338x32xbf16>
    %c0_6 = arith.constant 0 : index
    %c0_7 = arith.constant 0 : index
    %9 = vector.load %arg4[%c0_6, %c0_7] : memref<338x32xbf16, #tpu.memory_space<vmem>>, vector<338x32xbf16>
    tpu.vector_store %arg4[%c0_6, %c0_7], %8 {strides = array<i32>} : memref<338x32xbf16, #tpu.memory_space<vmem>>, vector<338x32xbf16>,
    return
  }
  func.func @transform_0(%arg0: i32) -> (i32, i32) {
    %c0_i32 = arith.constant 0 : i32
    %c0_i32_0 = arith.constant 0 : i32
    return %arg0, %c0_i32 : i32, i32
  }
  func.func @transform_1(%arg0: i32) -> (i32, i32) {
    %c0_i32 = arith.constant 0 : i32
    %c0_i32_0 = arith.constant 0 : i32
    %c0_i32_1 = arith.constant 0 : i32
    return %c0_i32, %c0_i32_0 : i32, i32
  }
  func.func @transform_2(%arg0: i32) -> (i32, i32) {
    %c0_i32 = arith.constant 0 : i32
    %c0_i32_0 = arith.constant 0 : i32
    %c0_i32_1 = arith.constant 0 : i32
    return %c0_i32, %c0_i32_0 : i32, i32
  }
  func.func @transform_3(%arg0: i32) -> (i32, i32) {
    %c0_i32 = arith.constant 0 : i32
    %c0_i32_0 = arith.constant 0 : i32
    return %arg0, %c0_i32 : i32, i32
  }
}

module attributes {stable_mosaic.version = 11 : i64} {
  func.func @_conv_mm_kernel(%arg0: i32, %arg1: memref<338x288xbf16, #tpu.memory_space<vmem>>, %arg2: memref<288x64xbf16, #tpu.memory_space<vmem>>, %arg3: memref<1x64xf32, #tpu.memory_space<vmem>>, %arg4: memref<338x64xbf16, #tpu.memory_space<vmem>>) attributes {dimension_semantics = [#tpu.dimension_semantics<parallel>], iteration_bounds = array<i64: 1>, scalar_prefetch = 0 : i64, scratch_operands = 0 : i64, tpu.core_type = #tpu.core_type<tc>, window_params = [{transform_indices = @transform_0, window_bounds = array<i64: 338, 288>}, {pipeline_mode = #tpu.pipeline_mode<synchronous>, transform_indices = @transform_1, window_bounds = array<i64: 288, 64>}, {pipeline_mode = #tpu.pipeline_mode<synchronous>, transform_indices = @transform_2, window_bounds = array<i64: 1, 64>}, {transform_indices = @transform_3, window_bounds = array<i64: 338, 64>}]} {
    %c0 = arith.constant 0 : index
    %c0_0 = arith.constant 0 : index
    %0 = vector.load %arg1[%c0, %c0_0] : memref<338x288xbf16, #tpu.memory_space<vmem>>, vector<338x288xbf16>
    %c0_1 = arith.constant 0 : index
    %c0_2 = arith.constant 0 : index
    %1 = vector.load %arg2[%c0_1, %c0_2] : memref<288x64xbf16, #tpu.memory_space<vmem>>, vector<288x64xbf16>
    %cst = arith.constant dense<0.000000e+00> : vector<338x64xf32>
    %2 = tpu.matmul %0, %1, %cst {dimension_numbers = #tpu.dot_dimension_numbers<[1], [0], [0], [1], [0, 0, 1, 1], [], []>} : vector<338x288xbf16>, vector<288x64xbf16>, vector<338x64xf32> -> vector<338x64xf32>
    %c0_3 = arith.constant 0 : index
    %c0_4 = arith.constant 0 : index
    %3 = vector.load %arg3[%c0_3, %c0_4] : memref<1x64xf32, #tpu.memory_space<vmem>>, vector<1x64xf32>
    %4 = vector.broadcast %3 : vector<1x64xf32> to vector<338x64xf32>
    %5 = arith.addf %2, %4 : vector<338x64xf32>
    %cst_5 = arith.constant 0.000000e+00 : f32
    %6 = vector.broadcast %cst_5 : f32 to vector<338x64xf32>
    %7 = arith.maximumf %5, %6 : vector<338x64xf32>
    %8 = arith.truncf %7 : vector<338x64xf32> to vector<338x64xbf16>
    %c0_6 = arith.constant 0 : index
    %c0_7 = arith.constant 0 : index
    %9 = vector.load %arg4[%c0_6, %c0_7] : memref<338x64xbf16, #tpu.memory_space<vmem>>, vector<338x64xbf16>
    tpu.vector_store %arg4[%c0_6, %c0_7], %8 {strides = array<i32>} : memref<338x64xbf16, #tpu.memory_space<vmem>>, vector<338x64xbf16>,
    return
  }
  func.func @transform_0(%arg0: i32) -> (i32, i32) {
    %c0_i32 = arith.constant 0 : i32
    %c0_i32_0 = arith.constant 0 : i32
    return %arg0, %c0_i32 : i32, i32
  }
  func.func @transform_1(%arg0: i32) -> (i32, i32) {
    %c0_i32 = arith.constant 0 : i32
    %c0_i32_0 = arith.constant 0 : i32
    %c0_i32_1 = arith.constant 0 : i32
    return %c0_i32, %c0_i32_0 : i32, i32
  }
  func.func @transform_2(%arg0: i32) -> (i32, i32) {
    %c0_i32 = arith.constant 0 : i32
    %c0_i32_0 = arith.constant 0 : i32
    %c0_i32_1 = arith.constant 0 : i32
    return %c0_i32, %c0_i32_0 : i32, i32
  }
  func.func @transform_3(%arg0: i32) -> (i32, i32) {
    %c0_i32 = arith.constant 0 : i32
    %c0_i32_0 = arith.constant 0 : i32
    return %arg0, %c0_i32 : i32, i32
  }
}

module attributes {stable_mosaic.version = 11 : i64} {
  func.func @_maxpool_kernel(%arg0: i32, %arg1: memref<1x7x7x64xbf16, #tpu.memory_space<vmem>>, %arg2: memref<1x7x6x64xbf16, #tpu.memory_space<vmem>>, %arg3: memref<1x6x7x64xbf16, #tpu.memory_space<vmem>>, %arg4: memref<1x6x6x64xbf16, #tpu.memory_space<vmem>>, %arg5: memref<1x6x6x64xbf16, #tpu.memory_space<vmem>>) attributes {dimension_semantics = [#tpu.dimension_semantics<parallel>], iteration_bounds = array<i64: 2>, scalar_prefetch = 0 : i64, scratch_operands = 0 : i64, tpu.core_type = #tpu.core_type<tc>, window_params = [{transform_indices = @transform_0, window_bounds = array<i64: 1, 7, 7, 64>}, {transform_indices = @transform_1, window_bounds = array<i64: 1, 7, 6, 64>}, {transform_indices = @transform_2, window_bounds = array<i64: 1, 6, 7, 64>}, {transform_indices = @transform_3, window_bounds = array<i64: 1, 6, 6, 64>}, {transform_indices = @transform_4, window_bounds = array<i64: 1, 6, 6, 64>}]} {
    %c0 = arith.constant 0 : index
    %c0_0 = arith.constant 0 : index
    %c0_1 = arith.constant 0 : index
    %c0_2 = arith.constant 0 : index
    %0 = vector.load %arg4[%c0, %c0_0, %c0_1, %c0_2] : memref<1x6x6x64xbf16, #tpu.memory_space<vmem>>, vector<1x6x6x64xbf16>
    %c0_3 = arith.constant 0 : index
    %c0_4 = arith.constant 0 : index
    %c0_5 = arith.constant 0 : index
    %c0_6 = arith.constant 0 : index
    %1 = vector.load %arg1[%c0_3, %c0_4, %c0_5, %c0_6] : memref<1x7x7x64xbf16, #tpu.memory_space<vmem>>, vector<1x6x6x64xbf16>
    %2 = arith.maximumf %0, %1 : vector<1x6x6x64xbf16>
    %c0_7 = arith.constant 0 : index
    %c0_8 = arith.constant 0 : index
    %c1 = arith.constant 1 : index
    %c0_9 = arith.constant 0 : index
    %3 = vector.load %arg1[%c0_7, %c0_8, %c1, %c0_9] : memref<1x7x7x64xbf16, #tpu.memory_space<vmem>>, vector<1x6x6x64xbf16>
    %4 = arith.maximumf %2, %3 : vector<1x6x6x64xbf16>
    %c0_10 = arith.constant 0 : index
    %c1_11 = arith.constant 1 : index
    %c0_12 = arith.constant 0 : index
    %c0_13 = arith.constant 0 : index
    %5 = vector.load %arg1[%c0_10, %c1_11, %c0_12, %c0_13] : memref<1x7x7x64xbf16, #tpu.memory_space<vmem>>, vector<1x6x6x64xbf16>
    %6 = arith.maximumf %4, %5 : vector<1x6x6x64xbf16>
    %c0_14 = arith.constant 0 : index
    %c1_15 = arith.constant 1 : index
    %c1_16 = arith.constant 1 : index
    %c0_17 = arith.constant 0 : index
    %7 = vector.load %arg1[%c0_14, %c1_15, %c1_16, %c0_17] : memref<1x7x7x64xbf16, #tpu.memory_space<vmem>>, vector<1x6x6x64xbf16>
    %8 = arith.maximumf %6, %7 : vector<1x6x6x64xbf16>
    %c0_18 = arith.constant 0 : index
    %c0_19 = arith.constant 0 : index
    %c0_20 = arith.constant 0 : index
    %c0_21 = arith.constant 0 : index
    %9 = vector.load %arg2[%c0_18, %c0_19, %c0_20, %c0_21] : memref<1x7x6x64xbf16, #tpu.memory_space<vmem>>, vector<1x6x6x64xbf16>
    %10 = arith.maximumf %8, %9 : vector<1x6x6x64xbf16>
    %c0_22 = arith.constant 0 : index
    %c1_23 = arith.constant 1 : index
    %c0_24 = arith.constant 0 : index
    %c0_25 = arith.constant 0 : index
    %11 = vector.load %arg2[%c0_22, %c1_23, %c0_24, %c0_25] : memref<1x7x6x64xbf16, #tpu.memory_space<vmem>>, vector<1x6x6x64xbf16>
    %12 = arith.maximumf %10, %11 : vector<1x6x6x64xbf16>
    %c0_26 = arith.constant 0 : index
    %c0_27 = arith.constant 0 : index
    %c0_28 = arith.constant 0 : index
    %c0_29 = arith.constant 0 : index
    %13 = vector.load %arg3[%c0_26, %c0_27, %c0_28, %c0_29] : memref<1x6x7x64xbf16, #tpu.memory_space<vmem>>, vector<1x6x6x64xbf16>
    %14 = arith.maximumf %12, %13 : vector<1x6x6x64xbf16>
    %c0_30 = arith.constant 0 : index
    %c0_31 = arith.constant 0 : index
    %c1_32 = arith.constant 1 : index
    %c0_33 = arith.constant 0 : index
    %15 = vector.load %arg3[%c0_30, %c0_31, %c1_32, %c0_33] : memref<1x6x7x64xbf16, #tpu.memory_space<vmem>>, vector<1x6x6x64xbf16>
    %16 = arith.maximumf %14, %15 : vector<1x6x6x64xbf16>
    %c0_34 = arith.constant 0 : index
    %c0_35 = arith.constant 0 : index
    %c0_36 = arith.constant 0 : index
    %c0_37 = arith.constant 0 : index
    %17 = vector.load %arg5[%c0_34, %c0_35, %c0_36, %c0_37] : memref<1x6x6x64xbf16, #tpu.memory_space<vmem>>, vector<1x6x6x64xbf16>
    tpu.vector_store %arg5[%c0_34, %c0_35, %c0_36, %c0_37], %16 {strides = array<i32>} : memref<1x6x6x64xbf16, #tpu.memory_space<vmem>>, vector<1x6x6x64xbf16>,
    return
  }
  func.func @transform_0(%arg0: i32) -> (i32, i32, i32, i32) {
    %c0_i32 = arith.constant 0 : i32
    %c0_i32_0 = arith.constant 0 : i32
    %c0_i32_1 = arith.constant 0 : i32
    %c0_i32_2 = arith.constant 0 : i32
    return %arg0, %c0_i32, %c0_i32_0, %c0_i32_1 : i32, i32, i32, i32
  }
  func.func @transform_1(%arg0: i32) -> (i32, i32, i32, i32) {
    %c0_i32 = arith.constant 0 : i32
    %c0_i32_0 = arith.constant 0 : i32
    %c0_i32_1 = arith.constant 0 : i32
    %c0_i32_2 = arith.constant 0 : i32
    return %arg0, %c0_i32, %c0_i32_0, %c0_i32_1 : i32, i32, i32, i32
  }
  func.func @transform_2(%arg0: i32) -> (i32, i32, i32, i32) {
    %c0_i32 = arith.constant 0 : i32
    %c0_i32_0 = arith.constant 0 : i32
    %c0_i32_1 = arith.constant 0 : i32
    %c0_i32_2 = arith.constant 0 : i32
    return %arg0, %c0_i32, %c0_i32_0, %c0_i32_1 : i32, i32, i32, i32
  }
  func.func @transform_3(%arg0: i32) -> (i32, i32, i32, i32) {
    %c0_i32 = arith.constant 0 : i32
    %c0_i32_0 = arith.constant 0 : i32
    %c0_i32_1 = arith.constant 0 : i32
    %c0_i32_2 = arith.constant 0 : i32
    return %arg0, %c0_i32, %c0_i32_0, %c0_i32_1 : i32, i32, i32, i32
  }
  func.func @transform_4(%arg0: i32) -> (i32, i32, i32, i32) {
    %c0_i32 = arith.constant 0 : i32
    %c0_i32_0 = arith.constant 0 : i32
    %c0_i32_1 = arith.constant 0 : i32
    %c0_i32_2 = arith.constant 0 : i32
    return %arg0, %c0_i32, %c0_i32_0, %c0_i32_1 : i32, i32, i32, i32
  }
}

module attributes {stable_mosaic.version = 11 : i64} {
  func.func @_conv_mm_kernel(%arg0: i32, %arg1: memref<72x576xbf16, #tpu.memory_space<vmem>>, %arg2: memref<576x96xbf16, #tpu.memory_space<vmem>>, %arg3: memref<1x96xf32, #tpu.memory_space<vmem>>, %arg4: memref<72x96xbf16, #tpu.memory_space<vmem>>) attributes {dimension_semantics = [#tpu.dimension_semantics<parallel>], iteration_bounds = array<i64: 1>, scalar_prefetch = 0 : i64, scratch_operands = 0 : i64, tpu.core_type = #tpu.core_type<tc>, window_params = [{transform_indices = @transform_0, window_bounds = array<i64: 72, 576>}, {pipeline_mode = #tpu.pipeline_mode<synchronous>, transform_indices = @transform_1, window_bounds = array<i64: 576, 96>}, {pipeline_mode = #tpu.pipeline_mode<synchronous>, transform_indices = @transform_2, window_bounds = array<i64: 1, 96>}, {transform_indices = @transform_3, window_bounds = array<i64: 72, 96>}]} {
    %c0 = arith.constant 0 : index
    %c0_0 = arith.constant 0 : index
    %0 = vector.load %arg1[%c0, %c0_0] : memref<72x576xbf16, #tpu.memory_space<vmem>>, vector<72x576xbf16>
    %c0_1 = arith.constant 0 : index
    %c0_2 = arith.constant 0 : index
    %1 = vector.load %arg2[%c0_1, %c0_2] : memref<576x96xbf16, #tpu.memory_space<vmem>>, vector<576x96xbf16>
    %cst = arith.constant dense<0.000000e+00> : vector<72x96xf32>
    %2 = tpu.matmul %0, %1, %cst {dimension_numbers = #tpu.dot_dimension_numbers<[1], [0], [0], [1], [0, 0, 1, 1], [], []>} : vector<72x576xbf16>, vector<576x96xbf16>, vector<72x96xf32> -> vector<72x96xf32>
    %c0_3 = arith.constant 0 : index
    %c0_4 = arith.constant 0 : index
    %3 = vector.load %arg3[%c0_3, %c0_4] : memref<1x96xf32, #tpu.memory_space<vmem>>, vector<1x96xf32>
    %4 = vector.broadcast %3 : vector<1x96xf32> to vector<72x96xf32>
    %5 = arith.addf %2, %4 : vector<72x96xf32>
    %cst_5 = arith.constant 0.000000e+00 : f32
    %6 = vector.broadcast %cst_5 : f32 to vector<72x96xf32>
    %7 = arith.maximumf %5, %6 : vector<72x96xf32>
    %8 = arith.truncf %7 : vector<72x96xf32> to vector<72x96xbf16>
    %c0_6 = arith.constant 0 : index
    %c0_7 = arith.constant 0 : index
    %9 = vector.load %arg4[%c0_6, %c0_7] : memref<72x96xbf16, #tpu.memory_space<vmem>>, vector<72x96xbf16>
    tpu.vector_store %arg4[%c0_6, %c0_7], %8 {strides = array<i32>} : memref<72x96xbf16, #tpu.memory_space<vmem>>, vector<72x96xbf16>,
    return
  }
  func.func @transform_0(%arg0: i32) -> (i32, i32) {
    %c0_i32 = arith.constant 0 : i32
    %c0_i32_0 = arith.constant 0 : i32
    return %arg0, %c0_i32 : i32, i32
  }
  func.func @transform_1(%arg0: i32) -> (i32, i32) {
    %c0_i32 = arith.constant 0 : i32
    %c0_i32_0 = arith.constant 0 : i32
    %c0_i32_1 = arith.constant 0 : i32
    return %c0_i32, %c0_i32_0 : i32, i32
  }
  func.func @transform_2(%arg0: i32) -> (i32, i32) {
    %c0_i32 = arith.constant 0 : i32
    %c0_i32_0 = arith.constant 0 : i32
    %c0_i32_1 = arith.constant 0 : i32
    return %c0_i32, %c0_i32_0 : i32, i32
  }
  func.func @transform_3(%arg0: i32) -> (i32, i32) {
    %c0_i32 = arith.constant 0 : i32
    %c0_i32_0 = arith.constant 0 : i32
    return %arg0, %c0_i32 : i32, i32
  }
}

module attributes {stable_mosaic.version = 11 : i64} {
  func.func @_conv_mm_kernel(%arg0: i32, %arg1: memref<72x160xbf16, #tpu.memory_space<vmem>>, %arg2: memref<160x128xbf16, #tpu.memory_space<vmem>>, %arg3: memref<1x128xf32, #tpu.memory_space<vmem>>, %arg4: memref<72x128xbf16, #tpu.memory_space<vmem>>) attributes {dimension_semantics = [#tpu.dimension_semantics<parallel>], iteration_bounds = array<i64: 1>, scalar_prefetch = 0 : i64, scratch_operands = 0 : i64, tpu.core_type = #tpu.core_type<tc>, window_params = [{transform_indices = @transform_0, window_bounds = array<i64: 72, 160>}, {pipeline_mode = #tpu.pipeline_mode<synchronous>, transform_indices = @transform_1, window_bounds = array<i64: 160, 128>}, {pipeline_mode = #tpu.pipeline_mode<synchronous>, transform_indices = @transform_2, window_bounds = array<i64: 1, 128>}, {transform_indices = @transform_3, window_bounds = array<i64: 72, 128>}]} {
    %c0 = arith.constant 0 : index
    %c0_0 = arith.constant 0 : index
    %0 = vector.load %arg1[%c0, %c0_0] : memref<72x160xbf16, #tpu.memory_space<vmem>>, vector<72x160xbf16>
    %c0_1 = arith.constant 0 : index
    %c0_2 = arith.constant 0 : index
    %1 = vector.load %arg2[%c0_1, %c0_2] : memref<160x128xbf16, #tpu.memory_space<vmem>>, vector<160x128xbf16>
    %cst = arith.constant dense<0.000000e+00> : vector<72x128xf32>
    %2 = tpu.matmul %0, %1, %cst {dimension_numbers = #tpu.dot_dimension_numbers<[1], [0], [0], [1], [0, 0, 1, 1], [], []>} : vector<72x160xbf16>, vector<160x128xbf16>, vector<72x128xf32> -> vector<72x128xf32>
    %c0_3 = arith.constant 0 : index
    %c0_4 = arith.constant 0 : index
    %3 = vector.load %arg3[%c0_3, %c0_4] : memref<1x128xf32, #tpu.memory_space<vmem>>, vector<1x128xf32>
    %4 = vector.broadcast %3 : vector<1x128xf32> to vector<72x128xf32>
    %5 = arith.addf %2, %4 : vector<72x128xf32>
    %cst_5 = arith.constant 0.000000e+00 : f32
    %6 = vector.broadcast %cst_5 : f32 to vector<72x128xf32>
    %7 = arith.maximumf %5, %6 : vector<72x128xf32>
    %8 = arith.truncf %7 : vector<72x128xf32> to vector<72x128xbf16>
    %c0_6 = arith.constant 0 : index
    %c0_7 = arith.constant 0 : index
    %9 = vector.load %arg4[%c0_6, %c0_7] : memref<72x128xbf16, #tpu.memory_space<vmem>>, vector<72x128xbf16>
    tpu.vector_store %arg4[%c0_6, %c0_7], %8 {strides = array<i32>} : memref<72x128xbf16, #tpu.memory_space<vmem>>, vector<72x128xbf16>,
    return
  }
  func.func @transform_0(%arg0: i32) -> (i32, i32) {
    %c0_i32 = arith.constant 0 : i32
    %c0_i32_0 = arith.constant 0 : i32
    return %arg0, %c0_i32 : i32, i32
  }
  func.func @transform_1(%arg0: i32) -> (i32, i32) {
    %c0_i32 = arith.constant 0 : i32
    %c0_i32_0 = arith.constant 0 : i32
    %c0_i32_1 = arith.constant 0 : i32
    return %c0_i32, %c0_i32_0 : i32, i32
  }
  func.func @transform_2(%arg0: i32) -> (i32, i32) {
    %c0_i32 = arith.constant 0 : i32
    %c0_i32_0 = arith.constant 0 : i32
    %c0_i32_1 = arith.constant 0 : i32
    return %c0_i32, %c0_i32_0 : i32, i32
  }
  func.func @transform_3(%arg0: i32) -> (i32, i32) {
    %c0_i32 = arith.constant 0 : i32
    %c0_i32_0 = arith.constant 0 : i32
    return %arg0, %c0_i32 : i32, i32
  }
}

module attributes {stable_mosaic.version = 11 : i64} {
  func.func @_conv_mm_kernel(%arg0: i32, %arg1: memref<72x448xbf16, #tpu.memory_space<vmem>>, %arg2: memref<448x64xbf16, #tpu.memory_space<vmem>>, %arg3: memref<1x64xf32, #tpu.memory_space<vmem>>, %arg4: memref<72x64xbf16, #tpu.memory_space<vmem>>) attributes {dimension_semantics = [#tpu.dimension_semantics<parallel>], iteration_bounds = array<i64: 1>, scalar_prefetch = 0 : i64, scratch_operands = 0 : i64, tpu.core_type = #tpu.core_type<tc>, window_params = [{transform_indices = @transform_0, window_bounds = array<i64: 72, 448>}, {pipeline_mode = #tpu.pipeline_mode<synchronous>, transform_indices = @transform_1, window_bounds = array<i64: 448, 64>}, {pipeline_mode = #tpu.pipeline_mode<synchronous>, transform_indices = @transform_2, window_bounds = array<i64: 1, 64>}, {transform_indices = @transform_3, window_bounds = array<i64: 72, 64>}]} {
    %c0 = arith.constant 0 : index
    %c0_0 = arith.constant 0 : index
    %0 = vector.load %arg1[%c0, %c0_0] : memref<72x448xbf16, #tpu.memory_space<vmem>>, vector<72x448xbf16>
    %c0_1 = arith.constant 0 : index
    %c0_2 = arith.constant 0 : index
    %1 = vector.load %arg2[%c0_1, %c0_2] : memref<448x64xbf16, #tpu.memory_space<vmem>>, vector<448x64xbf16>
    %cst = arith.constant dense<0.000000e+00> : vector<72x64xf32>
    %2 = tpu.matmul %0, %1, %cst {dimension_numbers = #tpu.dot_dimension_numbers<[1], [0], [0], [1], [0, 0, 1, 1], [], []>} : vector<72x448xbf16>, vector<448x64xbf16>, vector<72x64xf32> -> vector<72x64xf32>
    %c0_3 = arith.constant 0 : index
    %c0_4 = arith.constant 0 : index
    %3 = vector.load %arg3[%c0_3, %c0_4] : memref<1x64xf32, #tpu.memory_space<vmem>>, vector<1x64xf32>
    %4 = vector.broadcast %3 : vector<1x64xf32> to vector<72x64xf32>
    %5 = arith.addf %2, %4 : vector<72x64xf32>
    %cst_5 = arith.constant 0.000000e+00 : f32
    %6 = vector.broadcast %cst_5 : f32 to vector<72x64xf32>
    %7 = arith.maximumf %5, %6 : vector<72x64xf32>
    %8 = arith.truncf %7 : vector<72x64xf32> to vector<72x64xbf16>
    %c0_6 = arith.constant 0 : index
    %c0_7 = arith.constant 0 : index
    %9 = vector.load %arg4[%c0_6, %c0_7] : memref<72x64xbf16, #tpu.memory_space<vmem>>, vector<72x64xbf16>
    tpu.vector_store %arg4[%c0_6, %c0_7], %8 {strides = array<i32>} : memref<72x64xbf16, #tpu.memory_space<vmem>>, vector<72x64xbf16>,
    return
  }
  func.func @transform_0(%arg0: i32) -> (i32, i32) {
    %c0_i32 = arith.constant 0 : i32
    %c0_i32_0 = arith.constant 0 : i32
    return %arg0, %c0_i32 : i32, i32
  }
  func.func @transform_1(%arg0: i32) -> (i32, i32) {
    %c0_i32 = arith.constant 0 : i32
    %c0_i32_0 = arith.constant 0 : i32
    %c0_i32_1 = arith.constant 0 : i32
    return %c0_i32, %c0_i32_0 : i32, i32
  }
  func.func @transform_2(%arg0: i32) -> (i32, i32) {
    %c0_i32 = arith.constant 0 : i32
    %c0_i32_0 = arith.constant 0 : i32
    %c0_i32_1 = arith.constant 0 : i32
    return %c0_i32, %c0_i32_0 : i32, i32
  }
  func.func @transform_3(%arg0: i32) -> (i32, i32) {
    %c0_i32 = arith.constant 0 : i32
    %c0_i32_0 = arith.constant 0 : i32
    return %arg0, %c0_i32 : i32, i32
  }
}

module attributes {stable_mosaic.version = 11 : i64} {
  func.func @_dual_conv_mm_kernel(%arg0: i32, %arg1: memref<32x576xbf16, #tpu.memory_space<vmem>>, %arg2: memref<32x576xbf16, #tpu.memory_space<vmem>>, %arg3: memref<576x96xbf16, #tpu.memory_space<vmem>>, %arg4: memref<576x96xbf16, #tpu.memory_space<vmem>>, %arg5: memref<1x192xf32, #tpu.memory_space<vmem>>, %arg6: memref<32x192xbf16, #tpu.memory_space<vmem>>) attributes {dimension_semantics = [#tpu.dimension_semantics<parallel>], iteration_bounds = array<i64: 1>, scalar_prefetch = 0 : i64, scratch_operands = 0 : i64, tpu.core_type = #tpu.core_type<tc>, window_params = [{transform_indices = @transform_0, window_bounds = array<i64: 32, 576>}, {transform_indices = @transform_1, window_bounds = array<i64: 32, 576>}, {pipeline_mode = #tpu.pipeline_mode<synchronous>, transform_indices = @transform_2, window_bounds = array<i64: 576, 96>}, {pipeline_mode = #tpu.pipeline_mode<synchronous>, transform_indices = @transform_3, window_bounds = array<i64: 576, 96>}, {pipeline_mode = #tpu.pipeline_mode<synchronous>, transform_indices = @transform_4, window_bounds = array<i64: 1, 192>}, {transform_indices = @transform_5, window_bounds = array<i64: 32, 192>}]} {
    %c0 = arith.constant 0 : index
    %c0_0 = arith.constant 0 : index
    %0 = vector.load %arg1[%c0, %c0_0] : memref<32x576xbf16, #tpu.memory_space<vmem>>, vector<32x576xbf16>
    %c0_1 = arith.constant 0 : index
    %c0_2 = arith.constant 0 : index
    %1 = vector.load %arg3[%c0_1, %c0_2] : memref<576x96xbf16, #tpu.memory_space<vmem>>, vector<576x96xbf16>
    %cst = arith.constant dense<0.000000e+00> : vector<32x96xf32>
    %2 = tpu.matmul %0, %1, %cst {dimension_numbers = #tpu.dot_dimension_numbers<[1], [0], [0], [1], [0, 0, 1, 1], [], []>} : vector<32x576xbf16>, vector<576x96xbf16>, vector<32x96xf32> -> vector<32x96xf32>
    %c0_3 = arith.constant 0 : index
    %c0_4 = arith.constant 0 : index
    %3 = vector.load %arg2[%c0_3, %c0_4] : memref<32x576xbf16, #tpu.memory_space<vmem>>, vector<32x576xbf16>
    %c0_5 = arith.constant 0 : index
    %c0_6 = arith.constant 0 : index
    %4 = vector.load %arg4[%c0_5, %c0_6] : memref<576x96xbf16, #tpu.memory_space<vmem>>, vector<576x96xbf16>
    %cst_7 = arith.constant dense<0.000000e+00> : vector<32x96xf32>
    %5 = tpu.matmul %3, %4, %cst_7 {dimension_numbers = #tpu.dot_dimension_numbers<[1], [0], [0], [1], [0, 0, 1, 1], [], []>} : vector<32x576xbf16>, vector<576x96xbf16>, vector<32x96xf32> -> vector<32x96xf32>
    %6 = tpu.concatenate %2, %5 in 1 : vector<32x96xf32>, vector<32x96xf32> -> vector<32x192xf32>
    %c0_8 = arith.constant 0 : index
    %c0_9 = arith.constant 0 : index
    %7 = vector.load %arg5[%c0_8, %c0_9] : memref<1x192xf32, #tpu.memory_space<vmem>>, vector<1x192xf32>
    %8 = vector.broadcast %7 : vector<1x192xf32> to vector<32x192xf32>
    %9 = arith.addf %6, %8 : vector<32x192xf32>
    %cst_10 = arith.constant 0.000000e+00 : f32
    %10 = vector.broadcast %cst_10 : f32 to vector<32x192xf32>
    %11 = arith.maximumf %9, %10 : vector<32x192xf32>
    %12 = arith.truncf %11 : vector<32x192xf32> to vector<32x192xbf16>
    %c0_11 = arith.constant 0 : index
    %c0_12 = arith.constant 0 : index
    %13 = vector.load %arg6[%c0_11, %c0_12] : memref<32x192xbf16, #tpu.memory_space<vmem>>, vector<32x192xbf16>
    tpu.vector_store %arg6[%c0_11, %c0_12], %12 {strides = array<i32>} : memref<32x192xbf16, #tpu.memory_space<vmem>>, vector<32x192xbf16>,
    return
  }
  func.func @transform_0(%arg0: i32) -> (i32, i32) {
    %c0_i32 = arith.constant 0 : i32
    %c0_i32_0 = arith.constant 0 : i32
    return %arg0, %c0_i32 : i32, i32
  }
  func.func @transform_1(%arg0: i32) -> (i32, i32) {
    %c0_i32 = arith.constant 0 : i32
    %c0_i32_0 = arith.constant 0 : i32
    return %arg0, %c0_i32 : i32, i32
  }
  func.func @transform_2(%arg0: i32) -> (i32, i32) {
    %c0_i32 = arith.constant 0 : i32
    %c0_i32_0 = arith.constant 0 : i32
    %c0_i32_1 = arith.constant 0 : i32
    return %c0_i32, %c0_i32_0 : i32, i32
  }
  func.func @transform_3(%arg0: i32) -> (i32, i32) {
    %c0_i32 = arith.constant 0 : i32
    %c0_i32_0 = arith.constant 0 : i32
    %c0_i32_1 = arith.constant 0 : i32
    return %c0_i32, %c0_i32_0 : i32, i32
  }
  func.func @transform_4(%arg0: i32) -> (i32, i32) {
    %c0_i32 = arith.constant 0 : i32
    %c0_i32_0 = arith.constant 0 : i32
    %c0_i32_1 = arith.constant 0 : i32
    return %c0_i32, %c0_i32_0 : i32, i32
  }
  func.func @transform_5(%arg0: i32) -> (i32, i32) {
    %c0_i32 = arith.constant 0 : i32
    %c0_i32_0 = arith.constant 0 : i32
    return %arg0, %c0_i32 : i32, i32
  }
}

module attributes {stable_mosaic.version = 11 : i64} {
  func.func @_conv_mm_kernel(%arg0: i32, %arg1: memref<2x1728xbf16, #tpu.memory_space<vmem>>, %arg2: memref<1728x192xbf16, #tpu.memory_space<vmem>>, %arg3: memref<1x192xf32, #tpu.memory_space<vmem>>, %arg4: memref<2x192xbf16, #tpu.memory_space<vmem>>) attributes {dimension_semantics = [#tpu.dimension_semantics<parallel>], iteration_bounds = array<i64: 1>, scalar_prefetch = 0 : i64, scratch_operands = 0 : i64, tpu.core_type = #tpu.core_type<tc>, window_params = [{transform_indices = @transform_0, window_bounds = array<i64: 2, 1728>}, {pipeline_mode = #tpu.pipeline_mode<synchronous>, transform_indices = @transform_1, window_bounds = array<i64: 1728, 192>}, {pipeline_mode = #tpu.pipeline_mode<synchronous>, transform_indices = @transform_2, window_bounds = array<i64: 1, 192>}, {transform_indices = @transform_3, window_bounds = array<i64: 2, 192>}]} {
    %c0 = arith.constant 0 : index
    %c0_0 = arith.constant 0 : index
    %0 = vector.load %arg1[%c0, %c0_0] : memref<2x1728xbf16, #tpu.memory_space<vmem>>, vector<2x1728xbf16>
    %c0_1 = arith.constant 0 : index
    %c0_2 = arith.constant 0 : index
    %1 = vector.load %arg2[%c0_1, %c0_2] : memref<1728x192xbf16, #tpu.memory_space<vmem>>, vector<1728x192xbf16>
    %cst = arith.constant dense<0.000000e+00> : vector<2x192xf32>
    %2 = tpu.matmul %0, %1, %cst {dimension_numbers = #tpu.dot_dimension_numbers<[1], [0], [0], [1], [0, 0, 1, 1], [], []>} : vector<2x1728xbf16>, vector<1728x192xbf16>, vector<2x192xf32> -> vector<2x192xf32>
    %c0_3 = arith.constant 0 : index
    %c0_4 = arith.constant 0 : index
    %3 = vector.load %arg3[%c0_3, %c0_4] : memref<1x192xf32, #tpu.memory_space<vmem>>, vector<1x192xf32>
    %4 = vector.broadcast %3 : vector<1x192xf32> to vector<2x192xf32>
    %5 = arith.addf %2, %4 : vector<2x192xf32>
    %cst_5 = arith.constant 0.000000e+00 : f32
    %6 = vector.broadcast %cst_5 : f32 to vector<2x192xf32>
    %7 = arith.maximumf %5, %6 : vector<2x192xf32>
    %8 = arith.truncf %7 : vector<2x192xf32> to vector<2x192xbf16>
    %c0_6 = arith.constant 0 : index
    %c0_7 = arith.constant 0 : index
    %9 = vector.load %arg4[%c0_6, %c0_7] : memref<2x192xbf16, #tpu.memory_space<vmem>>, vector<2x192xbf16>
    tpu.vector_store %arg4[%c0_6, %c0_7], %8 {strides = array<i32>} : memref<2x192xbf16, #tpu.memory_space<vmem>>, vector<2x192xbf16>,
    return
  }
  func.func @transform_0(%arg0: i32) -> (i32, i32) {
    %c0_i32 = arith.constant 0 : i32
    %c0_i32_0 = arith.constant 0 : i32
    return %arg0, %c0_i32 : i32, i32
  }
  func.func @transform_1(%arg0: i32) -> (i32, i32) {
    %c0_i32 = arith.constant 0 : i32
    %c0_i32_0 = arith.constant 0 : i32
    %c0_i32_1 = arith.constant 0 : i32
    return %c0_i32, %c0_i32_0 : i32, i32
  }
  func.func @transform_2(%arg0: i32) -> (i32, i32) {
    %c0_i32 = arith.constant 0 : i32
    %c0_i32_0 = arith.constant 0 : i32
    %c0_i32_1 = arith.constant 0 : i32
    return %c0_i32, %c0_i32_0 : i32, i32
  }
  func.func @transform_3(%arg0: i32) -> (i32, i32) {
    %c0_i32 = arith.constant 0 : i32
    %c0_i32_0 = arith.constant 0 : i32
    return %arg0, %c0_i32 : i32, i32
  }
}

module attributes {stable_mosaic.version = 11 : i64} {
  func.func @_maxpool_kernel(%arg0: i32, %arg1: memref<1x2x2x192xbf16, #tpu.memory_space<vmem>>, %arg2: memref<1x2x1x192xbf16, #tpu.memory_space<vmem>>, %arg3: memref<1x1x2x192xbf16, #tpu.memory_space<vmem>>, %arg4: memref<1x1x1x192xbf16, #tpu.memory_space<vmem>>, %arg5: memref<1x1x1x192xbf16, #tpu.memory_space<vmem>>) attributes {dimension_semantics = [#tpu.dimension_semantics<parallel>], iteration_bounds = array<i64: 2>, scalar_prefetch = 0 : i64, scratch_operands = 0 : i64, tpu.core_type = #tpu.core_type<tc>, window_params = [{transform_indices = @transform_0, window_bounds = array<i64: 1, 2, 2, 192>}, {transform_indices = @transform_1, window_bounds = array<i64: 1, 2, 1, 192>}, {transform_indices = @transform_2, window_bounds = array<i64: 1, 1, 2, 192>}, {transform_indices = @transform_3, window_bounds = array<i64: 1, 1, 1, 192>}, {transform_indices = @transform_4, window_bounds = array<i64: 1, 1, 1, 192>}]} {
    %c0 = arith.constant 0 : index
    %c0_0 = arith.constant 0 : index
    %c0_1 = arith.constant 0 : index
    %c0_2 = arith.constant 0 : index
    %0 = vector.load %arg4[%c0, %c0_0, %c0_1, %c0_2] : memref<1x1x1x192xbf16, #tpu.memory_space<vmem>>, vector<1x1x1x192xbf16>
    %c0_3 = arith.constant 0 : index
    %c0_4 = arith.constant 0 : index
    %c0_5 = arith.constant 0 : index
    %c0_6 = arith.constant 0 : index
    %1 = vector.load %arg1[%c0_3, %c0_4, %c0_5, %c0_6] : memref<1x2x2x192xbf16, #tpu.memory_space<vmem>>, vector<1x1x1x192xbf16>
    %2 = arith.maximumf %0, %1 : vector<1x1x1x192xbf16>
    %c0_7 = arith.constant 0 : index
    %c0_8 = arith.constant 0 : index
    %c1 = arith.constant 1 : index
    %c0_9 = arith.constant 0 : index
    %3 = vector.load %arg1[%c0_7, %c0_8, %c1, %c0_9] : memref<1x2x2x192xbf16, #tpu.memory_space<vmem>>, vector<1x1x1x192xbf16>
    %4 = arith.maximumf %2, %3 : vector<1x1x1x192xbf16>
    %c0_10 = arith.constant 0 : index
    %c1_11 = arith.constant 1 : index
    %c0_12 = arith.constant 0 : index
    %c0_13 = arith.constant 0 : index
    %5 = vector.load %arg1[%c0_10, %c1_11, %c0_12, %c0_13] : memref<1x2x2x192xbf16, #tpu.memory_space<vmem>>, vector<1x1x1x192xbf16>
    %6 = arith.maximumf %4, %5 : vector<1x1x1x192xbf16>
    %c0_14 = arith.constant 0 : index
    %c1_15 = arith.constant 1 : index
    %c1_16 = arith.constant 1 : index
    %c0_17 = arith.constant 0 : index
    %7 = vector.load %arg1[%c0_14, %c1_15, %c1_16, %c0_17] : memref<1x2x2x192xbf16, #tpu.memory_space<vmem>>, vector<1x1x1x192xbf16>
    %8 = arith.maximumf %6, %7 : vector<1x1x1x192xbf16>
    %c0_18 = arith.constant 0 : index
    %c0_19 = arith.constant 0 : index
    %c0_20 = arith.constant 0 : index
    %c0_21 = arith.constant 0 : index
    %9 = vector.load %arg2[%c0_18, %c0_19, %c0_20, %c0_21] : memref<1x2x1x192xbf16, #tpu.memory_space<vmem>>, vector<1x1x1x192xbf16>
    %10 = arith.maximumf %8, %9 : vector<1x1x1x192xbf16>
    %c0_22 = arith.constant 0 : index
    %c1_23 = arith.constant 1 : index
    %c0_24 = arith.constant 0 : index
    %c0_25 = arith.constant 0 : index
    %11 = vector.load %arg2[%c0_22, %c1_23, %c0_24, %c0_25] : memref<1x2x1x192xbf16, #tpu.memory_space<vmem>>, vector<1x1x1x192xbf16>
    %12 = arith.maximumf %10, %11 : vector<1x1x1x192xbf16>
    %c0_26 = arith.constant 0 : index
    %c0_27 = arith.constant 0 : index
    %c0_28 = arith.constant 0 : index
    %c0_29 = arith.constant 0 : index
    %13 = vector.load %arg3[%c0_26, %c0_27, %c0_28, %c0_29] : memref<1x1x2x192xbf16, #tpu.memory_space<vmem>>, vector<1x1x1x192xbf16>
    %14 = arith.maximumf %12, %13 : vector<1x1x1x192xbf16>
    %c0_30 = arith.constant 0 : index
    %c0_31 = arith.constant 0 : index
    %c1_32 = arith.constant 1 : index
    %c0_33 = arith.constant 0 : index
    %15 = vector.load %arg3[%c0_30, %c0_31, %c1_32, %c0_33] : memref<1x1x2x192xbf16, #tpu.memory_space<vmem>>, vector<1x1x1x192xbf16>
    %16 = arith.maximumf %14, %15 : vector<1x1x1x192xbf16>
    %c0_34 = arith.constant 0 : index
    %c0_35 = arith.constant 0 : index
    %c0_36 = arith.constant 0 : index
    %c0_37 = arith.constant 0 : index
    %17 = vector.load %arg5[%c0_34, %c0_35, %c0_36, %c0_37] : memref<1x1x1x192xbf16, #tpu.memory_space<vmem>>, vector<1x1x1x192xbf16>
    tpu.vector_store %arg5[%c0_34, %c0_35, %c0_36, %c0_37], %16 {strides = array<i32>} : memref<1x1x1x192xbf16, #tpu.memory_space<vmem>>, vector<1x1x1x192xbf16>,
    return
  }
  func.func @transform_0(%arg0: i32) -> (i32, i32, i32, i32) {
    %c0_i32 = arith.constant 0 : i32
    %c0_i32_0 = arith.constant 0 : i32
    %c0_i32_1 = arith.constant 0 : i32
    %c0_i32_2 = arith.constant 0 : i32
    return %arg0, %c0_i32, %c0_i32_0, %c0_i32_1 : i32, i32, i32, i32
  }
  func.func @transform_1(%arg0: i32) -> (i32, i32, i32, i32) {
    %c0_i32 = arith.constant 0 : i32
    %c0_i32_0 = arith.constant 0 : i32
    %c0_i32_1 = arith.constant 0 : i32
    %c0_i32_2 = arith.constant 0 : i32
    return %arg0, %c0_i32, %c0_i32_0, %c0_i32_1 : i32, i32, i32, i32
  }
  func.func @transform_2(%arg0: i32) -> (i32, i32, i32, i32) {
    %c0_i32 = arith.constant 0 : i32
    %c0_i32_0 = arith.constant 0 : i32
    %c0_i32_1 = arith.constant 0 : i32
    %c0_i32_2 = arith.constant 0 : i32
    return %arg0, %c0_i32, %c0_i32_0, %c0_i32_1 : i32, i32, i32, i32
  }
  func.func @transform_3(%arg0: i32) -> (i32, i32, i32, i32) {
    %c0_i32 = arith.constant 0 : i32
    %c0_i32_0 = arith.constant 0 : i32
    %c0_i32_1 = arith.constant 0 : i32
    %c0_i32_2 = arith.constant 0 : i32
    return %arg0, %c0_i32, %c0_i32_0, %c0_i32_1 : i32, i32, i32, i32
  }
  func.func @transform_4(%arg0: i32) -> (i32, i32, i32, i32) {
    %c0_i32 = arith.constant 0 : i32
    %c0_i32_0 = arith.constant 0 : i32
    %c0_i32_1 = arith.constant 0 : i32
    %c0_i32_2 = arith.constant 0 : i32
    return %arg0, %c0_i32, %c0_i32_0, %c0_i32_1 : i32, i32, i32, i32
  }
}

</mosaic_0001>

<bundles_post_ra>
// kernel: inception_stem.11
= control target key start
LH: loop header
LB: loop body
LE: loop exit
PB: predicated region body
PF: predicated region fallthrough
CT: control target
= control target key end

     0   :  { %v1347_v0 = vmov 0.0   ;;  %vm1348_vm0 = vmmov 0   ;;  %vm346_vm1 = vcmask 1043456   ;;  %vm258_vm2 = vcmask 588800   ;;  %s1857_s1 = inlined_call_operand.vmem [shape: bf16[72,32], index: 1, kind: input, shape index: {}]   ;;  %s1858_s0 = inlined_call_operand.vmem [shape: bf16[450,72], index: 0, kind: input, shape index: {}]   ;;  %s1859_s2 = inlined_call_operand.vmem [shape: f32[1,32], index: 2, kind: input, shape index: {}]   ;;  %s1860_s3 = inlined_call_operand.vmem [shape: bf16[450,32], index: 3, kind: output, shape index: {}]  }
   0x1   :  { %1175 = vmatprep.subr.bf16.mxu0 %v1347_v0  ;;  %v1313_v1 = vld [vmem:[%s1857_s1] sm:$0xff]   ;;  %1301 = vmatprep.subr.bf16.mxu1 %v1347_v0  ;;  %v1314_v2 = vld [vmem:[%s1857_s1 + $0x8] sm:$0xff]   ;;  %v1315_v3 = vld [vmem:[%s1857_s1 + $0x10] sm:$0xff]   ;;  %vm900_vm3 = vcmask 257024   ;;  %vm957_vm4 = vcmask 253952  }
   0x2   :  { %1185 = vmatprep.mubr.msk.bf16.mxu0 %vm1348_vm0, %v1347_v0  ;;  %1245 = vmatprep.mubr.msk.bf16.mxu1 %vm1348_vm0, %v1347_v0  ;;  %v1316_v4 = vld [vmem:[%s1857_s1 + $0x18] sm:$0xff]   ;;  %v1317_v5 = vld [vmem:[%s1857_s1 + $0x20] ss:$0 sps:$4 sm:$0xff]   ;;  %v1320_v9 = vld [vmem:[%s1858_s0 + $0x8] sm:$0xff]  }
   0x3   :  { %1176 = vmatpush3.bf16.msra.mxu0 %v1313_v1  ;;  %1306 = vmatpush3.bf16.msra.mxu1 %v1313_v1  ;;  %v348_v6 = vsel %vm346_vm1, %v1317_v5, 0  ;;  %v1318_v7 = vld [vmem:[%s1858_s0] sm:$0xff]   ;;  %v1319_v8 = vld [vmem:[%s1858_s0 + $0x78] sm:$0xff]   ;;  %v1322_v11 = vld [vmem:[%s1858_s0 + $0x10] sm:$0xff]  }
   0x4   :  { %1177 = vmatprep.subr.bf16.mxu0 %v1347_v0  ;;  %1302 = vmatprep.subr.bf16.mxu1 %v1347_v0  ;;  %v1321_v10 = vld [vmem:[%s1858_s0 + $0x80] sm:$0xff]   ;;  %v1323_v12 = vld [vmem:[%s1858_s0 + $0x88] sm:$0xff]   ;;  %v1324_v13 = vld [vmem:[%s1858_s0 + $0x18] sm:$0xff]  }
   0x5   :  { %v1325_v14 = vld [vmem:[%s1858_s0 + $0x90] sm:$0xff]   ;;  %v1326_v15 = vld [vmem:[%s1858_s0 + $0x20] sm:$0xff]   ;;  %v1327_v16 = vld [vmem:[%s1858_s0 + $0x98] sm:$0xff]  }
   0x6   :  { %v1328_v17 = vld [vmem:[%s1858_s0 + $0x28] sm:$0xff]   ;;  %v1329_v18 = vld [vmem:[%s1858_s0 + $0xa0] sm:$0xff]   ;;  %v1330_v19 = vld [vmem:[%s1858_s0 + $0x30] sm:$0xff]  }
   0x7   :  { %1178 = vmatpush3.bf16.msra.mxu0 %v1314_v2  ;;  %1307 = vmatpush3.bf16.msra.mxu1 %v1314_v2  ;;  %v1331_v20 = vld [vmem:[%s1858_s0 + $0xa8] sm:$0xff]   ;;  %v1332_v21 = vld [vmem:[%s1858_s0 + $0x38] sm:$0xff]   ;;  %v1333_v22 = vld [vmem:[%s1858_s0 + $0xb0] sm:$0xff]  }
   0x8   :  { %1179 = vmatprep.subr.bf16.mxu0 %v1347_v0  ;;  %1303 = vmatprep.subr.bf16.mxu1 %v1347_v0  ;;  %v1334_v23 = vld [vmem:[%s1858_s0 + $0x40] sm:$0xff]   ;;  %v1335_v24 = vld [vmem:[%s1858_s0 + $0xb8] sm:$0xff]   ;;  %v1336_v25 = vld [vmem:[%s1858_s0 + $0x48] sm:$0xff]  }
   0x9   :  { %v1337_v26 = vld [vmem:[%s1858_s0 + $0xc0] sm:$0xff]   ;;  %v1338_v27 = vld [vmem:[%s1858_s0 + $0x50] sm:$0xff]   ;;  %v1339_v28 = vld [vmem:[%s1858_s0 + $0xc8] sm:$0xff]  }
   0xa   :  { %v1340_v29 = vld [vmem:[%s1858_s0 + $0x58] sm:$0xff]   ;;  %v1341_v30 = vld [vmem:[%s1858_s0 + $0xd0] sm:$0xff]   ;;  %v1342_v31 = vld [vmem:[%s1858_s0 + $0x60] sm:$0xff]  }
   0xb   :  { %1180 = vmatpush3.bf16.msra.mxu0 %v1315_v3  ;;  %1308 = vmatpush3.bf16.msra.mxu1 %v1315_v3  ;;  %v1343_v32 = vld [vmem:[%s1858_s0 + $0xd8] sm:$0xff]   ;;  %v1344_v33 = vld [vmem:[%s1858_s0 + $0x68] sm:$0xff]   ;;  %v1345_v34 = vld [vmem:[%s1858_s0 + $0xe0] ss:$0 sps:$4 sm:$0x11]  }
   0xc   :  { %1181 = vmatprep.subr.bf16.mxu0 %v1347_v0  ;;  %1304 = vmatprep.subr.bf16.mxu1 %v1347_v0  ;;  %v1346_v35 = vld [vmem:[%s1858_s0 + $0x70] sm:$0xff]   ;;  %v1571_v36 = vld [vmem:[%s1859_s2] ss:$0 sm:$0xff] }
   0xf   :  { %1182 = vmatpush3.bf16.msra.mxu0 %v1316_v4  ;;  %1309 = vmatpush3.bf16.msra.mxu1 %v1316_v4 }
  0x10   :  { %1183 = vmatprep.subr.bf16.mxu0 %v1347_v0  ;;  %1305 = vmatprep.subr.bf16.mxu1 %v1347_v0 }
  0x13   :  { %1184 = vmatpush3.bf16.msra.mxu0 %v348_v6  ;;  %1310 = vmatpush3.bf16.msra.mxu1 %v348_v6 }
  0x16   :  { %1186 = vmatmul.mubr.msk.bf16.vlgmr.msra.gmra.mrb[0].mxu0 %vm258_vm2, %v1318_v7  ;;  %1246 = vmatmul.mubr.msk.bf16.vlgmr.msra.gmra.mrb[0].mxu1 %vm258_vm2, %v1319_v8 }
  0x17   :  { %1189 = vmatprep.mubr.msk.bf16.mxu0 %vm1348_vm0, %v1347_v0  ;;  %1249 = vmatprep.mubr.msk.bf16.mxu1 %vm1348_vm0, %v1347_v0 }
  0x1e   :  { %1190 = vmatmul.mubr.msk.bf16.gmra.mrb[4].mxu0 %vm258_vm2, %v1320_v9  ;;  %1250 = vmatmul.mubr.msk.bf16.gmra.mrb[4].mxu1 %vm258_vm2, %v1321_v10 }
  0x1f   :  { %1193 = vmatprep.mubr.msk.bf16.mxu0 %vm1348_vm0, %v1347_v0  ;;  %1253 = vmatprep.mubr.msk.bf16.mxu1 %vm1348_vm0, %v1347_v0 }
  0x26   :  { %1194 = vmatmul.mubr.msk.bf16.gmra.mrb[8].mxu0 %vm258_vm2, %v1322_v11  ;;  %1254 = vmatmul.mubr.msk.bf16.gmra.mrb[8].mxu1 %vm258_vm2, %v1323_v12 }
  0x27   :  { %1197 = vmatprep.mubr.msk.bf16.mxu0 %vm1348_vm0, %v1347_v0  ;;  %1257 = vmatprep.mubr.msk.bf16.mxu1 %vm1348_vm0, %v1347_v0 }
  0x2e   :  { %1198 = vmatmul.mubr.msk.bf16.gmra.mrb[12].mxu0 %vm258_vm2, %v1324_v13  ;;  %1258 = vmatmul.mubr.msk.bf16.gmra.mrb[12].mxu1 %vm258_vm2, %v1325_v14 }
  0x2f   :  { %1201 = vmatprep.mubr.msk.bf16.mxu0 %vm1348_vm0, %v1347_v0  ;;  %1261 = vmatprep.mubr.msk.bf16.mxu1 %vm1348_vm0, %v1347_v0 }
  0x36   :  { %1202 = vmatmul.mubr.msk.bf16.gmra.mrb[16].mxu0 %vm258_vm2, %v1326_v15  ;;  %1262 = vmatmul.mubr.msk.bf16.gmra.mrb[16].mxu1 %vm258_vm2, %v1327_v16 }
  0x37   :  { %1205 = vmatprep.mubr.msk.bf16.mxu0 %vm1348_vm0, %v1347_v0  ;;  %1265 = vmatprep.mubr.msk.bf16.mxu1 %vm1348_vm0, %v1347_v0 }
  0x3e   :  { %1206 = vmatmul.mubr.msk.bf16.gmra.mrb[20].mxu0 %vm258_vm2, %v1328_v17  ;;  %1266 = vmatmul.mubr.msk.bf16.gmra.mrb[20].mxu1 %vm258_vm2, %v1329_v18 }
  0x3f   :  { %1209 = vmatprep.mubr.msk.bf16.mxu0 %vm1348_vm0, %v1347_v0  ;;  %1269 = vmatprep.mubr.msk.bf16.mxu1 %vm1348_vm0, %v1347_v0 }
  0x46   :  { %1210 = vmatmul.mubr.msk.bf16.gmra.mrb[24].mxu0 %vm258_vm2, %v1330_v19  ;;  %1270 = vmatmul.mubr.msk.bf16.gmra.mrb[24].mxu1 %vm258_vm2, %v1331_v20 }
  0x47   :  { %1213 = vmatprep.mubr.msk.bf16.mxu0 %vm1348_vm0, %v1347_v0  ;;  %1273 = vmatprep.mubr.msk.bf16.mxu1 %vm1348_vm0, %v1347_v0 }
  0x4e   :  { %1214 = vmatmul.mubr.msk.bf16.gmra.mrb[28].mxu0 %vm258_vm2, %v1332_v21  ;;  %1274 = vmatmul.mubr.msk.bf16.gmra.mrb[28].mxu1 %vm258_vm2, %v1333_v22 }
  0x4f   :  { %1217 = vmatprep.mubr.msk.bf16.mxu0 %vm1348_vm0, %v1347_v0  ;;  %1277 = vmatprep.mubr.msk.bf16.mxu1 %vm1348_vm0, %v1347_v0 }
  0x56   :  { %1218 = vmatmul.mubr.msk.bf16.gmra.mrb[32].mxu0 %vm258_vm2, %v1334_v23  ;;  %1278 = vmatmul.mubr.msk.bf16.gmra.mrb[32].mxu1 %vm258_vm2, %v1335_v24 }
  0x57   :  { %1221 = vmatprep.mubr.msk.bf16.mxu0 %vm1348_vm0, %v1347_v0  ;;  %1281 = vmatprep.mubr.msk.bf16.mxu1 %vm1348_vm0, %v1347_v0 }
  0x5e   :  { %1222 = vmatmul.mubr.msk.bf16.gmra.mrb[36].mxu0 %vm258_vm2, %v1336_v25  ;;  %1282 = vmatmul.mubr.msk.bf16.gmra.mrb[36].mxu1 %vm258_vm2, %v1337_v26 }
  0x5f   :  { %1225 = vmatprep.mubr.msk.bf16.mxu0 %vm1348_vm0, %v1347_v0  ;;  %1285 = vmatprep.mubr.msk.bf16.mxu1 %vm1348_vm0, %v1347_v0 }
  0x66   :  { %1226 = vmatmul.mubr.msk.bf16.gmra.mrb[40].mxu0 %vm258_vm2, %v1338_v27  ;;  %1286 = vmatmul.mubr.msk.bf16.gmra.mrb[40].mxu1 %vm258_vm2, %v1339_v28 }
  0x67   :  { %1229 = vmatprep.mubr.msk.bf16.mxu0 %vm1348_vm0, %v1347_v0  ;;  %1289 = vmatprep.mubr.msk.bf16.mxu1 %vm1348_vm0, %v1347_v0 }
  0x6e   :  { %1230 = vmatmul.mubr.msk.bf16.gmra.mrb[44].mxu0 %vm258_vm2, %v1340_v29  ;;  %1290 = vmatmul.mubr.msk.bf16.gmra.mrb[44].mxu1 %vm258_vm2, %v1341_v30 }
  0x6f   :  { %1233 = vmatprep.mubr.msk.bf16.mxu0 %vm1348_vm0, %v1347_v0  ;;  %1293 = vmatprep.mubr.msk.bf16.mxu1 %vm1348_vm0, %v1347_v0 }
  0x76   :  { %1234 = vmatmul.mubr.msk.bf16.gmra.mrb[48].mxu0 %vm258_vm2, %v1342_v31  ;;  %1294 = vmatmul.mubr.msk.bf16.gmra.mrb[48].mxu1 %vm258_vm2, %v1343_v32 }
  0x77   :  { %1237 = vmatprep.mubr.msk.bf16.mxu0 %vm1348_vm0, %v1347_v0  ;;  %1297 = vmatprep.mubr.msk.bf16.mxu1 %vm1348_vm0, %v1347_v0 }
  0x7e   :  { %1238 = vmatmul.mubr.msk.bf16.gmra.mrb[52].mxu0 %vm258_vm2, %v1344_v33  ;;  %1298 = vmatmul.mubr.msk.bf16.gmra.mrb[52].mxu1 %vm258_vm2, %v1345_v34 }
  0x7f   :  { %1241 = vmatprep.mubr.msk.bf16.mxu0 %vm1348_vm0, %v1347_v0 }
  0x86   :  { %1242 = vmatmul.mubr.msk.bf16.gmra.mrb[56].mxu0 %vm258_vm2, %v1346_v35 }
  0xe9   :  { %v384_v37 = vpop.f32.mrb[0].mxu0  ;;  %v504_v38 = vpop.f32.mrb[0].mxu1 }
  0xea   :  { %v385_v39 = vadd.f32 %v1571_v36, %v384_v37  ;;  %v1187_v40 = vpop.f32.mrb[1].mxu0  ;;  %v505_v41 = vadd.f32 %v1571_v36, %v504_v38  ;;  %v1247_v42 = vpop.f32.mrb[1].mxu1 }
  0xeb   :  { %v387_v43 = vpop.f32.mrb[2].mxu0  ;;  %v507_v44 = vpop.f32.mrb[2].mxu1 }
  0xec   :  { %v614_v45 = vmax.f32 %v385_v39, 0.0  ;;  %v388_v46 = vadd.f32 %v1571_v36, %v387_v43  ;;  %v1188_v47 = vpop.f32.mrb[3].mxu0  ;;  %v644_v48 = vmax.f32 %v505_v41, 0.0  ;;  %v508_v49 = vadd.f32 %v1571_v36, %v507_v44  ;;  %v1248_v50 = vpop.f32.mrb[3].mxu1 }
  0xee   :  { %v1084_v51 = vpack.c.bf16 %v614_v45, %v614_v45  ;;  %v615_v52 = vmax.f32 %v388_v46, 0.0  ;;  %v1114_v53 = vpack.c.bf16 %v644_v48, %v644_v48  ;;  %v645_v54 = vmax.f32 %v508_v49, 0.0 }
  0xf0   :  { %901 = vst.msk [vmem:[%s1860_s3] sm:$0xf] %vm900_vm3, %v1084_v51  ;;  %v1085_v55 = vpack.c.bf16 %v615_v52, %v615_v52  ;;  %931 = vst.msk [vmem:[%s1860_s3 + $0x78] sm:$0xf] %vm900_vm3, %v1114_v53  ;;  %v1115_v56 = vpack.c.bf16 %v645_v54, %v645_v54 }
  0xf1   :  { %v392_v57 = vpop.f32.mrb[4].mxu0  ;;  %v512_v58 = vpop.f32.mrb[4].mxu1 }
  0xf2   :  { %902 = vst.msk [vmem:[%s1860_s3 + $0x4] sm:$0xf] %vm900_vm3, %v1085_v55  ;;  %v393_v59 = vadd.f32 %v1571_v36, %v392_v57  ;;  %v1191_v60 = vpop.f32.mrb[5].mxu0  ;;  %932 = vst.msk [vmem:[%s1860_s3 + $0x7c] sm:$0xf] %vm900_vm3, %v1115_v56  ;;  %v513_v61 = vadd.f32 %v1571_v36, %v512_v58  ;;  %v1251_v62 = vpop.f32.mrb[5].mxu1 }
  0xf3   :  { %v395_v63 = vpop.f32.mrb[6].mxu0  ;;  %v515_v0 = vpop.f32.mrb[6].mxu1 }
  0xf4   :  { %v616_v1 = vmax.f32 %v393_v59, 0.0  ;;  %v396_v2 = vadd.f32 %v1571_v36, %v395_v63  ;;  %v1192_v3 = vpop.f32.mrb[7].mxu0  ;;  %v646_v4 = vmax.f32 %v513_v61, 0.0  ;;  %v516_v5 = vadd.f32 %v1571_v36, %v515_v0  ;;  %v1252_v6 = vpop.f32.mrb[7].mxu1 }
  0xf6   :  { %v1086_v7 = vpack.c.bf16 %v616_v1, %v616_v1  ;;  %v617_v8 = vmax.f32 %v396_v2, 0.0  ;;  %v1116_v9 = vpack.c.bf16 %v646_v4, %v646_v4  ;;  %v647_v10 = vmax.f32 %v516_v5, 0.0 }
  0xf8   :  { %903 = vst.msk [vmem:[%s1860_s3 + $0x8] sm:$0xf] %vm900_vm3, %v1086_v7  ;;  %v1087_v11 = vpack.c.bf16 %v617_v8, %v617_v8  ;;  %933 = vst.msk [vmem:[%s1860_s3 + $0x80] sm:$0xf] %vm900_vm3, %v1116_v9  ;;  %v1117_v12 = vpack.c.bf16 %v647_v10, %v647_v10 }
  0xf9   :  { %v400_v13 = vpop.f32.mrb[8].mxu0  ;;  %v520_v14 = vpop.f32.mrb[8].mxu1 }
  0xfa   :  { %904 = vst.msk [vmem:[%s1860_s3 + $0xc] sm:$0xf] %vm900_vm3, %v1087_v11  ;;  %v401_v15 = vadd.f32 %v1571_v36, %v400_v13  ;;  %v1195_v16 = vpop.f32.mrb[9].mxu0  ;;  %934 = vst.msk [vmem:[%s1860_s3 + $0x84] sm:$0xf] %vm900_vm3, %v1117_v12  ;;  %v521_v17 = vadd.f32 %v1571_v36, %v520_v14  ;;  %v1255_v18 = vpop.f32.mrb[9].mxu1 }
  0xfb   :  { %v403_v19 = vpop.f32.mrb[10].mxu0  ;;  %v523_v20 = vpop.f32.mrb[10].mxu1 }
  0xfc   :  { %v618_v21 = vmax.f32 %v401_v15, 0.0  ;;  %v404_v22 = vadd.f32 %v1571_v36, %v403_v19  ;;  %v1196_v23 = vpop.f32.mrb[11].mxu0  ;;  %v648_v24 = vmax.f32 %v521_v17, 0.0  ;;  %v524_v25 = vadd.f32 %v1571_v36, %v523_v20  ;;  %v1256_v26 = vpop.f32.mrb[11].mxu1 }
  0xfe   :  { %v1088_v27 = vpack.c.bf16 %v618_v21, %v618_v21  ;;  %v619_v28 = vmax.f32 %v404_v22, 0.0  ;;  %v1118_v29 = vpack.c.bf16 %v648_v24, %v648_v24  ;;  %v649_v30 = vmax.f32 %v524_v25, 0.0 }
 0x100   :  { %905 = vst.msk [vmem:[%s1860_s3 + $0x10] sm:$0xf] %vm900_vm3, %v1088_v27  ;;  %v1089_v31 = vpack.c.bf16 %v619_v28, %v619_v28  ;;  %935 = vst.msk [vmem:[%s1860_s3 + $0x88] sm:$0xf] %vm900_vm3, %v1118_v29  ;;  %v1119_v32 = vpack.c.bf16 %v649_v30, %v649_v30 }
 0x101   :  { %v408_v33 = vpop.f32.mrb[12].mxu0  ;;  %v528_v34 = vpop.f32.mrb[12].mxu1 }
 0x102   :  { %906 = vst.msk [vmem:[%s1860_s3 + $0x14] sm:$0xf] %vm900_vm3, %v1089_v31  ;;  %v409_v35 = vadd.f32 %v1571_v36, %v408_v33  ;;  %v1199_v37 = vpop.f32.mrb[13].mxu0  ;;  %936 = vst.msk [vmem:[%s1860_s3 + $0x8c] sm:$0xf] %vm900_vm3, %v1119_v32  ;;  %v529_v38 = vadd.f32 %v1571_v36, %v528_v34  ;;  %v1259_v39 = vpop.f32.mrb[13].mxu1 }
 0x103   :  { %v411_v40 = vpop.f32.mrb[14].mxu0  ;;  %v531_v41 = vpop.f32.mrb[14].mxu1 }
 0x104   :  { %v620_v42 = vmax.f32 %v409_v35, 0.0  ;;  %v412_v43 = vadd.f32 %v1571_v36, %v411_v40  ;;  %v1200_v44 = vpop.f32.mrb[15].mxu0  ;;  %v650_v45 = vmax.f32 %v529_v38, 0.0  ;;  %v532_v46 = vadd.f32 %v1571_v36, %v531_v41  ;;  %v1260_v47 = vpop.f32.mrb[15].mxu1 }
 0x106   :  { %v1090_v48 = vpack.c.bf16 %v620_v42, %v620_v42  ;;  %v621_v49 = vmax.f32 %v412_v43, 0.0  ;;  %v1120_v50 = vpack.c.bf16 %v650_v45, %v650_v45  ;;  %v651_v51 = vmax.f32 %v532_v46, 0.0 }
 0x108   :  { %907 = vst.msk [vmem:[%s1860_s3 + $0x18] sm:$0xf] %vm900_vm3, %v1090_v48  ;;  %v1091_v52 = vpack.c.bf16 %v621_v49, %v621_v49  ;;  %937 = vst.msk [vmem:[%s1860_s3 + $0x90] sm:$0xf] %vm900_vm3, %v1120_v50  ;;  %v1121_v53 = vpack.c.bf16 %v651_v51, %v651_v51 }
 0x109   :  { %v416_v54 = vpop.f32.mrb[16].mxu0  ;;  %v536_v55 = vpop.f32.mrb[16].mxu1 }
 0x10a   :  { %908 = vst.msk [vmem:[%s1860_s3 + $0x1c] sm:$0xf] %vm900_vm3, %v1091_v52  ;;  %v417_v56 = vadd.f32 %v1571_v36, %v416_v54  ;;  %v1203_v57 = vpop.f32.mrb[17].mxu0  ;;  %938 = vst.msk [vmem:[%s1860_s3 + $0x94] sm:$0xf] %vm900_vm3, %v1121_v53  ;;  %v537_v58 = vadd.f32 %v1571_v36, %v536_v55  ;;  %v1263_v59 = vpop.f32.mrb[17].mxu1 }
 0x10b   :  { %v419_v60 = vpop.f32.mrb[18].mxu0  ;;  %v539_v61 = vpop.f32.mrb[18].mxu1 }
 0x10c   :  { %v622_v62 = vmax.f32 %v417_v56, 0.0  ;;  %v420_v63 = vadd.f32 %v1571_v36, %v419_v60  ;;  %v1204_v0 = vpop.f32.mrb[19].mxu0  ;;  %v652_v1 = vmax.f32 %v537_v58, 0.0  ;;  %v540_v2 = vadd.f32 %v1571_v36, %v539_v61  ;;  %v1264_v3 = vpop.f32.mrb[19].mxu1 }
 0x10e   :  { %v1092_v4 = vpack.c.bf16 %v622_v62, %v622_v62  ;;  %v623_v5 = vmax.f32 %v420_v63, 0.0  ;;  %v1122_v6 = vpack.c.bf16 %v652_v1, %v652_v1  ;;  %v653_v7 = vmax.f32 %v540_v2, 0.0 }
 0x110   :  { %909 = vst.msk [vmem:[%s1860_s3 + $0x20] sm:$0xf] %vm900_vm3, %v1092_v4  ;;  %v1093_v8 = vpack.c.bf16 %v623_v5, %v623_v5  ;;  %939 = vst.msk [vmem:[%s1860_s3 + $0x98] sm:$0xf] %vm900_vm3, %v1122_v6  ;;  %v1123_v9 = vpack.c.bf16 %v653_v7, %v653_v7 }
 0x111   :  { %v424_v10 = vpop.f32.mrb[20].mxu0  ;;  %v544_v11 = vpop.f32.mrb[20].mxu1 }
 0x112   :  { %910 = vst.msk [vmem:[%s1860_s3 + $0x24] sm:$0xf] %vm900_vm3, %v1093_v8  ;;  %v425_v12 = vadd.f32 %v1571_v36, %v424_v10  ;;  %v1207_v13 = vpop.f32.mrb[21].mxu0  ;;  %940 = vst.msk [vmem:[%s1860_s3 + $0x9c] sm:$0xf] %vm900_vm3, %v1123_v9  ;;  %v545_v14 = vadd.f32 %v1571_v36, %v544_v11  ;;  %v1267_v15 = vpop.f32.mrb[21].mxu1 }
 0x113   :  { %v427_v16 = vpop.f32.mrb[22].mxu0  ;;  %v547_v17 = vpop.f32.mrb[22].mxu1 }
 0x114   :  { %v624_v18 = vmax.f32 %v425_v12, 0.0  ;;  %v428_v19 = vadd.f32 %v1571_v36, %v427_v16  ;;  %v1208_v20 = vpop.f32.mrb[23].mxu0  ;;  %v654_v21 = vmax.f32 %v545_v14, 0.0  ;;  %v548_v22 = vadd.f32 %v1571_v36, %v547_v17  ;;  %v1268_v23 = vpop.f32.mrb[23].mxu1 }
 0x116   :  { %v1094_v24 = vpack.c.bf16 %v624_v18, %v624_v18  ;;  %v625_v25 = vmax.f32 %v428_v19, 0.0  ;;  %v1124_v26 = vpack.c.bf16 %v654_v21, %v654_v21  ;;  %v655_v27 = vmax.f32 %v548_v22, 0.0 }
 0x118   :  { %911 = vst.msk [vmem:[%s1860_s3 + $0x28] sm:$0xf] %vm900_vm3, %v1094_v24  ;;  %v1095_v28 = vpack.c.bf16 %v625_v25, %v625_v25  ;;  %941 = vst.msk [vmem:[%s1860_s3 + $0xa0] sm:$0xf] %vm900_vm3, %v1124_v26  ;;  %v1125_v29 = vpack.c.bf16 %v655_v27, %v655_v27 }
 0x119   :  { %v432_v30 = vpop.f32.mrb[24].mxu0  ;;  %v552_v31 = vpop.f32.mrb[24].mxu1 }
 0x11a   :  { %912 = vst.msk [vmem:[%s1860_s3 + $0x2c] sm:$0xf] %vm900_vm3, %v1095_v28  ;;  %v433_v32 = vadd.f32 %v1571_v36, %v432_v30  ;;  %v1211_v33 = vpop.f32.mrb[25].mxu0  ;;  %942 = vst.msk [vmem:[%s1860_s3 + $0xa4] sm:$0xf] %vm900_vm3, %v1125_v29  ;;  %v553_v34 = vadd.f32 %v1571_v36, %v552_v31  ;;  %v1271_v35 = vpop.f32.mrb[25].mxu1 }
 0x11b   :  { %v435_v37 = vpop.f32.mrb[26].mxu0  ;;  %v555_v38 = vpop.f32.mrb[26].mxu1 }
 0x11c   :  { %v626_v39 = vmax.f32 %v433_v32, 0.0  ;;  %v436_v40 = vadd.f32 %v1571_v36, %v435_v37  ;;  %v1212_v41 = vpop.f32.mrb[27].mxu0  ;;  %v656_v42 = vmax.f32 %v553_v34, 0.0  ;;  %v556_v43 = vadd.f32 %v1571_v36, %v555_v38  ;;  %v1272_v44 = vpop.f32.mrb[27].mxu1 }
 0x11e   :  { %v1096_v45 = vpack.c.bf16 %v626_v39, %v626_v39  ;;  %v627_v46 = vmax.f32 %v436_v40, 0.0  ;;  %v1126_v47 = vpack.c.bf16 %v656_v42, %v656_v42  ;;  %v657_v48 = vmax.f32 %v556_v43, 0.0 }
 0x120   :  { %913 = vst.msk [vmem:[%s1860_s3 + $0x30] sm:$0xf] %vm900_vm3, %v1096_v45  ;;  %v1097_v49 = vpack.c.bf16 %v627_v46, %v627_v46  ;;  %943 = vst.msk [vmem:[%s1860_s3 + $0xa8] sm:$0xf] %vm900_vm3, %v1126_v47  ;;  %v1127_v50 = vpack.c.bf16 %v657_v48, %v657_v48 }
 0x121   :  { %v440_v51 = vpop.f32.mrb[28].mxu0  ;;  %v560_v52 = vpop.f32.mrb[28].mxu1 }
 0x122   :  { %914 = vst.msk [vmem:[%s1860_s3 + $0x34] sm:$0xf] %vm900_vm3, %v1097_v49  ;;  %v441_v53 = vadd.f32 %v1571_v36, %v440_v51  ;;  %v1215_v54 = vpop.f32.mrb[29].mxu0  ;;  %944 = vst.msk [vmem:[%s1860_s3 + $0xac] sm:$0xf] %vm900_vm3, %v1127_v50  ;;  %v561_v55 = vadd.f32 %v1571_v36, %v560_v52  ;;  %v1275_v56 = vpop.f32.mrb[29].mxu1 }
 0x123   :  { %v443_v57 = vpop.f32.mrb[30].mxu0  ;;  %v563_v58 = vpop.f32.mrb[30].mxu1 }
 0x124   :  { %v628_v59 = vmax.f32 %v441_v53, 0.0  ;;  %v444_v60 = vadd.f32 %v1571_v36, %v443_v57  ;;  %v1216_v61 = vpop.f32.mrb[31].mxu0  ;;  %v658_v62 = vmax.f32 %v561_v55, 0.0  ;;  %v564_v63 = vadd.f32 %v1571_v36, %v563_v58  ;;  %v1276_v0 = vpop.f32.mrb[31].mxu1 }
 0x126   :  { %v1098_v1 = vpack.c.bf16 %v628_v59, %v628_v59  ;;  %v629_v2 = vmax.f32 %v444_v60, 0.0  ;;  %v1128_v3 = vpack.c.bf16 %v658_v62, %v658_v62  ;;  %v659_v4 = vmax.f32 %v564_v63, 0.0 }
 0x128   :  { %915 = vst.msk [vmem:[%s1860_s3 + $0x38] sm:$0xf] %vm900_vm3, %v1098_v1  ;;  %v1099_v5 = vpack.c.bf16 %v629_v2, %v629_v2  ;;  %945 = vst.msk [vmem:[%s1860_s3 + $0xb0] sm:$0xf] %vm900_vm3, %v1128_v3  ;;  %v1129_v6 = vpack.c.bf16 %v659_v4, %v659_v4 }
 0x129   :  { %v448_v7 = vpop.f32.mrb[32].mxu0  ;;  %v568_v8 = vpop.f32.mrb[32].mxu1 }
 0x12a   :  { %916 = vst.msk [vmem:[%s1860_s3 + $0x3c] sm:$0xf] %vm900_vm3, %v1099_v5  ;;  %v449_v9 = vadd.f32 %v1571_v36, %v448_v7  ;;  %v1219_v10 = vpop.f32.mrb[33].mxu0  ;;  %946 = vst.msk [vmem:[%s1860_s3 + $0xb4] sm:$0xf] %vm900_vm3, %v1129_v6  ;;  %v569_v11 = vadd.f32 %v1571_v36, %v568_v8  ;;  %v1279_v12 = vpop.f32.mrb[33].mxu1 }
 0x12b   :  { %v451_v13 = vpop.f32.mrb[34].mxu0  ;;  %v571_v14 = vpop.f32.mrb[34].mxu1 }
 0x12c   :  { %v630_v15 = vmax.f32 %v449_v9, 0.0  ;;  %v452_v16 = vadd.f32 %v1571_v36, %v451_v13  ;;  %v1220_v17 = vpop.f32.mrb[35].mxu0  ;;  %v660_v18 = vmax.f32 %v569_v11, 0.0  ;;  %v572_v19 = vadd.f32 %v1571_v36, %v571_v14  ;;  %v1280_v20 = vpop.f32.mrb[35].mxu1 }
 0x12e   :  { %v1100_v21 = vpack.c.bf16 %v630_v15, %v630_v15  ;;  %v631_v22 = vmax.f32 %v452_v16, 0.0  ;;  %v1130_v23 = vpack.c.bf16 %v660_v18, %v660_v18  ;;  %v661_v24 = vmax.f32 %v572_v19, 0.0 }
 0x130   :  { %917 = vst.msk [vmem:[%s1860_s3 + $0x40] sm:$0xf] %vm900_vm3, %v1100_v21  ;;  %v1101_v25 = vpack.c.bf16 %v631_v22, %v631_v22  ;;  %947 = vst.msk [vmem:[%s1860_s3 + $0xb8] sm:$0xf] %vm900_vm3, %v1130_v23  ;;  %v1131_v26 = vpack.c.bf16 %v661_v24, %v661_v24 }
 0x131   :  { %v456_v27 = vpop.f32.mrb[36].mxu0  ;;  %v576_v28 = vpop.f32.mrb[36].mxu1 }
 0x132   :  { %918 = vst.msk [vmem:[%s1860_s3 + $0x44] sm:$0xf] %vm900_vm3, %v1101_v25  ;;  %v457_v29 = vadd.f32 %v1571_v36, %v456_v27  ;;  %v1223_v30 = vpop.f32.mrb[37].mxu0  ;;  %948 = vst.msk [vmem:[%s1860_s3 + $0xbc] sm:$0xf] %vm900_vm3, %v1131_v26  ;;  %v577_v31 = vadd.f32 %v1571_v36, %v576_v28  ;;  %v1283_v32 = vpop.f32.mrb[37].mxu1 }
 0x133   :  { %v459_v33 = vpop.f32.mrb[38].mxu0  ;;  %v579_v34 = vpop.f32.mrb[38].mxu1 }
 0x134   :  { %v632_v35 = vmax.f32 %v457_v29, 0.0  ;;  %v460_v37 = vadd.f32 %v1571_v36, %v459_v33  ;;  %v1224_v38 = vpop.f32.mrb[39].mxu0  ;;  %v662_v39 = vmax.f32 %v577_v31, 0.0  ;;  %v580_v40 = vadd.f32 %v1571_v36, %v579_v34  ;;  %v1284_v41 = vpop.f32.mrb[39].mxu1 }
 0x136   :  { %v1102_v42 = vpack.c.bf16 %v632_v35, %v632_v35  ;;  %v633_v43 = vmax.f32 %v460_v37, 0.0  ;;  %v1132_v44 = vpack.c.bf16 %v662_v39, %v662_v39  ;;  %v663_v45 = vmax.f32 %v580_v40, 0.0 }
 0x138   :  { %919 = vst.msk [vmem:[%s1860_s3 + $0x48] sm:$0xf] %vm900_vm3, %v1102_v42  ;;  %v1103_v46 = vpack.c.bf16 %v633_v43, %v633_v43  ;;  %949 = vst.msk [vmem:[%s1860_s3 + $0xc0] sm:$0xf] %vm900_vm3, %v1132_v44  ;;  %v1133_v47 = vpack.c.bf16 %v663_v45, %v663_v45 }
 0x139   :  { %v464_v48 = vpop.f32.mrb[40].mxu0  ;;  %v584_v49 = vpop.f32.mrb[40].mxu1 }
 0x13a   :  { %920 = vst.msk [vmem:[%s1860_s3 + $0x4c] sm:$0xf] %vm900_vm3, %v1103_v46  ;;  %v465_v50 = vadd.f32 %v1571_v36, %v464_v48  ;;  %v1227_v51 = vpop.f32.mrb[41].mxu0  ;;  %950 = vst.msk [vmem:[%s1860_s3 + $0xc4] sm:$0xf] %vm900_vm3, %v1133_v47  ;;  %v585_v52 = vadd.f32 %v1571_v36, %v584_v49  ;;  %v1287_v53 = vpop.f32.mrb[41].mxu1 }
 0x13b   :  { %v467_v54 = vpop.f32.mrb[42].mxu0  ;;  %v587_v55 = vpop.f32.mrb[42].mxu1 }
 0x13c   :  { %v634_v56 = vmax.f32 %v465_v50, 0.0  ;;  %v468_v57 = vadd.f32 %v1571_v36, %v467_v54  ;;  %v1228_v58 = vpop.f32.mrb[43].mxu0  ;;  %v664_v59 = vmax.f32 %v585_v52, 0.0  ;;  %v588_v60 = vadd.f32 %v1571_v36, %v587_v55  ;;  %v1288_v61 = vpop.f32.mrb[43].mxu1 }
 0x13e   :  { %v1104_v62 = vpack.c.bf16 %v634_v56, %v634_v56  ;;  %v635_v63 = vmax.f32 %v468_v57, 0.0  ;;  %v1134_v0 = vpack.c.bf16 %v664_v59, %v664_v59  ;;  %v665_v1 = vmax.f32 %v588_v60, 0.0 }
 0x140   :  { %921 = vst.msk [vmem:[%s1860_s3 + $0x50] sm:$0xf] %vm900_vm3, %v1104_v62  ;;  %v1105_v2 = vpack.c.bf16 %v635_v63, %v635_v63  ;;  %951 = vst.msk [vmem:[%s1860_s3 + $0xc8] sm:$0xf] %vm900_vm3, %v1134_v0  ;;  %v1135_v3 = vpack.c.bf16 %v665_v1, %v665_v1 }
 0x141   :  { %v472_v4 = vpop.f32.mrb[44].mxu0  ;;  %v592_v5 = vpop.f32.mrb[44].mxu1 }
 0x142   :  { %922 = vst.msk [vmem:[%s1860_s3 + $0x54] sm:$0xf] %vm900_vm3, %v1105_v2  ;;  %v473_v6 = vadd.f32 %v1571_v36, %v472_v4  ;;  %v1231_v7 = vpop.f32.mrb[45].mxu0  ;;  %952 = vst.msk [vmem:[%s1860_s3 + $0xcc] sm:$0xf] %vm900_vm3, %v1135_v3  ;;  %v593_v8 = vadd.f32 %v1571_v36, %v592_v5  ;;  %v1291_v9 = vpop.f32.mrb[45].mxu1 }
 0x143   :  { %v475_v10 = vpop.f32.mrb[46].mxu0  ;;  %v595_v11 = vpop.f32.mrb[46].mxu1 }
 0x144   :  { %v636_v12 = vmax.f32 %v473_v6, 0.0  ;;  %v476_v13 = vadd.f32 %v1571_v36, %v475_v10  ;;  %v1232_v14 = vpop.f32.mrb[47].mxu0  ;;  %v666_v15 = vmax.f32 %v593_v8, 0.0  ;;  %v596_v16 = vadd.f32 %v1571_v36, %v595_v11  ;;  %v1292_v17 = vpop.f32.mrb[47].mxu1 }
 0x146   :  { %v1106_v18 = vpack.c.bf16 %v636_v12, %v636_v12  ;;  %v637_v19 = vmax.f32 %v476_v13, 0.0  ;;  %v1136_v20 = vpack.c.bf16 %v666_v15, %v666_v15  ;;  %v667_v21 = vmax.f32 %v596_v16, 0.0 }
 0x148   :  { %923 = vst.msk [vmem:[%s1860_s3 + $0x58] sm:$0xf] %vm900_vm3, %v1106_v18  ;;  %v1107_v22 = vpack.c.bf16 %v637_v19, %v637_v19  ;;  %953 = vst.msk [vmem:[%s1860_s3 + $0xd0] sm:$0xf] %vm900_vm3, %v1136_v20  ;;  %v1137_v23 = vpack.c.bf16 %v667_v21, %v667_v21 }
 0x149   :  { %v480_v24 = vpop.f32.mrb[48].mxu0  ;;  %v600_v25 = vpop.f32.mrb[48].mxu1 }
 0x14a   :  { %924 = vst.msk [vmem:[%s1860_s3 + $0x5c] sm:$0xf] %vm900_vm3, %v1107_v22  ;;  %v481_v26 = vadd.f32 %v1571_v36, %v480_v24  ;;  %v1235_v27 = vpop.f32.mrb[49].mxu0  ;;  %954 = vst.msk [vmem:[%s1860_s3 + $0xd4] sm:$0xf] %vm900_vm3, %v1137_v23  ;;  %v601_v28 = vadd.f32 %v1571_v36, %v600_v25  ;;  %v1295_v29 = vpop.f32.mrb[49].mxu1 }
 0x14b   :  { %v483_v30 = vpop.f32.mrb[50].mxu0  ;;  %v603_v31 = vpop.f32.mrb[50].mxu1 }
 0x14c   :  { %v638_v32 = vmax.f32 %v481_v26, 0.0  ;;  %v484_v33 = vadd.f32 %v1571_v36, %v483_v30  ;;  %v1236_v34 = vpop.f32.mrb[51].mxu0  ;;  %v668_v35 = vmax.f32 %v601_v28, 0.0  ;;  %v604_v37 = vadd.f32 %v1571_v36, %v603_v31  ;;  %v1296_v38 = vpop.f32.mrb[51].mxu1 }
 0x14e   :  { %v1108_v39 = vpack.c.bf16 %v638_v32, %v638_v32  ;;  %v639_v40 = vmax.f32 %v484_v33, 0.0  ;;  %v1138_v41 = vpack.c.bf16 %v668_v35, %v668_v35  ;;  %v669_v42 = vmax.f32 %v604_v37, 0.0 }
 0x150   :  { %925 = vst.msk [vmem:[%s1860_s3 + $0x60] sm:$0xf] %vm900_vm3, %v1108_v39  ;;  %v1109_v43 = vpack.c.bf16 %v639_v40, %v639_v40  ;;  %955 = vst.msk [vmem:[%s1860_s3 + $0xd8] sm:$0xf] %vm900_vm3, %v1138_v41  ;;  %v1139_v44 = vpack.c.bf16 %v669_v42, %v669_v42 }
 0x151   :  { %v488_v45 = vpop.f32.mrb[52].mxu0  ;;  %v608_v46 = vpop.f32.mrb[52].mxu1 }
 0x152   :  { %926 = vst.msk [vmem:[%s1860_s3 + $0x64] sm:$0xf] %vm900_vm3, %v1109_v43  ;;  %v489_v47 = vadd.f32 %v1571_v36, %v488_v45  ;;  %v1239_v48 = vpop.f32.mrb[53].mxu0  ;;  %956 = vst.msk [vmem:[%s1860_s3 + $0xdc] sm:$0xf] %vm900_vm3, %v1139_v44  ;;  %v609_v49 = vadd.f32 %v1571_v36, %v608_v46  ;;  %v1299_v50 = vpop.f32.mrb[53].mxu1 }
 0x153   :  { %v491_v51 = vpop.f32.mrb[54].mxu0  ;;  %v611_v52 = vpop.f32.mrb[54].mxu1 }
 0x154   :  { %v640_v53 = vmax.f32 %v489_v47, 0.0  ;;  %v492_v54 = vadd.f32 %v1571_v36, %v491_v51  ;;  %v1240_v55 = vpop.f32.mrb[55].mxu0  ;;  %v670_v56 = vmax.f32 %v609_v49, 0.0  ;;  %v1300_v57 = vpop.f32.mrb[55].mxu1 }
 0x156   :  { %v1110_v58 = vpack.c.bf16 %v640_v53, %v640_v53  ;;  %v641_v59 = vmax.f32 %v492_v54, 0.0  ;;  %v1140_v60 = vpack.c.bf16 %v670_v56, %v670_v56 }
 0x158   :  { %927 = vst.msk [vmem:[%s1860_s3 + $0x68] sm:$0xf] %vm900_vm3, %v1110_v58  ;;  %v1111_v61 = vpack.c.bf16 %v641_v59, %v641_v59 }
 0x159   :  { %958 = vst.msk [vmem:[%s1860_s3 + $0xe0] sm:$0x1] %vm957_vm4, %v1140_v60  ;;  %v496_v62 = vpop.f32.mrb[56].mxu0 }
 0x15a   :  { %928 = vst.msk [vmem:[%s1860_s3 + $0x6c] sm:$0xf] %vm900_vm3, %v1111_v61  ;;  %v497_v63 = vadd.f32 %v1571_v36, %v496_v62  ;;  %v1243_v0 = vpop.f32.mrb[57].mxu0 }
 0x15b   :  { %v499_v1 = vpop.f32.mrb[58].mxu0 }
 0x15c   :  { %v642_v2 = vmax.f32 %v497_v63, 0.0  ;;  %v500_v3 = vadd.f32 %v1571_v36, %v499_v1  ;;  %v1244_v4 = vpop.f32.mrb[59].mxu0 }
 0x15e   :  { %v1112_v5 = vpack.c.bf16 %v642_v2, %v642_v2  ;;  %v643_v6 = vmax.f32 %v500_v3, 0.0 }
 0x160   :  { %929 = vst.msk [vmem:[%s1860_s3 + $0x70] sm:$0xf] %vm900_vm3, %v1112_v5  ;;  %v1113_v7 = vpack.c.bf16 %v643_v6, %v643_v6 }
 0x162   :  { %930 = vst.msk [vmem:[%s1860_s3 + $0x74] sm:$0xf] %vm900_vm3, %v1113_v7 }

// kernel: inception_stem.12
= control target key start
LH: loop header
LB: loop body
LE: loop exit
PB: predicated region body
PF: predicated region fallthrough
CT: control target
= control target key end

     0   :  { %v1728_v0 = vmov 0   ;;  %vm577_vm0 = vcmask 261120   ;;  %vm1276_vm1 = vcmask 257024   ;;  %vm1319_vm2 = vcmask 253952   ;;  %s2316_s1 = inlined_call_operand.vmem [shape: bf16[288,32], index: 1, kind: input, shape index: {}]   ;;  %s2317_s0 = inlined_call_operand.vmem [shape: bf16[338,288], index: 0, kind: input, shape index: {}]   ;;  %s2318_s2 = inlined_call_operand.vmem [shape: f32[1,32], index: 2, kind: input, shape index: {}]   ;;  %s2319_s3 = inlined_call_operand.vmem [shape: bf16[338,32], index: 3, kind: output, shape index: {}]  }
   0x1   :  { %644 = vmatprep.subr.bf16.mxu0 %v1728_v0  ;;  %1590 = vmatprep.subr.bf16.mxu1 %v1728_v0  ;;  %v1623_v1 = vld [vmem:[%s2316_s1] sm:$0xff]   ;;  %v1624_v2 = vld [vmem:[%s2316_s1 + $0x8] sm:$0xff]   ;;  %v1625_v3 = vld [vmem:[%s2316_s1 + $0x10] sm:$0xff]  }
   0x2   :  { %645 = vmatpush1.bf16.msra.mxu0 %v1623_v1  ;;  %1606 = vmatpush1.bf16.msra.mxu1 %v1623_v1  ;;  %v1626_v4 = vld [vmem:[%s2316_s1 + $0x18] sm:$0xff]   ;;  %v1627_v5 = vld [vmem:[%s2316_s1 + $0x20] sm:$0xff]   ;;  %v1628_v7 = vld [vmem:[%s2316_s1 + $0x28] sm:$0xff]  }
   0x3   :  { %646 = vmatprep.subr.bf16.mxu0 %v1728_v0  ;;  %1591 = vmatprep.subr.bf16.mxu1 %v1728_v0  ;;  %v1641_v6 = vld [vmem:[%s2317_s0 + $0x4] ss:$12 sps:$4 sm:$0xff]   ;;  %v1644_v8 = vld [vmem:[%s2317_s0 + $0x19c] ss:$12 sps:$4 sm:$0xff]   ;;  %v1639_v20 = vld [vmem:[%s2317_s0] ss:$12 sps:$4 sm:$0xff]  }
   0x4   :  { %676 = vmatprep.mubr.bf16.mxu0 %v1641_v6  ;;  %812 = vmatprep.mubr.bf16.mxu1 %v1644_v8  ;;  %v1629_v9 = vld [vmem:[%s2316_s1 + $0x30] sm:$0xff]   ;;  %v1630_v10 = vld [vmem:[%s2316_s1 + $0x38] sm:$0xff]   ;;  %v1631_v11 = vld [vmem:[%s2316_s1 + $0x40] sm:$0xff]  }
   0x5   :  { %v1632_v12 = vld [vmem:[%s2316_s1 + $0x48] sm:$0xff]   ;;  %v1633_v13 = vld [vmem:[%s2316_s1 + $0x50] sm:$0xff]   ;;  %v1634_v14 = vld [vmem:[%s2316_s1 + $0x58] sm:$0xff]  }
   0x6   :  { %647 = vmatpush1.bf16.msra.mxu0 %v1624_v2  ;;  %1607 = vmatpush1.bf16.msra.mxu1 %v1624_v2  ;;  %v1635_v15 = vld [vmem:[%s2316_s1 + $0x60] sm:$0xff]   ;;  %v1636_v16 = vld [vmem:[%s2316_s1 + $0x68] sm:$0xff]   ;;  %v1637_v17 = vld [vmem:[%s2316_s1 + $0x70] sm:$0xff]  }
   0x7   :  { %648 = vmatprep.subr.bf16.mxu0 %v1728_v0  ;;  %1592 = vmatprep.subr.bf16.mxu1 %v1728_v0  ;;  %v1638_v18 = vld [vmem:[%s2316_s1 + $0x78] sm:$0xff]   ;;  %v1651_v19 = vld [vmem:[%s2316_s1 + $0x80] sm:$0xff]   ;;  %v1664_v24 = vld [vmem:[%s2316_s1 + $0x88] sm:$0xff]  }
   0x8   :  { %v1642_v21 = vld [vmem:[%s2317_s0 + $0x198] ss:$12 sps:$4 sm:$0xff]   ;;  %v1645_v22 = vld [vmem:[%s2317_s0 + $0x1c] ss:$12 sps:$4 sm:$0xff]   ;;  %v1647_v23 = vld [vmem:[%s2317_s0 + $0x1b4] ss:$12 sps:$4 sm:$0xff]  }
   0x9   :  { %v1649_v25 = vld [vmem:[%s2317_s0 + $0x18] ss:$12 sps:$4 sm:$0xff]   ;;  %v1650_v26 = vld [vmem:[%s2317_s0 + $0x1b0] ss:$12 sps:$4 sm:$0xff]   ;;  %v1652_v27 = vld [vmem:[%s2317_s0 + $0x34] ss:$12 sps:$4 sm:$0xff]  }
   0xa   :  { %649 = vmatpush1.bf16.msra.mxu0 %v1625_v3  ;;  %1608 = vmatpush1.bf16.msra.mxu1 %v1625_v3  ;;  %v1654_v28 = vld [vmem:[%s2317_s0 + $0x1cc] ss:$12 sps:$4 sm:$0xff]   ;;  %v1656_v29 = vld [vmem:[%s2317_s0 + $0x30] ss:$12 sps:$4 sm:$0xff]   ;;  %v1657_v30 = vld [vmem:[%s2317_s0 + $0x1c8] ss:$12 sps:$4 sm:$0xff]  }
   0xb   :  { %650 = vmatprep.subr.bf16.mxu0 %v1728_v0  ;;  %1593 = vmatprep.subr.bf16.mxu1 %v1728_v0  ;;  %v1658_v31 = vld [vmem:[%s2317_s0 + $0x4c] ss:$12 sps:$4 sm:$0xff]   ;;  %v1660_v32 = vld [vmem:[%s2317_s0 + $0x1e4] ss:$12 sps:$4 sm:$0xff]   ;;  %v1662_v34 = vld [vmem:[%s2317_s0 + $0x48] ss:$12 sps:$4 sm:$0xff]  }
   0xc   :  { %v99_v33 = vld [vmem:[%s2317_s0 + $0x1f8] sm:$0x11]  ;;  %v1663_v35 = vld [vmem:[%s2317_s0 + $0x1e0] ss:$12 sps:$4 sm:$0xff]   ;;  %v1665_v36 = vld [vmem:[%s2317_s0 + $0x64] ss:$12 sps:$4 sm:$0xff]  }
   0xd   :  { %v1390_v37 = vcombine.high %v99_v33, %v99_v33  ;;  %v1668_v38 = vld [vmem:[%s2317_s0 + $0x60] ss:$12 sps:$4 sm:$0xff]   ;;  %v1389_v39 = vcombine.low %v99_v33, %v99_v33  ;;  %v1670_v40 = vld [vmem:[%s2317_s0 + $0x7c] ss:$12 sps:$4 sm:$0xff]   ;;  %v1673_v42 = vld [vmem:[%s2317_s0 + $0x78] ss:$12 sps:$4 sm:$0xff]  }
   0xe   :  { %651 = vmatpush1.bf16.msra.mxu0 %v1626_v4  ;;  %1609 = vmatpush1.bf16.msra.mxu1 %v1626_v4  ;;  %v1672_v41 = vld [vmem:[%s2317_s0 + $0x8] ss:$12 sps:$4 sm:$0xff]   ;;  %v1674_v43 = vld [vmem:[%s2317_s0 + $0x20] ss:$12 sps:$4 sm:$0xff]   ;;  %v1677_v45 = vld [vmem:[%s2317_s0 + $0x38] ss:$12 sps:$4 sm:$0xff]  }
   0xf   :  { %652 = vmatprep.subr.bf16.mxu0 %v1728_v0  ;;  %1594 = vmatprep.subr.bf16.mxu1 %v1728_v0  ;;  %v1675_v44 = vld [vmem:[%s2317_s0 + $0x94] ss:$12 sps:$4 sm:$0xff]   ;;  %v1678_v46 = vld [vmem:[%s2317_s0 + $0x90] ss:$12 sps:$4 sm:$0xff]   ;;  %v1680_v48 = vld [vmem:[%s2317_s0 + $0xac] ss:$12 sps:$4 sm:$0xff]  }
  0x10   :  { %v1679_v47 = vld [vmem:[%s2317_s0 + $0x50] ss:$12 sps:$4 sm:$0xff]   ;;  %v1682_v49 = vld [vmem:[%s2317_s0 + $0x68] ss:$12 sps:$4 sm:$0xff]   ;;  %v1684_v51 = vld [vmem:[%s2317_s0 + $0x80] ss:$12 sps:$4 sm:$0xff]  }
  0x11   :  { %v1683_v50 = vld [vmem:[%s2317_s0 + $0xa8] ss:$12 sps:$4 sm:$0xff]   ;;  %v1685_v52 = vld [vmem:[%s2317_s0 + $0xc4] ss:$12 sps:$4 sm:$0xff]   ;;  %v1688_v54 = vld [vmem:[%s2317_s0 + $0xc0] ss:$12 sps:$4 sm:$0xff]  }
  0x12   :  { %653 = vmatpush1.bf16.msra.mxu0 %v1627_v5  ;;  %1610 = vmatpush1.bf16.msra.mxu1 %v1627_v5  ;;  %v1687_v53 = vld [vmem:[%s2317_s0 + $0x98] ss:$12 sps:$4 sm:$0xff]   ;;  %v1689_v55 = vld [vmem:[%s2317_s0 + $0xb0] ss:$12 sps:$4 sm:$0xff]   ;;  %v1692_v57 = vld [vmem:[%s2317_s0 + $0xc8] ss:$12 sps:$4 sm:$0xff]  }
  0x13   :  { %654 = vmatprep.subr.bf16.mxu0 %v1728_v0  ;;  %1595 = vmatprep.subr.bf16.mxu1 %v1728_v0  ;;  %v1690_v56 = vld [vmem:[%s2317_s0 + $0xdc] ss:$12 sps:$4 sm:$0xff]   ;;  %v1693_v58 = vld [vmem:[%s2317_s0 + $0xd8] ss:$12 sps:$4 sm:$0xff]   ;;  %v1694_v59 = vld [vmem:[%s2317_s0 + $0xe0] ss:$12 sps:$4 sm:$0xff]  }
  0x14   :  { %v1695_v60 = vld [vmem:[%s2317_s0 + $0xf4] ss:$12 sps:$4 sm:$0xff]   ;;  %v1697_v61 = vld [vmem:[%s2317_s0 + $0xf8] ss:$12 sps:$4 sm:$0xff]   ;;  %v1698_v62 = vld [vmem:[%s2317_s0 + $0xf0] ss:$12 sps:$4 sm:$0xff]  }
  0x15   :  { %v1699_v63 = vld [vmem:[%s2317_s0 + $0x110] ss:$12 sps:$4 sm:$0xff]   ;;  %v1702_v1 = vld [vmem:[%s2317_s0 + $0x128] ss:$12 sps:$4 sm:$0xff]   ;;  %v1704_v3 = vld [vmem:[%s2317_s0 + $0x140] ss:$12 sps:$4 sm:$0xff]  }
  0x16   :  { %655 = vmatpush1.bf16.msra.mxu0 %v1628_v7  ;;  %1611 = vmatpush1.bf16.msra.mxu1 %v1628_v7  ;;  %v1703_v2 = vld [vmem:[%s2317_s0 + $0x108] ss:$12 sps:$4 sm:$0xff]   ;;  %v1705_v4 = vld [vmem:[%s2317_s0 + $0x124] ss:$12 sps:$4 sm:$0xff]   ;;  %v1708_v6 = vld [vmem:[%s2317_s0 + $0x120] ss:$12 sps:$4 sm:$0xff]  }
  0x17   :  { %656 = vmatprep.subr.bf16.mxu0 %v1728_v0  ;;  %1596 = vmatprep.subr.bf16.mxu1 %v1728_v0  ;;  %v1707_v5 = vld [vmem:[%s2317_s0 + $0x158] ss:$12 sps:$4 sm:$0xff]   ;;  %v1709_v7 = vld [vmem:[%s2317_s0 + $0x170] ss:$12 sps:$4 sm:$0xff]  }
  0x18   :  { %v1710_v8 = vld [vmem:[%s2317_s0 + $0x13c] ss:$12 sps:$4 sm:$0xff]  }
  0x1a   :  { %657 = vmatpush1.bf16.msra.mxu0 %v1629_v9  ;;  %1612 = vmatpush1.bf16.msra.mxu1 %v1629_v9  ;;  %v1712_v9 = vld [vmem:[%s2317_s0 + $0x188] ss:$12 sps:$4 sm:$0xff]  }
  0x1b   :  { %658 = vmatprep.subr.bf16.mxu0 %v1728_v0  ;;  %1597 = vmatprep.subr.bf16.mxu1 %v1728_v0 }
  0x1e   :  { %659 = vmatpush1.bf16.msra.mxu0 %v1630_v10  ;;  %1613 = vmatpush1.bf16.msra.mxu1 %v1630_v10  ;;  %v1713_v10 = vld [vmem:[%s2317_s0 + $0x138] ss:$12 sps:$4 sm:$0xff]  }
  0x1f   :  { %660 = vmatprep.subr.bf16.mxu0 %v1728_v0  ;;  %1598 = vmatprep.subr.bf16.mxu1 %v1728_v0 }
  0x22   :  { %661 = vmatpush1.bf16.msra.mxu0 %v1631_v11  ;;  %1614 = vmatpush1.bf16.msra.mxu1 %v1631_v11  ;;  %v1714_v11 = vld [vmem:[%s2317_s0 + $0x1a0] ss:$12 sps:$4 sm:$0xff]  }
  0x23   :  { %662 = vmatprep.subr.bf16.mxu0 %v1728_v0  ;;  %1599 = vmatprep.subr.bf16.mxu1 %v1728_v0 }
  0x26   :  { %663 = vmatpush1.bf16.msra.mxu0 %v1632_v12  ;;  %1615 = vmatpush1.bf16.msra.mxu1 %v1632_v12  ;;  %v1715_v12 = vld [vmem:[%s2317_s0 + $0x154] ss:$12 sps:$4 sm:$0xff]  }
  0x27   :  { %664 = vmatprep.subr.bf16.mxu0 %v1728_v0  ;;  %1600 = vmatprep.subr.bf16.mxu1 %v1728_v0 }
  0x2a   :  { %665 = vmatpush1.bf16.msra.mxu0 %v1633_v13  ;;  %1616 = vmatpush1.bf16.msra.mxu1 %v1633_v13  ;;  %v1717_v13 = vld [vmem:[%s2317_s0 + $0x1b8] ss:$12 sps:$4 sm:$0xff]  }
  0x2b   :  { %666 = vmatprep.subr.bf16.mxu0 %v1728_v0  ;;  %1601 = vmatprep.subr.bf16.mxu1 %v1728_v0 }
  0x2e   :  { %667 = vmatpush1.bf16.msra.mxu0 %v1634_v14  ;;  %1617 = vmatpush1.bf16.msra.mxu1 %v1634_v14  ;;  %v1718_v14 = vld [vmem:[%s2317_s0 + $0x150] ss:$12 sps:$4 sm:$0xff]  }
  0x2f   :  { %668 = vmatprep.subr.bf16.mxu0 %v1728_v0  ;;  %1602 = vmatprep.subr.bf16.mxu1 %v1728_v0 }
  0x32   :  { %669 = vmatpush1.bf16.msra.mxu0 %v1635_v15  ;;  %1618 = vmatpush1.bf16.msra.mxu1 %v1635_v15  ;;  %v1719_v15 = vld [vmem:[%s2317_s0 + $0x1d0] ss:$12 sps:$4 sm:$0xff]  }
  0x33   :  { %670 = vmatprep.subr.bf16.mxu0 %v1728_v0  ;;  %1603 = vmatprep.subr.bf16.mxu1 %v1728_v0 }
  0x36   :  { %671 = vmatpush1.bf16.msra.mxu0 %v1636_v16  ;;  %1619 = vmatpush1.bf16.msra.mxu1 %v1636_v16  ;;  %v1720_v16 = vld [vmem:[%s2317_s0 + $0x16c] ss:$12 sps:$4 sm:$0xff]  }
  0x37   :  { %672 = vmatprep.subr.bf16.mxu0 %v1728_v0  ;;  %1604 = vmatprep.subr.bf16.mxu1 %v1728_v0 }
  0x3a   :  { %673 = vmatpush1.bf16.msra.mxu0 %v1637_v17  ;;  %1620 = vmatpush1.bf16.msra.mxu1 %v1637_v17  ;;  %v1722_v17 = vld [vmem:[%s2317_s0 + $0x1e8] ss:$12 sps:$4 sm:$0xff]  }
  0x3b   :  { %674 = vmatprep.subr.bf16.mxu0 %v1728_v0  ;;  %1605 = vmatprep.subr.bf16.mxu1 %v1728_v0  ;;  %v1700_v0 = vld [vmem:[%s2317_s0 + $0x10c] ss:$12 sps:$4 sm:$0xff]  }
  0x3e   :  { %675 = vmatpush1.bf16.msra.mxu0 %v1638_v18  ;;  %1621 = vmatpush1.bf16.msra.mxu1 %v1638_v18  ;;  %v1723_v18 = vld [vmem:[%s2317_s0 + $0x168] ss:$12 sps:$4 sm:$0xff]  }
  0x3f   :  { %1542 = vmatprep.subr.bf16.mxu1 %v1651_v19 }
  0x41   :  { %677 = vmatmul.mubr.bf16.vlgmr.msra.gmra.mrb[0].mxu0 %v1639_v20  ;;  %813 = vmatmul.mubr.bf16.vlgmr.msra.gmra.mrb[0].mxu1 %v1642_v21  ;;  %v1725_v20 = vld [vmem:[%s2317_s0 + $0x184] ss:$12 sps:$4 sm:$0xff]   ;;  %v1727_v21 = vld [vmem:[%s2317_s0 + $0x180] ss:$12 sps:$4 sm:$0xff]  }
  0x42   :  { %684 = vmatprep.mubr.bf16.mxu0 %v1645_v22  ;;  %820 = vmatprep.mubr.bf16.mxu1 %v1647_v23 }
  0x43   :  { %1543 = vmatpush3.bf16.msra.mxu1 %v1651_v19  ;;  %v1724_v19 = vld [vmem:[%s2317_s0 + $0x200] ss:$0 sps:$4 sm:$0x11]  }
  0x44   :  { %1544 = vmatprep.subr.bf16.mxu1 %v1664_v24 }
  0x47   :  { %1545 = vmatpush3.bf16.msra.mxu1 %v1664_v24 }
  0x49   :  { %685 = vmatmul.mubr.bf16.gmra.mrb[4].mxu0 %v1649_v25  ;;  %821 = vmatmul.mubr.bf16.gmra.mrb[4].mxu1 %v1650_v26 }
  0x4a   :  { %692 = vmatprep.mubr.bf16.mxu0 %v1652_v27  ;;  %828 = vmatprep.mubr.bf16.mxu1 %v1654_v28 }
  0x51   :  { %693 = vmatmul.mubr.bf16.gmra.mrb[8].mxu0 %v1656_v29  ;;  %829 = vmatmul.mubr.bf16.gmra.mrb[8].mxu1 %v1657_v30 }
  0x52   :  { %700 = vmatprep.mubr.bf16.mxu0 %v1658_v31  ;;  %836 = vmatprep.mubr.bf16.mxu1 %v1660_v32 }
  0x59   :  { %701 = vmatmul.mubr.bf16.gmra.mrb[12].mxu0 %v1662_v34  ;;  %837 = vmatmul.mubr.bf16.gmra.mrb[12].mxu1 %v1663_v35 }
  0x5a   :  { %708 = vmatprep.mubr.bf16.mxu0 %v1665_v36  ;;  %844 = vmatprep.mubr.bf16.mxu1 %v1390_v37 }
  0x61   :  { %709 = vmatmul.mubr.bf16.gmra.mrb[16].mxu0 %v1668_v38  ;;  %845 = vmatmul.mubr.bf16.gmra.mrb[16].mxu1 %v1389_v39 }
  0x62   :  { %716 = vmatprep.mubr.bf16.mxu0 %v1670_v40  ;;  %1546 = vmatprep.mubr.msk.bf16.mxu1 %vm577_vm0, %v1672_v41 }
  0x69   :  { %717 = vmatmul.mubr.bf16.gmra.mrb[20].mxu0 %v1673_v42  ;;  %1547 = vmatmul.mubr.msk.bf16.vlgmr.msra.gmra.mrb[20].mxu1 %vm577_vm0, %v1674_v43 }
  0x6a   :  { %724 = vmatprep.mubr.bf16.mxu0 %v1675_v44  ;;  %1550 = vmatprep.mubr.msk.bf16.mxu1 %vm577_vm0, %v1677_v45 }
  0x71   :  { %725 = vmatmul.mubr.bf16.gmra.mrb[24].mxu0 %v1678_v46  ;;  %1551 = vmatmul.mubr.msk.bf16.gmra.mrb[24].mxu1 %vm577_vm0, %v1679_v47 }
  0x72   :  { %732 = vmatprep.mubr.bf16.mxu0 %v1680_v48  ;;  %1554 = vmatprep.mubr.msk.bf16.mxu1 %vm577_vm0, %v1682_v49 }
  0x79   :  { %733 = vmatmul.mubr.bf16.gmra.mrb[28].mxu0 %v1683_v50  ;;  %1555 = vmatmul.mubr.msk.bf16.gmra.mrb[28].mxu1 %vm577_vm0, %v1684_v51 }
  0x7a   :  { %740 = vmatprep.mubr.bf16.mxu0 %v1685_v52  ;;  %1558 = vmatprep.mubr.msk.bf16.mxu1 %vm577_vm0, %v1687_v53 }
  0x81   :  { %741 = vmatmul.mubr.bf16.gmra.mrb[32].mxu0 %v1688_v54  ;;  %1559 = vmatmul.mubr.msk.bf16.gmra.mrb[32].mxu1 %vm577_vm0, %v1689_v55 }
  0x82   :  { %748 = vmatprep.mubr.bf16.mxu0 %v1690_v56  ;;  %1562 = vmatprep.mubr.msk.bf16.mxu1 %vm577_vm0, %v1692_v57 }
  0x89   :  { %749 = vmatmul.mubr.bf16.gmra.mrb[36].mxu0 %v1693_v58  ;;  %1563 = vmatmul.mubr.msk.bf16.gmra.mrb[36].mxu1 %vm577_vm0, %v1694_v59 }
  0x8a   :  { %756 = vmatprep.mubr.bf16.mxu0 %v1695_v60  ;;  %1566 = vmatprep.mubr.msk.bf16.mxu1 %vm577_vm0, %v1697_v61 }
  0x91   :  { %757 = vmatmul.mubr.bf16.gmra.mrb[40].mxu0 %v1698_v62  ;;  %1567 = vmatmul.mubr.msk.bf16.gmra.mrb[40].mxu1 %vm577_vm0, %v1699_v63  ;;  %v2077_v62 = vld [vmem:[%s2318_s2] ss:$0 sm:$0xff] }
  0x92   :  { %764 = vmatprep.mubr.bf16.mxu0 %v1700_v0  ;;  %1570 = vmatprep.mubr.msk.bf16.mxu1 %vm577_vm0, %v1702_v1 }
  0x99   :  { %765 = vmatmul.mubr.bf16.gmra.mrb[44].mxu0 %v1703_v2  ;;  %1571 = vmatmul.mubr.msk.bf16.gmra.mrb[44].mxu1 %vm577_vm0, %v1704_v3 }
  0x9a   :  { %772 = vmatprep.mubr.bf16.mxu0 %v1705_v4  ;;  %1574 = vmatprep.mubr.msk.bf16.mxu1 %vm577_vm0, %v1707_v5 }
  0xa1   :  { %773 = vmatmul.mubr.bf16.gmra.mrb[48].mxu0 %v1708_v6  ;;  %1575 = vmatmul.mubr.msk.bf16.gmra.mrb[48].mxu1 %vm577_vm0, %v1709_v7 }
  0xa2   :  { %780 = vmatprep.mubr.bf16.mxu0 %v1710_v8  ;;  %1578 = vmatprep.mubr.msk.bf16.mxu1 %vm577_vm0, %v1712_v9 }
  0xa9   :  { %781 = vmatmul.mubr.bf16.gmra.mrb[52].mxu0 %v1713_v10  ;;  %1579 = vmatmul.mubr.msk.bf16.gmra.mrb[52].mxu1 %vm577_vm0, %v1714_v11 }
  0xaa   :  { %788 = vmatprep.mubr.bf16.mxu0 %v1715_v12  ;;  %1582 = vmatprep.mubr.msk.bf16.mxu1 %vm577_vm0, %v1717_v13 }
  0xb1   :  { %789 = vmatmul.mubr.bf16.gmra.mrb[56].mxu0 %v1718_v14  ;;  %1583 = vmatmul.mubr.msk.bf16.gmra.mrb[56].mxu1 %vm577_vm0, %v1719_v15 }
  0xb2   :  { %796 = vmatprep.mubr.bf16.mxu0 %v1720_v16  ;;  %1586 = vmatprep.mubr.msk.bf16.mxu1 %vm577_vm0, %v1722_v17 }
  0xb9   :  { %797 = vmatmul.mubr.bf16.gmra.mrb[60].mxu0 %v1723_v18  ;;  %1587 = vmatmul.mubr.msk.bf16.gmra.mrb[60].mxu1 %vm577_vm0, %v1724_v19 }
  0xba   :  { %804 = vmatprep.mubr.bf16.mxu0 %v1725_v20 }
  0xc1   :  { %805 = vmatmul.mubr.bf16.gmra.mrb[64].mxu0 %v1727_v21 }
 0x114   :  { %v678_v22 = vpop.f32.mrb[0].mxu0  ;;  %v2052_v23 = vpop.f32.mrb[0].mxu1 }
 0x115   :  { %v680_v24 = vpop.f32.mrb[1].mxu0  ;;  %v816_v25 = vpop.f32.mrb[1].mxu1  ;;  %v679_v0 = vadd.f32 %v2077_v62, %v678_v22 }
 0x116   :  { %v681_v26 = vpop.f32.mrb[2].mxu0  ;;  %v2054_v27 = vpop.f32.mrb[2].mxu1 }
 0x117   :  { %v683_v28 = vpop.f32.mrb[3].mxu0  ;;  %v819_v29 = vpop.f32.mrb[3].mxu1  ;;  %v682_v7 = vadd.f32 %v2077_v62, %v681_v26 }
 0x11c   :  { %v686_v30 = vpop.f32.mrb[4].mxu0  ;;  %v2056_v31 = vpop.f32.mrb[4].mxu1 }
 0x11d   :  { %v688_v32 = vpop.f32.mrb[5].mxu0  ;;  %v824_v33 = vpop.f32.mrb[5].mxu1  ;;  %v687_v63 = vadd.f32 %v2077_v62, %v686_v30 }
 0x11e   :  { %v689_v34 = vpop.f32.mrb[6].mxu0  ;;  %v2058_v35 = vpop.f32.mrb[6].mxu1 }
 0x11f   :  { %v691_v36 = vpop.f32.mrb[7].mxu0  ;;  %v827_v37 = vpop.f32.mrb[7].mxu1  ;;  %v690_v3 = vadd.f32 %v2077_v62, %v689_v34 }
 0x124   :  { %v694_v38 = vpop.f32.mrb[8].mxu0  ;;  %v2060_v39 = vpop.f32.mrb[8].mxu1 }
 0x125   :  { %v696_v40 = vpop.f32.mrb[9].mxu0  ;;  %v832_v41 = vpop.f32.mrb[9].mxu1  ;;  %v695_v24 = vadd.f32 %v2077_v62, %v694_v38 }
 0x126   :  { %v697_v42 = vpop.f32.mrb[10].mxu0  ;;  %v2062_v43 = vpop.f32.mrb[10].mxu1 }
 0x127   :  { %v699_v44 = vpop.f32.mrb[11].mxu0  ;;  %v835_v45 = vpop.f32.mrb[11].mxu1  ;;  %v698_v34 = vadd.f32 %v2077_v62, %v697_v42 }
 0x12c   :  { %v702_v46 = vpop.f32.mrb[12].mxu0  ;;  %v2064_v47 = vpop.f32.mrb[12].mxu1 }
 0x12d   :  { %v704_v48 = vpop.f32.mrb[13].mxu0  ;;  %v840_v49 = vpop.f32.mrb[13].mxu1  ;;  %v703_v21 = vadd.f32 %v2077_v62, %v702_v46 }
 0x12e   :  { %v705_v50 = vpop.f32.mrb[14].mxu0  ;;  %v2066_v51 = vpop.f32.mrb[14].mxu1 }
 0x12f   :  { %v707_v52 = vpop.f32.mrb[15].mxu0  ;;  %v843_v53 = vpop.f32.mrb[15].mxu1  ;;  %v706_v29 = vadd.f32 %v2077_v62, %v705_v50 }
 0x134   :  { %v2068_v54 = vpop.f32.mrb[16].mxu0  ;;  %v2070_v55 = vpop.f32.mrb[16].mxu1 }
 0x135   :  { %v712_v56 = vpop.f32.mrb[17].mxu0  ;;  %v848_v57 = vpop.f32.mrb[17].mxu1 }
 0x136   :  { %v2072_v58 = vpop.f32.mrb[18].mxu0  ;;  %v849_v59 = vpop.f32.mrb[18].mxu1  ;;  %v711_v57 = vadd.f32 %v2077_v62, %v2068_v54 }
 0x137   :  { %v715_v60 = vpop.f32.mrb[19].mxu0  ;;  %v850_v61 = vpop.f32.mrb[19].mxu1  ;;  %v714_v54 = vadd.f32 %v2077_v62, %v2072_v58 }
 0x13c   :  { %v718_v1 = vpop.f32.mrb[20].mxu0  ;;  %v1548_v2 = vpop.f32.mrb[20].mxu1 }
 0x13d   :  { %v895_v4 = vadd.f32 %v1548_v2, %v687_v63  ;;  %v720_v5 = vpop.f32.mrb[21].mxu0  ;;  %v886_v6 = vpop.f32.mrb[21].mxu1  ;;  %v719_v42 = vadd.f32 %v2077_v62, %v718_v1 }
 0x13e   :  { %v887_v8 = vadd.f32 %v886_v6, %v679_v0  ;;  %v721_v9 = vpop.f32.mrb[22].mxu0  ;;  %v1549_v10 = vpop.f32.mrb[22].mxu1 }
 0x13f   :  { %v1062_v11 = vmax.f32 %v895_v4, 0.0  ;;  %v898_v12 = vadd.f32 %v1549_v10, %v690_v3  ;;  %v723_v13 = vpop.f32.mrb[23].mxu0  ;;  %v889_v14 = vpop.f32.mrb[23].mxu1  ;;  %v722_v63 = vadd.f32 %v2077_v62, %v721_v9 }
 0x140   :  { %v1060_v15 = vmax.f32 %v887_v8, 0.0  ;;  %v890_v16 = vadd.f32 %v889_v14, %v682_v7 }
 0x141   :  { %v1477_v17 = vpack.c.bf16 %v1062_v11, %v1062_v11  ;;  %v1063_v18 = vmax.f32 %v898_v12, 0.0 }
 0x142   :  { %v1475_v19 = vpack.c.bf16 %v1060_v15, %v1060_v15  ;;  %v1061_v20 = vmax.f32 %v890_v16, 0.0 }
 0x143   :  { %1279 = vst.msk [vmem:[%s2319_s3 + $0x8] sm:$0xf] %vm1276_vm1, %v1477_v17  ;;  %v1478_v22 = vpack.c.bf16 %v1063_v18, %v1063_v18 }
 0x144   :  { %1277 = vst.msk [vmem:[%s2319_s3] sm:$0xf] %vm1276_vm1, %v1475_v19  ;;  %v1476_v25 = vpack.c.bf16 %v1061_v20, %v1061_v20  ;;  %v726_v26 = vpop.f32.mrb[24].mxu0  ;;  %v1552_v28 = vpop.f32.mrb[24].mxu1 }
 0x145   :  { %1280 = vst.msk [vmem:[%s2319_s3 + $0xc] sm:$0xf] %vm1276_vm1, %v1478_v22  ;;  %v911_v30 = vadd.f32 %v1552_v28, %v703_v21  ;;  %v728_v32 = vpop.f32.mrb[25].mxu0  ;;  %v902_v33 = vpop.f32.mrb[25].mxu1  ;;  %v727_v17 = vadd.f32 %v2077_v62, %v726_v26 }
 0x146   :  { %1278 = vst.msk [vmem:[%s2319_s3 + $0x4] sm:$0xf] %vm1276_vm1, %v1476_v25  ;;  %v903_v36 = vadd.f32 %v902_v33, %v695_v24  ;;  %v729_v37 = vpop.f32.mrb[26].mxu0  ;;  %v1553_v38 = vpop.f32.mrb[26].mxu1 }
 0x147   :  { %v1066_v40 = vmax.f32 %v911_v30, 0.0  ;;  %v914_v41 = vadd.f32 %v1553_v38, %v706_v29  ;;  %v731_v44 = vpop.f32.mrb[27].mxu0  ;;  %v905_v45 = vpop.f32.mrb[27].mxu1  ;;  %v730_v26 = vadd.f32 %v2077_v62, %v729_v37 }
 0x148   :  { %v1064_v46 = vmax.f32 %v903_v36, 0.0  ;;  %v906_v48 = vadd.f32 %v905_v45, %v698_v34 }
 0x149   :  { %v1481_v49 = vpack.c.bf16 %v1066_v40, %v1066_v40  ;;  %v1067_v50 = vmax.f32 %v914_v41, 0.0 }
 0x14a   :  { %v1479_v52 = vpack.c.bf16 %v1064_v46, %v1064_v46  ;;  %v1065_v53 = vmax.f32 %v906_v48, 0.0 }
 0x14b   :  { %1283 = vst.msk [vmem:[%s2319_s3 + $0x18] sm:$0xf] %vm1276_vm1, %v1481_v49  ;;  %v1482_v56 = vpack.c.bf16 %v1067_v50, %v1067_v50 }
 0x14c   :  { %1281 = vst.msk [vmem:[%s2319_s3 + $0x10] sm:$0xf] %vm1276_vm1, %v1479_v52  ;;  %v1480_v59 = vpack.c.bf16 %v1065_v53, %v1065_v53  ;;  %v734_v60 = vpop.f32.mrb[28].mxu0  ;;  %v1556_v61 = vpop.f32.mrb[28].mxu1 }
 0x14d   :  { %1284 = vst.msk [vmem:[%s2319_s3 + $0x1c] sm:$0xf] %vm1276_vm1, %v1482_v56  ;;  %v927_v0 = vadd.f32 %v1556_v61, %v719_v42  ;;  %v736_v1 = vpop.f32.mrb[29].mxu0  ;;  %v918_v2 = vpop.f32.mrb[29].mxu1  ;;  %v735_v58 = vadd.f32 %v2077_v62, %v734_v60 }
 0x14e   :  { %1282 = vst.msk [vmem:[%s2319_s3 + $0x14] sm:$0xf] %vm1276_vm1, %v1480_v59  ;;  %v919_v3 = vadd.f32 %v918_v2, %v711_v57  ;;  %v737_v4 = vpop.f32.mrb[30].mxu0  ;;  %v1557_v5 = vpop.f32.mrb[30].mxu1 }
 0x14f   :  { %v1070_v6 = vmax.f32 %v927_v0, 0.0  ;;  %v930_v7 = vadd.f32 %v1557_v5, %v722_v63  ;;  %v739_v8 = vpop.f32.mrb[31].mxu0  ;;  %v921_v9 = vpop.f32.mrb[31].mxu1  ;;  %v738_v21 = vadd.f32 %v2077_v62, %v737_v4 }
 0x150   :  { %v1068_v10 = vmax.f32 %v919_v3, 0.0  ;;  %v922_v11 = vadd.f32 %v921_v9, %v714_v54 }
 0x151   :  { %v1485_v12 = vpack.c.bf16 %v1070_v6, %v1070_v6  ;;  %v1071_v13 = vmax.f32 %v930_v7, 0.0 }
 0x152   :  { %v1483_v14 = vpack.c.bf16 %v1068_v10, %v1068_v10  ;;  %v1069_v15 = vmax.f32 %v922_v11, 0.0 }
 0x153   :  { %1287 = vst.msk [vmem:[%s2319_s3 + $0x28] sm:$0xf] %vm1276_vm1, %v1485_v12  ;;  %v1486_v16 = vpack.c.bf16 %v1071_v13, %v1071_v13 }
 0x154   :  { %1285 = vst.msk [vmem:[%s2319_s3 + $0x20] sm:$0xf] %vm1276_vm1, %v1483_v14  ;;  %v1484_v18 = vpack.c.bf16 %v1069_v15, %v1069_v15  ;;  %v742_v19 = vpop.f32.mrb[32].mxu0  ;;  %v1560_v20 = vpop.f32.mrb[32].mxu1 }
 0x155   :  { %1288 = vst.msk [vmem:[%s2319_s3 + $0x2c] sm:$0xf] %vm1276_vm1, %v1486_v16  ;;  %v943_v22 = vadd.f32 %v1560_v20, %v735_v58  ;;  %v744_v24 = vpop.f32.mrb[33].mxu0  ;;  %v934_v25 = vpop.f32.mrb[33].mxu1  ;;  %v743_v48 = vadd.f32 %v2077_v62, %v742_v19 }
 0x156   :  { %1286 = vst.msk [vmem:[%s2319_s3 + $0x24] sm:$0xf] %vm1276_vm1, %v1484_v18  ;;  %v935_v28 = vadd.f32 %v934_v25, %v727_v17  ;;  %v745_v29 = vpop.f32.mrb[34].mxu0  ;;  %v1561_v30 = vpop.f32.mrb[34].mxu1 }
 0x157   :  { %v1074_v32 = vmax.f32 %v943_v22, 0.0  ;;  %v946_v33 = vadd.f32 %v1561_v30, %v738_v21  ;;  %v747_v34 = vpop.f32.mrb[35].mxu0  ;;  %v937_v36 = vpop.f32.mrb[35].mxu1  ;;  %v746_v57 = vadd.f32 %v2077_v62, %v745_v29 }
 0x158   :  { %v1072_v38 = vmax.f32 %v935_v28, 0.0  ;;  %v938_v40 = vadd.f32 %v937_v36, %v730_v26 }
 0x159   :  { %v1489_v41 = vpack.c.bf16 %v1074_v32, %v1074_v32  ;;  %v1075_v44 = vmax.f32 %v946_v33, 0.0 }
 0x15a   :  { %v1487_v45 = vpack.c.bf16 %v1072_v38, %v1072_v38  ;;  %v1073_v46 = vmax.f32 %v938_v40, 0.0 }
 0x15b   :  { %1291 = vst.msk [vmem:[%s2319_s3 + $0x38] sm:$0xf] %vm1276_vm1, %v1489_v41  ;;  %v1490_v37 = vpack.c.bf16 %v1075_v44, %v1075_v44 }
 0x15c   :  { %1289 = vst.msk [vmem:[%s2319_s3 + $0x30] sm:$0xf] %vm1276_vm1, %v1487_v45  ;;  %v1488_v49 = vpack.c.bf16 %v1073_v46, %v1073_v46  ;;  %v750_v50 = vpop.f32.mrb[36].mxu0  ;;  %v1564_v52 = vpop.f32.mrb[36].mxu1 }
 0x15d   :  { %1292 = vst.msk [vmem:[%s2319_s3 + $0x3c] sm:$0xf] %vm1276_vm1, %v1490_v37  ;;  %v751_v53 = vadd.f32 %v2077_v62, %v750_v50  ;;  %v752_v42 = vpop.f32.mrb[37].mxu0  ;;  %v950_v56 = vpop.f32.mrb[37].mxu1 }
 0x15e   :  { %1290 = vst.msk [vmem:[%s2319_s3 + $0x34] sm:$0xf] %vm1276_vm1, %v1488_v49  ;;  %v951_v59 = vadd.f32 %v950_v56, %v743_v48  ;;  %v753_v60 = vpop.f32.mrb[38].mxu0  ;;  %v1565_v61 = vpop.f32.mrb[38].mxu1 }
 0x15f   :  { %v959_v63 = vadd.f32 %v1564_v52, %v751_v53  ;;  %v754_v0 = vadd.f32 %v2077_v62, %v753_v60  ;;  %v755_v1 = vpop.f32.mrb[39].mxu0  ;;  %v953_v2 = vpop.f32.mrb[39].mxu1 }
 0x160   :  { %v1076_v54 = vmax.f32 %v951_v59, 0.0  ;;  %v954_v3 = vadd.f32 %v953_v2, %v746_v57 }
 0x161   :  { %v1078_v4 = vmax.f32 %v959_v63, 0.0  ;;  %v962_v5 = vadd.f32 %v1565_v61, %v754_v0 }
 0x162   :  { %v1491_v6 = vpack.c.bf16 %v1076_v54, %v1076_v54  ;;  %v1077_v7 = vmax.f32 %v954_v3, 0.0  ;;  %v815_v3 = vadd.f32 %v2077_v62, %v2052_v23 }
 0x163   :  { %v1493_v8 = vpack.c.bf16 %v1078_v4, %v1078_v4  ;;  %v1079_v9 = vmax.f32 %v962_v5, 0.0 }
 0x164   :  { %1293 = vst.msk [vmem:[%s2319_s3 + $0x40] sm:$0xf] %vm1276_vm1, %v1491_v6  ;;  %v1492_v10 = vpack.c.bf16 %v1077_v7, %v1077_v7  ;;  %v758_v11 = vpop.f32.mrb[40].mxu0  ;;  %v1568_v12 = vpop.f32.mrb[40].mxu1 }
 0x165   :  { %1295 = vst.msk [vmem:[%s2319_s3 + $0x48] sm:$0xf] %vm1276_vm1, %v1493_v8  ;;  %v1494_v13 = vpack.c.bf16 %v1079_v9, %v1079_v9  ;;  %v759_v14 = vadd.f32 %v2077_v62, %v758_v11  ;;  %v760_v15 = vpop.f32.mrb[41].mxu0  ;;  %v966_v58 = vpop.f32.mrb[41].mxu1  ;;  %v818_v8 = vadd.f32 %v2077_v62, %v2054_v27 }
 0x166   :  { %1294 = vst.msk [vmem:[%s2319_s3 + $0x44] sm:$0xf] %vm1276_vm1, %v1492_v10  ;;  %v761_v16 = vpop.f32.mrb[42].mxu0  ;;  %v1569_v17 = vpop.f32.mrb[42].mxu1 }
 0x167   :  { %1296 = vst.msk [vmem:[%s2319_s3 + $0x4c] sm:$0xf] %vm1276_vm1, %v1494_v13  ;;  %v762_v18 = vadd.f32 %v2077_v62, %v761_v16  ;;  %v967_v19 = vadd.f32 %v966_v58, %v759_v14  ;;  %v763_v20 = vpop.f32.mrb[43].mxu0  ;;  %v969_v21 = vpop.f32.mrb[43].mxu1 }
 0x169   :  { %v1080_v22 = vmax.f32 %v967_v19, 0.0  ;;  %v970_v24 = vadd.f32 %v969_v21, %v762_v18 }
 0x16b   :  { %v1495_v25 = vpack.c.bf16 %v1080_v22, %v1080_v22  ;;  %v1081_v26 = vmax.f32 %v970_v24, 0.0  ;;  %v831_v24 = vadd.f32 %v2077_v62, %v2060_v39 }
 0x16c   :  { %v766_v28 = vpop.f32.mrb[44].mxu0  ;;  %v1572_v29 = vpop.f32.mrb[44].mxu1 }
 0x16d   :  { %1297 = vst.msk [vmem:[%s2319_s3 + $0x50] sm:$0xf] %vm1276_vm1, %v1495_v25  ;;  %v1496_v30 = vpack.c.bf16 %v1081_v26, %v1081_v26  ;;  %v767_v32 = vadd.f32 %v2077_v62, %v766_v28  ;;  %v768_v33 = vpop.f32.mrb[45].mxu0  ;;  %v982_v34 = vpop.f32.mrb[45].mxu1 }
 0x16e   :  { %v769_v36 = vpop.f32.mrb[46].mxu0  ;;  %v1573_v38 = vpop.f32.mrb[46].mxu1  ;;  %v834_v33 = vadd.f32 %v2077_v62, %v2062_v43 }
 0x16f   :  { %1298 = vst.msk [vmem:[%s2319_s3 + $0x54] sm:$0xf] %vm1276_vm1, %v1496_v30  ;;  %v975_v40 = vadd.f32 %v1568_v12, %v767_v32  ;;  %v770_v41 = vadd.f32 %v2077_v62, %v769_v36  ;;  %v771_v44 = vpop.f32.mrb[47].mxu0  ;;  %v985_v45 = vpop.f32.mrb[47].mxu1 }
 0x171   :  { %v1082_v46 = vmax.f32 %v975_v40, 0.0  ;;  %v978_v37 = vadd.f32 %v1569_v17, %v770_v41  ;;  %v826_v40 = vadd.f32 %v2077_v62, %v2058_v35 }
 0x173   :  { %v1497_v48 = vpack.c.bf16 %v1082_v46, %v1082_v46  ;;  %v1083_v49 = vmax.f32 %v978_v37, 0.0 }
 0x174   :  { %v774_v50 = vpop.f32.mrb[48].mxu0  ;;  %v2193_v52 = vpop.f32.mrb[48].mxu1 }
 0x175   :  { %1299 = vst.msk [vmem:[%s2319_s3 + $0x58] sm:$0xf] %vm1276_vm1, %v1497_v48  ;;  %v1498_v53 = vpack.c.bf16 %v1083_v49, %v1083_v49  ;;  %v775_v42 = vadd.f32 %v2077_v62, %v774_v50  ;;  %v776_v56 = vpop.f32.mrb[49].mxu0  ;;  %v998_v57 = vpop.f32.mrb[49].mxu1 }
 0x176   :  { %v777_v59 = vpop.f32.mrb[50].mxu0  ;;  %v2200_v60 = vpop.f32.mrb[50].mxu1 }
 0x177   :  { %1300 = vst.msk [vmem:[%s2319_s3 + $0x5c] sm:$0xf] %vm1276_vm1, %v1498_v53  ;;  %v983_v61 = vadd.f32 %v982_v34, %v775_v42  ;;  %v778_v63 = vadd.f32 %v2077_v62, %v777_v59  ;;  %v779_v0 = vpop.f32.mrb[51].mxu0  ;;  %v1001_v1 = vpop.f32.mrb[51].mxu1 }
 0x179   :  { %v1084_v2 = vmax.f32 %v983_v61, 0.0  ;;  %v986_v54 = vadd.f32 %v985_v45, %v778_v63 }
 0x17b   :  { %v1499_v4 = vpack.c.bf16 %v1084_v2, %v1084_v2  ;;  %v1085_v5 = vmax.f32 %v986_v54, 0.0  ;;  %v847_v2 = vadd.f32 %v2077_v62, %v2070_v55 }
 0x17c   :  { %v782_v6 = vpop.f32.mrb[52].mxu0  ;;  %v1580_v7 = vpop.f32.mrb[52].mxu1 }
 0x17d   :  { %1301 = vst.msk [vmem:[%s2319_s3 + $0x60] sm:$0xf] %vm1276_vm1, %v1499_v4  ;;  %v1500_v9 = vpack.c.bf16 %v1085_v5, %v1085_v5  ;;  %v783_v10 = vadd.f32 %v2077_v62, %v782_v6  ;;  %v1023_v11 = vadd.f32 %v1580_v7, %v815_v3  ;;  %v784_v12 = vpop.f32.mrb[53].mxu0  ;;  %v2216_v13 = vpop.f32.mrb[53].mxu1  ;;  %v839_v4 = vadd.f32 %v2077_v62, %v2064_v47 }
 0x17e   :  { %v785_v23 = vpop.f32.mrb[54].mxu0  ;;  %v1581_v14 = vpop.f32.mrb[54].mxu1 }
 0x17f   :  { %1302 = vst.msk [vmem:[%s2319_s3 + $0x64] sm:$0xf] %vm1276_vm1, %v1500_v9  ;;  %v991_v27 = vadd.f32 %v1572_v29, %v783_v10  ;;  %v1094_v15 = vmax.f32 %v1023_v11, 0.0  ;;  %v786_v58 = vadd.f32 %v2077_v62, %v785_v23  ;;  %v1026_v16 = vadd.f32 %v1581_v14, %v818_v8  ;;  %v787_v17 = vpop.f32.mrb[55].mxu0  ;;  %v2223_v18 = vpop.f32.mrb[55].mxu1 }
 0x180   :  { %v823_v29 = vadd.f32 %v2077_v62, %v2056_v31  ;;  %v842_v10 = vadd.f32 %v2077_v62, %v2066_v51 }
 0x181   :  { %v1086_v19 = vmax.f32 %v991_v27, 0.0  ;;  %v1509_v20 = vpack.c.bf16 %v1094_v15, %v1094_v15  ;;  %v994_v21 = vadd.f32 %v1573_v38, %v786_v58  ;;  %v1095_v22 = vmax.f32 %v1026_v16, 0.0 }
 0x183   :  { %v1501_v25 = vpack.c.bf16 %v1086_v19, %v1086_v19  ;;  %1311 = vst.msk [vmem:[%s2319_s3 + $0x88] sm:$0xf] %vm1276_vm1, %v1509_v20  ;;  %v1087_v26 = vmax.f32 %v994_v21, 0.0  ;;  %v1510_v28 = vpack.c.bf16 %v1095_v22, %v1095_v22 }
 0x184   :  { %v790_v30 = vpop.f32.mrb[56].mxu0  ;;  %v1584_v32 = vpop.f32.mrb[56].mxu1 }
 0x185   :  { %1303 = vst.msk [vmem:[%s2319_s3 + $0x68] sm:$0xf] %vm1276_vm1, %v1501_v25  ;;  %v1502_v39 = vpack.c.bf16 %v1087_v26, %v1087_v26  ;;  %1312 = vst.msk [vmem:[%s2319_s3 + $0x8c] sm:$0xf] %vm1276_vm1, %v1510_v28  ;;  %v791_v34 = vadd.f32 %v2077_v62, %v790_v30  ;;  %v1039_v36 = vadd.f32 %v1584_v32, %v831_v24  ;;  %v792_v31 = vpop.f32.mrb[57].mxu0  ;;  %v1030_v38 = vpop.f32.mrb[57].mxu1 }
 0x186   :  { %v1031_v43 = vadd.f32 %v1030_v38, %v823_v29  ;;  %v793_v41 = vpop.f32.mrb[58].mxu0  ;;  %v1585_v44 = vpop.f32.mrb[58].mxu1 }
 0x187   :  { %1304 = vst.msk [vmem:[%s2319_s3 + $0x6c] sm:$0xf] %vm1276_vm1, %v1502_v39  ;;  %v999_v45 = vadd.f32 %v998_v57, %v791_v34  ;;  %v1098_v46 = vmax.f32 %v1039_v36, 0.0  ;;  %v794_v37 = vadd.f32 %v2077_v62, %v793_v41  ;;  %v1042_v48 = vadd.f32 %v1585_v44, %v834_v33  ;;  %v795_v49 = vpop.f32.mrb[59].mxu0  ;;  %v1033_v50 = vpop.f32.mrb[59].mxu1 }
 0x188   :  { %v1096_v53 = vmax.f32 %v1031_v43, 0.0  ;;  %v1034_v42 = vadd.f32 %v1033_v50, %v826_v40 }
 0x189   :  { %v1088_v56 = vmax.f32 %v999_v45, 0.0  ;;  %v1513_v59 = vpack.c.bf16 %v1098_v46, %v1098_v46  ;;  %v1002_v35 = vadd.f32 %v1001_v1, %v794_v37  ;;  %v1099_v61 = vmax.f32 %v1042_v48, 0.0 }
 0x18a   :  { %v1511_v63 = vpack.c.bf16 %v1096_v53, %v1096_v53  ;;  %v1097_v0 = vmax.f32 %v1034_v42, 0.0 }
 0x18b   :  { %v1503_v54 = vpack.c.bf16 %v1088_v56, %v1088_v56  ;;  %1315 = vst.msk [vmem:[%s2319_s3 + $0x98] sm:$0xf] %vm1276_vm1, %v1513_v59  ;;  %v1089_v57 = vmax.f32 %v1002_v35, 0.0  ;;  %v1514_v3 = vpack.c.bf16 %v1099_v61, %v1099_v61 }
 0x18c   :  { %1313 = vst.msk [vmem:[%s2319_s3 + $0x90] sm:$0xf] %vm1276_vm1, %v1511_v63  ;;  %v1512_v1 = vpack.c.bf16 %v1097_v0, %v1097_v0  ;;  %v798_v5 = vpop.f32.mrb[60].mxu0  ;;  %v1588_v6 = vpop.f32.mrb[60].mxu1 }
 0x18d   :  { %1305 = vst.msk [vmem:[%s2319_s3 + $0x70] sm:$0xf] %vm1276_vm1, %v1503_v54  ;;  %v1504_v55 = vpack.c.bf16 %v1089_v57, %v1089_v57  ;;  %1316 = vst.msk [vmem:[%s2319_s3 + $0x9c] sm:$0xf] %vm1276_vm1, %v1514_v3  ;;  %v799_v47 = vadd.f32 %v2077_v62, %v798_v5  ;;  %v1055_v7 = vadd.f32 %v1588_v6, %v847_v2  ;;  %v800_v8 = vpop.f32.mrb[61].mxu0  ;;  %v1046_v9 = vpop.f32.mrb[61].mxu1 }
 0x18e   :  { %1314 = vst.msk [vmem:[%s2319_s3 + $0x94] sm:$0xf] %vm1276_vm1, %v1512_v1  ;;  %v1047_v11 = vadd.f32 %v1046_v9, %v839_v4  ;;  %v801_v12 = vpop.f32.mrb[62].mxu0  ;;  %v1589_v23 = vpop.f32.mrb[62].mxu1 }
 0x18f   :  { %1306 = vst.msk [vmem:[%s2319_s3 + $0x74] sm:$0xf] %vm1276_vm1, %v1504_v55  ;;  %v1007_v14 = vadd.f32 %v2193_v52, %v799_v47  ;;  %v1102_v27 = vmax.f32 %v1055_v7, 0.0  ;;  %v802_v15 = vadd.f32 %v2077_v62, %v801_v12  ;;  %v803_v58 = vpop.f32.mrb[63].mxu0  ;;  %v1049_v51 = vpop.f32.mrb[63].mxu1 }
 0x190   :  { %v1100_v16 = vmax.f32 %v1047_v11, 0.0  ;;  %v1050_v17 = vadd.f32 %v1049_v51, %v842_v10 }
 0x191   :  { %v1090_v19 = vmax.f32 %v1007_v14, 0.0  ;;  %v1517_v20 = vpack.c.bf16 %v1102_v27, %v1102_v27  ;;  %v1010_v21 = vadd.f32 %v2200_v60, %v802_v15 }
 0x192   :  { %v1515_v22 = vpack.c.bf16 %v1100_v16, %v1100_v16  ;;  %v1101_v24 = vmax.f32 %v1050_v17, 0.0 }
 0x193   :  { %v1505_v25 = vpack.c.bf16 %v1090_v19, %v1090_v19  ;;  %1320 = vst.msk [vmem:[%s2319_s3 + $0xa8] sm:$0x1] %vm1319_vm2, %v1517_v20  ;;  %v1091_v52 = vmax.f32 %v1010_v21, 0.0 }
 0x194   :  { %1317 = vst.msk [vmem:[%s2319_s3 + $0xa0] sm:$0xf] %vm1276_vm1, %v1515_v22  ;;  %v1516_v26 = vpack.c.bf16 %v1101_v24, %v1101_v24  ;;  %v806_v28 = vpop.f32.mrb[64].mxu0 }
 0x195   :  { %1307 = vst.msk [vmem:[%s2319_s3 + $0x78] sm:$0xf] %vm1276_vm1, %v1505_v25  ;;  %v1506_v60 = vpack.c.bf16 %v1091_v52, %v1091_v52  ;;  %v807_v29 = vadd.f32 %v2077_v62, %v806_v28  ;;  %v808_v30 = vpop.f32.mrb[65].mxu0 }
 0x196   :  { %1318 = vst.msk [vmem:[%s2319_s3 + $0xa4] sm:$0xf] %vm1276_vm1, %v1516_v26  ;;  %v809_v32 = vpop.f32.mrb[66].mxu0 }
 0x197   :  { %1308 = vst.msk [vmem:[%s2319_s3 + $0x7c] sm:$0xf] %vm1276_vm1, %v1506_v60  ;;  %v1015_v33 = vadd.f32 %v2216_v13, %v807_v29  ;;  %v810_v39 = vadd.f32 %v2077_v62, %v809_v32  ;;  %v811_v34 = vpop.f32.mrb[67].mxu0 }
 0x199   :  { %v1092_v36 = vmax.f32 %v1015_v33, 0.0  ;;  %v1018_v31 = vadd.f32 %v2223_v18, %v810_v39 }
 0x19b   :  { %v1507_v38 = vpack.c.bf16 %v1092_v36, %v1092_v36  ;;  %v1093_v40 = vmax.f32 %v1018_v31, 0.0 }
 0x19d   :  { %1309 = vst.msk [vmem:[%s2319_s3 + $0x80] sm:$0xf] %vm1276_vm1, %v1507_v38  ;;  %v1508_v43 = vpack.c.bf16 %v1093_v40, %v1093_v40 }
 0x19f   :  { %1310 = vst.msk [vmem:[%s2319_s3 + $0x84] sm:$0xf] %vm1276_vm1, %v1508_v43 }

// kernel: inception_stem.13
= control target key start
LH: loop header
LB: loop body
LE: loop exit
PB: predicated region body
PF: predicated region fallthrough
CT: control target
= control target key end

     0   :  { %v1728_v0 = vmov 0   ;;  %vm577_vm0 = vcmask 261120   ;;  %vm1276_vm1 = vcmask 519168   ;;  %vm1319_vm2 = vcmask 516096   ;;  %s2316_s1 = inlined_call_operand.vmem [shape: bf16[288,64], index: 1, kind: input, shape index: {}]   ;;  %s2317_s0 = inlined_call_operand.vmem [shape: bf16[338,288], index: 0, kind: input, shape index: {}]   ;;  %s2318_s2 = inlined_call_operand.vmem [shape: f32[1,64], index: 2, kind: input, shape index: {}]   ;;  %s2319_s3 = inlined_call_operand.vmem [shape: bf16[338,64], index: 3, kind: output, shape index: {}]  }
   0x1   :  { %644 = vmatprep.subr.bf16.mxu0 %v1728_v0  ;;  %1590 = vmatprep.subr.bf16.mxu1 %v1728_v0  ;;  %v1623_v1 = vld [vmem:[%s2316_s1] sm:$0xff]   ;;  %v1624_v2 = vld [vmem:[%s2316_s1 + $0x8] sm:$0xff]   ;;  %v1625_v3 = vld [vmem:[%s2316_s1 + $0x10] sm:$0xff]  }
   0x2   :  { %645 = vmatpush1.bf16.msra.mxu0 %v1623_v1  ;;  %1606 = vmatpush1.bf16.msra.mxu1 %v1623_v1  ;;  %v1626_v4 = vld [vmem:[%s2316_s1 + $0x18] sm:$0xff]   ;;  %v1627_v5 = vld [vmem:[%s2316_s1 + $0x20] sm:$0xff]   ;;  %v1628_v7 = vld [vmem:[%s2316_s1 + $0x28] sm:$0xff]  }
   0x3   :  { %646 = vmatprep.subr.bf16.mxu0 %v1728_v0  ;;  %1591 = vmatprep.subr.bf16.mxu1 %v1728_v0  ;;  %v1641_v6 = vld [vmem:[%s2317_s0 + $0x4] ss:$12 sps:$4 sm:$0xff]   ;;  %v1644_v8 = vld [vmem:[%s2317_s0 + $0x19c] ss:$12 sps:$4 sm:$0xff]   ;;  %v1639_v20 = vld [vmem:[%s2317_s0] ss:$12 sps:$4 sm:$0xff]  }
   0x4   :  { %676 = vmatprep.mubr.bf16.mxu0 %v1641_v6  ;;  %812 = vmatprep.mubr.bf16.mxu1 %v1644_v8  ;;  %v1629_v9 = vld [vmem:[%s2316_s1 + $0x30] sm:$0xff]   ;;  %v1630_v10 = vld [vmem:[%s2316_s1 + $0x38] sm:$0xff]   ;;  %v1631_v11 = vld [vmem:[%s2316_s1 + $0x40] sm:$0xff]  }
   0x5   :  { %v1632_v12 = vld [vmem:[%s2316_s1 + $0x48] sm:$0xff]   ;;  %v1633_v13 = vld [vmem:[%s2316_s1 + $0x50] sm:$0xff]   ;;  %v1634_v14 = vld [vmem:[%s2316_s1 + $0x58] sm:$0xff]  }
   0x6   :  { %647 = vmatpush1.bf16.msra.mxu0 %v1624_v2  ;;  %1607 = vmatpush1.bf16.msra.mxu1 %v1624_v2  ;;  %v1635_v15 = vld [vmem:[%s2316_s1 + $0x60] sm:$0xff]   ;;  %v1636_v16 = vld [vmem:[%s2316_s1 + $0x68] sm:$0xff]   ;;  %v1637_v17 = vld [vmem:[%s2316_s1 + $0x70] sm:$0xff]  }
   0x7   :  { %648 = vmatprep.subr.bf16.mxu0 %v1728_v0  ;;  %1592 = vmatprep.subr.bf16.mxu1 %v1728_v0  ;;  %v1638_v18 = vld [vmem:[%s2316_s1 + $0x78] sm:$0xff]   ;;  %v1651_v19 = vld [vmem:[%s2316_s1 + $0x80] sm:$0xff]   ;;  %v1664_v24 = vld [vmem:[%s2316_s1 + $0x88] sm:$0xff]  }
   0x8   :  { %v1642_v21 = vld [vmem:[%s2317_s0 + $0x198] ss:$12 sps:$4 sm:$0xff]   ;;  %v1645_v22 = vld [vmem:[%s2317_s0 + $0x1c] ss:$12 sps:$4 sm:$0xff]   ;;  %v1647_v23 = vld [vmem:[%s2317_s0 + $0x1b4] ss:$12 sps:$4 sm:$0xff]  }
   0x9   :  { %v1649_v25 = vld [vmem:[%s2317_s0 + $0x18] ss:$12 sps:$4 sm:$0xff]   ;;  %v1650_v26 = vld [vmem:[%s2317_s0 + $0x1b0] ss:$12 sps:$4 sm:$0xff]   ;;  %v1652_v27 = vld [vmem:[%s2317_s0 + $0x34] ss:$12 sps:$4 sm:$0xff]  }
   0xa   :  { %649 = vmatpush1.bf16.msra.mxu0 %v1625_v3  ;;  %1608 = vmatpush1.bf16.msra.mxu1 %v1625_v3  ;;  %v1654_v28 = vld [vmem:[%s2317_s0 + $0x1cc] ss:$12 sps:$4 sm:$0xff]   ;;  %v1656_v29 = vld [vmem:[%s2317_s0 + $0x30] ss:$12 sps:$4 sm:$0xff]   ;;  %v1657_v30 = vld [vmem:[%s2317_s0 + $0x1c8] ss:$12 sps:$4 sm:$0xff]  }
   0xb   :  { %650 = vmatprep.subr.bf16.mxu0 %v1728_v0  ;;  %1593 = vmatprep.subr.bf16.mxu1 %v1728_v0  ;;  %v1658_v31 = vld [vmem:[%s2317_s0 + $0x4c] ss:$12 sps:$4 sm:$0xff]   ;;  %v1660_v32 = vld [vmem:[%s2317_s0 + $0x1e4] ss:$12 sps:$4 sm:$0xff]   ;;  %v1662_v34 = vld [vmem:[%s2317_s0 + $0x48] ss:$12 sps:$4 sm:$0xff]  }
   0xc   :  { %v99_v33 = vld [vmem:[%s2317_s0 + $0x1f8] sm:$0x11]  ;;  %v1663_v35 = vld [vmem:[%s2317_s0 + $0x1e0] ss:$12 sps:$4 sm:$0xff]   ;;  %v1665_v36 = vld [vmem:[%s2317_s0 + $0x64] ss:$12 sps:$4 sm:$0xff]  }
   0xd   :  { %v1390_v37 = vcombine.high %v99_v33, %v99_v33  ;;  %v1668_v38 = vld [vmem:[%s2317_s0 + $0x60] ss:$12 sps:$4 sm:$0xff]   ;;  %v1389_v39 = vcombine.low %v99_v33, %v99_v33  ;;  %v1670_v40 = vld [vmem:[%s2317_s0 + $0x7c] ss:$12 sps:$4 sm:$0xff]   ;;  %v1673_v42 = vld [vmem:[%s2317_s0 + $0x78] ss:$12 sps:$4 sm:$0xff]  }
   0xe   :  { %651 = vmatpush1.bf16.msra.mxu0 %v1626_v4  ;;  %1609 = vmatpush1.bf16.msra.mxu1 %v1626_v4  ;;  %v1672_v41 = vld [vmem:[%s2317_s0 + $0x8] ss:$12 sps:$4 sm:$0xff]   ;;  %v1674_v43 = vld [vmem:[%s2317_s0 + $0x20] ss:$12 sps:$4 sm:$0xff]   ;;  %v1677_v45 = vld [vmem:[%s2317_s0 + $0x38] ss:$12 sps:$4 sm:$0xff]  }
   0xf   :  { %652 = vmatprep.subr.bf16.mxu0 %v1728_v0  ;;  %1594 = vmatprep.subr.bf16.mxu1 %v1728_v0  ;;  %v1675_v44 = vld [vmem:[%s2317_s0 + $0x94] ss:$12 sps:$4 sm:$0xff]   ;;  %v1678_v46 = vld [vmem:[%s2317_s0 + $0x90] ss:$12 sps:$4 sm:$0xff]   ;;  %v1680_v48 = vld [vmem:[%s2317_s0 + $0xac] ss:$12 sps:$4 sm:$0xff]  }
  0x10   :  { %v1679_v47 = vld [vmem:[%s2317_s0 + $0x50] ss:$12 sps:$4 sm:$0xff]   ;;  %v1682_v49 = vld [vmem:[%s2317_s0 + $0x68] ss:$12 sps:$4 sm:$0xff]   ;;  %v1684_v51 = vld [vmem:[%s2317_s0 + $0x80] ss:$12 sps:$4 sm:$0xff]  }
  0x11   :  { %v1683_v50 = vld [vmem:[%s2317_s0 + $0xa8] ss:$12 sps:$4 sm:$0xff]   ;;  %v1685_v52 = vld [vmem:[%s2317_s0 + $0xc4] ss:$12 sps:$4 sm:$0xff]   ;;  %v1688_v54 = vld [vmem:[%s2317_s0 + $0xc0] ss:$12 sps:$4 sm:$0xff]  }
  0x12   :  { %653 = vmatpush1.bf16.msra.mxu0 %v1627_v5  ;;  %1610 = vmatpush1.bf16.msra.mxu1 %v1627_v5  ;;  %v1687_v53 = vld [vmem:[%s2317_s0 + $0x98] ss:$12 sps:$4 sm:$0xff]   ;;  %v1689_v55 = vld [vmem:[%s2317_s0 + $0xb0] ss:$12 sps:$4 sm:$0xff]   ;;  %v1692_v57 = vld [vmem:[%s2317_s0 + $0xc8] ss:$12 sps:$4 sm:$0xff]  }
  0x13   :  { %654 = vmatprep.subr.bf16.mxu0 %v1728_v0  ;;  %1595 = vmatprep.subr.bf16.mxu1 %v1728_v0  ;;  %v1690_v56 = vld [vmem:[%s2317_s0 + $0xdc] ss:$12 sps:$4 sm:$0xff]   ;;  %v1693_v58 = vld [vmem:[%s2317_s0 + $0xd8] ss:$12 sps:$4 sm:$0xff]   ;;  %v1694_v59 = vld [vmem:[%s2317_s0 + $0xe0] ss:$12 sps:$4 sm:$0xff]  }
  0x14   :  { %v1695_v60 = vld [vmem:[%s2317_s0 + $0xf4] ss:$12 sps:$4 sm:$0xff]   ;;  %v1697_v61 = vld [vmem:[%s2317_s0 + $0xf8] ss:$12 sps:$4 sm:$0xff]   ;;  %v1698_v62 = vld [vmem:[%s2317_s0 + $0xf0] ss:$12 sps:$4 sm:$0xff]  }
  0x15   :  { %v1699_v63 = vld [vmem:[%s2317_s0 + $0x110] ss:$12 sps:$4 sm:$0xff]   ;;  %v1702_v1 = vld [vmem:[%s2317_s0 + $0x128] ss:$12 sps:$4 sm:$0xff]   ;;  %v1704_v3 = vld [vmem:[%s2317_s0 + $0x140] ss:$12 sps:$4 sm:$0xff]  }
  0x16   :  { %655 = vmatpush1.bf16.msra.mxu0 %v1628_v7  ;;  %1611 = vmatpush1.bf16.msra.mxu1 %v1628_v7  ;;  %v1703_v2 = vld [vmem:[%s2317_s0 + $0x108] ss:$12 sps:$4 sm:$0xff]   ;;  %v1705_v4 = vld [vmem:[%s2317_s0 + $0x124] ss:$12 sps:$4 sm:$0xff]   ;;  %v1708_v6 = vld [vmem:[%s2317_s0 + $0x120] ss:$12 sps:$4 sm:$0xff]  }
  0x17   :  { %656 = vmatprep.subr.bf16.mxu0 %v1728_v0  ;;  %1596 = vmatprep.subr.bf16.mxu1 %v1728_v0  ;;  %v1707_v5 = vld [vmem:[%s2317_s0 + $0x158] ss:$12 sps:$4 sm:$0xff]   ;;  %v1709_v7 = vld [vmem:[%s2317_s0 + $0x170] ss:$12 sps:$4 sm:$0xff]  }
  0x18   :  { %v1710_v8 = vld [vmem:[%s2317_s0 + $0x13c] ss:$12 sps:$4 sm:$0xff]  }
  0x1a   :  { %657 = vmatpush1.bf16.msra.mxu0 %v1629_v9  ;;  %1612 = vmatpush1.bf16.msra.mxu1 %v1629_v9  ;;  %v1712_v9 = vld [vmem:[%s2317_s0 + $0x188] ss:$12 sps:$4 sm:$0xff]  }
  0x1b   :  { %658 = vmatprep.subr.bf16.mxu0 %v1728_v0  ;;  %1597 = vmatprep.subr.bf16.mxu1 %v1728_v0 }
  0x1e   :  { %659 = vmatpush1.bf16.msra.mxu0 %v1630_v10  ;;  %1613 = vmatpush1.bf16.msra.mxu1 %v1630_v10  ;;  %v1713_v10 = vld [vmem:[%s2317_s0 + $0x138] ss:$12 sps:$4 sm:$0xff]  }
  0x1f   :  { %660 = vmatprep.subr.bf16.mxu0 %v1728_v0  ;;  %1598 = vmatprep.subr.bf16.mxu1 %v1728_v0 }
  0x22   :  { %661 = vmatpush1.bf16.msra.mxu0 %v1631_v11  ;;  %1614 = vmatpush1.bf16.msra.mxu1 %v1631_v11  ;;  %v1714_v11 = vld [vmem:[%s2317_s0 + $0x1a0] ss:$12 sps:$4 sm:$0xff]  }
  0x23   :  { %662 = vmatprep.subr.bf16.mxu0 %v1728_v0  ;;  %1599 = vmatprep.subr.bf16.mxu1 %v1728_v0 }
  0x26   :  { %663 = vmatpush1.bf16.msra.mxu0 %v1632_v12  ;;  %1615 = vmatpush1.bf16.msra.mxu1 %v1632_v12  ;;  %v1715_v12 = vld [vmem:[%s2317_s0 + $0x154] ss:$12 sps:$4 sm:$0xff]  }
  0x27   :  { %664 = vmatprep.subr.bf16.mxu0 %v1728_v0  ;;  %1600 = vmatprep.subr.bf16.mxu1 %v1728_v0 }
  0x2a   :  { %665 = vmatpush1.bf16.msra.mxu0 %v1633_v13  ;;  %1616 = vmatpush1.bf16.msra.mxu1 %v1633_v13  ;;  %v1717_v13 = vld [vmem:[%s2317_s0 + $0x1b8] ss:$12 sps:$4 sm:$0xff]  }
  0x2b   :  { %666 = vmatprep.subr.bf16.mxu0 %v1728_v0  ;;  %1601 = vmatprep.subr.bf16.mxu1 %v1728_v0 }
  0x2e   :  { %667 = vmatpush1.bf16.msra.mxu0 %v1634_v14  ;;  %1617 = vmatpush1.bf16.msra.mxu1 %v1634_v14  ;;  %v1718_v14 = vld [vmem:[%s2317_s0 + $0x150] ss:$12 sps:$4 sm:$0xff]  }
  0x2f   :  { %668 = vmatprep.subr.bf16.mxu0 %v1728_v0  ;;  %1602 = vmatprep.subr.bf16.mxu1 %v1728_v0 }
  0x32   :  { %669 = vmatpush1.bf16.msra.mxu0 %v1635_v15  ;;  %1618 = vmatpush1.bf16.msra.mxu1 %v1635_v15  ;;  %v1719_v15 = vld [vmem:[%s2317_s0 + $0x1d0] ss:$12 sps:$4 sm:$0xff]  }
  0x33   :  { %670 = vmatprep.subr.bf16.mxu0 %v1728_v0  ;;  %1603 = vmatprep.subr.bf16.mxu1 %v1728_v0 }
  0x36   :  { %671 = vmatpush1.bf16.msra.mxu0 %v1636_v16  ;;  %1619 = vmatpush1.bf16.msra.mxu1 %v1636_v16  ;;  %v1720_v16 = vld [vmem:[%s2317_s0 + $0x16c] ss:$12 sps:$4 sm:$0xff]  }
  0x37   :  { %672 = vmatprep.subr.bf16.mxu0 %v1728_v0  ;;  %1604 = vmatprep.subr.bf16.mxu1 %v1728_v0 }
  0x3a   :  { %673 = vmatpush1.bf16.msra.mxu0 %v1637_v17  ;;  %1620 = vmatpush1.bf16.msra.mxu1 %v1637_v17  ;;  %v1722_v17 = vld [vmem:[%s2317_s0 + $0x1e8] ss:$12 sps:$4 sm:$0xff]  }
  0x3b   :  { %674 = vmatprep.subr.bf16.mxu0 %v1728_v0  ;;  %1605 = vmatprep.subr.bf16.mxu1 %v1728_v0  ;;  %v1700_v0 = vld [vmem:[%s2317_s0 + $0x10c] ss:$12 sps:$4 sm:$0xff]  }
  0x3e   :  { %675 = vmatpush1.bf16.msra.mxu0 %v1638_v18  ;;  %1621 = vmatpush1.bf16.msra.mxu1 %v1638_v18  ;;  %v1723_v18 = vld [vmem:[%s2317_s0 + $0x168] ss:$12 sps:$4 sm:$0xff]  }
  0x3f   :  { %1542 = vmatprep.subr.bf16.mxu1 %v1651_v19 }
  0x41   :  { %677 = vmatmul.mubr.bf16.vlgmr.msra.gmra.mrb[0].mxu0 %v1639_v20  ;;  %813 = vmatmul.mubr.bf16.vlgmr.msra.gmra.mrb[0].mxu1 %v1642_v21  ;;  %v1725_v20 = vld [vmem:[%s2317_s0 + $0x184] ss:$12 sps:$4 sm:$0xff]   ;;  %v1727_v21 = vld [vmem:[%s2317_s0 + $0x180] ss:$12 sps:$4 sm:$0xff]  }
  0x42   :  { %684 = vmatprep.mubr.bf16.mxu0 %v1645_v22  ;;  %820 = vmatprep.mubr.bf16.mxu1 %v1647_v23 }
  0x43   :  { %1543 = vmatpush3.bf16.msra.mxu1 %v1651_v19  ;;  %v1724_v19 = vld [vmem:[%s2317_s0 + $0x200] ss:$0 sps:$4 sm:$0x11]  }
  0x44   :  { %1544 = vmatprep.subr.bf16.mxu1 %v1664_v24 }
  0x47   :  { %1545 = vmatpush3.bf16.msra.mxu1 %v1664_v24 }
  0x49   :  { %685 = vmatmul.mubr.bf16.gmra.mrb[4].mxu0 %v1649_v25  ;;  %821 = vmatmul.mubr.bf16.gmra.mrb[4].mxu1 %v1650_v26 }
  0x4a   :  { %692 = vmatprep.mubr.bf16.mxu0 %v1652_v27  ;;  %828 = vmatprep.mubr.bf16.mxu1 %v1654_v28 }
  0x51   :  { %693 = vmatmul.mubr.bf16.gmra.mrb[8].mxu0 %v1656_v29  ;;  %829 = vmatmul.mubr.bf16.gmra.mrb[8].mxu1 %v1657_v30 }
  0x52   :  { %700 = vmatprep.mubr.bf16.mxu0 %v1658_v31  ;;  %836 = vmatprep.mubr.bf16.mxu1 %v1660_v32 }
  0x59   :  { %701 = vmatmul.mubr.bf16.gmra.mrb[12].mxu0 %v1662_v34  ;;  %837 = vmatmul.mubr.bf16.gmra.mrb[12].mxu1 %v1663_v35 }
  0x5a   :  { %708 = vmatprep.mubr.bf16.mxu0 %v1665_v36  ;;  %844 = vmatprep.mubr.bf16.mxu1 %v1390_v37 }
  0x61   :  { %709 = vmatmul.mubr.bf16.gmra.mrb[16].mxu0 %v1668_v38  ;;  %845 = vmatmul.mubr.bf16.gmra.mrb[16].mxu1 %v1389_v39 }
  0x62   :  { %716 = vmatprep.mubr.bf16.mxu0 %v1670_v40  ;;  %1546 = vmatprep.mubr.msk.bf16.mxu1 %vm577_vm0, %v1672_v41 }
  0x69   :  { %717 = vmatmul.mubr.bf16.gmra.mrb[20].mxu0 %v1673_v42  ;;  %1547 = vmatmul.mubr.msk.bf16.vlgmr.msra.gmra.mrb[20].mxu1 %vm577_vm0, %v1674_v43 }
  0x6a   :  { %724 = vmatprep.mubr.bf16.mxu0 %v1675_v44  ;;  %1550 = vmatprep.mubr.msk.bf16.mxu1 %vm577_vm0, %v1677_v45 }
  0x71   :  { %725 = vmatmul.mubr.bf16.gmra.mrb[24].mxu0 %v1678_v46  ;;  %1551 = vmatmul.mubr.msk.bf16.gmra.mrb[24].mxu1 %vm577_vm0, %v1679_v47 }
  0x72   :  { %732 = vmatprep.mubr.bf16.mxu0 %v1680_v48  ;;  %1554 = vmatprep.mubr.msk.bf16.mxu1 %vm577_vm0, %v1682_v49 }
  0x79   :  { %733 = vmatmul.mubr.bf16.gmra.mrb[28].mxu0 %v1683_v50  ;;  %1555 = vmatmul.mubr.msk.bf16.gmra.mrb[28].mxu1 %vm577_vm0, %v1684_v51 }
  0x7a   :  { %740 = vmatprep.mubr.bf16.mxu0 %v1685_v52  ;;  %1558 = vmatprep.mubr.msk.bf16.mxu1 %vm577_vm0, %v1687_v53 }
  0x81   :  { %741 = vmatmul.mubr.bf16.gmra.mrb[32].mxu0 %v1688_v54  ;;  %1559 = vmatmul.mubr.msk.bf16.gmra.mrb[32].mxu1 %vm577_vm0, %v1689_v55 }
  0x82   :  { %748 = vmatprep.mubr.bf16.mxu0 %v1690_v56  ;;  %1562 = vmatprep.mubr.msk.bf16.mxu1 %vm577_vm0, %v1692_v57 }
  0x89   :  { %749 = vmatmul.mubr.bf16.gmra.mrb[36].mxu0 %v1693_v58  ;;  %1563 = vmatmul.mubr.msk.bf16.gmra.mrb[36].mxu1 %vm577_vm0, %v1694_v59 }
  0x8a   :  { %756 = vmatprep.mubr.bf16.mxu0 %v1695_v60  ;;  %1566 = vmatprep.mubr.msk.bf16.mxu1 %vm577_vm0, %v1697_v61 }
  0x91   :  { %757 = vmatmul.mubr.bf16.gmra.mrb[40].mxu0 %v1698_v62  ;;  %1567 = vmatmul.mubr.msk.bf16.gmra.mrb[40].mxu1 %vm577_vm0, %v1699_v63  ;;  %v2077_v62 = vld [vmem:[%s2318_s2] ss:$0 sm:$0xff] }
  0x92   :  { %764 = vmatprep.mubr.bf16.mxu0 %v1700_v0  ;;  %1570 = vmatprep.mubr.msk.bf16.mxu1 %vm577_vm0, %v1702_v1 }
  0x99   :  { %765 = vmatmul.mubr.bf16.gmra.mrb[44].mxu0 %v1703_v2  ;;  %1571 = vmatmul.mubr.msk.bf16.gmra.mrb[44].mxu1 %vm577_vm0, %v1704_v3 }
  0x9a   :  { %772 = vmatprep.mubr.bf16.mxu0 %v1705_v4  ;;  %1574 = vmatprep.mubr.msk.bf16.mxu1 %vm577_vm0, %v1707_v5 }
  0xa1   :  { %773 = vmatmul.mubr.bf16.gmra.mrb[48].mxu0 %v1708_v6  ;;  %1575 = vmatmul.mubr.msk.bf16.gmra.mrb[48].mxu1 %vm577_vm0, %v1709_v7 }
  0xa2   :  { %780 = vmatprep.mubr.bf16.mxu0 %v1710_v8  ;;  %1578 = vmatprep.mubr.msk.bf16.mxu1 %vm577_vm0, %v1712_v9 }
  0xa9   :  { %781 = vmatmul.mubr.bf16.gmra.mrb[52].mxu0 %v1713_v10  ;;  %1579 = vmatmul.mubr.msk.bf16.gmra.mrb[52].mxu1 %vm577_vm0, %v1714_v11 }
  0xaa   :  { %788 = vmatprep.mubr.bf16.mxu0 %v1715_v12  ;;  %1582 = vmatprep.mubr.msk.bf16.mxu1 %vm577_vm0, %v1717_v13 }
  0xb1   :  { %789 = vmatmul.mubr.bf16.gmra.mrb[56].mxu0 %v1718_v14  ;;  %1583 = vmatmul.mubr.msk.bf16.gmra.mrb[56].mxu1 %vm577_vm0, %v1719_v15 }
  0xb2   :  { %796 = vmatprep.mubr.bf16.mxu0 %v1720_v16  ;;  %1586 = vmatprep.mubr.msk.bf16.mxu1 %vm577_vm0, %v1722_v17 }
  0xb9   :  { %797 = vmatmul.mubr.bf16.gmra.mrb[60].mxu0 %v1723_v18  ;;  %1587 = vmatmul.mubr.msk.bf16.gmra.mrb[60].mxu1 %vm577_vm0, %v1724_v19 }
  0xba   :  { %804 = vmatprep.mubr.bf16.mxu0 %v1725_v20 }
  0xc1   :  { %805 = vmatmul.mubr.bf16.gmra.mrb[64].mxu0 %v1727_v21 }
 0x114   :  { %v678_v22 = vpop.f32.mrb[0].mxu0  ;;  %v2052_v23 = vpop.f32.mrb[0].mxu1 }
 0x115   :  { %v680_v24 = vpop.f32.mrb[1].mxu0  ;;  %v816_v25 = vpop.f32.mrb[1].mxu1  ;;  %v679_v0 = vadd.f32 %v2077_v62, %v678_v22 }
 0x116   :  { %v681_v26 = vpop.f32.mrb[2].mxu0  ;;  %v2054_v27 = vpop.f32.mrb[2].mxu1 }
 0x117   :  { %v683_v28 = vpop.f32.mrb[3].mxu0  ;;  %v819_v29 = vpop.f32.mrb[3].mxu1  ;;  %v682_v7 = vadd.f32 %v2077_v62, %v681_v26 }
 0x11c   :  { %v686_v30 = vpop.f32.mrb[4].mxu0  ;;  %v2056_v31 = vpop.f32.mrb[4].mxu1 }
 0x11d   :  { %v688_v32 = vpop.f32.mrb[5].mxu0  ;;  %v824_v33 = vpop.f32.mrb[5].mxu1  ;;  %v687_v63 = vadd.f32 %v2077_v62, %v686_v30 }
 0x11e   :  { %v689_v34 = vpop.f32.mrb[6].mxu0  ;;  %v2058_v35 = vpop.f32.mrb[6].mxu1 }
 0x11f   :  { %v691_v36 = vpop.f32.mrb[7].mxu0  ;;  %v827_v37 = vpop.f32.mrb[7].mxu1  ;;  %v690_v3 = vadd.f32 %v2077_v62, %v689_v34 }
 0x124   :  { %v694_v38 = vpop.f32.mrb[8].mxu0  ;;  %v2060_v39 = vpop.f32.mrb[8].mxu1 }
 0x125   :  { %v696_v40 = vpop.f32.mrb[9].mxu0  ;;  %v832_v41 = vpop.f32.mrb[9].mxu1  ;;  %v695_v24 = vadd.f32 %v2077_v62, %v694_v38 }
 0x126   :  { %v697_v42 = vpop.f32.mrb[10].mxu0  ;;  %v2062_v43 = vpop.f32.mrb[10].mxu1 }
 0x127   :  { %v699_v44 = vpop.f32.mrb[11].mxu0  ;;  %v835_v45 = vpop.f32.mrb[11].mxu1  ;;  %v698_v34 = vadd.f32 %v2077_v62, %v697_v42 }
 0x12c   :  { %v702_v46 = vpop.f32.mrb[12].mxu0  ;;  %v2064_v47 = vpop.f32.mrb[12].mxu1 }
 0x12d   :  { %v704_v48 = vpop.f32.mrb[13].mxu0  ;;  %v840_v49 = vpop.f32.mrb[13].mxu1  ;;  %v703_v21 = vadd.f32 %v2077_v62, %v702_v46 }
 0x12e   :  { %v705_v50 = vpop.f32.mrb[14].mxu0  ;;  %v2066_v51 = vpop.f32.mrb[14].mxu1 }
 0x12f   :  { %v707_v52 = vpop.f32.mrb[15].mxu0  ;;  %v843_v53 = vpop.f32.mrb[15].mxu1  ;;  %v706_v29 = vadd.f32 %v2077_v62, %v705_v50 }
 0x134   :  { %v2068_v54 = vpop.f32.mrb[16].mxu0  ;;  %v2070_v55 = vpop.f32.mrb[16].mxu1 }
 0x135   :  { %v712_v56 = vpop.f32.mrb[17].mxu0  ;;  %v848_v57 = vpop.f32.mrb[17].mxu1 }
 0x136   :  { %v2072_v58 = vpop.f32.mrb[18].mxu0  ;;  %v849_v59 = vpop.f32.mrb[18].mxu1  ;;  %v711_v57 = vadd.f32 %v2077_v62, %v2068_v54 }
 0x137   :  { %v715_v60 = vpop.f32.mrb[19].mxu0  ;;  %v850_v61 = vpop.f32.mrb[19].mxu1  ;;  %v714_v54 = vadd.f32 %v2077_v62, %v2072_v58 }
 0x13c   :  { %v718_v1 = vpop.f32.mrb[20].mxu0  ;;  %v1548_v2 = vpop.f32.mrb[20].mxu1 }
 0x13d   :  { %v895_v4 = vadd.f32 %v1548_v2, %v687_v63  ;;  %v720_v5 = vpop.f32.mrb[21].mxu0  ;;  %v886_v6 = vpop.f32.mrb[21].mxu1  ;;  %v719_v42 = vadd.f32 %v2077_v62, %v718_v1 }
 0x13e   :  { %v887_v8 = vadd.f32 %v886_v6, %v679_v0  ;;  %v721_v9 = vpop.f32.mrb[22].mxu0  ;;  %v1549_v10 = vpop.f32.mrb[22].mxu1 }
 0x13f   :  { %v1062_v11 = vmax.f32 %v895_v4, 0.0  ;;  %v898_v12 = vadd.f32 %v1549_v10, %v690_v3  ;;  %v723_v13 = vpop.f32.mrb[23].mxu0  ;;  %v889_v14 = vpop.f32.mrb[23].mxu1  ;;  %v722_v63 = vadd.f32 %v2077_v62, %v721_v9 }
 0x140   :  { %v1060_v15 = vmax.f32 %v887_v8, 0.0  ;;  %v890_v16 = vadd.f32 %v889_v14, %v682_v7 }
 0x141   :  { %v1477_v17 = vpack.c.bf16 %v1062_v11, %v1062_v11  ;;  %v1063_v18 = vmax.f32 %v898_v12, 0.0 }
 0x142   :  { %v1475_v19 = vpack.c.bf16 %v1060_v15, %v1060_v15  ;;  %v1061_v20 = vmax.f32 %v890_v16, 0.0 }
 0x143   :  { %1279 = vst.msk [vmem:[%s2319_s3 + $0x8] sm:$0xf] %vm1276_vm1, %v1477_v17  ;;  %v1478_v22 = vpack.c.bf16 %v1063_v18, %v1063_v18 }
 0x144   :  { %1277 = vst.msk [vmem:[%s2319_s3] sm:$0xf] %vm1276_vm1, %v1475_v19  ;;  %v1476_v25 = vpack.c.bf16 %v1061_v20, %v1061_v20  ;;  %v726_v26 = vpop.f32.mrb[24].mxu0  ;;  %v1552_v28 = vpop.f32.mrb[24].mxu1 }
 0x145   :  { %1280 = vst.msk [vmem:[%s2319_s3 + $0xc] sm:$0xf] %vm1276_vm1, %v1478_v22  ;;  %v911_v30 = vadd.f32 %v1552_v28, %v703_v21  ;;  %v728_v32 = vpop.f32.mrb[25].mxu0  ;;  %v902_v33 = vpop.f32.mrb[25].mxu1  ;;  %v727_v17 = vadd.f32 %v2077_v62, %v726_v26 }
 0x146   :  { %1278 = vst.msk [vmem:[%s2319_s3 + $0x4] sm:$0xf] %vm1276_vm1, %v1476_v25  ;;  %v903_v36 = vadd.f32 %v902_v33, %v695_v24  ;;  %v729_v37 = vpop.f32.mrb[26].mxu0  ;;  %v1553_v38 = vpop.f32.mrb[26].mxu1 }
 0x147   :  { %v1066_v40 = vmax.f32 %v911_v30, 0.0  ;;  %v914_v41 = vadd.f32 %v1553_v38, %v706_v29  ;;  %v731_v44 = vpop.f32.mrb[27].mxu0  ;;  %v905_v45 = vpop.f32.mrb[27].mxu1  ;;  %v730_v26 = vadd.f32 %v2077_v62, %v729_v37 }
 0x148   :  { %v1064_v46 = vmax.f32 %v903_v36, 0.0  ;;  %v906_v48 = vadd.f32 %v905_v45, %v698_v34 }
 0x149   :  { %v1481_v49 = vpack.c.bf16 %v1066_v40, %v1066_v40  ;;  %v1067_v50 = vmax.f32 %v914_v41, 0.0 }
 0x14a   :  { %v1479_v52 = vpack.c.bf16 %v1064_v46, %v1064_v46  ;;  %v1065_v53 = vmax.f32 %v906_v48, 0.0 }
 0x14b   :  { %1283 = vst.msk [vmem:[%s2319_s3 + $0x18] sm:$0xf] %vm1276_vm1, %v1481_v49  ;;  %v1482_v56 = vpack.c.bf16 %v1067_v50, %v1067_v50 }
 0x14c   :  { %1281 = vst.msk [vmem:[%s2319_s3 + $0x10] sm:$0xf] %vm1276_vm1, %v1479_v52  ;;  %v1480_v59 = vpack.c.bf16 %v1065_v53, %v1065_v53  ;;  %v734_v60 = vpop.f32.mrb[28].mxu0  ;;  %v1556_v61 = vpop.f32.mrb[28].mxu1 }
 0x14d   :  { %1284 = vst.msk [vmem:[%s2319_s3 + $0x1c] sm:$0xf] %vm1276_vm1, %v1482_v56  ;;  %v927_v0 = vadd.f32 %v1556_v61, %v719_v42  ;;  %v736_v1 = vpop.f32.mrb[29].mxu0  ;;  %v918_v2 = vpop.f32.mrb[29].mxu1  ;;  %v735_v58 = vadd.f32 %v2077_v62, %v734_v60 }
 0x14e   :  { %1282 = vst.msk [vmem:[%s2319_s3 + $0x14] sm:$0xf] %vm1276_vm1, %v1480_v59  ;;  %v919_v3 = vadd.f32 %v918_v2, %v711_v57  ;;  %v737_v4 = vpop.f32.mrb[30].mxu0  ;;  %v1557_v5 = vpop.f32.mrb[30].mxu1 }
 0x14f   :  { %v1070_v6 = vmax.f32 %v927_v0, 0.0  ;;  %v930_v7 = vadd.f32 %v1557_v5, %v722_v63  ;;  %v739_v8 = vpop.f32.mrb[31].mxu0  ;;  %v921_v9 = vpop.f32.mrb[31].mxu1  ;;  %v738_v21 = vadd.f32 %v2077_v62, %v737_v4 }
 0x150   :  { %v1068_v10 = vmax.f32 %v919_v3, 0.0  ;;  %v922_v11 = vadd.f32 %v921_v9, %v714_v54 }
 0x151   :  { %v1485_v12 = vpack.c.bf16 %v1070_v6, %v1070_v6  ;;  %v1071_v13 = vmax.f32 %v930_v7, 0.0 }
 0x152   :  { %v1483_v14 = vpack.c.bf16 %v1068_v10, %v1068_v10  ;;  %v1069_v15 = vmax.f32 %v922_v11, 0.0 }
 0x153   :  { %1287 = vst.msk [vmem:[%s2319_s3 + $0x28] sm:$0xf] %vm1276_vm1, %v1485_v12  ;;  %v1486_v16 = vpack.c.bf16 %v1071_v13, %v1071_v13 }
 0x154   :  { %1285 = vst.msk [vmem:[%s2319_s3 + $0x20] sm:$0xf] %vm1276_vm1, %v1483_v14  ;;  %v1484_v18 = vpack.c.bf16 %v1069_v15, %v1069_v15  ;;  %v742_v19 = vpop.f32.mrb[32].mxu0  ;;  %v1560_v20 = vpop.f32.mrb[32].mxu1 }
 0x155   :  { %1288 = vst.msk [vmem:[%s2319_s3 + $0x2c] sm:$0xf] %vm1276_vm1, %v1486_v16  ;;  %v943_v22 = vadd.f32 %v1560_v20, %v735_v58  ;;  %v744_v24 = vpop.f32.mrb[33].mxu0  ;;  %v934_v25 = vpop.f32.mrb[33].mxu1  ;;  %v743_v48 = vadd.f32 %v2077_v62, %v742_v19 }
 0x156   :  { %1286 = vst.msk [vmem:[%s2319_s3 + $0x24] sm:$0xf] %vm1276_vm1, %v1484_v18  ;;  %v935_v28 = vadd.f32 %v934_v25, %v727_v17  ;;  %v745_v29 = vpop.f32.mrb[34].mxu0  ;;  %v1561_v30 = vpop.f32.mrb[34].mxu1 }
 0x157   :  { %v1074_v32 = vmax.f32 %v943_v22, 0.0  ;;  %v946_v33 = vadd.f32 %v1561_v30, %v738_v21  ;;  %v747_v34 = vpop.f32.mrb[35].mxu0  ;;  %v937_v36 = vpop.f32.mrb[35].mxu1  ;;  %v746_v57 = vadd.f32 %v2077_v62, %v745_v29 }
 0x158   :  { %v1072_v38 = vmax.f32 %v935_v28, 0.0  ;;  %v938_v40 = vadd.f32 %v937_v36, %v730_v26 }
 0x159   :  { %v1489_v41 = vpack.c.bf16 %v1074_v32, %v1074_v32  ;;  %v1075_v44 = vmax.f32 %v946_v33, 0.0 }
 0x15a   :  { %v1487_v45 = vpack.c.bf16 %v1072_v38, %v1072_v38  ;;  %v1073_v46 = vmax.f32 %v938_v40, 0.0 }
 0x15b   :  { %1291 = vst.msk [vmem:[%s2319_s3 + $0x38] sm:$0xf] %vm1276_vm1, %v1489_v41  ;;  %v1490_v37 = vpack.c.bf16 %v1075_v44, %v1075_v44 }
 0x15c   :  { %1289 = vst.msk [vmem:[%s2319_s3 + $0x30] sm:$0xf] %vm1276_vm1, %v1487_v45  ;;  %v1488_v49 = vpack.c.bf16 %v1073_v46, %v1073_v46  ;;  %v750_v50 = vpop.f32.mrb[36].mxu0  ;;  %v1564_v52 = vpop.f32.mrb[36].mxu1 }
 0x15d   :  { %1292 = vst.msk [vmem:[%s2319_s3 + $0x3c] sm:$0xf] %vm1276_vm1, %v1490_v37  ;;  %v751_v53 = vadd.f32 %v2077_v62, %v750_v50  ;;  %v752_v42 = vpop.f32.mrb[37].mxu0  ;;  %v950_v56 = vpop.f32.mrb[37].mxu1 }
 0x15e   :  { %1290 = vst.msk [vmem:[%s2319_s3 + $0x34] sm:$0xf] %vm1276_vm1, %v1488_v49  ;;  %v951_v59 = vadd.f32 %v950_v56, %v743_v48  ;;  %v753_v60 = vpop.f32.mrb[38].mxu0  ;;  %v1565_v61 = vpop.f32.mrb[38].mxu1 }
 0x15f   :  { %v959_v63 = vadd.f32 %v1564_v52, %v751_v53  ;;  %v754_v0 = vadd.f32 %v2077_v62, %v753_v60  ;;  %v755_v1 = vpop.f32.mrb[39].mxu0  ;;  %v953_v2 = vpop.f32.mrb[39].mxu1 }
 0x160   :  { %v1076_v54 = vmax.f32 %v951_v59, 0.0  ;;  %v954_v3 = vadd.f32 %v953_v2, %v746_v57 }
 0x161   :  { %v1078_v4 = vmax.f32 %v959_v63, 0.0  ;;  %v962_v5 = vadd.f32 %v1565_v61, %v754_v0 }
 0x162   :  { %v1491_v6 = vpack.c.bf16 %v1076_v54, %v1076_v54  ;;  %v1077_v7 = vmax.f32 %v954_v3, 0.0  ;;  %v815_v3 = vadd.f32 %v2077_v62, %v2052_v23 }
 0x163   :  { %v1493_v8 = vpack.c.bf16 %v1078_v4, %v1078_v4  ;;  %v1079_v9 = vmax.f32 %v962_v5, 0.0 }
 0x164   :  { %1293 = vst.msk [vmem:[%s2319_s3 + $0x40] sm:$0xf] %vm1276_vm1, %v1491_v6  ;;  %v1492_v10 = vpack.c.bf16 %v1077_v7, %v1077_v7  ;;  %v758_v11 = vpop.f32.mrb[40].mxu0  ;;  %v1568_v12 = vpop.f32.mrb[40].mxu1 }
 0x165   :  { %1295 = vst.msk [vmem:[%s2319_s3 + $0x48] sm:$0xf] %vm1276_vm1, %v1493_v8  ;;  %v1494_v13 = vpack.c.bf16 %v1079_v9, %v1079_v9  ;;  %v759_v14 = vadd.f32 %v2077_v62, %v758_v11  ;;  %v760_v15 = vpop.f32.mrb[41].mxu0  ;;  %v966_v58 = vpop.f32.mrb[41].mxu1  ;;  %v818_v8 = vadd.f32 %v2077_v62, %v2054_v27 }
 0x166   :  { %1294 = vst.msk [vmem:[%s2319_s3 + $0x44] sm:$0xf] %vm1276_vm1, %v1492_v10  ;;  %v761_v16 = vpop.f32.mrb[42].mxu0  ;;  %v1569_v17 = vpop.f32.mrb[42].mxu1 }
 0x167   :  { %1296 = vst.msk [vmem:[%s2319_s3 + $0x4c] sm:$0xf] %vm1276_vm1, %v1494_v13  ;;  %v762_v18 = vadd.f32 %v2077_v62, %v761_v16  ;;  %v967_v19 = vadd.f32 %v966_v58, %v759_v14  ;;  %v763_v20 = vpop.f32.mrb[43].mxu0  ;;  %v969_v21 = vpop.f32.mrb[43].mxu1 }
 0x169   :  { %v1080_v22 = vmax.f32 %v967_v19, 0.0  ;;  %v970_v24 = vadd.f32 %v969_v21, %v762_v18 }
 0x16b   :  { %v1495_v25 = vpack.c.bf16 %v1080_v22, %v1080_v22  ;;  %v1081_v26 = vmax.f32 %v970_v24, 0.0  ;;  %v831_v24 = vadd.f32 %v2077_v62, %v2060_v39 }
 0x16c   :  { %v766_v28 = vpop.f32.mrb[44].mxu0  ;;  %v1572_v29 = vpop.f32.mrb[44].mxu1 }
 0x16d   :  { %1297 = vst.msk [vmem:[%s2319_s3 + $0x50] sm:$0xf] %vm1276_vm1, %v1495_v25  ;;  %v1496_v30 = vpack.c.bf16 %v1081_v26, %v1081_v26  ;;  %v767_v32 = vadd.f32 %v2077_v62, %v766_v28  ;;  %v768_v33 = vpop.f32.mrb[45].mxu0  ;;  %v982_v34 = vpop.f32.mrb[45].mxu1 }
 0x16e   :  { %v769_v36 = vpop.f32.mrb[46].mxu0  ;;  %v1573_v38 = vpop.f32.mrb[46].mxu1  ;;  %v834_v33 = vadd.f32 %v2077_v62, %v2062_v43 }
 0x16f   :  { %1298 = vst.msk [vmem:[%s2319_s3 + $0x54] sm:$0xf] %vm1276_vm1, %v1496_v30  ;;  %v975_v40 = vadd.f32 %v1568_v12, %v767_v32  ;;  %v770_v41 = vadd.f32 %v2077_v62, %v769_v36  ;;  %v771_v44 = vpop.f32.mrb[47].mxu0  ;;  %v985_v45 = vpop.f32.mrb[47].mxu1 }
 0x171   :  { %v1082_v46 = vmax.f32 %v975_v40, 0.0  ;;  %v978_v37 = vadd.f32 %v1569_v17, %v770_v41  ;;  %v826_v40 = vadd.f32 %v2077_v62, %v2058_v35 }
 0x173   :  { %v1497_v48 = vpack.c.bf16 %v1082_v46, %v1082_v46  ;;  %v1083_v49 = vmax.f32 %v978_v37, 0.0 }
 0x174   :  { %v774_v50 = vpop.f32.mrb[48].mxu0  ;;  %v2193_v52 = vpop.f32.mrb[48].mxu1 }
 0x175   :  { %1299 = vst.msk [vmem:[%s2319_s3 + $0x58] sm:$0xf] %vm1276_vm1, %v1497_v48  ;;  %v1498_v53 = vpack.c.bf16 %v1083_v49, %v1083_v49  ;;  %v775_v42 = vadd.f32 %v2077_v62, %v774_v50  ;;  %v776_v56 = vpop.f32.mrb[49].mxu0  ;;  %v998_v57 = vpop.f32.mrb[49].mxu1 }
 0x176   :  { %v777_v59 = vpop.f32.mrb[50].mxu0  ;;  %v2200_v60 = vpop.f32.mrb[50].mxu1 }
 0x177   :  { %1300 = vst.msk [vmem:[%s2319_s3 + $0x5c] sm:$0xf] %vm1276_vm1, %v1498_v53  ;;  %v983_v61 = vadd.f32 %v982_v34, %v775_v42  ;;  %v778_v63 = vadd.f32 %v2077_v62, %v777_v59  ;;  %v779_v0 = vpop.f32.mrb[51].mxu0  ;;  %v1001_v1 = vpop.f32.mrb[51].mxu1 }
 0x179   :  { %v1084_v2 = vmax.f32 %v983_v61, 0.0  ;;  %v986_v54 = vadd.f32 %v985_v45, %v778_v63 }
 0x17b   :  { %v1499_v4 = vpack.c.bf16 %v1084_v2, %v1084_v2  ;;  %v1085_v5 = vmax.f32 %v986_v54, 0.0  ;;  %v847_v2 = vadd.f32 %v2077_v62, %v2070_v55 }
 0x17c   :  { %v782_v6 = vpop.f32.mrb[52].mxu0  ;;  %v1580_v7 = vpop.f32.mrb[52].mxu1 }
 0x17d   :  { %1301 = vst.msk [vmem:[%s2319_s3 + $0x60] sm:$0xf] %vm1276_vm1, %v1499_v4  ;;  %v1500_v9 = vpack.c.bf16 %v1085_v5, %v1085_v5  ;;  %v783_v10 = vadd.f32 %v2077_v62, %v782_v6  ;;  %v1023_v11 = vadd.f32 %v1580_v7, %v815_v3  ;;  %v784_v12 = vpop.f32.mrb[53].mxu0  ;;  %v2216_v13 = vpop.f32.mrb[53].mxu1  ;;  %v839_v4 = vadd.f32 %v2077_v62, %v2064_v47 }
 0x17e   :  { %v785_v23 = vpop.f32.mrb[54].mxu0  ;;  %v1581_v14 = vpop.f32.mrb[54].mxu1 }
 0x17f   :  { %1302 = vst.msk [vmem:[%s2319_s3 + $0x64] sm:$0xf] %vm1276_vm1, %v1500_v9  ;;  %v991_v27 = vadd.f32 %v1572_v29, %v783_v10  ;;  %v1094_v15 = vmax.f32 %v1023_v11, 0.0  ;;  %v786_v58 = vadd.f32 %v2077_v62, %v785_v23  ;;  %v1026_v16 = vadd.f32 %v1581_v14, %v818_v8  ;;  %v787_v17 = vpop.f32.mrb[55].mxu0  ;;  %v2223_v18 = vpop.f32.mrb[55].mxu1 }
 0x180   :  { %v823_v29 = vadd.f32 %v2077_v62, %v2056_v31  ;;  %v842_v10 = vadd.f32 %v2077_v62, %v2066_v51 }
 0x181   :  { %v1086_v19 = vmax.f32 %v991_v27, 0.0  ;;  %v1509_v20 = vpack.c.bf16 %v1094_v15, %v1094_v15  ;;  %v994_v21 = vadd.f32 %v1573_v38, %v786_v58  ;;  %v1095_v22 = vmax.f32 %v1026_v16, 0.0 }
 0x183   :  { %v1501_v25 = vpack.c.bf16 %v1086_v19, %v1086_v19  ;;  %1311 = vst.msk [vmem:[%s2319_s3 + $0x88] sm:$0xf] %vm1276_vm1, %v1509_v20  ;;  %v1087_v26 = vmax.f32 %v994_v21, 0.0  ;;  %v1510_v28 = vpack.c.bf16 %v1095_v22, %v1095_v22 }
 0x184   :  { %v790_v30 = vpop.f32.mrb[56].mxu0  ;;  %v1584_v32 = vpop.f32.mrb[56].mxu1 }
 0x185   :  { %1303 = vst.msk [vmem:[%s2319_s3 + $0x68] sm:$0xf] %vm1276_vm1, %v1501_v25  ;;  %v1502_v39 = vpack.c.bf16 %v1087_v26, %v1087_v26  ;;  %1312 = vst.msk [vmem:[%s2319_s3 + $0x8c] sm:$0xf] %vm1276_vm1, %v1510_v28  ;;  %v791_v34 = vadd.f32 %v2077_v62, %v790_v30  ;;  %v1039_v36 = vadd.f32 %v1584_v32, %v831_v24  ;;  %v792_v31 = vpop.f32.mrb[57].mxu0  ;;  %v1030_v38 = vpop.f32.mrb[57].mxu1 }
 0x186   :  { %v1031_v43 = vadd.f32 %v1030_v38, %v823_v29  ;;  %v793_v41 = vpop.f32.mrb[58].mxu0  ;;  %v1585_v44 = vpop.f32.mrb[58].mxu1 }
 0x187   :  { %1304 = vst.msk [vmem:[%s2319_s3 + $0x6c] sm:$0xf] %vm1276_vm1, %v1502_v39  ;;  %v999_v45 = vadd.f32 %v998_v57, %v791_v34  ;;  %v1098_v46 = vmax.f32 %v1039_v36, 0.0  ;;  %v794_v37 = vadd.f32 %v2077_v62, %v793_v41  ;;  %v1042_v48 = vadd.f32 %v1585_v44, %v834_v33  ;;  %v795_v49 = vpop.f32.mrb[59].mxu0  ;;  %v1033_v50 = vpop.f32.mrb[59].mxu1 }
 0x188   :  { %v1096_v53 = vmax.f32 %v1031_v43, 0.0  ;;  %v1034_v42 = vadd.f32 %v1033_v50, %v826_v40 }
 0x189   :  { %v1088_v56 = vmax.f32 %v999_v45, 0.0  ;;  %v1513_v59 = vpack.c.bf16 %v1098_v46, %v1098_v46  ;;  %v1002_v35 = vadd.f32 %v1001_v1, %v794_v37  ;;  %v1099_v61 = vmax.f32 %v1042_v48, 0.0 }
 0x18a   :  { %v1511_v63 = vpack.c.bf16 %v1096_v53, %v1096_v53  ;;  %v1097_v0 = vmax.f32 %v1034_v42, 0.0 }
 0x18b   :  { %v1503_v54 = vpack.c.bf16 %v1088_v56, %v1088_v56  ;;  %1315 = vst.msk [vmem:[%s2319_s3 + $0x98] sm:$0xf] %vm1276_vm1, %v1513_v59  ;;  %v1089_v57 = vmax.f32 %v1002_v35, 0.0  ;;  %v1514_v3 = vpack.c.bf16 %v1099_v61, %v1099_v61 }
 0x18c   :  { %1313 = vst.msk [vmem:[%s2319_s3 + $0x90] sm:$0xf] %vm1276_vm1, %v1511_v63  ;;  %v1512_v1 = vpack.c.bf16 %v1097_v0, %v1097_v0  ;;  %v798_v5 = vpop.f32.mrb[60].mxu0  ;;  %v1588_v6 = vpop.f32.mrb[60].mxu1 }
 0x18d   :  { %1305 = vst.msk [vmem:[%s2319_s3 + $0x70] sm:$0xf] %vm1276_vm1, %v1503_v54  ;;  %v1504_v55 = vpack.c.bf16 %v1089_v57, %v1089_v57  ;;  %1316 = vst.msk [vmem:[%s2319_s3 + $0x9c] sm:$0xf] %vm1276_vm1, %v1514_v3  ;;  %v799_v47 = vadd.f32 %v2077_v62, %v798_v5  ;;  %v1055_v7 = vadd.f32 %v1588_v6, %v847_v2  ;;  %v800_v8 = vpop.f32.mrb[61].mxu0  ;;  %v1046_v9 = vpop.f32.mrb[61].mxu1 }
 0x18e   :  { %1314 = vst.msk [vmem:[%s2319_s3 + $0x94] sm:$0xf] %vm1276_vm1, %v1512_v1  ;;  %v1047_v11 = vadd.f32 %v1046_v9, %v839_v4  ;;  %v801_v12 = vpop.f32.mrb[62].mxu0  ;;  %v1589_v23 = vpop.f32.mrb[62].mxu1 }
 0x18f   :  { %1306 = vst.msk [vmem:[%s2319_s3 + $0x74] sm:$0xf] %vm1276_vm1, %v1504_v55  ;;  %v1007_v14 = vadd.f32 %v2193_v52, %v799_v47  ;;  %v1102_v27 = vmax.f32 %v1055_v7, 0.0  ;;  %v802_v15 = vadd.f32 %v2077_v62, %v801_v12  ;;  %v803_v58 = vpop.f32.mrb[63].mxu0  ;;  %v1049_v51 = vpop.f32.mrb[63].mxu1 }
 0x190   :  { %v1100_v16 = vmax.f32 %v1047_v11, 0.0  ;;  %v1050_v17 = vadd.f32 %v1049_v51, %v842_v10 }
 0x191   :  { %v1090_v19 = vmax.f32 %v1007_v14, 0.0  ;;  %v1517_v20 = vpack.c.bf16 %v1102_v27, %v1102_v27  ;;  %v1010_v21 = vadd.f32 %v2200_v60, %v802_v15 }
 0x192   :  { %v1515_v22 = vpack.c.bf16 %v1100_v16, %v1100_v16  ;;  %v1101_v24 = vmax.f32 %v1050_v17, 0.0 }
 0x193   :  { %v1505_v25 = vpack.c.bf16 %v1090_v19, %v1090_v19  ;;  %1320 = vst.msk [vmem:[%s2319_s3 + $0xa8] sm:$0x1] %vm1319_vm2, %v1517_v20  ;;  %v1091_v52 = vmax.f32 %v1010_v21, 0.0 }
 0x194   :  { %1317 = vst.msk [vmem:[%s2319_s3 + $0xa0] sm:$0xf] %vm1276_vm1, %v1515_v22  ;;  %v1516_v26 = vpack.c.bf16 %v1101_v24, %v1101_v24  ;;  %v806_v28 = vpop.f32.mrb[64].mxu0 }
 0x195   :  { %1307 = vst.msk [vmem:[%s2319_s3 + $0x78] sm:$0xf] %vm1276_vm1, %v1505_v25  ;;  %v1506_v60 = vpack.c.bf16 %v1091_v52, %v1091_v52  ;;  %v807_v29 = vadd.f32 %v2077_v62, %v806_v28  ;;  %v808_v30 = vpop.f32.mrb[65].mxu0 }
 0x196   :  { %1318 = vst.msk [vmem:[%s2319_s3 + $0xa4] sm:$0xf] %vm1276_vm1, %v1516_v26  ;;  %v809_v32 = vpop.f32.mrb[66].mxu0 }
 0x197   :  { %1308 = vst.msk [vmem:[%s2319_s3 + $0x7c] sm:$0xf] %vm1276_vm1, %v1506_v60  ;;  %v1015_v33 = vadd.f32 %v2216_v13, %v807_v29  ;;  %v810_v39 = vadd.f32 %v2077_v62, %v809_v32  ;;  %v811_v34 = vpop.f32.mrb[67].mxu0 }
 0x199   :  { %v1092_v36 = vmax.f32 %v1015_v33, 0.0  ;;  %v1018_v31 = vadd.f32 %v2223_v18, %v810_v39 }
 0x19b   :  { %v1507_v38 = vpack.c.bf16 %v1092_v36, %v1092_v36  ;;  %v1093_v40 = vmax.f32 %v1018_v31, 0.0 }
 0x19d   :  { %1309 = vst.msk [vmem:[%s2319_s3 + $0x80] sm:$0xf] %vm1276_vm1, %v1507_v38  ;;  %v1508_v43 = vpack.c.bf16 %v1093_v40, %v1093_v40 }
 0x19f   :  { %1310 = vst.msk [vmem:[%s2319_s3 + $0x84] sm:$0xf] %vm1276_vm1, %v1508_v43 }

// kernel: inception_stem.14
= control target key start
LH: loop header
LB: loop body
LE: loop exit
PB: predicated region body
PF: predicated region fallthrough
CT: control target
= control target key end

     0   :  { %s713_s15 = smov 0   ;;  %s828_s0 = inlined_call_operand.vmem [shape: bf16[2,7,7,64], index: 0, kind: input, shape index: {}]   ;;  %s829_s1 = inlined_call_operand.vmem [shape: bf16[2,7,6,64], index: 1, kind: input, shape index: {}]   ;;  %s830_s2 = inlined_call_operand.vmem [shape: bf16[2,6,7,64], index: 2, kind: input, shape index: {}]   ;;  %s831_s3 = inlined_call_operand.vmem [shape: bf16[2,6,6,64], index: 3, kind: input, shape index: {}]   ;;  %s832_s4 = inlined_call_operand.vmem [shape: bf16[2,6,6,64], index: 4, kind: output, shape index: {}]  }
   0x1 LB: > { %s640_s16 = sadd.s32 4294967295, %s686_s15   ;;  %p644_p0 = scmp.ge.s32.totalorder %s686_s15, 1  ;;  %s686_s15 = sphi %s713_s15, %s14_s15  }
   0x2   : > { %p192_p1 = scmp.lt.s32.totalorder %s686_s15, 3 }
   0x4   : > { %p193_p2 = pnand %p644_p0, %p192_p1 }
   0x5   : > { %p233_p3 = scmp.lt.s32.totalorder (!%p193_p2), %s640_s16, 1  ;;  %vm542_vm0 = vcmask (!%p193_p2), 518144  }
   0x6   : > { %196 = sbr.rel (%p193_p2) target bundleno = 70 (0x46), region = 36 }
   0xd   : > { %s834_s16 = smov (!%p233_p3, %s640_s16), 1 }
   0xe   : > { %s670_s17 = smul.u32 28, %s834_s16 }
   0xf   : > { %s725_s18 = smul.u32 24, %s834_s16 }
  0x10   : > { %s732_s21 = scalar_lea.vmem %s828_s0, %s670_s17  ;;  %s760_s30 = scalar_lea.vmem %s829_s1, %s670_s17 }
  0x11   : > { %s738_s24 = scalar_lea.vmem %s830_s2, %s725_s18  ;;  %s744_s27 = scalar_lea.vmem %s831_s3, %s725_s18  ;;  %v276_v0 = vld [vmem:[%s732_s21] sm:$0xf]  ;;  %v656_v3 = vld [vmem:[%s732_s21 + $0x4] sm:$0xf]  ;;  %v657_v22 = vld [vmem:[%s732_s21 + $0x8] sm:$0xf] }
  0x12   : > { %v283_v1 = vshrl.u32 %v276_v0, 16  ;;  %v286_v2 = vshll.u32 %v276_v0, 16  ;;  %v258_v4 = vld [vmem:[%s744_s27] sm:$0x7]  ;;  %v368_v6 = vshrl.u32 %v656_v3, 16  ;;  %v371_v7 = vshll.u32 %v656_v3, 16  ;;  %s784_s7 = scalar_lea.vmem %s832_s4, %s725_s18 }
  0x13   : > { %v264_v5 = vld [vmem:[%s732_s21] sm:$0x7]  ;;  %v277_v17 = vld [vmem:[%s732_s21 + $0x4] sm:$0xf]  ;;  %v377_v27 = vshrl.u32 %v657_v22, 16  ;;  %v380_v30 = vshll.u32 %v657_v22, 16 }
  0x14   : > { %v285_v8 = vrot.slane %v283_v1, 4  ;;  %v288_v9 = vrot.slane %v286_v2, 5  ;;  %v470_v10 = vld [vmem:[%s738_s24] sm:$0xf]  ;;  %v370_v11 = vrot.slane %v368_v6, 4  ;;  %v373_v12 = vrot.slane %v371_v7, 5 }
  0x15   : > { %v477_v13 = vshrl.u32 %v470_v10, 16  ;;  %v480_v14 = vshll.u32 %v470_v10, 16  ;;  %v270_v15 = vmax.bf16 %v264_v5, %v258_v4  ;;  %v650_v18 = vld [vmem:[%s732_s21 + $0x4] sm:$0x7]  ;;  %v292_v25 = vshrl.u32 %v277_v17, 16 }
  0x16   : > { %v289_v16 = vor.u32 %v288_v9, %v285_v8  ;;  %v374_v19 = vor.u32 %v373_v12, %v370_v11  ;;  %v259_v24 = vld [vmem:[%s744_s27 + $0x4] sm:$0x7]  ;;  %v295_v26 = vshll.u32 %v277_v17, 16  ;;  %v379_v35 = vrot.slane %v377_v27, 4  ;;  %v433_v40 = vld [vmem:[%s760_s30] sm:$0x7] }
  0x17   : > { %v479_v20 = vrot.slane %v477_v13, 4  ;;  %v482_v21 = vrot.slane %v480_v14, 5  ;;  %v265_v29 = vld [vmem:[%s732_s21 + $0x4] sm:$0x7]  ;;  %v294_v33 = vrot.slane %v292_v25, 4  ;;  %v382_v36 = vrot.slane %v380_v30, 5 }
  0x18   : > { %v290_v23 = vrot.slane %v289_v16, 4  ;;  %v375_v28 = vrot.slane %v374_v19, 4  ;;  %v471_v31 = vld [vmem:[%s738_s24 + $0x4] sm:$0xf]  ;;  %v297_v34 = vrot.slane %v295_v26, 5  ;;  %v271_v42 = vmax.bf16 %v265_v29, %v259_v24 }
  0x19   : > { %v486_v37 = vshrl.u32 %v471_v31, 16  ;;  %v489_v38 = vshll.u32 %v471_v31, 16  ;;  %v483_v41 = vor.u32 %v482_v21, %v479_v20  ;;  %v278_v44 = vld [vmem:[%s732_s21 + $0x8] sm:$0xf]  ;;  %v658_v45 = vld [vmem:[%s732_s21 + $0xc] sm:$0xf]  ;;  %v383_v48 = vor.u32 %v382_v36, %v379_v35 }
  0x1a   : > { %v342_v32 = vmax.bf16 %v290_v23, %v270_v15  ;;  %v298_v43 = vor.u32 %v297_v34, %v294_v33  ;;  %v662_v46 = vld [vmem:[%s760_s30 + $0x4] sm:$0x7]  ;;  %v651_v47 = vld [vmem:[%s732_s21 + $0x8] sm:$0x7]  ;;  %v301_v51 = vshrl.u32 %v278_v44, 16  ;;  %v304_v55 = vshll.u32 %v278_v44, 16 }
  0x1b   : > { %v488_v49 = vrot.slane %v486_v37, 4  ;;  %v491_v50 = vrot.slane %v489_v38, 5  ;;  %v260_v54 = vld [vmem:[%s744_s27 + $0x8] sm:$0x7]  ;;  %v386_v56 = vshrl.u32 %v658_v45, 16  ;;  %v384_v57 = vrot.slane %v383_v48, 4 }
  0x1c   : > { %v355_v39 = vmax.bf16 %v650_v18, %v342_v32  ;;  %v299_v53 = vrot.slane %v298_v43, 4  ;;  %v266_v59 = vld [vmem:[%s732_s21 + $0x8] sm:$0x7]  ;;  %v303_v60 = vrot.slane %v301_v51, 4  ;;  %v389_v61 = vshll.u32 %v658_v45, 16 }
  0x1d   : > { %v492_v58 = vor.u32 %v491_v50, %v488_v49  ;;  %v306_v0 = vrot.slane %v304_v55, 5  ;;  %v388_v1 = vrot.slane %v386_v56, 4  ;;  %v472_v2 = vld [vmem:[%s738_s24 + $0x8] sm:$0xf]  ;;  %v458_v3 = vld [vmem:[%s738_s24] sm:$0x7]  ;;  %v272_v11 = vmax.bf16 %v266_v59, %v260_v54 }
  0x1e   : > { %v427_v52 = vmax.bf16 %v375_v28, %v355_v39  ;;  %v343_v63 = vmax.bf16 %v299_v53, %v271_v42  ;;  %v484_v4 = vrot.slane %v483_v41, 4  ;;  %v391_v5 = vrot.slane %v389_v61, 5  ;;  %v434_v10 = vld [vmem:[%s760_s30 + $0x4] sm:$0x7]  ;;  %v279_v13 = vld [vmem:[%s732_s21 + $0xc] sm:$0xf] }
  0x1f   : > { %v495_v6 = vshrl.u32 %v472_v2, 16  ;;  %v498_v7 = vshll.u32 %v472_v2, 16  ;;  %v307_v12 = vor.u32 %v306_v0, %v303_v60  ;;  %v659_v14 = vld [vmem:[%s732_s21 + $0x10] sm:$0xf]  ;;  %v663_v15 = vld [vmem:[%s760_s30 + $0x8] sm:$0x7] }
  0x20   : > { %v439_v62 = vmax.bf16 %v433_v40, %v427_v52  ;;  %v356_v9 = vmax.bf16 %v651_v47, %v343_v63  ;;  %v493_v16 = vrot.slane %v492_v58, 4  ;;  %v652_v17 = vld [vmem:[%s732_s21 + $0xc] sm:$0x7]  ;;  %v392_v18 = vor.u32 %v391_v5, %v388_v1  ;;  %v459_v34 = vld [vmem:[%s738_s24 + $0x4] sm:$0x7] }
  0x21   : > { %v497_v19 = vrot.slane %v495_v6, 4  ;;  %v310_v20 = vshrl.u32 %v279_v13, 16  ;;  %v308_v23 = vrot.slane %v307_v12, 4  ;;  %v261_v24 = vld [vmem:[%s744_s27 + $0xc] sm:$0x7]  ;;  %v313_v26 = vshll.u32 %v279_v13, 16 }
  0x22   : > { %v452_v8 = vmax.bf16 %v662_v46, %v439_v62  ;;  %v428_v22 = vmax.bf16 %v384_v57, %v356_v9  ;;  %v267_v25 = vld [vmem:[%s732_s21 + $0xc] sm:$0x7]  ;;  %v393_v27 = vrot.slane %v392_v18, 4  ;;  %v500_v28 = vrot.slane %v498_v7, 5  ;;  %v280_v41 = vld [vmem:[%s732_s21 + $0x10] sm:$0xf] }
  0x23   : > { %v312_v29 = vrot.slane %v310_v20, 4  ;;  %v395_v30 = vshrl.u32 %v659_v14, 16  ;;  %v473_v31 = vld [vmem:[%s738_s24 + $0xc] sm:$0xf]  ;;  %v344_v35 = vmax.bf16 %v308_v23, %v272_v11  ;;  %v315_v36 = vrot.slane %v313_v26, 5 }
  0x24   : > { %v464_v21 = vmax.bf16 %v458_v3, %v452_v8  ;;  %v440_v33 = vmax.bf16 %v434_v10, %v428_v22  ;;  %v273_v37 = vmax.bf16 %v267_v25, %v261_v24  ;;  %v398_v39 = vshll.u32 %v659_v14, 16  ;;  %v660_v46 = vld [vmem:[%s732_s21 + $0x14] sm:$0xf]  ;;  %v435_v47 = vld [vmem:[%s760_s30 + $0x8] sm:$0x7] }
  0x25   : > { %v397_v38 = vrot.slane %v395_v30, 4  ;;  %v504_v40 = vshrl.u32 %v473_v31, 16  ;;  %v357_v43 = vmax.bf16 %v652_v17, %v344_v35  ;;  %v316_v44 = vor.u32 %v315_v36, %v312_v29  ;;  %v664_v54 = vld [vmem:[%s760_s30 + $0xc] sm:$0x7]  ;;  %v653_v56 = vld [vmem:[%s732_s21 + $0x10] sm:$0x7] }
  0x26   : > { %v536_v32 = vmax.bf16 %v484_v4, %v464_v21  ;;  %v453_v42 = vmax.bf16 %v663_v15, %v440_v33  ;;  %v507_v45 = vshll.u32 %v473_v31, 16  ;;  %v501_v48 = vor.u32 %v500_v28, %v497_v19  ;;  %v474_v62 = vld [vmem:[%s738_s24 + $0x10] sm:$0xf]  ;;  %v460_v1 = vld [vmem:[%s738_s24 + $0x8] sm:$0x7] }
  0x27   : > { %v400_v49 = vrot.slane %v398_v39, 5  ;;  %v506_v50 = vrot.slane %v504_v40, 4  ;;  %v319_v51 = vshrl.u32 %v280_v41, 16  ;;  %v429_v53 = vmax.bf16 %v393_v27, %v357_v43  ;;  %v262_v4 = vld [vmem:[%s744_s27 + $0x10] sm:$0x7] }
  0x28   : > { %543 = vst.msk [vmem:[%s784_s7] sm:$0x7] %vm542_vm0, %v536_v32  ;;  %v465_v52 = vmax.bf16 %v459_v34, %v453_v42  ;;  %v317_v55 = vrot.slane %v316_v44, 4  ;;  %v509_v57 = vrot.slane %v507_v45, 5  ;;  %v322_v60 = vshll.u32 %v280_v41, 16 }
  0x29   : > { %v401_v58 = vor.u32 %v400_v49, %v397_v38  ;;  %v321_v59 = vrot.slane %v319_v51, 4  ;;  %v404_v61 = vshrl.u32 %v660_v46, 16  ;;  %v441_v0 = vmax.bf16 %v435_v47, %v429_v53  ;;  %v268_v5 = vld [vmem:[%s732_s21 + $0x10] sm:$0x7]  ;;  %v281_v10 = vld [vmem:[%s732_s21 + $0x14] sm:$0xf] }
  0x2a   : > { %v537_v63 = vmax.bf16 %v493_v16, %v465_v52  ;;  %v345_v2 = vmax.bf16 %v317_v55, %v273_v37  ;;  %v510_v3 = vor.u32 %v509_v57, %v506_v50  ;;  %v324_v7 = vrot.slane %v322_v60, 5  ;;  %v436_v15 = vld [vmem:[%s760_s30 + $0xc] sm:$0x7]  ;;  %v661_v20 = vld [vmem:[%s732_s21 + $0x18] sm:$0xf] }
  0x2b   : > { %v402_v6 = vrot.slane %v401_v58, 4  ;;  %v406_v8 = vrot.slane %v404_v61, 4  ;;  %v407_v9 = vshll.u32 %v660_v46, 16  ;;  %v454_v11 = vmax.bf16 %v664_v54, %v441_v0  ;;  %v665_v23 = vld [vmem:[%s760_s30 + $0x10] sm:$0x7] }
  0x2c   : > { %544 = vst.msk [vmem:[%s784_s7 + $0x4] sm:$0x7] %vm542_vm0, %v537_v63  ;;  %v502_v12 = vrot.slane %v501_v48, 4  ;;  %v358_v13 = vmax.bf16 %v653_v56, %v345_v2  ;;  %v513_v14 = vshrl.u32 %v474_v62, 16  ;;  %v274_v16 = vmax.bf16 %v268_v5, %v262_v4  ;;  %v263_v25 = vld [vmem:[%s744_s27 + $0x14] sm:$0x7] }
  0x2d   : > { %v325_v17 = vor.u32 %v324_v7, %v321_v59  ;;  %v409_v18 = vrot.slane %v407_v9, 5  ;;  %v516_v19 = vshll.u32 %v474_v62, 16  ;;  %v466_v21 = vmax.bf16 %v460_v1, %v454_v11  ;;  %v269_v30 = vld [vmem:[%s732_s21 + $0x14] sm:$0x7]  ;;  %v461_v38 = vld [vmem:[%s738_s24 + $0xc] sm:$0x7] }
  0x2e   : > { %v430_v22 = vmax.bf16 %v402_v6, %v358_v13  ;;  %v511_v24 = vrot.slane %v510_v3, 4  ;;  %v328_v26 = vshrl.u32 %v281_v10, 16  ;;  %v515_v29 = vrot.slane %v513_v14, 4  ;;  %v654_v34 = vld [vmem:[%s732_s21 + $0x14] sm:$0x7] }
  0x2f   : > { %v326_v27 = vrot.slane %v325_v17, 4  ;;  %v410_v28 = vor.u32 %v409_v18, %v406_v8  ;;  %v331_v31 = vshll.u32 %v281_v10, 16  ;;  %v538_v32 = vmax.bf16 %v502_v12, %v466_v21  ;;  %v475_v37 = vld [vmem:[%s738_s24 + $0x14] sm:$0xf]  ;;  %v437_v52 = vld [vmem:[%s760_s30 + $0x10] sm:$0x7] }
  0x30   : > { %v442_v33 = vmax.bf16 %v436_v15, %v430_v22  ;;  %v330_v35 = vrot.slane %v328_v26, 4  ;;  %v413_v36 = vshrl.u32 %v661_v20, 16  ;;  %v518_v41 = vrot.slane %v516_v19, 5  ;;  %v666_v58 = vld [vmem:[%s760_s30 + $0x14] sm:$0x7] }
  0x31   : > { %v346_v39 = vmax.bf16 %v326_v27, %v274_v16  ;;  %v411_v40 = vrot.slane %v410_v28, 4  ;;  %v333_v42 = vrot.slane %v331_v31, 5  ;;  %545 = vst.msk [vmem:[%s784_s7 + $0x8] sm:$0x7] %vm542_vm0, %v538_v32  ;;  %v275_v44 = vmax.bf16 %v269_v30, %v263_v25  ;;  %v655_v59 = vld [vmem:[%s732_s21 + $0x18] sm:$0x7] }
  0x32   : > { %v455_v43 = vmax.bf16 %v665_v23, %v442_v33  ;;  %v415_v45 = vrot.slane %v413_v36, 4  ;;  %v416_v46 = vshll.u32 %v661_v20, 16  ;;  %v522_v49 = vshrl.u32 %v475_v37, 16  ;;  %v462_v1 = vld [vmem:[%s738_s24 + $0x10] sm:$0x7] }
  0x33   : > { %v359_v47 = vmax.bf16 %v654_v34, %v346_v39  ;;  %v334_v48 = vor.u32 %v333_v42, %v330_v35  ;;  %v525_v50 = vshll.u32 %v475_v37, 16  ;;  %v519_v55 = vor.u32 %v518_v41, %v515_v29  ;;  %v438_v6 = vld [vmem:[%s760_s30 + $0x14] sm:$0x7]  ;;  %v667_v10 = vld [vmem:[%s760_s30 + $0x18] sm:$0x7] }
  0x34   : > { %v467_v51 = vmax.bf16 %v461_v38, %v455_v43  ;;  %v418_v53 = vrot.slane %v416_v46, 5  ;;  %v524_v63 = vrot.slane %v522_v49, 4  ;;  %v463_v13 = vld [vmem:[%s738_s24 + $0x14] sm:$0x7] }
  0x35   : > { %v431_v54 = vmax.bf16 %v411_v40, %v359_v47  ;;  %v335_v56 = vrot.slane %v334_v48, 4  ;;  %v527_v0 = vrot.slane %v525_v50, 5  ;;  %v520_v4 = vrot.slane %v519_v55, 4 }
  0x36   : > { %v539_v57 = vmax.bf16 %v511_v24, %v467_v51  ;;  %v419_v60 = vor.u32 %v418_v53, %v415_v45 }
  0x37   : > { %v443_v61 = vmax.bf16 %v437_v52, %v431_v54  ;;  %v347_v62 = vmax.bf16 %v335_v56, %v275_v44  ;;  %v528_v9 = vor.u32 %v527_v0, %v524_v63 }
  0x38   : > { %546 = vst.msk [vmem:[%s784_s7 + $0xc] sm:$0x7] %vm542_vm0, %v539_v57  ;;  %v420_v2 = vrot.slane %v419_v60, 4 }
  0x39   : > { %v456_v3 = vmax.bf16 %v666_v58, %v443_v61  ;;  %v360_v5 = vmax.bf16 %v655_v59, %v347_v62  ;;  %v529_v15 = vrot.slane %v528_v9, 4 }
  0x3b   : > { %v468_v7 = vmax.bf16 %v462_v1, %v456_v3  ;;  %v432_v8 = vmax.bf16 %v420_v2, %v360_v5 }
  0x3d   : > { %v540_v11 = vmax.bf16 %v520_v4, %v468_v7  ;;  %v444_v12 = vmax.bf16 %v438_v6, %v432_v8 }
  0x3f   : > { %547 = vst.msk [vmem:[%s784_s7 + $0x10] sm:$0x7] %vm542_vm0, %v540_v11  ;;  %v457_v14 = vmax.bf16 %v667_v10, %v444_v12 }
  0x41   : > { %v469_v16 = vmax.bf16 %v463_v13, %v457_v14 }
  0x43   : > { %v541_v17 = vmax.bf16 %v529_v15, %v469_v16 }
  0x45   : > { %548 = vst.msk [vmem:[%s784_s7 + $0x14] sm:$0x7] %vm542_vm0, %v541_v17 }
  0x46 PF: > { %s14_s15 = sadd.s32 1, %s686_s15  }
  0x47   : > { %p11_p4 = scmp.ge.s32.totalorder %s14_s15, 4  }
  0x49   :  { %13 = sbr.rel (!%p11_p4) target bundleno = 1 (0x1), region = 77 }

// kernel: inception_stem.16
= control target key start
LH: loop header
LB: loop body
LE: loop exit
PB: predicated region body
PF: predicated region fallthrough
CT: control target
= control target key end

     0   :  { %v412_v0 = vmov 0   ;;  %vm153_vm0 = vcmask 261120   ;;  %s513_s1 = inlined_call_operand.vmem [shape: bf16[160,128], index: 1, kind: input, shape index: {}]   ;;  %s514_s0 = inlined_call_operand.vmem [shape: bf16[72,160], index: 0, kind: input, shape index: {}]   ;;  %s515_s2 = inlined_call_operand.vmem [shape: f32[1,128], index: 2, kind: input, shape index: {}]   ;;  %s516_s3 = inlined_call_operand.vmem [shape: bf16[72,128], index: 3, kind: output, shape index: {}]  }
   0x1   :  { %169 = vmatprep.subr.bf16.mxu0 %v412_v0  ;;  %v388_v1 = vld [vmem:[%s513_s1] sm:$0xff]   ;;  %367 = vmatprep.subr.bf16.mxu1 %v412_v0  ;;  %v389_v2 = vld [vmem:[%s513_s1 + $0x8] sm:$0xff]   ;;  %v390_v3 = vld [vmem:[%s513_s1 + $0x10] sm:$0xff]  }
   0x2   :  { %170 = vmatpush1.bf16.msra.mxu0 %v388_v1  ;;  %377 = vmatpush1.bf16.msra.mxu1 %v388_v1  ;;  %v391_v4 = vld [vmem:[%s513_s1 + $0x18] sm:$0xff]   ;;  %v400_v5 = vld [vmem:[%s514_s0 + $0x4] ss:$8 sps:$4 sm:$0xff]   ;;  %v394_v9 = vld [vmem:[%s513_s1 + $0x30] sm:$0xff]  }
   0x3   :  { %171 = vmatprep.subr.bf16.mxu0 %v412_v0  ;;  %368 = vmatprep.subr.bf16.mxu1 %v412_v0  ;;  %v403_v6 = vld [vmem:[%s514_s0 + $0x34] ss:$8 sps:$4 sm:$0xff]   ;;  %v392_v7 = vld [vmem:[%s513_s1 + $0x20] sm:$0xff]   ;;  %v393_v8 = vld [vmem:[%s513_s1 + $0x28] sm:$0xff]  }
   0x4   :  { %321 = vmatprep.mubr.msk.bf16.mxu0 %vm153_vm0, %v400_v5  ;;  %324 = vmatprep.mubr.msk.bf16.mxu1 %vm153_vm0, %v403_v6  ;;  %v395_v10 = vld [vmem:[%s513_s1 + $0x38] sm:$0xff]   ;;  %v396_v11 = vld [vmem:[%s513_s1 + $0x40] sm:$0xff]   ;;  %v397_v12 = vld [vmem:[%s513_s1 + $0x48] sm:$0xff]  }
   0x5   :  { %v23_v13 = vld [vmem:[%s514_s0 + $0x40] sm:$0xff]  ;;  %v401_v15 = vld [vmem:[%s514_s0 + $0x30] ss:$8 sps:$4 sm:$0xff]   ;;  %v404_v16 = vld [vmem:[%s514_s0 + $0x14] ss:$8 sps:$4 sm:$0xff]  }
   0x6   :  { %172 = vmatpush1.bf16.msra.mxu0 %v389_v2  ;;  %378 = vmatpush1.bf16.msra.mxu1 %v389_v2  ;;  %v398_v14 = vld [vmem:[%s514_s0] ss:$8 sps:$4 sm:$0xff]   ;;  %v310_v17 = vcombine.high %v23_v13, %v23_v13  ;;  %v406_v18 = vld [vmem:[%s514_s0 + $0x10] ss:$8 sps:$4 sm:$0xff]   ;;  %v309_v19 = vcombine.low %v23_v13, %v23_v13  ;;  %v408_v20 = vld [vmem:[%s514_s0 + $0x24] ss:$8 sps:$4 sm:$0xff]  }
   0x7   :  { %173 = vmatprep.subr.bf16.mxu0 %v412_v0  ;;  %369 = vmatprep.subr.bf16.mxu1 %v412_v0  ;;  %v411_v21 = vld [vmem:[%s514_s0 + $0x20] ss:$8 sps:$4 sm:$0xff]  }
   0x8   :  { %v300_v22 = vld [vmem:[%s515_s2] ss:$0 sm:$0xff] }
   0xa   :  { %174 = vmatpush1.bf16.msra.mxu0 %v390_v3  ;;  %379 = vmatpush1.bf16.msra.mxu1 %v390_v3 }
   0xb   :  { %175 = vmatprep.subr.bf16.mxu0 %v412_v0  ;;  %370 = vmatprep.subr.bf16.mxu1 %v412_v0 }
   0xe   :  { %176 = vmatpush1.bf16.msra.mxu0 %v391_v4  ;;  %380 = vmatpush1.bf16.msra.mxu1 %v391_v4 }
   0xf   :  { %177 = vmatprep.subr.bf16.mxu0 %v412_v0  ;;  %371 = vmatprep.subr.bf16.mxu1 %v412_v0 }
  0x12   :  { %178 = vmatpush1.bf16.msra.mxu0 %v392_v7  ;;  %381 = vmatpush1.bf16.msra.mxu1 %v392_v7 }
  0x13   :  { %179 = vmatprep.subr.bf16.mxu0 %v412_v0  ;;  %372 = vmatprep.subr.bf16.mxu1 %v412_v0 }
  0x16   :  { %180 = vmatpush1.bf16.msra.mxu0 %v393_v8  ;;  %382 = vmatpush1.bf16.msra.mxu1 %v393_v8 }
  0x17   :  { %181 = vmatprep.subr.bf16.mxu0 %v412_v0  ;;  %373 = vmatprep.subr.bf16.mxu1 %v412_v0 }
  0x1a   :  { %182 = vmatpush1.bf16.msra.mxu0 %v394_v9  ;;  %383 = vmatpush1.bf16.msra.mxu1 %v394_v9 }
  0x1b   :  { %183 = vmatprep.subr.bf16.mxu0 %v412_v0  ;;  %374 = vmatprep.subr.bf16.mxu1 %v412_v0 }
  0x1e   :  { %184 = vmatpush1.bf16.msra.mxu0 %v395_v10  ;;  %384 = vmatpush1.bf16.msra.mxu1 %v395_v10 }
  0x1f   :  { %185 = vmatprep.subr.bf16.mxu0 %v412_v0  ;;  %375 = vmatprep.subr.bf16.mxu1 %v412_v0 }
  0x22   :  { %186 = vmatpush1.bf16.msra.mxu0 %v396_v11  ;;  %385 = vmatpush1.bf16.msra.mxu1 %v396_v11 }
  0x23   :  { %187 = vmatprep.subr.bf16.mxu0 %v412_v0  ;;  %376 = vmatprep.subr.bf16.mxu1 %v412_v0 }
  0x26   :  { %188 = vmatpush1.bf16.msra.mxu0 %v397_v12  ;;  %386 = vmatpush1.bf16.msra.mxu1 %v397_v12 }
  0x29   :  { %202 = vmatmul.mubr.bf16.vlgmr.msra.gmra.mrb[0].mxu0 %v398_v14  ;;  %226 = vmatmul.mubr.bf16.vlgmr.msra.gmra.mrb[0].mxu1 %v401_v15 }
  0x2a   :  { %322 = vmatprep.mubr.msk.bf16.mxu0 %vm153_vm0, %v404_v16  ;;  %325 = vmatprep.mubr.msk.bf16.mxu1 %vm153_vm0, %v310_v17 }
  0x31   :  { %210 = vmatmul.mubr.bf16.gmra.mrb[4].mxu0 %v406_v18  ;;  %234 = vmatmul.mubr.bf16.gmra.mrb[4].mxu1 %v309_v19 }
  0x32   :  { %323 = vmatprep.mubr.msk.bf16.mxu0 %vm153_vm0, %v408_v20 }
  0x39   :  { %218 = vmatmul.mubr.bf16.gmra.mrb[8].mxu0 %v411_v21 }
  0xfc   :  { %v203_v23 = vpop.f32.mrb[0].mxu0  ;;  %v227_v24 = vpop.f32.mrb[0].mxu1 }
  0xfd   :  { %v204_v25 = vadd.f32 %v300_v22, %v203_v23  ;;  %v205_v26 = vpop.f32.mrb[1].mxu0  ;;  %v228_v27 = vadd.f32 %v300_v22, %v227_v24  ;;  %v229_v28 = vpop.f32.mrb[1].mxu1 }
  0xfe   :  { %v206_v29 = vpop.f32.mrb[2].mxu0  ;;  %v230_v30 = vpop.f32.mrb[2].mxu1 }
  0xff   :  { %v207_v31 = vadd.f32 %v300_v22, %v206_v29  ;;  %v208_v32 = vpop.f32.mrb[3].mxu0  ;;  %v247_v33 = vmax.f32 %v228_v27, 0.0  ;;  %v231_v34 = vadd.f32 %v300_v22, %v230_v30  ;;  %v232_v35 = vpop.f32.mrb[3].mxu1  ;;  %v241_v36 = vmax.f32 %v204_v25, 0.0 }
 0x101   :  { %v242_v37 = vmax.f32 %v207_v31, 0.0  ;;  %v248_v38 = vmax.f32 %v231_v34, 0.0 }
 0x103   :  { %v347_v39 = vpack.c.bf16 %v242_v37, %v241_v36  ;;  %v362_v40 = vpack.c.bf16 %v248_v38, %v247_v33 }
 0x104   :  { %v211_v41 = vpop.f32.mrb[4].mxu0  ;;  %v235_v42 = vpop.f32.mrb[4].mxu1 }
 0x105   :  { %348 = vst [vmem:[%s516_s3] sm:$0xff] %v347_v39   ;;  %v212_v43 = vadd.f32 %v300_v22, %v211_v41  ;;  %v213_v44 = vpop.f32.mrb[5].mxu0  ;;  %366 = vst [vmem:[%s516_s3 + $0x18] sm:$0xff] %v362_v40   ;;  %v236_v45 = vadd.f32 %v300_v22, %v235_v42  ;;  %v237_v46 = vpop.f32.mrb[5].mxu1 }
 0x106   :  { %v214_v47 = vpop.f32.mrb[6].mxu0  ;;  %v238_v48 = vpop.f32.mrb[6].mxu1 }
 0x107   :  { %v215_v49 = vadd.f32 %v300_v22, %v214_v47  ;;  %v216_v50 = vpop.f32.mrb[7].mxu0  ;;  %v249_v51 = vmax.f32 %v236_v45, 0.0  ;;  %v239_v52 = vpop.f32.mrb[7].mxu1  ;;  %v243_v53 = vmax.f32 %v212_v43, 0.0 }
 0x109   :  { %v244_v54 = vmax.f32 %v215_v49, 0.0  ;;  %v343_v55 = vpack.c.bf16 %v249_v51, %v249_v51 }
 0x10b   :  { %v352_v56 = vpack.c.bf16 %v244_v54, %v243_v53  ;;  %295 = vst [vmem:[%s516_s3 + $0x20] sm:$0xf] %v343_v55 }
 0x10c   :  { %v219_v57 = vpop.f32.mrb[8].mxu0 }
 0x10d   :  { %364 = vst [vmem:[%s516_s3 + $0x8] sm:$0xff] %v352_v56   ;;  %v220_v58 = vadd.f32 %v300_v22, %v219_v57  ;;  %v221_v59 = vpop.f32.mrb[9].mxu0 }
 0x10e   :  { %v222_v60 = vpop.f32.mrb[10].mxu0 }
 0x10f   :  { %v223_v61 = vadd.f32 %v300_v22, %v222_v60  ;;  %v224_v62 = vpop.f32.mrb[11].mxu0  ;;  %v245_v63 = vmax.f32 %v220_v58, 0.0 }
 0x111   :  { %v246_v0 = vmax.f32 %v223_v61, 0.0 }
 0x113   :  { %v357_v1 = vpack.c.bf16 %v246_v0, %v245_v63 }
 0x115   :  { %365 = vst [vmem:[%s516_s3 + $0x10] sm:$0xff] %v357_v1  }

// kernel: inception_stem.15
= control target key start
LH: loop header
LB: loop body
LE: loop exit
PB: predicated region body
PF: predicated region fallthrough
CT: control target
= control target key end

     0   :  { %v1039_v34 = vmov 0.0   ;;  %vm1040_vm0 = vmmov 0   ;;  %vm454_vm1 = vcmask 523264   ;;  %vm732_vm2 = vcmask 781312   ;;  %s1319_s1 = inlined_call_operand.vmem [shape: bf16[576,96], index: 1, kind: input, shape index: {}]   ;;  %s1320_s0 = inlined_call_operand.vmem [shape: bf16[72,576], index: 0, kind: input, shape index: {}]   ;;  %s1321_s2 = inlined_call_operand.vmem [shape: f32[1,96], index: 2, kind: input, shape index: {}]   ;;  %s1322_s3 = inlined_call_operand.vmem [shape: bf16[72,96], index: 3, kind: output, shape index: {}]  }
   0x1   :  { %v970_v0 = vld [vmem:[%s1319_s1 + $0x40] sm:$0xff]   ;;  %v974_v4 = vld [vmem:[%s1319_s1 + $0x48] sm:$0xff]   ;;  %v978_v8 = vld [vmem:[%s1319_s1 + $0x50] sm:$0xff]  }
   0x2   :  { %v971_v1 = vld [vmem:[%s1319_s1 + $0xc0] sm:$0xff]   ;;  %831 = vmatprep.subr.bf16.mxu0 %v970_v0  ;;  %v975_v5 = vld [vmem:[%s1319_s1 + $0xc8] sm:$0xff]   ;;  %v979_v9 = vld [vmem:[%s1319_s1 + $0xd0] sm:$0xff]  }
   0x3   :  { %v972_v2 = vld [vmem:[%s1319_s1] sm:$0xff]   ;;  %877 = vmatprep.subr.bf16.mxu1 %v971_v1  ;;  %v976_v6 = vld [vmem:[%s1319_s1 + $0x8] sm:$0xff]   ;;  %v980_v10 = vld [vmem:[%s1319_s1 + $0x10] sm:$0xff]  }
   0x4   :  { %v973_v3 = vld [vmem:[%s1319_s1 + $0x80] sm:$0xff]   ;;  %832 = vmatpush3.bf16.msra.mxu0 %v972_v2  ;;  %v977_v7 = vld [vmem:[%s1319_s1 + $0x88] sm:$0xff]   ;;  %v981_v11 = vld [vmem:[%s1319_s1 + $0x90] sm:$0xff]  }
   0x5   :  { %878 = vmatpush3.bf16.msra.mxu1 %v973_v3  ;;  %833 = vmatprep.subr.bf16.mxu0 %v974_v4  ;;  %v982_v12 = vld [vmem:[%s1319_s1 + $0x58] sm:$0xff]   ;;  %v986_v16 = vld [vmem:[%s1319_s1 + $0x60] sm:$0xff]   ;;  %v990_v20 = vld [vmem:[%s1319_s1 + $0x68] sm:$0xff]  }
   0x6   :  { %879 = vmatprep.subr.bf16.mxu1 %v975_v5  ;;  %v983_v13 = vld [vmem:[%s1319_s1 + $0xd8] sm:$0xff]   ;;  %v987_v17 = vld [vmem:[%s1319_s1 + $0xe0] sm:$0xff]   ;;  %v991_v21 = vld [vmem:[%s1319_s1 + $0xe8] sm:$0xff]  }
   0x7   :  { %v984_v14 = vld [vmem:[%s1319_s1 + $0x18] sm:$0xff]   ;;  %v988_v18 = vld [vmem:[%s1319_s1 + $0x20] sm:$0xff]   ;;  %v992_v22 = vld [vmem:[%s1319_s1 + $0x28] sm:$0xff]  }
   0x8   :  { %834 = vmatpush3.bf16.msra.mxu0 %v976_v6  ;;  %v985_v15 = vld [vmem:[%s1319_s1 + $0x98] sm:$0xff]   ;;  %v989_v19 = vld [vmem:[%s1319_s1 + $0xa0] sm:$0xff]   ;;  %v993_v23 = vld [vmem:[%s1319_s1 + $0xa8] sm:$0xff]  }
   0x9   :  { %880 = vmatpush3.bf16.msra.mxu1 %v977_v7  ;;  %835 = vmatprep.subr.bf16.mxu0 %v978_v8  ;;  %v994_v24 = vld [vmem:[%s1319_s1 + $0x70] sm:$0xff]   ;;  %v998_v28 = vld [vmem:[%s1319_s1 + $0x78] sm:$0xff]   ;;  %v1007_v36 = vld [vmem:[%s1320_s0 + $0xc] ss:$20 sps:$4 sm:$0xff]  }
   0xa   :  { %881 = vmatprep.subr.bf16.mxu1 %v979_v9  ;;  %v995_v25 = vld [vmem:[%s1319_s1 + $0xf0] sm:$0xff]   ;;  %v999_v29 = vld [vmem:[%s1319_s1 + $0xf8] sm:$0xff]   ;;  %v1008_v37 = vld [vmem:[%s1319_s1 + $0x100] sm:$0xff]   ;;  %574 = vmatprep.mubr.bf16.mxu1 %v1007_v36 }
   0xb   :  { %v996_v26 = vld [vmem:[%s1319_s1 + $0x30] sm:$0xff]   ;;  %v1000_v30 = vld [vmem:[%s1319_s1 + $0x38] sm:$0xff]   ;;  %v1009_v38 = vld [vmem:[%s1320_s0 + $0x2c] ss:$20 sps:$4 sm:$0xff]  }
   0xc   :  { %836 = vmatpush3.bf16.msra.mxu0 %v980_v10  ;;  %v997_v27 = vld [vmem:[%s1319_s1 + $0xb0] sm:$0xff]   ;;  %v1001_v31 = vld [vmem:[%s1319_s1 + $0xb8] sm:$0xff]   ;;  %v1015_v40 = vld [vmem:[%s1319_s1 + $0x108] sm:$0xff]  }
   0xd   :  { %882 = vmatpush3.bf16.msra.mxu1 %v981_v11  ;;  %837 = vmatprep.subr.bf16.mxu0 %v982_v12  ;;  %v1002_v32 = vld [vmem:[%s1320_s0] ss:$20 sps:$4 sm:$0xff]   ;;  %v1004_v33 = vld [vmem:[%s1320_s0 + $0x4] ss:$20 sps:$4 sm:$0xff]   ;;  %v1005_v35 = vld [vmem:[%s1320_s0 + $0x8] ss:$20 sps:$4 sm:$0xff]  }
   0xe   :  { %883 = vmatprep.subr.bf16.mxu1 %v983_v13  ;;  %502 = vmatprep.mubr.bf16.mxu0 %v1004_v33  ;;  %v1011_v39 = vld [vmem:[%s1320_s0 + $0x34] ss:$20 sps:$4 sm:$0xff]   ;;  %v1014_v42 = vld [vmem:[%s1320_s0 + $0x30] ss:$20 sps:$4 sm:$0xff]   ;;  %v1031_v47 = vld [vmem:[%s1319_s1 + $0x118] sm:$0xff]  }
   0xf   :  { %v1013_v41 = vld [vmem:[%s1320_s0 + $0x28] ss:$20 sps:$4 sm:$0xff]   ;;  %v1022_v45 = vld [vmem:[%s1319_s1 + $0x110] sm:$0xff]   ;;  %v1021_v48 = vld [vmem:[%s1320_s0 + $0x58] ss:$20 sps:$4 sm:$0xff]  }
  0x10   :  { %838 = vmatpush3.bf16.msra.mxu0 %v984_v14  ;;  %v1016_v43 = vld [vmem:[%s1320_s0 + $0x54] ss:$20 sps:$4 sm:$0xff]   ;;  %v1018_v44 = vld [vmem:[%s1320_s0 + $0x5c] ss:$20 sps:$4 sm:$0xff]   ;;  %v1025_v50 = vld [vmem:[%s1320_s0 + $0x84] ss:$20 sps:$4 sm:$0xff]  }
  0x11   :  { %884 = vmatpush3.bf16.msra.mxu1 %v985_v15  ;;  %839 = vmatprep.subr.bf16.mxu0 %v986_v16  ;;  %v1020_v46 = vld [vmem:[%s1320_s0 + $0x50] ss:$20 sps:$4 sm:$0xff]   ;;  %v40_v52 = vld [vmem:[%s1320_s0 + $0xa8] sm:$0xff]  ;;  %v1028_v54 = vld [vmem:[%s1320_s0 + $0x80] ss:$20 sps:$4 sm:$0xff]  }
  0x12   :  { %885 = vmatprep.subr.bf16.mxu1 %v987_v17  ;;  %v1023_v49 = vld [vmem:[%s1320_s0 + $0x7c] ss:$20 sps:$4 sm:$0xff]   ;;  %v39_v51 = vld [vmem:[%s1320_s0 + $0xa0] sm:$0xff]  ;;  %v1027_v53 = vld [vmem:[%s1320_s0 + $0x78] ss:$20 sps:$4 sm:$0xff]   ;;  %v770_v56 = vcombine.high %v40_v52, %v40_v52  ;;  %v769_v58 = vcombine.low %v40_v52, %v40_v52 }
  0x13   :  { %v768_v55 = vcombine.high %v39_v51, %v39_v51  ;;  %v767_v57 = vcombine.low %v39_v51, %v39_v51  ;;  %v1034_v59 = vld [vmem:[%s1320_s0 + $0x10] ss:$20 sps:$4 sm:$0xff]   ;;  %v1035_v60 = vld [vmem:[%s1320_s0 + $0x88] ss:$20 sps:$4 sm:$0xff]   ;;  %v1036_v61 = vld [vmem:[%s1320_s0 + $0x38] ss:$20 sps:$4 sm:$0xff]  }
  0x14   :  { %840 = vmatpush3.bf16.msra.mxu0 %v988_v18  ;;  %v1037_v62 = vld [vmem:[%s1320_s0 + $0xb0] ss:$0 sps:$4 sm:$0xff]   ;;  %v1038_v63 = vld [vmem:[%s1320_s0 + $0x60] ss:$20 sps:$4 sm:$0xff]  }
  0x15   :  { %886 = vmatpush3.bf16.msra.mxu1 %v989_v19  ;;  %841 = vmatprep.subr.bf16.mxu0 %v990_v20  ;;  %v1254_v1 = vld [vmem:[%s1321_s2] ss:$0 sm:$0xff] }
  0x16   :  { %887 = vmatprep.subr.bf16.mxu1 %v991_v21 }
  0x18   :  { %842 = vmatpush3.bf16.msra.mxu0 %v992_v22 }
  0x19   :  { %888 = vmatpush3.bf16.msra.mxu1 %v993_v23  ;;  %843 = vmatprep.subr.bf16.mxu0 %v994_v24 }
  0x1a   :  { %889 = vmatprep.subr.bf16.mxu1 %v995_v25 }
  0x1c   :  { %844 = vmatpush3.bf16.msra.mxu0 %v996_v26 }
  0x1d   :  { %890 = vmatpush3.bf16.msra.mxu1 %v997_v27  ;;  %845 = vmatprep.subr.bf16.mxu0 %v998_v28 }
  0x1e   :  { %891 = vmatprep.subr.bf16.mxu1 %v999_v29 }
  0x20   :  { %846 = vmatpush3.bf16.msra.mxu0 %v1000_v30 }
  0x21   :  { %892 = vmatpush3.bf16.msra.mxu1 %v1001_v31  ;;  %932 = vmatprep.subr.bf16.mxu0 %v1039_v34 }
  0x22   :  { %960 = vmatprep.subr.bf16.mxu1 %v1039_v34 }
  0x23   :  { %503 = vmatmul.mubr.bf16.vlgmr.msra.gmra.mrb[0].mxu0 %v1002_v32 }
  0x24   :  { %575 = vmatmul.mubr.bf16.vlgmr.msra.gmra.mrb[0].mxu1 %v1005_v35  ;;  %933 = vmatpush3.bf16.msra.mxu0 %v1008_v37 }
  0x25   :  { %510 = vmatprep.mubr.bf16.mxu0 %v1009_v38  ;;  %934 = vmatprep.subr.bf16.mxu0 %v1039_v34 }
  0x26   :  { %582 = vmatprep.mubr.bf16.mxu1 %v1011_v39  ;;  %964 = vmatpush3.bf16.msra.mxu1 %v1008_v37 }
  0x27   :  { %961 = vmatprep.subr.bf16.mxu1 %v1039_v34 }
  0x28   :  { %935 = vmatpush3.bf16.msra.mxu0 %v1015_v40 }
  0x29   :  { %936 = vmatprep.subr.bf16.mxu0 %v1039_v34 }
  0x2a   :  { %965 = vmatpush3.bf16.msra.mxu1 %v1015_v40 }
  0x2b   :  { %511 = vmatmul.mubr.bf16.gmra.mrb[4].mxu0 %v1013_v41  ;;  %962 = vmatprep.subr.bf16.mxu1 %v1039_v34 }
  0x2c   :  { %583 = vmatmul.mubr.bf16.gmra.mrb[4].mxu1 %v1014_v42  ;;  %518 = vmatprep.mubr.bf16.mxu0 %v1016_v43 }
  0x2d   :  { %590 = vmatprep.mubr.bf16.mxu1 %v1018_v44  ;;  %937 = vmatpush3.bf16.msra.mxu0 %v1022_v45 }
  0x2e   :  { %938 = vmatprep.subr.bf16.mxu0 %v1039_v34  ;;  %966 = vmatpush3.bf16.msra.mxu1 %v1022_v45 }
  0x2f   :  { %963 = vmatprep.subr.bf16.mxu1 %v1039_v34 }
  0x31   :  { %939 = vmatpush3.bf16.msra.mxu0 %v1031_v47 }
  0x32   :  { %967 = vmatpush3.bf16.msra.mxu1 %v1031_v47 }
  0x33   :  { %519 = vmatmul.mubr.bf16.gmra.mrb[8].mxu0 %v1020_v46 }
  0x34   :  { %591 = vmatmul.mubr.bf16.gmra.mrb[8].mxu1 %v1021_v48  ;;  %526 = vmatprep.mubr.bf16.mxu0 %v1023_v49 }
  0x35   :  { %598 = vmatprep.mubr.bf16.mxu1 %v1025_v50 }
  0x3b   :  { %527 = vmatmul.mubr.bf16.gmra.mrb[12].mxu0 %v1027_v53 }
  0x3c   :  { %599 = vmatmul.mubr.bf16.gmra.mrb[12].mxu1 %v1028_v54  ;;  %534 = vmatprep.mubr.bf16.mxu0 %v768_v55 }
  0x3d   :  { %606 = vmatprep.mubr.bf16.mxu1 %v770_v56 }
  0x43   :  { %535 = vmatmul.mubr.bf16.gmra.mrb[16].mxu0 %v767_v57 }
  0x44   :  { %607 = vmatmul.mubr.bf16.gmra.mrb[16].mxu1 %v769_v58  ;;  %940 = vmatprep.mubr.msk.bf16.mxu0 %vm1040_vm0, %v1039_v34 }
  0x45   :  { %952 = vmatprep.mubr.msk.bf16.mxu1 %vm1040_vm0, %v1039_v34 }
  0x4b   :  { %941 = vmatmul.mubr.msk.bf16.vlgmr.msra.gmra.mrb[20].mxu0 %vm454_vm1, %v1034_v59 }
  0x4c   :  { %953 = vmatmul.mubr.msk.bf16.vlgmr.msra.gmra.mrb[20].mxu1 %vm454_vm1, %v1035_v60  ;;  %944 = vmatprep.mubr.msk.bf16.mxu0 %vm1040_vm0, %v1039_v34 }
  0x4d   :  { %956 = vmatprep.mubr.msk.bf16.mxu1 %vm1040_vm0, %v1039_v34 }
  0x53   :  { %945 = vmatmul.mubr.msk.bf16.gmra.mrb[24].mxu0 %vm454_vm1, %v1036_v61 }
  0x54   :  { %957 = vmatmul.mubr.msk.bf16.gmra.mrb[24].mxu1 %vm454_vm1, %v1037_v62  ;;  %948 = vmatprep.mubr.msk.bf16.mxu0 %vm1040_vm0, %v1039_v34 }
  0x5b   :  { %949 = vmatmul.mubr.msk.bf16.gmra.mrb[28].mxu0 %vm454_vm1, %v1038_v63 }
  0xf6   :  { %v847_v0 = vpop.f32.mrb[0].mxu0 }
  0xf7   :  { %v848_v2 = vpop.f32.mrb[1].mxu0  ;;  %v893_v3 = vpop.f32.mrb[0].mxu1 }
  0xf8   :  { %v849_v4 = vadd.f32 %v848_v2, %v847_v0  ;;  %v850_v5 = vpop.f32.mrb[2].mxu0  ;;  %v894_v6 = vpop.f32.mrb[1].mxu1 }
  0xf9   :  { %v851_v7 = vpop.f32.mrb[3].mxu0  ;;  %v895_v8 = vadd.f32 %v894_v6, %v893_v3  ;;  %v896_v9 = vpop.f32.mrb[2].mxu1 }
  0xfa   :  { %v505_v10 = vadd.f32 %v849_v4, %v1254_v1  ;;  %v852_v11 = vadd.f32 %v851_v7, %v850_v5  ;;  %v897_v12 = vpop.f32.mrb[3].mxu1 }
  0xfb   :  { %v898_v13 = vadd.f32 %v897_v12, %v896_v9 }
  0xfc   :  { %v508_v14 = vadd.f32 %v852_v11, %v1254_v1  ;;  %v1258_v15 = vadd.f32 %v895_v8, %v505_v10 }
  0xfe   :  { %v853_v16 = vpop.f32.mrb[4].mxu0  ;;  %v1260_v17 = vadd.f32 %v898_v13, %v508_v14 }
  0xff   :  { %v854_v18 = vpop.f32.mrb[5].mxu0  ;;  %v899_v19 = vpop.f32.mrb[4].mxu1 }
 0x100   :  { %v855_v20 = vadd.f32 %v854_v18, %v853_v16  ;;  %v856_v21 = vpop.f32.mrb[6].mxu0  ;;  %v900_v22 = vpop.f32.mrb[5].mxu1 }
 0x101   :  { %v857_v23 = vpop.f32.mrb[7].mxu0  ;;  %v901_v24 = vadd.f32 %v900_v22, %v899_v19  ;;  %v902_v25 = vpop.f32.mrb[6].mxu1 }
 0x102   :  { %v513_v26 = vadd.f32 %v855_v20, %v1254_v1  ;;  %v858_v27 = vadd.f32 %v857_v23, %v856_v21  ;;  %v903_v28 = vpop.f32.mrb[7].mxu1 }
 0x103   :  { %v904_v29 = vadd.f32 %v903_v28, %v902_v25 }
 0x104   :  { %v516_v30 = vadd.f32 %v858_v27, %v1254_v1  ;;  %v1264_v31 = vadd.f32 %v901_v24, %v513_v26 }
 0x106   :  { %v859_v32 = vpop.f32.mrb[8].mxu0  ;;  %v1266_v33 = vadd.f32 %v904_v29, %v516_v30 }
 0x107   :  { %v860_v34 = vpop.f32.mrb[9].mxu0  ;;  %v905_v35 = vpop.f32.mrb[8].mxu1 }
 0x108   :  { %v861_v36 = vadd.f32 %v860_v34, %v859_v32  ;;  %v862_v37 = vpop.f32.mrb[10].mxu0  ;;  %v906_v38 = vpop.f32.mrb[9].mxu1 }
 0x109   :  { %v863_v39 = vpop.f32.mrb[11].mxu0  ;;  %v907_v40 = vadd.f32 %v906_v38, %v905_v35  ;;  %v908_v41 = vpop.f32.mrb[10].mxu1 }
 0x10a   :  { %v521_v42 = vadd.f32 %v861_v36, %v1254_v1  ;;  %v864_v43 = vadd.f32 %v863_v39, %v862_v37  ;;  %v909_v44 = vpop.f32.mrb[11].mxu1 }
 0x10b   :  { %v910_v45 = vadd.f32 %v909_v44, %v908_v41 }
 0x10c   :  { %v524_v46 = vadd.f32 %v864_v43, %v1254_v1  ;;  %v1270_v47 = vadd.f32 %v907_v40, %v521_v42 }
 0x10e   :  { %v865_v48 = vpop.f32.mrb[12].mxu0  ;;  %v1272_v49 = vadd.f32 %v910_v45, %v524_v46 }
 0x10f   :  { %v866_v50 = vpop.f32.mrb[13].mxu0  ;;  %v911_v51 = vpop.f32.mrb[12].mxu1 }
 0x110   :  { %v867_v52 = vadd.f32 %v866_v50, %v865_v48  ;;  %v868_v53 = vpop.f32.mrb[14].mxu0  ;;  %v912_v54 = vpop.f32.mrb[13].mxu1 }
 0x111   :  { %v869_v55 = vpop.f32.mrb[15].mxu0  ;;  %v913_v56 = vadd.f32 %v912_v54, %v911_v51  ;;  %v914_v57 = vpop.f32.mrb[14].mxu1 }
 0x112   :  { %v529_v58 = vadd.f32 %v867_v52, %v1254_v1  ;;  %v870_v59 = vadd.f32 %v869_v55, %v868_v53  ;;  %v915_v60 = vpop.f32.mrb[15].mxu1 }
 0x113   :  { %v916_v61 = vadd.f32 %v915_v60, %v914_v57 }
 0x114   :  { %v532_v62 = vadd.f32 %v870_v59, %v1254_v1  ;;  %v601_v63 = vadd.f32 %v913_v56, %v529_v58 }
 0x116   :  { %v871_v0 = vpop.f32.mrb[16].mxu0  ;;  %v604_v2 = vadd.f32 %v916_v61, %v532_v62 }
 0x117   :  { %v872_v3 = vpop.f32.mrb[17].mxu0  ;;  %v917_v4 = vpop.f32.mrb[16].mxu1 }
 0x118   :  { %v873_v5 = vadd.f32 %v872_v3, %v871_v0  ;;  %v874_v6 = vpop.f32.mrb[18].mxu0  ;;  %v918_v7 = vpop.f32.mrb[17].mxu1 }
 0x119   :  { %v875_v8 = vpop.f32.mrb[19].mxu0  ;;  %v919_v9 = vadd.f32 %v918_v7, %v917_v4  ;;  %v920_v10 = vpop.f32.mrb[18].mxu1 }
 0x11a   :  { %v537_v11 = vadd.f32 %v873_v5, %v1254_v1  ;;  %v921_v12 = vpop.f32.mrb[19].mxu1 }
 0x11c   :  { %v609_v13 = vadd.f32 %v919_v9, %v537_v11 }
 0x11e   :  { %v648_v14 = vpop.f32.mrb[20].mxu0 }
 0x11f   :  { %v649_v16 = vadd.f32 %v648_v14, %v1258_v15  ;;  %v672_v18 = vpop.f32.mrb[20].mxu1  ;;  %v942_v19 = vpop.f32.mrb[21].mxu0 }
 0x120   :  { %v673_v20 = vadd.f32 %v672_v18, %v601_v63  ;;  %v954_v21 = vpop.f32.mrb[21].mxu1  ;;  %v651_v22 = vpop.f32.mrb[22].mxu0 }
 0x121   :  { %v686_v23 = vmax.f32 %v649_v16, 0.0  ;;  %v652_v24 = vadd.f32 %v651_v22, %v1260_v17  ;;  %v675_v25 = vpop.f32.mrb[22].mxu1  ;;  %v943_v26 = vpop.f32.mrb[23].mxu0 }
 0x122   :  { %v692_v27 = vmax.f32 %v673_v20, 0.0  ;;  %v676_v28 = vadd.f32 %v675_v25, %v604_v2  ;;  %v955_v29 = vpop.f32.mrb[23].mxu1 }
 0x123   :  { %v822_v1 = vpack.c.bf16 %v686_v23, %v686_v23  ;;  %v687_v30 = vmax.f32 %v652_v24, 0.0 }
 0x124   :  { %v828_v32 = vpack.c.bf16 %v692_v27, %v692_v27  ;;  %v693_v34 = vmax.f32 %v676_v28, 0.0 }
 0x125   :  { %733 = vst.msk [vmem:[%s1322_s3] sm:$0xf] %vm732_vm2, %v822_v1  ;;  %v823_v15 = vpack.c.bf16 %v687_v30, %v687_v30 }
 0x126   :  { %739 = vst.msk [vmem:[%s1322_s3 + $0x18] sm:$0xf] %vm732_vm2, %v828_v32  ;;  %v829_v17 = vpack.c.bf16 %v693_v34, %v693_v34  ;;  %v656_v35 = vpop.f32.mrb[24].mxu0 }
 0x127   :  { %734 = vst.msk [vmem:[%s1322_s3 + $0x4] sm:$0xf] %vm732_vm2, %v823_v15  ;;  %v657_v36 = vadd.f32 %v656_v35, %v1264_v31  ;;  %v680_v37 = vpop.f32.mrb[24].mxu1  ;;  %v946_v38 = vpop.f32.mrb[25].mxu0 }
 0x128   :  { %740 = vst.msk [vmem:[%s1322_s3 + $0x1c] sm:$0xf] %vm732_vm2, %v829_v17  ;;  %v681_v39 = vadd.f32 %v680_v37, %v609_v13  ;;  %v659_v40 = vpop.f32.mrb[26].mxu0  ;;  %v958_v41 = vpop.f32.mrb[25].mxu1 }
 0x129   :  { %v688_v42 = vmax.f32 %v657_v36, 0.0  ;;  %v660_v43 = vadd.f32 %v659_v40, %v1266_v33  ;;  %v947_v44 = vpop.f32.mrb[27].mxu0  ;;  %v683_v45 = vpop.f32.mrb[26].mxu1 }
 0x12a   :  { %v694_v46 = vmax.f32 %v681_v39, 0.0  ;;  %v959_v48 = vpop.f32.mrb[27].mxu1 }
 0x12b   :  { %v824_v50 = vpack.c.bf16 %v688_v42, %v688_v42  ;;  %v689_v51 = vmax.f32 %v660_v43, 0.0 }
 0x12c   :  { %v830_v31 = vpack.c.bf16 %v694_v46, %v694_v46 }
 0x12d   :  { %735 = vst.msk [vmem:[%s1322_s3 + $0x8] sm:$0xf] %vm732_vm2, %v824_v50  ;;  %v825_v52 = vpack.c.bf16 %v689_v51, %v689_v51 }
 0x12e   :  { %741 = vst.msk [vmem:[%s1322_s3 + $0x20] sm:$0xf] %vm732_vm2, %v830_v31  ;;  %v664_v53 = vpop.f32.mrb[28].mxu0 }
 0x12f   :  { %736 = vst.msk [vmem:[%s1322_s3 + $0xc] sm:$0xf] %vm732_vm2, %v825_v52  ;;  %v665_v33 = vadd.f32 %v664_v53, %v1270_v47  ;;  %v950_v54 = vpop.f32.mrb[29].mxu0 }
 0x130   :  { %v667_v55 = vpop.f32.mrb[30].mxu0 }
 0x131   :  { %v690_v56 = vmax.f32 %v665_v33, 0.0  ;;  %v668_v57 = vadd.f32 %v667_v55, %v1272_v49  ;;  %v951_v58 = vpop.f32.mrb[31].mxu0 }
 0x133   :  { %v826_v59 = vpack.c.bf16 %v690_v56, %v690_v56  ;;  %v691_v60 = vmax.f32 %v668_v57, 0.0 }
 0x135   :  { %737 = vst.msk [vmem:[%s1322_s3 + $0x10] sm:$0xf] %vm732_vm2, %v826_v59  ;;  %v827_v61 = vpack.c.bf16 %v691_v60, %v691_v60 }
 0x137   :  { %738 = vst.msk [vmem:[%s1322_s3 + $0x14] sm:$0xf] %vm732_vm2, %v827_v61 }

// kernel: inception_stem.17
= control target key start
LH: loop header
LB: loop body
LE: loop exit
PB: predicated region body
PF: predicated region fallthrough
CT: control target
= control target key end

     0   :  { %v748_v0 = vmov 0   ;;  %vm353_vm0 = vcmask 523264   ;;  %vm559_vm1 = vcmask 519168   ;;  %s974_s1 = inlined_call_operand.vmem [shape: bf16[448,64], index: 1, kind: input, shape index: {}]   ;;  %s975_s0 = inlined_call_operand.vmem [shape: bf16[72,448], index: 0, kind: input, shape index: {}]   ;;  %s976_s2 = inlined_call_operand.vmem [shape: f32[1,64], index: 2, kind: input, shape index: {}]   ;;  %s977_s3 = inlined_call_operand.vmem [shape: bf16[72,64], index: 3, kind: output, shape index: {}]  }
   0x1   :  { %441 = vmatprep.subr.bf16.mxu1 %v748_v0  ;;  %v692_v1 = vld [vmem:[%s974_s1 + $0x80] sm:$0xff]   ;;  %v693_v2 = vld [vmem:[%s974_s1 + $0x88] sm:$0xff]   ;;  %v696_v5 = vld [vmem:[%s974_s1 + $0x90] sm:$0xff]  }
   0x2   :  { %442 = vmatpush1.bf16.msra.mxu1 %v692_v1  ;;  %v694_v3 = vld [vmem:[%s974_s1 + $0x40] sm:$0xff]   ;;  %v697_v6 = vld [vmem:[%s974_s1 + $0x48] sm:$0xff]   ;;  %v700_v8 = vld [vmem:[%s974_s1 + $0x50] sm:$0xff]  }
   0x3   :  { %443 = vmatprep.subr.bf16.mxu1 %v748_v0  ;;  %v695_v4 = vld [vmem:[%s974_s1] sm:$0xff]   ;;  %645 = vmatprep.subr.bf16.mxu0 %v694_v3  ;;  %v698_v7 = vld [vmem:[%s974_s1 + $0x8] sm:$0xff]   ;;  %v701_v9 = vld [vmem:[%s974_s1 + $0x10] sm:$0xff]  }
   0x4   :  { %646 = vmatpush3.bf16.msra.mxu0 %v695_v4  ;;  %v699_v10 = vld [vmem:[%s974_s1 + $0x98] sm:$0xff]   ;;  %v702_v12 = vld [vmem:[%s974_s1 + $0xa0] sm:$0xff]   ;;  %v705_v15 = vld [vmem:[%s974_s1 + $0xa8] sm:$0xff]  }
   0x5   :  { %647 = vmatprep.subr.bf16.mxu0 %v697_v6  ;;  %v703_v11 = vld [vmem:[%s974_s1 + $0x58] sm:$0xff]   ;;  %v706_v14 = vld [vmem:[%s974_s1 + $0x60] sm:$0xff]   ;;  %v709_v17 = vld [vmem:[%s974_s1 + $0x68] sm:$0xff]  }
   0x6   :  { %444 = vmatpush1.bf16.msra.mxu1 %v693_v2  ;;  %v704_v13 = vld [vmem:[%s974_s1 + $0x18] sm:$0xff]   ;;  %v707_v16 = vld [vmem:[%s974_s1 + $0x20] sm:$0xff]   ;;  %v708_v18 = vld [vmem:[%s974_s1 + $0xb0] sm:$0xff]  }
   0x7   :  { %445 = vmatprep.subr.bf16.mxu1 %v748_v0  ;;  %v710_v19 = vld [vmem:[%s974_s1 + $0x28] sm:$0xff]   ;;  %v712_v20 = vld [vmem:[%s974_s1 + $0x70] sm:$0xff]   ;;  %v711_v21 = vld [vmem:[%s974_s1 + $0xb8] sm:$0xff]  }
   0x8   :  { %648 = vmatpush3.bf16.msra.mxu0 %v698_v7  ;;  %v713_v22 = vld [vmem:[%s974_s1 + $0x30] sm:$0xff]   ;;  %v715_v23 = vld [vmem:[%s974_s1 + $0x78] sm:$0xff]   ;;  %v714_v26 = vld [vmem:[%s974_s1 + $0xc0] sm:$0xff]  }
   0x9   :  { %649 = vmatprep.subr.bf16.mxu0 %v700_v8  ;;  %v720_v24 = vld [vmem:[%s975_s0 + $0x4] ss:$16 sps:$4 sm:$0xff]   ;;  %v716_v25 = vld [vmem:[%s974_s1 + $0x38] sm:$0xff]   ;;  %v718_v28 = vld [vmem:[%s975_s0] ss:$16 sps:$4 sm:$0xff]  }
   0xa   :  { %446 = vmatpush1.bf16.msra.mxu1 %v696_v5  ;;  %401 = vmatprep.mubr.bf16.mxu0 %v720_v24  ;;  %v727_v27 = vld [vmem:[%s975_s0 + $0xc] ss:$16 sps:$4 sm:$0xff]   ;;  %v723_v29 = vld [vmem:[%s975_s0 + $0x24] ss:$16 sps:$4 sm:$0xff]   ;;  %v728_v32 = vld [vmem:[%s975_s0 + $0x20] ss:$16 sps:$4 sm:$0xff]  }
   0xb   :  { %447 = vmatprep.subr.bf16.mxu1 %v748_v0  ;;  %622 = vmatprep.mubr.msk.bf16.mxu1 %vm353_vm0, %v727_v27  ;;  %v717_v30 = vld [vmem:[%s974_s1 + $0xc8] sm:$0xff]   ;;  %v721_v31 = vld [vmem:[%s974_s1 + $0xd0] sm:$0xff]   ;;  %v722_v34 = vld [vmem:[%s974_s1 + $0xd8] sm:$0xff]  }
   0xc   :  { %650 = vmatpush3.bf16.msra.mxu0 %v701_v9  ;;  %v729_v33 = vld [vmem:[%s975_s0 + $0x44] ss:$16 sps:$4 sm:$0xff]   ;;  %v725_v35 = vld [vmem:[%s975_s0 + $0x8] ss:$16 sps:$4 sm:$0xff]   ;;  %v731_v36 = vld [vmem:[%s975_s0 + $0x2c] ss:$16 sps:$4 sm:$0xff]  }
   0xd   :  { %651 = vmatprep.subr.bf16.mxu0 %v703_v11  ;;  %v733_v37 = vld [vmem:[%s975_s0 + $0x40] ss:$16 sps:$4 sm:$0xff]   ;;  %v735_v38 = vld [vmem:[%s975_s0 + $0x64] ss:$16 sps:$4 sm:$0xff]   ;;  %v734_v39 = vld [vmem:[%s975_s0 + $0x28] ss:$16 sps:$4 sm:$0xff]  }
   0xe   :  { %448 = vmatpush1.bf16.msra.mxu1 %v699_v10  ;;  %v737_v40 = vld [vmem:[%s975_s0 + $0x4c] ss:$16 sps:$4 sm:$0xff]   ;;  %v31_v41 = vld [vmem:[%s975_s0 + $0x80] sm:$0xff]  ;;  %v740_v44 = vld [vmem:[%s975_s0 + $0x48] ss:$16 sps:$4 sm:$0xff]  }
   0xf   :  { %449 = vmatprep.subr.bf16.mxu1 %v748_v0  ;;  %v739_v42 = vld [vmem:[%s975_s0 + $0x60] ss:$16 sps:$4 sm:$0xff]   ;;  %v591_v43 = vcombine.high %v31_v41, %v31_v41  ;;  %v742_v45 = vld [vmem:[%s975_s0 + $0x6c] ss:$16 sps:$4 sm:$0xff]   ;;  %v590_v46 = vcombine.low %v31_v41, %v31_v41  ;;  %v745_v48 = vld [vmem:[%s975_s0 + $0x68] ss:$16 sps:$4 sm:$0xff]  }
  0x10   :  { %652 = vmatpush3.bf16.msra.mxu0 %v704_v13  ;;  %v32_v47 = vld [vmem:[%s975_s0 + $0x88] sm:$0xff]  ;;  %v927_v57 = vld [vmem:[%s976_s2] ss:$0 sm:$0xff] }
  0x11   :  { %653 = vmatprep.subr.bf16.mxu0 %v706_v14  ;;  %v593_v49 = vcombine.high %v32_v47, %v32_v47  ;;  %v592_v50 = vcombine.low %v32_v47, %v32_v47 }
  0x12   :  { %450 = vmatpush1.bf16.msra.mxu1 %v702_v12 }
  0x13   :  { %451 = vmatprep.subr.bf16.mxu1 %v748_v0 }
  0x14   :  { %654 = vmatpush3.bf16.msra.mxu0 %v707_v16 }
  0x15   :  { %655 = vmatprep.subr.bf16.mxu0 %v709_v17 }
  0x16   :  { %452 = vmatpush1.bf16.msra.mxu1 %v705_v15 }
  0x17   :  { %453 = vmatprep.subr.bf16.mxu1 %v748_v0 }
  0x18   :  { %656 = vmatpush3.bf16.msra.mxu0 %v710_v19 }
  0x19   :  { %657 = vmatprep.subr.bf16.mxu0 %v712_v20 }
  0x1a   :  { %454 = vmatpush1.bf16.msra.mxu1 %v708_v18 }
  0x1b   :  { %455 = vmatprep.subr.bf16.mxu1 %v748_v0 }
  0x1c   :  { %658 = vmatpush3.bf16.msra.mxu0 %v713_v22 }
  0x1d   :  { %659 = vmatprep.subr.bf16.mxu0 %v715_v23 }
  0x1e   :  { %456 = vmatpush1.bf16.msra.mxu1 %v711_v21 }
  0x1f   :  { %457 = vmatprep.subr.bf16.mxu1 %v748_v0 }
  0x20   :  { %660 = vmatpush3.bf16.msra.mxu0 %v716_v25 }
  0x22   :  { %458 = vmatpush1.bf16.msra.mxu1 %v714_v26 }
  0x23   :  { %459 = vmatprep.subr.bf16.mxu1 %v748_v0  ;;  %402 = vmatmul.mubr.bf16.vlgmr.msra.gmra.mrb[0].mxu0 %v718_v28 }
  0x24   :  { %409 = vmatprep.mubr.bf16.mxu0 %v723_v29 }
  0x26   :  { %460 = vmatpush1.bf16.msra.mxu1 %v717_v30 }
  0x27   :  { %461 = vmatprep.subr.bf16.mxu1 %v748_v0 }
  0x2a   :  { %462 = vmatpush1.bf16.msra.mxu1 %v721_v31 }
  0x2b   :  { %463 = vmatprep.subr.bf16.mxu1 %v748_v0  ;;  %410 = vmatmul.mubr.bf16.gmra.mrb[4].mxu0 %v728_v32 }
  0x2c   :  { %417 = vmatprep.mubr.bf16.mxu0 %v729_v33 }
  0x2e   :  { %464 = vmatpush1.bf16.msra.mxu1 %v722_v34 }
  0x31   :  { %474 = vmatmul.mubr.bf16.vlgmr.msra.gmra.mrb[0].mxu1 %v725_v35 }
  0x32   :  { %623 = vmatprep.mubr.msk.bf16.mxu1 %vm353_vm0, %v731_v36 }
  0x33   :  { %418 = vmatmul.mubr.bf16.gmra.mrb[8].mxu0 %v733_v37 }
  0x34   :  { %425 = vmatprep.mubr.bf16.mxu0 %v735_v38 }
  0x39   :  { %482 = vmatmul.mubr.bf16.gmra.mrb[4].mxu1 %v734_v39 }
  0x3a   :  { %624 = vmatprep.mubr.msk.bf16.mxu1 %vm353_vm0, %v737_v40 }
  0x3b   :  { %426 = vmatmul.mubr.bf16.gmra.mrb[12].mxu0 %v739_v42 }
  0x3c   :  { %433 = vmatprep.mubr.bf16.mxu0 %v591_v43 }
  0x41   :  { %490 = vmatmul.mubr.bf16.gmra.mrb[8].mxu1 %v740_v44 }
  0x42   :  { %625 = vmatprep.mubr.msk.bf16.mxu1 %vm353_vm0, %v742_v45 }
  0x43   :  { %434 = vmatmul.mubr.bf16.gmra.mrb[16].mxu0 %v590_v46 }
  0x49   :  { %498 = vmatmul.mubr.bf16.gmra.mrb[12].mxu1 %v745_v48 }
  0x4a   :  { %626 = vmatprep.mubr.msk.bf16.mxu1 %vm353_vm0, %v593_v49 }
  0x51   :  { %506 = vmatmul.mubr.bf16.gmra.mrb[16].mxu1 %v592_v50 }
  0xf6   :  { %v661_v51 = vpop.f32.mrb[0].mxu0 }
  0xf7   :  { %v662_v52 = vpop.f32.mrb[1].mxu0 }
  0xf8   :  { %v663_v53 = vadd.f32 %v662_v52, %v661_v51  ;;  %v664_v54 = vpop.f32.mrb[2].mxu0 }
  0xf9   :  { %v665_v55 = vpop.f32.mrb[3].mxu0 }
  0xfa   :  { %v666_v56 = vadd.f32 %v665_v55, %v664_v54  ;;  %v404_v60 = vadd.f32 %v663_v53, %v927_v57 }
  0xfc   :  { %v407_v4 = vadd.f32 %v666_v56, %v927_v57 }
  0xfe   :  { %v667_v58 = vpop.f32.mrb[4].mxu0 }
  0xff   :  { %v668_v59 = vpop.f32.mrb[5].mxu0 }
 0x100   :  { %v669_v61 = vadd.f32 %v668_v59, %v667_v58  ;;  %v670_v62 = vpop.f32.mrb[6].mxu0 }
 0x101   :  { %v671_v63 = vpop.f32.mrb[7].mxu0 }
 0x102   :  { %v672_v0 = vadd.f32 %v671_v63, %v670_v62  ;;  %v412_v13 = vadd.f32 %v669_v61, %v927_v57 }
 0x104   :  { %v475_v1 = vpop.f32.mrb[0].mxu1  ;;  %v415_v22 = vadd.f32 %v672_v0, %v927_v57 }
 0x105   :  { %v476_v2 = vadd.f32 %v475_v1, %v404_v60  ;;  %v477_v3 = vpop.f32.mrb[1].mxu1 }
 0x106   :  { %v478_v5 = vpop.f32.mrb[2].mxu1  ;;  %v673_v9 = vpop.f32.mrb[8].mxu0 }
 0x107   :  { %v513_v6 = vmax.f32 %v476_v2, 0.0  ;;  %v479_v7 = vadd.f32 %v478_v5, %v407_v4  ;;  %v480_v8 = vpop.f32.mrb[3].mxu1  ;;  %v674_v10 = vpop.f32.mrb[9].mxu0 }
 0x108   :  { %v675_v14 = vadd.f32 %v674_v10, %v673_v9  ;;  %v676_v15 = vpop.f32.mrb[10].mxu0 }
 0x109   :  { %v636_v11 = vpack.c.bf16 %v513_v6, %v513_v6  ;;  %v514_v12 = vmax.f32 %v479_v7, 0.0  ;;  %v677_v16 = vpop.f32.mrb[11].mxu0 }
 0x10a   :  { %v678_v18 = vadd.f32 %v677_v16, %v676_v15  ;;  %v420_v31 = vadd.f32 %v675_v14, %v927_v57 }
 0x10b   :  { %560 = vst.msk [vmem:[%s977_s3] sm:$0xf] %vm559_vm1, %v636_v11  ;;  %v637_v17 = vpack.c.bf16 %v514_v12, %v514_v12 }
 0x10c   :  { %v483_v19 = vpop.f32.mrb[4].mxu1  ;;  %v423_v40 = vadd.f32 %v678_v18, %v927_v57 }
 0x10d   :  { %561 = vst.msk [vmem:[%s977_s3 + $0x4] sm:$0xf] %vm559_vm1, %v637_v17  ;;  %v484_v20 = vadd.f32 %v483_v19, %v412_v13  ;;  %v485_v21 = vpop.f32.mrb[5].mxu1 }
 0x10e   :  { %v486_v23 = vpop.f32.mrb[6].mxu1  ;;  %v679_v27 = vpop.f32.mrb[12].mxu0 }
 0x10f   :  { %v515_v24 = vmax.f32 %v484_v20, 0.0  ;;  %v487_v25 = vadd.f32 %v486_v23, %v415_v22  ;;  %v488_v26 = vpop.f32.mrb[7].mxu1  ;;  %v680_v28 = vpop.f32.mrb[13].mxu0 }
 0x110   :  { %v681_v32 = vadd.f32 %v680_v28, %v679_v27  ;;  %v682_v33 = vpop.f32.mrb[14].mxu0 }
 0x111   :  { %v638_v29 = vpack.c.bf16 %v515_v24, %v515_v24  ;;  %v516_v30 = vmax.f32 %v487_v25, 0.0  ;;  %v683_v34 = vpop.f32.mrb[15].mxu0 }
 0x112   :  { %v684_v36 = vadd.f32 %v683_v34, %v682_v33  ;;  %v428_v49 = vadd.f32 %v681_v32, %v927_v57 }
 0x113   :  { %562 = vst.msk [vmem:[%s977_s3 + $0x8] sm:$0xf] %vm559_vm1, %v638_v29  ;;  %v639_v35 = vpack.c.bf16 %v516_v30, %v516_v30 }
 0x114   :  { %v491_v37 = vpop.f32.mrb[8].mxu1  ;;  %v431_v58 = vadd.f32 %v684_v36, %v927_v57 }
 0x115   :  { %563 = vst.msk [vmem:[%s977_s3 + $0xc] sm:$0xf] %vm559_vm1, %v639_v35  ;;  %v492_v38 = vadd.f32 %v491_v37, %v420_v31  ;;  %v493_v39 = vpop.f32.mrb[9].mxu1 }
 0x116   :  { %v494_v41 = vpop.f32.mrb[10].mxu1  ;;  %v685_v45 = vpop.f32.mrb[16].mxu0 }
 0x117   :  { %v517_v42 = vmax.f32 %v492_v38, 0.0  ;;  %v495_v43 = vadd.f32 %v494_v41, %v423_v40  ;;  %v496_v44 = vpop.f32.mrb[11].mxu1  ;;  %v686_v46 = vpop.f32.mrb[17].mxu0 }
 0x118   :  { %v687_v50 = vadd.f32 %v686_v46, %v685_v45  ;;  %v688_v51 = vpop.f32.mrb[18].mxu0 }
 0x119   :  { %v640_v47 = vpack.c.bf16 %v517_v42, %v517_v42  ;;  %v518_v48 = vmax.f32 %v495_v43, 0.0  ;;  %v689_v52 = vpop.f32.mrb[19].mxu0 }
 0x11a   :  { %v436_v1 = vadd.f32 %v687_v50, %v927_v57 }
 0x11b   :  { %564 = vst.msk [vmem:[%s977_s3 + $0x10] sm:$0xf] %vm559_vm1, %v640_v47  ;;  %v641_v53 = vpack.c.bf16 %v518_v48, %v518_v48 }
 0x11c   :  { %v499_v54 = vpop.f32.mrb[12].mxu1 }
 0x11d   :  { %565 = vst.msk [vmem:[%s977_s3 + $0x14] sm:$0xf] %vm559_vm1, %v641_v53  ;;  %v500_v55 = vadd.f32 %v499_v54, %v428_v49  ;;  %v501_v56 = vpop.f32.mrb[13].mxu1 }
 0x11e   :  { %v502_v59 = vpop.f32.mrb[14].mxu1 }
 0x11f   :  { %v519_v60 = vmax.f32 %v500_v55, 0.0  ;;  %v503_v61 = vadd.f32 %v502_v59, %v431_v58  ;;  %v504_v62 = vpop.f32.mrb[15].mxu1 }
 0x121   :  { %v642_v63 = vpack.c.bf16 %v519_v60, %v519_v60  ;;  %v520_v0 = vmax.f32 %v503_v61, 0.0 }
 0x123   :  { %566 = vst.msk [vmem:[%s977_s3 + $0x18] sm:$0xf] %vm559_vm1, %v642_v63  ;;  %v643_v2 = vpack.c.bf16 %v520_v0, %v520_v0 }
 0x124   :  { %v507_v3 = vpop.f32.mrb[16].mxu1 }
 0x125   :  { %567 = vst.msk [vmem:[%s977_s3 + $0x1c] sm:$0xf] %vm559_vm1, %v643_v2  ;;  %v508_v4 = vadd.f32 %v507_v3, %v436_v1  ;;  %v509_v5 = vpop.f32.mrb[17].mxu1 }
 0x126   :  { %v510_v6 = vpop.f32.mrb[18].mxu1 }
 0x127   :  { %v521_v7 = vmax.f32 %v508_v4, 0.0  ;;  %v511_v8 = vpop.f32.mrb[19].mxu1 }
 0x129   :  { %v644_v9 = vpack.c.bf16 %v521_v7, %v521_v7 }
 0x12b   :  { %568 = vst.msk [vmem:[%s977_s3 + $0x20] sm:$0xf] %vm559_vm1, %v644_v9 }

// kernel: inception_stem.21
= control target key start
LH: loop header
LB: loop body
LE: loop exit
PB: predicated region body
PF: predicated region fallthrough
CT: control target
= control target key end

     0   :  { %s435_s15 = smov 0   ;;  %s461_s0 = inlined_call_operand.vmem [shape: bf16[2,2,2,192], index: 0, kind: input, shape index: {}]   ;;  %s462_s1 = inlined_call_operand.vmem [shape: bf16[2,2,1,192], index: 1, kind: input, shape index: {}]   ;;  %s463_s2 = inlined_call_operand.vmem [shape: bf16[2,1,2,192], index: 2, kind: input, shape index: {}]   ;;  %s464_s3 = inlined_call_operand.vmem [shape: bf16[2,1,1,192], index: 3, kind: input, shape index: {}]   ;;  %s465_s4 = inlined_call_operand.vmem [shape: bf16[2,1,1,192], index: 4, kind: output, shape index: {}]  }
   0x1 LB: > { %s377_s16 = sadd.s32 4294967295, %s408_s15   ;;  %p381_p0 = scmp.ge.s32.totalorder %s408_s15, 1  ;;  %s408_s15 = sphi %s435_s15, %s14_s15  }
   0x2   : > { %p188_p1 = scmp.lt.s32.totalorder %s408_s15, 3 }
   0x4   : > { %p189_p2 = pnand %p381_p0, %p188_p1 }
   0x5   : > { %p224_p3 = scmp.lt.s32.totalorder (!%p189_p2), %s377_s16, 1  ;;  %vm278_vm0 = vcmask (!%p189_p2), 1040384   ;;  %vm279_vm1 = vsmask.f32 (!%p189_p2), 256  ;;  %vm281_vm2 = vcmask (!%p189_p2), 517121  }
   0x6   : > { %192 = sbr.rel (%p189_p2) target bundleno = 36 (0x24), region = 36  ;;  %vm282_vm3 = vsmask.f32 (!%p189_p2), 1280  ;;  %vm280_vm4 = vmand (!%p189_p2), %vm278_vm0, %vm279_vm1 }
   0x7   : > { %vm283_vm5 = vmand (!%p189_p2), %vm281_vm2, %vm282_vm3 }
   0x8   : > { %vm284_vm6 = vmor (!%p189_p2), %vm283_vm5, %vm280_vm4 }
   0xd   : > { %s467_s16 = smov (!%p224_p3, %s377_s16), 1 }
   0xe   : > { %s382_s17 = sshll.u32 %s467_s16, 2  ;;  %s384_s18 = sshll.u32 %s467_s16, 1 }
   0xf   : > { %s227_s21 = scalar_lea.vmem %s461_s0, %s382_s17  ;;  %s239_s24 = scalar_lea.vmem %s464_s3, %s384_s18 }
  0x10   : > { %v245_v0 = vld [vmem:[%s227_s21] sm:$0x3]  ;;  %v388_v3 = vld [vmem:[%s227_s21 + $0x2] sm:$0x3]  ;;  %s231_s27 = scalar_lea.vmem %s462_s1, %s382_s17  ;;  %s235_s30 = scalar_lea.vmem %s463_s2, %s384_s18 }
  0x11   : > { %v244_v1 = vld [vmem:[%s239_s24] sm:$0x3]  ;;  %v248_v2 = vshrl.u32 %v245_v0, 16  ;;  %v258_v6 = vshrl.u32 %v388_v3, 16  ;;  %v390_v10 = vld [vmem:[%s231_s27 + $0x2] sm:$0x3]  ;;  %s243_s7 = scalar_lea.vmem %s465_s4, %s384_s18 }
  0x12   : > { %v246_v4 = vmax.bf16 %v245_v0, %v244_v1  ;;  %v264_v8 = vld [vmem:[%s231_s27] sm:$0x3] }
  0x13   : > { %v269_v11 = vld [vmem:[%s235_s30] sm:$0x3] }
  0x14   : > { %v253_v5 = vmax.bf16 %v248_v2, %v246_v4  ;;  %v272_v14 = vshrl.u32 %v269_v11, 16  ;;  %v285_v16 = vld [vmem:[%s243_s7] sm:$0x3] }
  0x16   : > { %v256_v7 = vmax.bf16 %v388_v3, %v253_v5 }
  0x18   : > { %v263_v9 = vmax.bf16 %v258_v6, %v256_v7 }
  0x1a   : > { %v265_v12 = vmax.bf16 %v264_v8, %v263_v9 }
  0x1c   : > { %v268_v13 = vmax.bf16 %v390_v10, %v265_v12 }
  0x1e   : > { %v270_v15 = vmax.bf16 %v269_v11, %v268_v13 }
  0x20   : > { %v277_v17 = vmax.bf16 %v272_v14, %v270_v15 }
  0x22   : > { %v286_v18 = vsel %vm284_vm6, %v277_v17, %v285_v16 }
  0x23   : > { %287 = vst [vmem:[%s243_s7] sm:$0x3] %v286_v18 }
  0x24 PF: > { %s14_s15 = sadd.s32 1, %s408_s15  }
  0x25   : > { %p11_p4 = scmp.ge.s32.totalorder %s14_s15, 4  }
  0x27   :  { %13 = sbr.rel (!%p11_p4) target bundleno = 1 (0x1), region = 77 }

// kernel: inception_stem.19
= control target key start
LH: loop header
LB: loop body
LE: loop exit
PB: predicated region body
PF: predicated region fallthrough
CT: control target
= control target key end

     0   :  { %vm371_vm0 = vcmask 523264   ;;  %vm1044_vm1 = vcmask 785408   ;;  %vm1101_vm2 = vcmask 1043456   ;;  %vm1102_vm3 = vcmask 523268   ;;  %s1816_s2 = inlined_call_operand.vmem [shape: bf16[576,96], index: 2, kind: input, shape index: {}]   ;;  %s1817_s0 = inlined_call_operand.vmem [shape: bf16[32,576], index: 0, kind: input, shape index: {}]   ;;  %s1818_s3 = inlined_call_operand.vmem [shape: bf16[576,96], index: 3, kind: input, shape index: {}]   ;;  %s1819_s1 = inlined_call_operand.vmem [shape: bf16[32,576], index: 1, kind: input, shape index: {}]   ;;  %s1820_s4 = inlined_call_operand.vmem [shape: f32[1,192], index: 4, kind: input, shape index: {}]   ;;  %s1821_s5 = inlined_call_operand.vmem [shape: bf16[32,192], index: 5, kind: output, shape index: {}]  }
   0x1   :  { %v1365_v0 = vld [vmem:[%s1816_s2 + $0x40] sm:$0xff]   ;;  %v1369_v4 = vld [vmem:[%s1816_s2 + $0x48] sm:$0xff]   ;;  %v1373_v8 = vld [vmem:[%s1816_s2 + $0x50] sm:$0xff]  }
   0x2   :  { %v1366_v1 = vld [vmem:[%s1816_s2 + $0xc0] sm:$0xff]   ;;  %1216 = vmatprep.subr.bf16.mxu0 %v1365_v0  ;;  %v1370_v5 = vld [vmem:[%s1816_s2 + $0xc8] sm:$0xff]   ;;  %v1374_v9 = vld [vmem:[%s1816_s2 + $0xd0] sm:$0xff]  }
   0x3   :  { %v1367_v2 = vld [vmem:[%s1816_s2] sm:$0xff]   ;;  %1244 = vmatprep.subr.bf16.mxu1 %v1366_v1  ;;  %v1371_v6 = vld [vmem:[%s1816_s2 + $0x8] sm:$0xff]   ;;  %v1375_v10 = vld [vmem:[%s1816_s2 + $0x10] sm:$0xff]  }
   0x4   :  { %v1368_v3 = vld [vmem:[%s1816_s2 + $0x80] sm:$0xff]   ;;  %1217 = vmatpush3.bf16.msra.mxu0 %v1367_v2  ;;  %v1372_v7 = vld [vmem:[%s1816_s2 + $0x88] sm:$0xff]   ;;  %v1376_v11 = vld [vmem:[%s1816_s2 + $0x90] sm:$0xff]  }
   0x5   :  { %1245 = vmatpush3.bf16.msra.mxu1 %v1368_v3  ;;  %1218 = vmatprep.subr.bf16.mxu0 %v1369_v4  ;;  %v1377_v12 = vld [vmem:[%s1816_s2 + $0x58] sm:$0xff]   ;;  %v1381_v16 = vld [vmem:[%s1816_s2 + $0x60] sm:$0xff]   ;;  %v1385_v20 = vld [vmem:[%s1816_s2 + $0x68] sm:$0xff]  }
   0x6   :  { %1246 = vmatprep.subr.bf16.mxu1 %v1370_v5  ;;  %v1378_v13 = vld [vmem:[%s1816_s2 + $0xd8] sm:$0xff]   ;;  %v1382_v17 = vld [vmem:[%s1816_s2 + $0xe0] sm:$0xff]   ;;  %v1386_v21 = vld [vmem:[%s1816_s2 + $0xe8] sm:$0xff]  }
   0x7   :  { %v1379_v14 = vld [vmem:[%s1816_s2 + $0x18] sm:$0xff]   ;;  %v1383_v18 = vld [vmem:[%s1816_s2 + $0x20] sm:$0xff]   ;;  %v1387_v22 = vld [vmem:[%s1816_s2 + $0x28] sm:$0xff]  }
   0x8   :  { %1219 = vmatpush3.bf16.msra.mxu0 %v1371_v6  ;;  %v1380_v15 = vld [vmem:[%s1816_s2 + $0x98] sm:$0xff]   ;;  %v1384_v19 = vld [vmem:[%s1816_s2 + $0xa0] sm:$0xff]   ;;  %v1388_v23 = vld [vmem:[%s1816_s2 + $0xa8] sm:$0xff]  }
   0x9   :  { %1247 = vmatpush3.bf16.msra.mxu1 %v1372_v7  ;;  %1220 = vmatprep.subr.bf16.mxu0 %v1373_v8  ;;  %v1389_v24 = vld [vmem:[%s1816_s2 + $0x70] sm:$0xff]   ;;  %v1393_v28 = vld [vmem:[%s1816_s2 + $0x78] sm:$0xff]   ;;  %v1402_v35 = vld [vmem:[%s1817_s0 + $0xc] ss:$20 sps:$4 sm:$0xff]  }
   0xa   :  { %1248 = vmatprep.subr.bf16.mxu1 %v1374_v9  ;;  %v1390_v25 = vld [vmem:[%s1816_s2 + $0xf0] sm:$0xff]   ;;  %v1394_v29 = vld [vmem:[%s1816_s2 + $0xf8] sm:$0xff]   ;;  %v1403_v36 = vld [vmem:[%s1816_s2 + $0x100] sm:$0xff]   ;;  %459 = vmatprep.mubr.bf16.mxu1 %v1402_v35 }
   0xb   :  { %v1391_v26 = vld [vmem:[%s1816_s2 + $0x30] sm:$0xff]   ;;  %v1395_v30 = vld [vmem:[%s1816_s2 + $0x38] sm:$0xff]   ;;  %v1404_v37 = vld [vmem:[%s1816_s2 + $0x108] sm:$0xff]  }
   0xc   :  { %1221 = vmatpush3.bf16.msra.mxu0 %v1375_v10  ;;  %v1392_v27 = vld [vmem:[%s1816_s2 + $0xb0] sm:$0xff]   ;;  %v1396_v31 = vld [vmem:[%s1816_s2 + $0xb8] sm:$0xff]   ;;  %v1405_v38 = vld [vmem:[%s1818_s3 + $0x40] sm:$0xff]  }
   0xd   :  { %1249 = vmatpush3.bf16.msra.mxu1 %v1376_v11  ;;  %1222 = vmatprep.subr.bf16.mxu0 %v1377_v12  ;;  %v1397_v32 = vld [vmem:[%s1817_s0] ss:$20 sps:$4 sm:$0xff]   ;;  %v1399_v33 = vld [vmem:[%s1817_s0 + $0x4] ss:$20 sps:$4 sm:$0xff]   ;;  %v1400_v34 = vld [vmem:[%s1817_s0 + $0x8] ss:$20 sps:$4 sm:$0xff]  }
   0xe   :  { %1250 = vmatprep.subr.bf16.mxu1 %v1378_v13  ;;  %410 = vmatprep.mubr.bf16.mxu0 %v1399_v33  ;;  %v1406_v39 = vld [vmem:[%s1818_s3] sm:$0xff]   ;;  %v1409_v41 = vld [vmem:[%s1817_s0 + $0x34] ss:$20 sps:$4 sm:$0xff]   ;;  %v1416_v47 = vld [vmem:[%s1816_s2 + $0x118] sm:$0xff]  }
   0xf   :  { %v1407_v40 = vld [vmem:[%s1817_s0 + $0x2c] ss:$20 sps:$4 sm:$0xff]   ;;  %v1411_v42 = vld [vmem:[%s1817_s0 + $0x28] ss:$20 sps:$4 sm:$0xff]   ;;  %v1412_v43 = vld [vmem:[%s1817_s0 + $0x30] ss:$20 sps:$4 sm:$0xff]  }
  0x10   :  { %1223 = vmatpush3.bf16.msra.mxu0 %v1379_v14  ;;  %v1413_v44 = vld [vmem:[%s1816_s2 + $0x110] sm:$0xff]   ;;  %v1414_v45 = vld [vmem:[%s1818_s3 + $0x48] sm:$0xff]   ;;  %v1421_v52 = vld [vmem:[%s1818_s3 + $0x58] sm:$0xff]  }
  0x11   :  { %1251 = vmatpush3.bf16.msra.mxu1 %v1380_v15  ;;  %1224 = vmatprep.subr.bf16.mxu0 %v1381_v16  ;;  %v1415_v46 = vld [vmem:[%s1818_s3 + $0x8] sm:$0xff]   ;;  %v1417_v48 = vld [vmem:[%s1818_s3 + $0x50] sm:$0xff]   ;;  %v1422_v53 = vld [vmem:[%s1818_s3 + $0xc0] sm:$0xff]  }
  0x12   :  { %1252 = vmatprep.subr.bf16.mxu1 %v1382_v17  ;;  %v1418_v49 = vld [vmem:[%s1818_s3 + $0x10] sm:$0xff]   ;;  %v1420_v51 = vld [vmem:[%s1817_s0 + $0x38] ss:$20 sps:$4 sm:$0xff]   ;;  %v1424_v55 = vld [vmem:[%s1818_s3 + $0x80] sm:$0xff]  }
  0x13   :  { %v1419_v50 = vld [vmem:[%s1817_s0 + $0x10] ss:$20 sps:$4 sm:$0xff]   ;;  %v1423_v54 = vld [vmem:[%s1818_s3 + $0x18] sm:$0xff]   ;;  %v1426_v57 = vld [vmem:[%s1818_s3 + $0xc8] sm:$0xff]  }
  0x14   :  { %1225 = vmatpush3.bf16.msra.mxu0 %v1383_v18  ;;  %v1425_v56 = vld [vmem:[%s1818_s3 + $0x60] sm:$0xff]   ;;  %v1428_v59 = vld [vmem:[%s1818_s3 + $0x88] sm:$0xff]   ;;  %v1430_v61 = vld [vmem:[%s1818_s3 + $0xd0] sm:$0xff]  }
  0x15   :  { %1253 = vmatpush3.bf16.msra.mxu1 %v1384_v19  ;;  %1226 = vmatprep.subr.bf16.mxu0 %v1385_v20  ;;  %v1427_v58 = vld [vmem:[%s1818_s3 + $0x20] sm:$0xff]   ;;  %v1429_v60 = vld [vmem:[%s1818_s3 + $0x68] sm:$0xff]   ;;  %v1432_v63 = vld [vmem:[%s1818_s3 + $0x90] sm:$0xff]  }
  0x16   :  { %1254 = vmatprep.subr.bf16.mxu1 %v1386_v21  ;;  %v1431_v62 = vld [vmem:[%s1818_s3 + $0x28] sm:$0xff]   ;;  %v1433_v0 = vld [vmem:[%s1818_s3 + $0x70] sm:$0xff]   ;;  %v1434_v1 = vld [vmem:[%s1818_s3 + $0xd8] sm:$0xff]  }
  0x17   :  { %v1435_v2 = vld [vmem:[%s1818_s3 + $0x30] sm:$0xff]   ;;  %v1436_v3 = vld [vmem:[%s1818_s3 + $0x98] sm:$0xff]   ;;  %v1438_v5 = vld [vmem:[%s1818_s3 + $0xe0] sm:$0xff]  }
  0x18   :  { %1227 = vmatpush3.bf16.msra.mxu0 %v1387_v22  ;;  %v1437_v4 = vld [vmem:[%s1818_s3 + $0x78] sm:$0xff]   ;;  %v1440_v7 = vld [vmem:[%s1818_s3 + $0xa0] sm:$0xff]   ;;  %v1444_v10 = vld [vmem:[%s1818_s3 + $0xe8] sm:$0xff]  }
  0x19   :  { %1255 = vmatpush3.bf16.msra.mxu1 %v1388_v23  ;;  %1228 = vmatprep.subr.bf16.mxu0 %v1389_v24  ;;  %v1439_v6 = vld [vmem:[%s1818_s3 + $0x38] sm:$0xff]   ;;  %v1441_v8 = vld [vmem:[%s1819_s1] ss:$20 sps:$4 sm:$0xff]   ;;  %v1446_v12 = vld [vmem:[%s1818_s3 + $0xa8] sm:$0xff]  }
  0x1a   :  { %1256 = vmatprep.subr.bf16.mxu1 %v1390_v25  ;;  %v1443_v9 = vld [vmem:[%s1819_s1 + $0x4] ss:$20 sps:$4 sm:$0xff]   ;;  %v1447_v13 = vld [vmem:[%s1818_s3 + $0xf0] sm:$0xff]   ;;  %v1448_v14 = vld [vmem:[%s1818_s3 + $0x108] sm:$0xff]  }
  0x1b   :  { %v1445_v11 = vld [vmem:[%s1818_s3 + $0x100] sm:$0xff]   ;;  %v1449_v15 = vld [vmem:[%s1818_s3 + $0xb0] sm:$0xff]   ;;  %v1452_v17 = vld [vmem:[%s1819_s1 + $0x28] ss:$20 sps:$4 sm:$0xff]  }
  0x1c   :  { %1229 = vmatpush3.bf16.msra.mxu0 %v1391_v26  ;;  %v1450_v16 = vld [vmem:[%s1819_s1 + $0x2c] ss:$20 sps:$4 sm:$0xff]   ;;  %v1453_v18 = vld [vmem:[%s1818_s3 + $0xf8] sm:$0xff]   ;;  %v1454_v19 = vld [vmem:[%s1818_s3 + $0x110] sm:$0xff]  }
  0x1d   :  { %1257 = vmatpush3.bf16.msra.mxu1 %v1392_v27  ;;  %1230 = vmatprep.subr.bf16.mxu0 %v1393_v28  ;;  %v1455_v20 = vld [vmem:[%s1818_s3 + $0xb8] sm:$0xff]   ;;  %v1458_v22 = vld [vmem:[%s1819_s1 + $0xc] ss:$20 sps:$4 sm:$0xff]   ;;  %v1460_v24 = vld [vmem:[%s1819_s1 + $0x10] ss:$20 sps:$4 sm:$0xff]  }
  0x1e   :  { %1258 = vmatprep.subr.bf16.mxu1 %v1394_v29  ;;  %v1456_v21 = vld [vmem:[%s1819_s1 + $0x8] ss:$20 sps:$4 sm:$0xff]   ;;  %v1461_v25 = vld [vmem:[%s1819_s1 + $0x38] ss:$20 sps:$4 sm:$0xff]   ;;  %v1464_v27 = vld [vmem:[%s1819_s1 + $0x30] ss:$20 sps:$4 sm:$0xff]  }
  0x1f   :  { %v1459_v23 = vld [vmem:[%s1818_s3 + $0x118] sm:$0xff]   ;;  %v1462_v26 = vld [vmem:[%s1819_s1 + $0x34] ss:$20 sps:$4 sm:$0xff]   ;;  %s1465_s1 = smov 96   ;;  %vm1786_vm4 = vmor %vm1102_vm3, %vm1101_vm2 }
  0x20   :  { %1231 = vmatpush3.bf16.msra.mxu0 %v1395_v30 }
  0x21   :  { %1259 = vmatpush3.bf16.msra.mxu1 %v1396_v31  ;;  %1340 = vmatprep.subr.bf16.mxu0 %v1403_v36 }
  0x22   :  { %1278 = vmatprep.subr.bf16.mxu1 %v1405_v38 }
  0x23   :  { %411 = vmatmul.mubr.bf16.vlgmr.msra.gmra.mrb[0].mxu0 %v1397_v32 }
  0x24   :  { %460 = vmatmul.mubr.bf16.vlgmr.msra.gmra.mrb[0].mxu1 %v1400_v34  ;;  %1341 = vmatpush3.bf16.msra.mxu0 %v1403_v36 }
  0x25   :  { %1342 = vmatprep.subr.bf16.mxu0 %v1404_v37  ;;  %1279 = vmatpush3.bf16.msra.mxu1 %v1406_v39 }
  0x26   :  { %418 = vmatprep.mubr.bf16.mxu0 %v1407_v40  ;;  %467 = vmatprep.mubr.bf16.mxu1 %v1409_v41 }
  0x27   :  { %1280 = vmatprep.subr.bf16.mxu1 %v1414_v45 }
  0x28   :  { %1343 = vmatpush3.bf16.msra.mxu0 %v1404_v37 }
  0x29   :  { %1344 = vmatprep.subr.bf16.mxu0 %v1413_v44  ;;  %1281 = vmatpush3.bf16.msra.mxu1 %v1415_v46 }
  0x2a   :  { %1282 = vmatprep.subr.bf16.mxu1 %v1417_v48 }
  0x2b   :  { %419 = vmatmul.mubr.bf16.gmra.mrb[4].mxu0 %v1411_v42 }
  0x2c   :  { %468 = vmatmul.mubr.bf16.gmra.mrb[4].mxu1 %v1412_v43  ;;  %1345 = vmatpush3.bf16.msra.mxu0 %v1413_v44 }
  0x2d   :  { %1346 = vmatprep.subr.bf16.mxu0 %v1416_v47  ;;  %1283 = vmatpush3.bf16.msra.mxu1 %v1418_v49 }
  0x2e   :  { %1348 = vmatprep.mubr.msk.bf16.mxu0 %vm371_vm0, %v1419_v50  ;;  %1284 = vmatprep.subr.bf16.mxu1 %v1421_v52 }
  0x2f   :  { %913 = vmatprep.mubr.bf16.mxu1 %v1443_v9 }
  0x30   :  { %1347 = vmatpush3.bf16.msra.mxu0 %v1416_v47 }
  0x31   :  { %1306 = vmatprep.subr.bf16.mxu0 %v1422_v53  ;;  %1285 = vmatpush3.bf16.msra.mxu1 %v1423_v54 }
  0x32   :  { %1286 = vmatprep.subr.bf16.mxu1 %v1425_v56 }
  0x33   :  { %1349 = vmatmul.mubr.msk.bf16.vlgmr.msra.gmra.mrb[8].mxu0 %vm371_vm0, %v1420_v51 }
  0x34   :  { %1307 = vmatpush3.bf16.msra.mxu0 %v1424_v55  ;;  %962 = vmatprep.mubr.bf16.mxu0 %v1458_v22 }
  0x35   :  { %1308 = vmatprep.subr.bf16.mxu0 %v1426_v57  ;;  %1287 = vmatpush3.bf16.msra.mxu1 %v1427_v58 }
  0x36   :  { %1288 = vmatprep.subr.bf16.mxu1 %v1429_v60 }
  0x38   :  { %1309 = vmatpush3.bf16.msra.mxu0 %v1428_v59 }
  0x39   :  { %1310 = vmatprep.subr.bf16.mxu0 %v1430_v61  ;;  %1289 = vmatpush3.bf16.msra.mxu1 %v1431_v62 }
  0x3a   :  { %1290 = vmatprep.subr.bf16.mxu1 %v1433_v0 }
  0x3c   :  { %1311 = vmatpush3.bf16.msra.mxu0 %v1432_v63 }
  0x3d   :  { %1312 = vmatprep.subr.bf16.mxu0 %v1434_v1  ;;  %1291 = vmatpush3.bf16.msra.mxu1 %v1435_v2 }
  0x3e   :  { %1292 = vmatprep.subr.bf16.mxu1 %v1437_v4 }
  0x40   :  { %1313 = vmatpush3.bf16.msra.mxu0 %v1436_v3 }
  0x41   :  { %1314 = vmatprep.subr.bf16.mxu0 %v1438_v5  ;;  %1293 = vmatpush3.bf16.msra.mxu1 %v1439_v6 }
  0x42   :  { %1352 = vmatprep.subr.bf16.mxu1 %v1445_v11 }
  0x44   :  { %1315 = vmatpush3.bf16.msra.mxu0 %v1440_v7  ;;  %914 = vmatmul.mubr.bf16.vlgmr.msra.gmra.mrb[8].mxu1 %v1441_v8 }
  0x45   :  { %1316 = vmatprep.subr.bf16.mxu0 %v1444_v10  ;;  %1353 = vmatpush3.bf16.msra.mxu1 %v1445_v11 }
  0x46   :  { %1354 = vmatprep.subr.bf16.mxu1 %v1448_v14  ;;  %921 = vmatprep.mubr.bf16.mxu1 %v1450_v16 }
  0x48   :  { %1317 = vmatpush3.bf16.msra.mxu0 %v1446_v12 }
  0x49   :  { %1318 = vmatprep.subr.bf16.mxu0 %v1447_v13  ;;  %1355 = vmatpush3.bf16.msra.mxu1 %v1448_v14 }
  0x4a   :  { %1356 = vmatprep.subr.bf16.mxu1 %v1454_v19 }
  0x4c   :  { %1319 = vmatpush3.bf16.msra.mxu0 %v1449_v15  ;;  %922 = vmatmul.mubr.bf16.gmra.mrb[12].mxu1 %v1452_v17 }
  0x4d   :  { %1320 = vmatprep.subr.bf16.mxu0 %v1453_v18  ;;  %1357 = vmatpush3.bf16.msra.mxu1 %v1454_v19 }
  0x4e   :  { %1358 = vmatprep.subr.bf16.mxu1 %v1459_v23  ;;  %1360 = vmatprep.mubr.msk.bf16.mxu1 %vm371_vm0, %v1460_v24 }
  0x50   :  { %1321 = vmatpush3.bf16.msra.mxu0 %v1455_v20 }
  0x51   :  { %1359 = vmatpush3.bf16.msra.mxu1 %v1459_v23 }
  0x53   :  { %963 = vmatmul.mubr.bf16.vlgmr.msra.gmra.mrb[12].mxu0 %v1456_v21 }
  0x54   :  { %970 = vmatprep.mubr.bf16.mxu0 %v1462_v26  ;;  %1361 = vmatmul.mubr.msk.bf16.vlgmr.msra.gmra.mrb[16].mxu1 %vm371_vm0, %v1461_v25 }
  0x5b   :  { %971 = vmatmul.mubr.bf16.gmra.mrb[16].mxu0 %v1464_v27 }
  0xf6   :  { %v1232_v28 = vpop.f32.mrb[0].mxu0 }
  0xf7   :  { %v1260_v29 = vpop.f32.mrb[0].mxu1  ;;  %v1233_v30 = vpop.f32.mrb[1].mxu0 }
  0xf8   :  { %v1234_v31 = vadd.f32 %v1233_v30, %v1232_v28  ;;  %v1261_v32 = vpop.f32.mrb[1].mxu1  ;;  %v1235_v33 = vpop.f32.mrb[2].mxu0 }
  0xf9   :  { %v1262_v34 = vadd.f32 %v1261_v32, %v1260_v29  ;;  %v1263_v35 = vpop.f32.mrb[2].mxu1  ;;  %v1236_v36 = vpop.f32.mrb[3].mxu0 }
  0xfa   :  { %v1237_v37 = vadd.f32 %v1236_v36, %v1235_v33  ;;  %v1264_v38 = vpop.f32.mrb[3].mxu1  ;;  %v1051_v36 = vlaneseq }
  0xfb   :  { %v1265_v39 = vadd.f32 %v1264_v38, %v1263_v35  ;;  %v462_v40 = vadd.f32 %v1262_v34, %v1234_v31 }
  0xfd   :  { %v465_v41 = vadd.f32 %v1265_v39, %v1237_v37  ;;  %v1052_v37 = vshrl.u32 %v1051_v36, 7  ;;  %v1049_v39 = vld [vmem:[%s1820_s4] sm:$0x3] }
  0xfe   :  { %v1238_v42 = vpop.f32.mrb[4].mxu0 }
  0xff   :  { %v1266_v43 = vpop.f32.mrb[4].mxu1  ;;  %v1239_v44 = vpop.f32.mrb[5].mxu0  ;;  %v1057_v38 = vsub.s32 1, %v1052_v37 }
 0x100   :  { %v1240_v45 = vadd.f32 %v1239_v44, %v1238_v42  ;;  %v1267_v46 = vpop.f32.mrb[5].mxu1  ;;  %v1241_v47 = vpop.f32.mrb[6].mxu0 }
 0x101   :  { %v1268_v48 = vadd.f32 %v1267_v46, %v1266_v43  ;;  %v1269_v49 = vpop.f32.mrb[6].mxu1  ;;  %v1242_v50 = vpop.f32.mrb[7].mxu0 }
 0x102   :  { %v1243_v51 = vadd.f32 %v1242_v50, %v1241_v47  ;;  %v1270_v52 = vpop.f32.mrb[7].mxu1 }
 0x103   :  { %v1271_v53 = vadd.f32 %v1270_v52, %v1269_v49  ;;  %v470_v54 = vadd.f32 %v1268_v48, %v1240_v45 }
 0x105   :  { %v473_v55 = vadd.f32 %v1271_v53, %v1243_v51 }
 0x106   :  { %v1350_v56 = vpop.f32.mrb[8].mxu0 }
 0x107   :  { %v1776_v57 = vadd.f32 %v1350_v56, %v470_v54  ;;  %v510_v58 = vpop.f32.mrb[9].mxu0 }
 0x108   :  { %v511_v59 = vadd.f32 %v510_v58, %v462_v40  ;;  %v1351_v60 = vpop.f32.mrb[10].mxu0  ;;  %v1053_v40 = vsub.s32 0, %v1052_v37 }
 0x109   :  { %v1778_v61 = vadd.f32 %v1351_v60, %v473_v55  ;;  %v513_v62 = vpop.f32.mrb[11].mxu0 }
 0x10a   :  { %v1780_v63 = vadd.f32 %v513_v62, %v465_v41  ;;  %v1058_v41 = vrot.slane %v1049_v39, %v1057_v38  ;;  %v1054_v42 = vrot.slane %v1049_v39, %v1053_v40 }
 0x117   :  { %v1294_v0 = vpop.f32.mrb[8].mxu1 }
 0x118   :  { %v1295_v1 = vpop.f32.mrb[9].mxu1 }
 0x119   :  { %v1296_v2 = vadd.f32 %v1295_v1, %v1294_v0  ;;  %v1297_v3 = vpop.f32.mrb[10].mxu1 }
 0x11a   :  { %v1298_v4 = vpop.f32.mrb[11].mxu1 }
 0x11b   :  { %v1299_v5 = vadd.f32 %v1298_v4, %v1297_v3 }
 0x11f   :  { %v1300_v6 = vpop.f32.mrb[12].mxu1 }
 0x120   :  { %v1301_v7 = vpop.f32.mrb[13].mxu1 }
 0x121   :  { %v1302_v8 = vadd.f32 %v1301_v7, %v1300_v6  ;;  %v1303_v9 = vpop.f32.mrb[14].mxu1 }
 0x122   :  { %v1304_v10 = vpop.f32.mrb[15].mxu1 }
 0x123   :  { %v1305_v11 = vadd.f32 %v1304_v10, %v1303_v9 }
 0x126   :  { %v1322_v12 = vpop.f32.mrb[12].mxu0 }
 0x127   :  { %v1323_v13 = vpop.f32.mrb[13].mxu0  ;;  %v1362_v18 = vpop.f32.mrb[16].mxu1 }
 0x128   :  { %v1324_v14 = vadd.f32 %v1323_v13, %v1322_v12  ;;  %v1325_v15 = vpop.f32.mrb[14].mxu0  ;;  %v1013_v20 = vpop.f32.mrb[17].mxu1 }
 0x129   :  { %v1326_v16 = vpop.f32.mrb[15].mxu0  ;;  %v1363_v22 = vpop.f32.mrb[18].mxu1 }
 0x12a   :  { %v1327_v17 = vadd.f32 %v1326_v16, %v1325_v15  ;;  %v965_v19 = vadd.f32 %v1324_v14, %v1296_v2  ;;  %v1016_v24 = vpop.f32.mrb[19].mxu1 }
 0x12c   :  { %v1014_v21 = vadd.f32 %v1013_v20, %v965_v19  ;;  %v968_v23 = vadd.f32 %v1327_v17, %v1299_v5 }
 0x12e   :  { %v1017_v25 = vadd.f32 %v1016_v24, %v968_v23  ;;  %v1328_v26 = vpop.f32.mrb[16].mxu0  ;;  %1032 = vrot.lane.b32.xlu0 %v1014_v21, %s1465_s1 }
 0x12f   :  { %v1329_v27 = vpop.f32.mrb[17].mxu0 }
 0x130   :  { %v1330_v28 = vadd.f32 %v1329_v27, %v1328_v26  ;;  %v1331_v29 = vpop.f32.mrb[18].mxu0 }
 0x131   :  { %v1332_v30 = vpop.f32.mrb[19].mxu0 }
 0x132   :  { %v973_v31 = vadd.f32 %v1330_v28, %v1302_v8  ;;  %v1333_v32 = vadd.f32 %v1332_v30, %v1331_v29  ;;  %1034 = vrot.lane.b32.xlu0 %v1017_v25, %s1465_s1 }
 0x134   :  { %v976_v33 = vadd.f32 %v1333_v32, %v1305_v11  ;;  %v1022_v34 = vadd.f32 %v1362_v18, %v973_v31 }
 0x136   :  { %1036 = vrot.lane.b32.xlu1 %v1022_v34, %s1465_s1  ;;  %v1025_v35 = vadd.f32 %v1363_v22, %v976_v33 }
 0x13a   :  { %1038 = vrot.lane.b32.xlu1 %v1025_v35, %s1465_s1 }
 0x1a0   :  { %v1033_v43 = vpop.permute.xlu0 %1032 }
 0x1a1   :  { %v1045_v44 = vsel %vm1044_vm1, %v511_v59, %v1033_v43  ;;  %v1062_v45 = vadd.f32 %v1058_v41, %v1033_v43 }
 0x1a2   :  { %v1061_v46 = vadd.f32 %v1054_v42, %v1045_v44 }
 0x1a3   :  { %v1070_v47 = vmax.f32 %v1062_v45, 0.0 }
 0x1a4   :  { %v1069_v48 = vmax.f32 %v1061_v46, 0.0  ;;  %v1035_v49 = vpop.permute.xlu0 %1034 }
 0x1a5   :  { %v1046_v51 = vsel %vm1044_vm1, %v1780_v63, %v1035_v49  ;;  %v1064_v52 = vadd.f32 %v1058_v41, %v1035_v49 }
 0x1a6   :  { %v1212_v53 = vpack.c.bf16 %v1070_v47, %v1069_v48  ;;  %v1063_v54 = vadd.f32 %v1054_v42, %v1046_v51 }
 0x1a7   :  { %v1072_v55 = vmax.f32 %v1064_v52, 0.0 }
 0x1a8   :  { %1104 = vst.msk [vmem:[%s1821_s5] sm:$0xff] %vm1786_vm4, %v1212_v53  ;;  %v1071_v56 = vmax.f32 %v1063_v54, 0.0  ;;  %v1037_v58 = vpop.permute.xlu1 %1036 }
 0x1a9   :  { %v1047_v59 = vsel %vm1044_vm1, %v1776_v57, %v1037_v58  ;;  %v1066_v60 = vadd.f32 %v1058_v41, %v1037_v58 }
 0x1aa   :  { %v1213_v62 = vpack.c.bf16 %v1072_v55, %v1071_v56  ;;  %v1065_v0 = vadd.f32 %v1054_v42, %v1047_v59 }
 0x1ab   :  { %v1074_v1 = vmax.f32 %v1066_v60, 0.0 }
 0x1ac   :  { %1105 = vst.msk [vmem:[%s1821_s5 + $0x8] sm:$0xff] %vm1786_vm4, %v1213_v62  ;;  %v1073_v63 = vmax.f32 %v1065_v0, 0.0  ;;  %v1039_v2 = vpop.permute.xlu1 %1038 }
 0x1ad   :  { %v1048_v3 = vsel %vm1044_vm1, %v1778_v61, %v1039_v2  ;;  %v1068_v4 = vadd.f32 %v1058_v41, %v1039_v2 }
 0x1ae   :  { %v1214_v5 = vpack.c.bf16 %v1074_v1, %v1073_v63  ;;  %v1067_v6 = vadd.f32 %v1054_v42, %v1048_v3 }
 0x1af   :  { %v1076_v7 = vmax.f32 %v1068_v4, 0.0 }
 0x1b0   :  { %1106 = vst.msk [vmem:[%s1821_s5 + $0x10] sm:$0xff] %vm1786_vm4, %v1214_v5  ;;  %v1075_v57 = vmax.f32 %v1067_v6, 0.0 }
 0x1b2   :  { %v1215_v8 = vpack.c.bf16 %v1076_v7, %v1075_v57 }
 0x1b4   :  { %1107 = vst.msk [vmem:[%s1821_s5 + $0x18] sm:$0xff] %vm1786_vm4, %v1215_v8 }

// kernel: inception_stem.20
= control target key start
LH: loop header
LB: loop body
LE: loop exit
PB: predicated region body
PF: predicated region fallthrough
CT: control target
= control target key end

     0   :  { %v235_v38 = vlaneseq  ;;  %v2326_v39 = vmov 1966171168   ;;  %vm1436_vm0 = vcmask 523264   ;;  %vm1749_vm1 = vcmask 1040384   ;;  %s3073_s1 = inlined_call_operand.vmem [shape: bf16[1728,192], index: 1, kind: input, shape index: {}]   ;;  %s3074_s0 = inlined_call_operand.vmem [shape: bf16[2,1728], index: 0, kind: input, shape index: {}]   ;;  %s3075_s2 = inlined_call_operand.vmem [shape: f32[1,192], index: 2, kind: input, shape index: {}]   ;;  %s3076_s3 = inlined_call_operand.vmem [shape: bf16[2,192], index: 3, kind: output, shape index: {}]  }
   0x1   :  { %v2000_v0 = vld [vmem:[%s3073_s1 + $0x4] ss:$8 sps:$4 sm:$0xff]   ;;  %v2004_v2 = vld [vmem:[%s3073_s1] ss:$8 sps:$4 sm:$0xff]   ;;  %v2006_v4 = vld [vmem:[%s3073_s1 + $0x14] ss:$8 sps:$4 sm:$0xff]   ;;  %v249_v40 = vunpack.c.l.s4 %v2326_v39 }
   0x2   :  { %v2002_v1 = vld [vmem:[%s3073_s1 + $0x304] ss:$8 sps:$4 sm:$0xff]   ;;  %1440 = vmatprep.subr.bf16.mxu1 %v2000_v0  ;;  %v2005_v3 = vld [vmem:[%s3073_s1 + $0x300] ss:$8 sps:$4 sm:$0xff]   ;;  %v2008_v5 = vld [vmem:[%s3073_s1 + $0x314] ss:$8 sps:$4 sm:$0xff]  }
   0x3   :  { %1563 = vmatprep.subr.bf16.mxu0 %v2002_v1  ;;  %1441 = vmatpush1.bf16.msra.mxu1 %v2004_v2  ;;  %v2010_v6 = vld [vmem:[%s3073_s1 + $0x10] ss:$8 sps:$4 sm:$0xff]   ;;  %v2012_v8 = vld [vmem:[%s3073_s1 + $0x24] ss:$8 sps:$4 sm:$0xff]   ;;  %v2016_v10 = vld [vmem:[%s3073_s1 + $0x20] ss:$8 sps:$4 sm:$0xff]   ;;  %v250_v46 = vunpack.c.0.s8 %v249_v40 }
   0x4   :  { %1564 = vmatpush1.bf16.msra.mxu0 %v2005_v3  ;;  %1442 = vmatprep.subr.bf16.mxu1 %v2006_v4  ;;  %v2011_v7 = vld [vmem:[%s3073_s1 + $0x310] ss:$8 sps:$4 sm:$0xff]   ;;  %v2014_v9 = vld [vmem:[%s3073_s1 + $0x324] ss:$8 sps:$4 sm:$0xff]   ;;  %v2017_v11 = vld [vmem:[%s3073_s1 + $0x320] ss:$8 sps:$4 sm:$0xff]  }
   0x5   :  { %1565 = vmatprep.subr.bf16.mxu0 %v2008_v5  ;;  %v2018_v12 = vld [vmem:[%s3073_s1 + $0x34] ss:$8 sps:$4 sm:$0xff]   ;;  %v2022_v14 = vld [vmem:[%s3073_s1 + $0x30] ss:$8 sps:$4 sm:$0xff]   ;;  %v2024_v16 = vld [vmem:[%s3073_s1 + $0x44] ss:$8 sps:$4 sm:$0xff]  }
   0x6   :  { %v2020_v13 = vld [vmem:[%s3073_s1 + $0x334] ss:$8 sps:$4 sm:$0xff]   ;;  %v2023_v15 = vld [vmem:[%s3073_s1 + $0x330] ss:$8 sps:$4 sm:$0xff]   ;;  %v2026_v17 = vld [vmem:[%s3073_s1 + $0x344] ss:$8 sps:$4 sm:$0xff]  }
   0x7   :  { %1443 = vmatpush1.bf16.msra.mxu1 %v2010_v6  ;;  %v2028_v18 = vld [vmem:[%s3073_s1 + $0x40] ss:$8 sps:$4 sm:$0xff]   ;;  %v2030_v20 = vld [vmem:[%s3073_s1 + $0x54] ss:$8 sps:$4 sm:$0xff]   ;;  %v2034_v22 = vld [vmem:[%s3073_s1 + $0x50] ss:$8 sps:$4 sm:$0xff]  }
   0x8   :  { %1566 = vmatpush1.bf16.msra.mxu0 %v2011_v7  ;;  %1444 = vmatprep.subr.bf16.mxu1 %v2012_v8  ;;  %v2029_v19 = vld [vmem:[%s3073_s1 + $0x340] ss:$8 sps:$4 sm:$0xff]   ;;  %v2032_v21 = vld [vmem:[%s3073_s1 + $0x354] ss:$8 sps:$4 sm:$0xff]   ;;  %v2035_v23 = vld [vmem:[%s3073_s1 + $0x350] ss:$8 sps:$4 sm:$0xff]  }
   0x9   :  { %1567 = vmatprep.subr.bf16.mxu0 %v2014_v9  ;;  %v2036_v24 = vld [vmem:[%s3073_s1 + $0x64] ss:$8 sps:$4 sm:$0xff]   ;;  %v2040_v26 = vld [vmem:[%s3073_s1 + $0x60] ss:$8 sps:$4 sm:$0xff]   ;;  %v2042_v28 = vld [vmem:[%s3073_s1 + $0x74] ss:$8 sps:$4 sm:$0xff]  }
   0xa   :  { %v2038_v25 = vld [vmem:[%s3073_s1 + $0x364] ss:$8 sps:$4 sm:$0xff]   ;;  %v2041_v27 = vld [vmem:[%s3073_s1 + $0x360] ss:$8 sps:$4 sm:$0xff]   ;;  %v2044_v29 = vld [vmem:[%s3073_s1 + $0x374] ss:$8 sps:$4 sm:$0xff]  }
   0xb   :  { %1445 = vmatpush1.bf16.msra.mxu1 %v2016_v10  ;;  %v2046_v30 = vld [vmem:[%s3073_s1 + $0x70] ss:$8 sps:$4 sm:$0xff]   ;;  %v2048_v32 = vld [vmem:[%s3073_s1 + $0x84] ss:$8 sps:$4 sm:$0xff]   ;;  %v2052_v34 = vld [vmem:[%s3073_s1 + $0x80] ss:$8 sps:$4 sm:$0xff]  }
   0xc   :  { %1568 = vmatpush1.bf16.msra.mxu0 %v2017_v11  ;;  %1446 = vmatprep.subr.bf16.mxu1 %v2018_v12  ;;  %v2047_v31 = vld [vmem:[%s3073_s1 + $0x370] ss:$8 sps:$4 sm:$0xff]   ;;  %v2050_v33 = vld [vmem:[%s3073_s1 + $0x384] ss:$8 sps:$4 sm:$0xff]   ;;  %v2053_v35 = vld [vmem:[%s3073_s1 + $0x380] ss:$8 sps:$4 sm:$0xff]  }
   0xd   :  { %1569 = vmatprep.subr.bf16.mxu0 %v2020_v13  ;;  %v2054_v36 = vld [vmem:[%s3073_s1 + $0x94] ss:$8 sps:$4 sm:$0xff]   ;;  %v2058_v41 = vld [vmem:[%s3073_s1 + $0x90] ss:$8 sps:$4 sm:$0xff]   ;;  %v2060_v43 = vld [vmem:[%s3073_s1 + $0xa4] ss:$8 sps:$4 sm:$0xff]  }
   0xe   :  { %v2056_v37 = vld [vmem:[%s3073_s1 + $0x394] ss:$8 sps:$4 sm:$0xff]   ;;  %v2059_v42 = vld [vmem:[%s3073_s1 + $0x390] ss:$8 sps:$4 sm:$0xff]   ;;  %v2062_v44 = vld [vmem:[%s3073_s1 + $0x3a4] ss:$8 sps:$4 sm:$0xff]  }
   0xf   :  { %1447 = vmatpush1.bf16.msra.mxu1 %v2022_v14  ;;  %v2473_v45 = vshrl.u32 %v235_v38, 7  ;;  %v2064_v47 = vld [vmem:[%s3073_s1 + $0xa0] ss:$8 sps:$4 sm:$0xff]   ;;  %v2066_v49 = vld [vmem:[%s3073_s1 + $0xb4] ss:$8 sps:$4 sm:$0xff]   ;;  %vm1750_vm2 = vcmask 517121  }
  0x10   :  { %1570 = vmatpush1.bf16.msra.mxu0 %v2023_v15  ;;  %1448 = vmatprep.subr.bf16.mxu1 %v2024_v16  ;;  %v2065_v48 = vld [vmem:[%s3073_s1 + $0x3a0] ss:$8 sps:$4 sm:$0xff]   ;;  %v2068_v50 = vld [vmem:[%s3073_s1 + $0x3b4] ss:$8 sps:$4 sm:$0xff]   ;;  %v2070_v55 = vld [vmem:[%s3073_s1 + $0xb0] ss:$8 sps:$4 sm:$0xff]  }
  0x11   :  { %1571 = vmatprep.subr.bf16.mxu0 %v2026_v17  ;;  %v2488_v51 = vsub.s32 %v250_v46, %v2473_v45  ;;  %v15_v52 = vld [vmem:[%s3074_s0] sm:$0xff]  ;;  %v2071_v56 = vld [vmem:[%s3073_s1 + $0x3b0] ss:$8 sps:$4 sm:$0xff]   ;;  %v2078_v1 = vld [vmem:[%s3073_s1 + $0xd4] ss:$8 sps:$4 sm:$0xff]  }
  0x12   :  { %v247_v53 = vcombine.high %v15_v52, %v15_v52  ;;  %v2072_v57 = vld [vmem:[%s3073_s1 + $0xc4] ss:$8 sps:$4 sm:$0xff]   ;;  %v2076_v63 = vld [vmem:[%s3073_s1 + $0xc0] ss:$8 sps:$4 sm:$0xff]   ;;  %v2080_v2 = vld [vmem:[%s3073_s1 + $0x3d4] ss:$8 sps:$4 sm:$0xff]  }
  0x13   :  { %1449 = vmatpush1.bf16.msra.mxu1 %v2028_v18  ;;  %v254_v54 = vrot.slane %v15_v52, %v2488_v51  ;;  %v2074_v58 = vld [vmem:[%s3073_s1 + $0x3c4] ss:$8 sps:$4 sm:$0xff]   ;;  %v2077_v0 = vld [vmem:[%s3073_s1 + $0x3c0] ss:$8 sps:$4 sm:$0xff]   ;;  %v2082_v5 = vld [vmem:[%s3073_s1 + $0xd0] ss:$8 sps:$4 sm:$0xff]  }
  0x14   :  { %1572 = vmatpush1.bf16.msra.mxu0 %v2029_v19  ;;  %1450 = vmatprep.subr.bf16.mxu1 %v2030_v20  ;;  %v261_v60 = vrot.slane %v247_v53, %v2488_v51  ;;  %v2083_v6 = vld [vmem:[%s3073_s1 + $0x3d0] ss:$8 sps:$4 sm:$0xff]   ;;  %v2084_v7 = vld [vmem:[%s3073_s1 + $0xe4] ss:$8 sps:$4 sm:$0xff]   ;;  %v2088_v10 = vld [vmem:[%s3073_s1 + $0xe0] ss:$8 sps:$4 sm:$0xff]  }
  0x15   :  { %1573 = vmatprep.subr.bf16.mxu0 %v2032_v21  ;;  %v262_v59 = vcombine.high %v254_v54, %v254_v54  ;;  %v2086_v8 = vld [vmem:[%s3073_s1 + $0x3e4] ss:$8 sps:$4 sm:$0xff]   ;;  %v2089_v11 = vld [vmem:[%s3073_s1 + $0x3e0] ss:$8 sps:$4 sm:$0xff]   ;;  %v2090_v12 = vld [vmem:[%s3073_s1 + $0xf4] ss:$8 sps:$4 sm:$0xff]   ;;  %v2579_v21 = vrot.slane %v254_v54, %v2488_v51 }
  0x16   :  { %v263_v62 = vcombine.high %v261_v60, %v261_v60  ;;  %v2543_v9 = vld [vmem:[%s3074_s0 + $0x8] sm:$0x3f]  ;;  %v2092_v13 = vld [vmem:[%s3073_s1 + $0x3f4] ss:$8 sps:$4 sm:$0xff]   ;;  %v2562_v15 = vrot.slane %v261_v60, %v2488_v51  ;;  %v2094_v16 = vld [vmem:[%s3073_s1 + $0xf0] ss:$8 sps:$4 sm:$0xff]  }
  0x17   :  { %1451 = vmatpush1.bf16.msra.mxu1 %v2034_v22  ;;  %v2508_v61 = vrot.slane %v262_v59, %v2488_v51  ;;  %v2559_v14 = vrot.slane %v2543_v9, %v2488_v51  ;;  %v2095_v17 = vld [vmem:[%s3073_s1 + $0x3f0] ss:$8 sps:$4 sm:$0xff]   ;;  %v2100_v18 = vld [vmem:[%s3073_s1 + $0x104] ss:$8 sps:$4 sm:$0xff]   ;;  %v2137_v52 = vld [vmem:[%s3073_s1 + $0x460] ss:$8 sps:$4 sm:$0xff]  }
  0x18   :  { %1574 = vmatpush1.bf16.msra.mxu0 %v2035_v23  ;;  %1452 = vmatprep.subr.bf16.mxu1 %v2036_v24  ;;  %v2523_v3 = vrot.slane %v263_v62, %v2488_v51  ;;  %v2103_v19 = vld [vmem:[%s3073_s1 + $0x404] ss:$8 sps:$4 sm:$0xff]   ;;  %v293_v22 = vcombine.high %v2562_v15, %v2562_v15  ;;  %v2098_v23 = vld [vmem:[%s3073_s1 + $0x100] ss:$8 sps:$4 sm:$0xff]   ;;  %v2119_v38 = vld [vmem:[%s3073_s1 + $0x430] ss:$8 sps:$4 sm:$0xff]  }
  0x19   :  { %1575 = vmatprep.subr.bf16.mxu0 %v2038_v25  ;;  %1472 = vmatprep.mubr.bf16.mxu1 %v2508_v61  ;;  %v311_v20 = vcombine.high %v2559_v14, %v2559_v14  ;;  %v2101_v24 = vld [vmem:[%s3073_s1 + $0x400] ss:$8 sps:$4 sm:$0xff]   ;;  %v2106_v25 = vld [vmem:[%s3073_s1 + $0x114] ss:$8 sps:$4 sm:$0xff]   ;;  %v2124_v39 = vld [vmem:[%s3073_s1 + $0x144] ss:$8 sps:$4 sm:$0xff]  }
  0x1a   :  { %v295_v4 = vcombine.high %v2523_v3, %v2523_v3  ;;  %v2127_v40 = vld [vmem:[%s3073_s1 + $0x444] ss:$8 sps:$4 sm:$0xff]   ;;  %v2128_v46 = vld [vmem:[%s3073_s1 + $0x150] ss:$8 sps:$4 sm:$0xff]   ;;  %v2142_v53 = vld [vmem:[%s3073_s1 + $0x174] ss:$8 sps:$4 sm:$0xff]  }
  0x1b   :  { %1453 = vmatpush1.bf16.msra.mxu1 %v2040_v26  ;;  %v2109_v26 = vld [vmem:[%s3073_s1 + $0x414] ss:$8 sps:$4 sm:$0xff]   ;;  %v2146_v59 = vld [vmem:[%s3073_s1 + $0x180] ss:$8 sps:$4 sm:$0xff]   ;;  %vm1751_vm3 = vmor %vm1750_vm2, %vm1749_vm1 }
  0x1c   :  { %1576 = vmatpush1.bf16.msra.mxu0 %v2041_v27  ;;  %1454 = vmatprep.subr.bf16.mxu1 %v2042_v28  ;;  %v294_v27 = vcombine.high %v2508_v61, %v2508_v61  ;;  %v2598_v28 = vrot.slane %v311_v20, %v2488_v51  ;;  %v2145_v54 = vld [vmem:[%s3073_s1 + $0x474] ss:$8 sps:$4 sm:$0xff]   ;;  %v2149_v60 = vld [vmem:[%s3073_s1 + $0x480] ss:$8 sps:$4 sm:$0xff]   ;;  %v2179_v20 = vld [vmem:[%s3073_s1 + $0x4d0] ss:$8 sps:$4 sm:$0xff]  }
  0x1d   :  { %1577 = vmatprep.subr.bf16.mxu0 %v2044_v29  ;;  %1595 = vmatprep.mubr.bf16.mxu0 %v295_v4  ;;  %v2104_v29 = vld [vmem:[%s3073_s1 + $0x110] ss:$8 sps:$4 sm:$0xff]   ;;  %v2154_v61 = vld [vmem:[%s3073_s1 + $0x194] ss:$8 sps:$4 sm:$0xff]   ;;  %v2158_v4 = vld [vmem:[%s3073_s1 + $0x1a0] ss:$8 sps:$4 sm:$0xff]  }
  0x1e   :  { %v2157_v62 = vld [vmem:[%s3073_s1 + $0x494] ss:$8 sps:$4 sm:$0xff]  }
  0x1f   :  { %1455 = vmatpush1.bf16.msra.mxu1 %v2046_v30  ;;  %v2107_v30 = vld [vmem:[%s3073_s1 + $0x410] ss:$8 sps:$4 sm:$0xff]  }
  0x20   :  { %1578 = vmatpush1.bf16.msra.mxu0 %v2047_v31  ;;  %1456 = vmatprep.subr.bf16.mxu1 %v2048_v32  ;;  %v2112_v31 = vld [vmem:[%s3073_s1 + $0x124] ss:$8 sps:$4 sm:$0xff]  }
  0x21   :  { %1579 = vmatprep.subr.bf16.mxu0 %v2050_v33  ;;  %v2115_v32 = vld [vmem:[%s3073_s1 + $0x424] ss:$8 sps:$4 sm:$0xff]   ;;  %v2110_v33 = vld [vmem:[%s3073_s1 + $0x120] ss:$8 sps:$4 sm:$0xff]  }
  0x23   :  { %1457 = vmatpush1.bf16.msra.mxu1 %v2052_v34  ;;  %v2113_v34 = vld [vmem:[%s3073_s1 + $0x420] ss:$8 sps:$4 sm:$0xff]  }
  0x24   :  { %1580 = vmatpush1.bf16.msra.mxu0 %v2053_v35  ;;  %1458 = vmatprep.subr.bf16.mxu1 %v2054_v36  ;;  %v2118_v35 = vld [vmem:[%s3073_s1 + $0x134] ss:$8 sps:$4 sm:$0xff]  }
  0x25   :  { %1581 = vmatprep.subr.bf16.mxu0 %v2056_v37  ;;  %v2121_v36 = vld [vmem:[%s3073_s1 + $0x434] ss:$8 sps:$4 sm:$0xff]   ;;  %v2116_v37 = vld [vmem:[%s3073_s1 + $0x130] ss:$8 sps:$4 sm:$0xff]  }
  0x27   :  { %1459 = vmatpush1.bf16.msra.mxu1 %v2058_v41  ;;  %v2122_v41 = vld [vmem:[%s3073_s1 + $0x140] ss:$8 sps:$4 sm:$0xff]  }
  0x28   :  { %1582 = vmatpush1.bf16.msra.mxu0 %v2059_v42  ;;  %1460 = vmatprep.subr.bf16.mxu1 %v2060_v43  ;;  %v2125_v42 = vld [vmem:[%s3073_s1 + $0x440] ss:$8 sps:$4 sm:$0xff]   ;;  %v2130_v43 = vld [vmem:[%s3073_s1 + $0x154] ss:$8 sps:$4 sm:$0xff]  }
  0x29   :  { %1583 = vmatprep.subr.bf16.mxu0 %v2062_v44  ;;  %v2133_v44 = vld [vmem:[%s3073_s1 + $0x454] ss:$8 sps:$4 sm:$0xff]  }
  0x2b   :  { %1461 = vmatpush1.bf16.msra.mxu1 %v2064_v47  ;;  %v2131_v47 = vld [vmem:[%s3073_s1 + $0x450] ss:$8 sps:$4 sm:$0xff]  }
  0x2c   :  { %1584 = vmatpush1.bf16.msra.mxu0 %v2065_v48  ;;  %1462 = vmatprep.subr.bf16.mxu1 %v2066_v49  ;;  %v2136_v48 = vld [vmem:[%s3073_s1 + $0x164] ss:$8 sps:$4 sm:$0xff]  }
  0x2d   :  { %1585 = vmatprep.subr.bf16.mxu0 %v2068_v50  ;;  %v2139_v49 = vld [vmem:[%s3073_s1 + $0x464] ss:$8 sps:$4 sm:$0xff]   ;;  %v2134_v50 = vld [vmem:[%s3073_s1 + $0x160] ss:$8 sps:$4 sm:$0xff]  }
  0x2f   :  { %1463 = vmatpush1.bf16.msra.mxu1 %v2070_v55  ;;  %v2140_v55 = vld [vmem:[%s3073_s1 + $0x170] ss:$8 sps:$4 sm:$0xff]  }
  0x30   :  { %1586 = vmatpush1.bf16.msra.mxu0 %v2071_v56  ;;  %1464 = vmatprep.subr.bf16.mxu1 %v2072_v57  ;;  %v2143_v56 = vld [vmem:[%s3073_s1 + $0x470] ss:$8 sps:$4 sm:$0xff]   ;;  %v2148_v57 = vld [vmem:[%s3073_s1 + $0x184] ss:$8 sps:$4 sm:$0xff]  }
  0x31   :  { %1587 = vmatprep.subr.bf16.mxu0 %v2074_v58  ;;  %v2151_v58 = vld [vmem:[%s3073_s1 + $0x484] ss:$8 sps:$4 sm:$0xff]  }
  0x33   :  { %1465 = vmatpush1.bf16.msra.mxu1 %v2076_v63  ;;  %v2152_v63 = vld [vmem:[%s3073_s1 + $0x190] ss:$8 sps:$4 sm:$0xff]  }
  0x34   :  { %1588 = vmatpush1.bf16.msra.mxu0 %v2077_v0  ;;  %1466 = vmatprep.subr.bf16.mxu1 %v2078_v1  ;;  %v2155_v0 = vld [vmem:[%s3073_s1 + $0x490] ss:$8 sps:$4 sm:$0xff]   ;;  %v2160_v1 = vld [vmem:[%s3073_s1 + $0x1a4] ss:$8 sps:$4 sm:$0xff]  }
  0x35   :  { %1589 = vmatprep.subr.bf16.mxu0 %v2080_v2  ;;  %v2163_v2 = vld [vmem:[%s3073_s1 + $0x4a4] ss:$8 sps:$4 sm:$0xff]  }
  0x37   :  { %1467 = vmatpush1.bf16.msra.mxu1 %v2082_v5  ;;  %v2161_v5 = vld [vmem:[%s3073_s1 + $0x4a0] ss:$8 sps:$4 sm:$0xff]  }
  0x38   :  { %1590 = vmatpush1.bf16.msra.mxu0 %v2083_v6  ;;  %1468 = vmatprep.subr.bf16.mxu1 %v2084_v7  ;;  %v2166_v6 = vld [vmem:[%s3073_s1 + $0x1b4] ss:$8 sps:$4 sm:$0xff]  }
  0x39   :  { %1591 = vmatprep.subr.bf16.mxu0 %v2086_v8  ;;  %v2169_v7 = vld [vmem:[%s3073_s1 + $0x4b4] ss:$8 sps:$4 sm:$0xff]   ;;  %v2164_v8 = vld [vmem:[%s3073_s1 + $0x1b0] ss:$8 sps:$4 sm:$0xff]  }
  0x3b   :  { %1469 = vmatpush1.bf16.msra.mxu1 %v2088_v10  ;;  %v2167_v10 = vld [vmem:[%s3073_s1 + $0x4b0] ss:$8 sps:$4 sm:$0xff]  }
  0x3c   :  { %1592 = vmatpush1.bf16.msra.mxu0 %v2089_v11  ;;  %1470 = vmatprep.subr.bf16.mxu1 %v2090_v12  ;;  %v2172_v11 = vld [vmem:[%s3073_s1 + $0x1c4] ss:$8 sps:$4 sm:$0xff]  }
  0x3d   :  { %1593 = vmatprep.subr.bf16.mxu0 %v2092_v13  ;;  %v2175_v12 = vld [vmem:[%s3073_s1 + $0x4c4] ss:$8 sps:$4 sm:$0xff]   ;;  %v2170_v13 = vld [vmem:[%s3073_s1 + $0x1c0] ss:$8 sps:$4 sm:$0xff]  }
  0x3f   :  { %1471 = vmatpush1.bf16.msra.mxu1 %v2094_v16  ;;  %v2173_v16 = vld [vmem:[%s3073_s1 + $0x4c0] ss:$8 sps:$4 sm:$0xff]  }
  0x40   :  { %1594 = vmatpush1.bf16.msra.mxu0 %v2095_v17  ;;  %1481 = vmatprep.subr.bf16.mxu1 %v2100_v18  ;;  %v2178_v17 = vld [vmem:[%s3073_s1 + $0x1d4] ss:$8 sps:$4 sm:$0xff]  }
  0x41   :  { %1604 = vmatprep.subr.bf16.mxu0 %v2103_v19  ;;  %v2181_v18 = vld [vmem:[%s3073_s1 + $0x4d4] ss:$8 sps:$4 sm:$0xff]   ;;  %v2176_v19 = vld [vmem:[%s3073_s1 + $0x1d0] ss:$8 sps:$4 sm:$0xff]  }
  0x42   :  { %1473 = vmatmul.mubr.bf16.vlgmr.msra.gmra.mrb[0].mxu1 %v2579_v21 }
  0x43   :  { %1596 = vmatmul.mubr.bf16.vlgmr.msra.gmra.mrb[0].mxu0 %v293_v22  ;;  %1482 = vmatpush1.bf16.msra.mxu1 %v2098_v23  ;;  %v2184_v22 = vld [vmem:[%s3073_s1 + $0x1e4] ss:$8 sps:$4 sm:$0xff]  }
  0x44   :  { %1605 = vmatpush1.bf16.msra.mxu0 %v2101_v24  ;;  %1483 = vmatprep.subr.bf16.mxu1 %v2106_v25  ;;  %v2187_v23 = vld [vmem:[%s3073_s1 + $0x4e4] ss:$8 sps:$4 sm:$0xff]   ;;  %v2182_v24 = vld [vmem:[%s3073_s1 + $0x1e0] ss:$8 sps:$4 sm:$0xff]  }
  0x45   :  { %1606 = vmatprep.subr.bf16.mxu0 %v2109_v26  ;;  %1513 = vmatprep.mubr.bf16.mxu1 %v294_v27  ;;  %v2185_v25 = vld [vmem:[%s3073_s1 + $0x4e0] ss:$8 sps:$4 sm:$0xff]   ;;  %v2190_v26 = vld [vmem:[%s3073_s1 + $0x1f4] ss:$8 sps:$4 sm:$0xff]  }
  0x46   :  { %1636 = vmatprep.mubr.bf16.mxu0 %v2598_v28  ;;  %v2193_v27 = vld [vmem:[%s3073_s1 + $0x4f4] ss:$8 sps:$4 sm:$0xff]  }
  0x47   :  { %1484 = vmatpush1.bf16.msra.mxu1 %v2104_v29  ;;  %v2188_v29 = vld [vmem:[%s3073_s1 + $0x1f0] ss:$8 sps:$4 sm:$0xff]  }
  0x48   :  { %1607 = vmatpush1.bf16.msra.mxu0 %v2107_v30  ;;  %1485 = vmatprep.subr.bf16.mxu1 %v2112_v31  ;;  %v2191_v30 = vld [vmem:[%s3073_s1 + $0x4f0] ss:$8 sps:$4 sm:$0xff]   ;;  %v2196_v31 = vld [vmem:[%s3073_s1 + $0x204] ss:$8 sps:$4 sm:$0xff]  }
  0x49   :  { %1608 = vmatprep.subr.bf16.mxu0 %v2115_v32  ;;  %v2199_v32 = vld [vmem:[%s3073_s1 + $0x504] ss:$8 sps:$4 sm:$0xff]  }
  0x4b   :  { %1486 = vmatpush1.bf16.msra.mxu1 %v2110_v33  ;;  %v292_v33 = vcombine.high %v2579_v21, %v2579_v21  ;;  %v2202_v21 = vld [vmem:[%s3073_s1 + $0x214] ss:$8 sps:$4 sm:$0xff]  }
  0x4c   :  { %1609 = vmatpush1.bf16.msra.mxu0 %v2113_v34  ;;  %1487 = vmatprep.subr.bf16.mxu1 %v2118_v35  ;;  %v2786_v34 = vrot.slane %v2559_v14, %v2488_v51  ;;  %v2194_v35 = vld [vmem:[%s3073_s1 + $0x200] ss:$8 sps:$4 sm:$0xff]   ;;  %v2205_v14 = vld [vmem:[%s3073_s1 + $0x514] ss:$8 sps:$4 sm:$0xff]  }
  0x4d   :  { %1610 = vmatprep.subr.bf16.mxu0 %v2121_v36  ;;  %v2197_v36 = vld [vmem:[%s3073_s1 + $0x500] ss:$8 sps:$4 sm:$0xff]  }
  0x4f   :  { %1488 = vmatpush1.bf16.msra.mxu1 %v2116_v37  ;;  %v342_v37 = vcombine.high %v2598_v28, %v2598_v28  ;;  %v2211_v28 = vld [vmem:[%s3073_s1 + $0x524] ss:$8 sps:$4 sm:$0xff]  }
  0x50   :  { %1611 = vmatpush1.bf16.msra.mxu0 %v2119_v38  ;;  %1489 = vmatprep.subr.bf16.mxu1 %v2124_v39  ;;  %v2200_v38 = vld [vmem:[%s3073_s1 + $0x210] ss:$8 sps:$4 sm:$0xff]  }
  0x51   :  { %1612 = vmatprep.subr.bf16.mxu0 %v2127_v40  ;;  %v2203_v39 = vld [vmem:[%s3073_s1 + $0x510] ss:$8 sps:$4 sm:$0xff]   ;;  %v2208_v40 = vld [vmem:[%s3073_s1 + $0x224] ss:$8 sps:$4 sm:$0xff]  }
  0x53   :  { %1490 = vmatpush1.bf16.msra.mxu1 %v2122_v41  ;;  %v2206_v41 = vld [vmem:[%s3073_s1 + $0x220] ss:$8 sps:$4 sm:$0xff]  }
  0x54   :  { %1613 = vmatpush1.bf16.msra.mxu0 %v2125_v42  ;;  %1491 = vmatprep.subr.bf16.mxu1 %v2130_v43  ;;  %v2209_v42 = vld [vmem:[%s3073_s1 + $0x520] ss:$8 sps:$4 sm:$0xff]   ;;  %v2214_v43 = vld [vmem:[%s3073_s1 + $0x234] ss:$8 sps:$4 sm:$0xff]  }
  0x55   :  { %1614 = vmatprep.subr.bf16.mxu0 %v2133_v44  ;;  %v2212_v44 = vld [vmem:[%s3073_s1 + $0x230] ss:$8 sps:$4 sm:$0xff]  }
  0x57   :  { %1492 = vmatpush1.bf16.msra.mxu1 %v2128_v46  ;;  %v2215_v46 = vld [vmem:[%s3073_s1 + $0x530] ss:$8 sps:$4 sm:$0xff]  }
  0x58   :  { %1615 = vmatpush1.bf16.msra.mxu0 %v2131_v47  ;;  %1493 = vmatprep.subr.bf16.mxu1 %v2136_v48  ;;  %v2220_v47 = vld [vmem:[%s3073_s1 + $0x244] ss:$8 sps:$4 sm:$0xff]  }
  0x59   :  { %1616 = vmatprep.subr.bf16.mxu0 %v2139_v49  ;;  %v2223_v48 = vld [vmem:[%s3073_s1 + $0x544] ss:$8 sps:$4 sm:$0xff]   ;;  %v2218_v49 = vld [vmem:[%s3073_s1 + $0x240] ss:$8 sps:$4 sm:$0xff]  }
  0x5b   :  { %1494 = vmatpush1.bf16.msra.mxu1 %v2134_v50  ;;  %v2221_v50 = vld [vmem:[%s3073_s1 + $0x540] ss:$8 sps:$4 sm:$0xff]  }
  0x5c   :  { %1617 = vmatpush1.bf16.msra.mxu0 %v2137_v52  ;;  %1495 = vmatprep.subr.bf16.mxu1 %v2142_v53  ;;  %v2226_v52 = vld [vmem:[%s3073_s1 + $0x254] ss:$8 sps:$4 sm:$0xff]  }
  0x5d   :  { %1618 = vmatprep.subr.bf16.mxu0 %v2145_v54  ;;  %v2229_v53 = vld [vmem:[%s3073_s1 + $0x554] ss:$8 sps:$4 sm:$0xff]   ;;  %v2224_v54 = vld [vmem:[%s3073_s1 + $0x250] ss:$8 sps:$4 sm:$0xff]  }
  0x5f   :  { %1496 = vmatpush1.bf16.msra.mxu1 %v2140_v55  ;;  %v2227_v55 = vld [vmem:[%s3073_s1 + $0x550] ss:$8 sps:$4 sm:$0xff]  }
  0x60   :  { %1619 = vmatpush1.bf16.msra.mxu0 %v2143_v56  ;;  %1497 = vmatprep.subr.bf16.mxu1 %v2148_v57  ;;  %v2232_v56 = vld [vmem:[%s3073_s1 + $0x264] ss:$8 sps:$4 sm:$0xff]  }
  0x61   :  { %1620 = vmatprep.subr.bf16.mxu0 %v2151_v58  ;;  %v2235_v57 = vld [vmem:[%s3073_s1 + $0x564] ss:$8 sps:$4 sm:$0xff]   ;;  %v2230_v58 = vld [vmem:[%s3073_s1 + $0x260] ss:$8 sps:$4 sm:$0xff]  }
  0x63   :  { %1498 = vmatpush1.bf16.msra.mxu1 %v2146_v59  ;;  %v2233_v59 = vld [vmem:[%s3073_s1 + $0x560] ss:$8 sps:$4 sm:$0xff]  }
  0x64   :  { %1621 = vmatpush1.bf16.msra.mxu0 %v2149_v60  ;;  %1499 = vmatprep.subr.bf16.mxu1 %v2154_v61  ;;  %v2238_v60 = vld [vmem:[%s3073_s1 + $0x274] ss:$8 sps:$4 sm:$0xff]  }
  0x65   :  { %1622 = vmatprep.subr.bf16.mxu0 %v2157_v62  ;;  %v2241_v61 = vld [vmem:[%s3073_s1 + $0x574] ss:$8 sps:$4 sm:$0xff]   ;;  %v2236_v62 = vld [vmem:[%s3073_s1 + $0x270] ss:$8 sps:$4 sm:$0xff]  }
  0x67   :  { %1500 = vmatpush1.bf16.msra.mxu1 %v2152_v63  ;;  %v2239_v63 = vld [vmem:[%s3073_s1 + $0x570] ss:$8 sps:$4 sm:$0xff]  }
  0x68   :  { %1623 = vmatpush1.bf16.msra.mxu0 %v2155_v0  ;;  %1501 = vmatprep.subr.bf16.mxu1 %v2160_v1  ;;  %v2244_v0 = vld [vmem:[%s3073_s1 + $0x284] ss:$8 sps:$4 sm:$0xff]  }
  0x69   :  { %1624 = vmatprep.subr.bf16.mxu0 %v2163_v2  ;;  %v2247_v1 = vld [vmem:[%s3073_s1 + $0x584] ss:$8 sps:$4 sm:$0xff]   ;;  %v2242_v2 = vld [vmem:[%s3073_s1 + $0x280] ss:$8 sps:$4 sm:$0xff]  }
  0x6b   :  { %1502 = vmatpush1.bf16.msra.mxu1 %v2158_v4  ;;  %v2245_v4 = vld [vmem:[%s3073_s1 + $0x580] ss:$8 sps:$4 sm:$0xff]  }
  0x6c   :  { %1625 = vmatpush1.bf16.msra.mxu0 %v2161_v5  ;;  %1503 = vmatprep.subr.bf16.mxu1 %v2166_v6  ;;  %v2250_v5 = vld [vmem:[%s3073_s1 + $0x294] ss:$8 sps:$4 sm:$0xff]  }
  0x6d   :  { %1626 = vmatprep.subr.bf16.mxu0 %v2169_v7  ;;  %v2253_v6 = vld [vmem:[%s3073_s1 + $0x594] ss:$8 sps:$4 sm:$0xff]   ;;  %v2248_v7 = vld [vmem:[%s3073_s1 + $0x290] ss:$8 sps:$4 sm:$0xff]  }
  0x6f   :  { %1504 = vmatpush1.bf16.msra.mxu1 %v2164_v8  ;;  %v2251_v8 = vld [vmem:[%s3073_s1 + $0x590] ss:$8 sps:$4 sm:$0xff]  }
  0x70   :  { %1627 = vmatpush1.bf16.msra.mxu0 %v2167_v10  ;;  %1505 = vmatprep.subr.bf16.mxu1 %v2172_v11  ;;  %v2256_v10 = vld [vmem:[%s3073_s1 + $0x2a4] ss:$8 sps:$4 sm:$0xff]  }
  0x71   :  { %1628 = vmatprep.subr.bf16.mxu0 %v2175_v12  ;;  %v2259_v11 = vld [vmem:[%s3073_s1 + $0x5a4] ss:$8 sps:$4 sm:$0xff]   ;;  %v2254_v12 = vld [vmem:[%s3073_s1 + $0x2a0] ss:$8 sps:$4 sm:$0xff]  }
  0x73   :  { %1506 = vmatpush1.bf16.msra.mxu1 %v2170_v13  ;;  %v2257_v13 = vld [vmem:[%s3073_s1 + $0x5a0] ss:$8 sps:$4 sm:$0xff]  }
  0x74   :  { %1629 = vmatpush1.bf16.msra.mxu0 %v2173_v16  ;;  %1507 = vmatprep.subr.bf16.mxu1 %v2178_v17  ;;  %v2262_v16 = vld [vmem:[%s3073_s1 + $0x2b4] ss:$8 sps:$4 sm:$0xff]  }
  0x75   :  { %1630 = vmatprep.subr.bf16.mxu0 %v2181_v18  ;;  %v2265_v17 = vld [vmem:[%s3073_s1 + $0x5b4] ss:$8 sps:$4 sm:$0xff]   ;;  %v2260_v18 = vld [vmem:[%s3073_s1 + $0x2b0] ss:$8 sps:$4 sm:$0xff]  }
  0x77   :  { %1508 = vmatpush1.bf16.msra.mxu1 %v2176_v19  ;;  %v2263_v19 = vld [vmem:[%s3073_s1 + $0x5b0] ss:$8 sps:$4 sm:$0xff]  }
  0x78   :  { %1631 = vmatpush1.bf16.msra.mxu0 %v2179_v20  ;;  %1509 = vmatprep.subr.bf16.mxu1 %v2184_v22  ;;  %v2268_v20 = vld [vmem:[%s3073_s1 + $0x2c4] ss:$8 sps:$4 sm:$0xff]  }
  0x79   :  { %1632 = vmatprep.subr.bf16.mxu0 %v2187_v23  ;;  %v2271_v22 = vld [vmem:[%s3073_s1 + $0x5c4] ss:$8 sps:$4 sm:$0xff]   ;;  %v2266_v23 = vld [vmem:[%s3073_s1 + $0x2c0] ss:$8 sps:$4 sm:$0xff]  }
  0x7b   :  { %1510 = vmatpush1.bf16.msra.mxu1 %v2182_v24  ;;  %v2269_v24 = vld [vmem:[%s3073_s1 + $0x5c0] ss:$8 sps:$4 sm:$0xff]  }
  0x7c   :  { %1633 = vmatpush1.bf16.msra.mxu0 %v2185_v25  ;;  %1511 = vmatprep.subr.bf16.mxu1 %v2190_v26  ;;  %v2274_v25 = vld [vmem:[%s3073_s1 + $0x2d4] ss:$8 sps:$4 sm:$0xff]  }
  0x7d   :  { %1634 = vmatprep.subr.bf16.mxu0 %v2193_v27  ;;  %v2277_v26 = vld [vmem:[%s3073_s1 + $0x5d4] ss:$8 sps:$4 sm:$0xff]   ;;  %v296_v27 = vcombine.high %v2543_v9, %v2543_v9  ;;  %v2283_v9 = vld [vmem:[%s3073_s1 + $0x5e4] ss:$8 sps:$4 sm:$0xff]  }
  0x7f   :  { %1512 = vmatpush1.bf16.msra.mxu1 %v2188_v29  ;;  %v2272_v29 = vld [vmem:[%s3073_s1 + $0x2d0] ss:$8 sps:$4 sm:$0xff]  }
  0x80   :  { %1635 = vmatpush1.bf16.msra.mxu0 %v2191_v30  ;;  %1522 = vmatprep.subr.bf16.mxu1 %v2196_v31  ;;  %v2275_v30 = vld [vmem:[%s3073_s1 + $0x5d0] ss:$8 sps:$4 sm:$0xff]   ;;  %v2280_v31 = vld [vmem:[%s3073_s1 + $0x2e4] ss:$8 sps:$4 sm:$0xff]  }
  0x81   :  { %1645 = vmatprep.subr.bf16.mxu0 %v2199_v32  ;;  %v2278_v32 = vld [vmem:[%s3073_s1 + $0x2e0] ss:$8 sps:$4 sm:$0xff]  }
  0x82   :  { %1514 = vmatmul.mubr.bf16.vlgmr.msra.gmra.mrb[0].mxu1 %v292_v33  ;;  %v2281_v33 = vld [vmem:[%s3073_s1 + $0x5e0] ss:$8 sps:$4 sm:$0xff]  }
  0x83   :  { %1637 = vmatmul.mubr.bf16.vlgmr.msra.gmra.mrb[0].mxu0 %v2786_v34  ;;  %1523 = vmatpush1.bf16.msra.mxu1 %v2194_v35  ;;  %v2969_v35 = vrot.slane %v296_v27, %v2488_v51 }
  0x84   :  { %1646 = vmatpush1.bf16.msra.mxu0 %v2197_v36  ;;  %1524 = vmatprep.subr.bf16.mxu1 %v2202_v21  ;;  %v2286_v36 = vld [vmem:[%s3073_s1 + $0x2f4] ss:$8 sps:$4 sm:$0xff]  }
  0x85   :  { %1647 = vmatprep.subr.bf16.mxu0 %v2205_v14  ;;  %1554 = vmatprep.mubr.bf16.mxu1 %v2523_v3  ;;  %v2217_v3 = vld [vmem:[%s3073_s1 + $0x534] ss:$8 sps:$4 sm:$0xff]   ;;  %v2284_v14 = vld [vmem:[%s3073_s1 + $0x2f0] ss:$8 sps:$4 sm:$0xff]  }
  0x86   :  { %1677 = vmatprep.mubr.bf16.mxu0 %v342_v37  ;;  %v2289_v21 = vld [vmem:[%s3073_s1 + $0x5f4] ss:$8 sps:$4 sm:$0xff]   ;;  %v2287_v37 = vld [vmem:[%s3073_s1 + $0x5f0] ss:$8 sps:$4 sm:$0xff]  }
  0x87   :  { %1525 = vmatpush1.bf16.msra.mxu1 %v2200_v38  ;;  %v312_v38 = vcombine.high %v2969_v35, %v2969_v35 }
  0x88   :  { %1648 = vmatpush1.bf16.msra.mxu0 %v2203_v39  ;;  %1526 = vmatprep.subr.bf16.mxu1 %v2208_v40  ;;  %v2292_v39 = vld [vmem:[%s3073_s1 + $0x604] ss:$8 sps:$4 sm:$0xff]   ;;  %v341_v40 = vcombine.high %v2786_v34, %v2786_v34  ;;  %v2293_v34 = vld [vmem:[%s3073_s1 + $0x610] ss:$8 sps:$4 sm:$0xff]  }
  0x89   :  { %1649 = vmatprep.subr.bf16.mxu0 %v2211_v28  ;;  %v2290_v28 = vld [vmem:[%s3073_s1 + $0x600] ss:$8 sps:$4 sm:$0xff]  }
  0x8b   :  { %1527 = vmatpush1.bf16.msra.mxu1 %v2206_v41  ;;  %v340_v41 = vrot.slane %v312_v38, %v2488_v51 }
  0x8c   :  { %1650 = vmatpush1.bf16.msra.mxu0 %v2209_v42  ;;  %1528 = vmatprep.subr.bf16.mxu1 %v2214_v43  ;;  %v2295_v42 = vld [vmem:[%s3073_s1 + $0x614] ss:$8 sps:$4 sm:$0xff]   ;;  %v2298_v43 = vld [vmem:[%s3073_s1 + $0x624] ss:$8 sps:$4 sm:$0xff]  }
  0x8d   :  { %1651 = vmatprep.subr.bf16.mxu0 %v2217_v3  ;;  %v2296_v3 = vld [vmem:[%s3073_s1 + $0x620] ss:$8 sps:$4 sm:$0xff]  }
  0x8f   :  { %1529 = vmatpush1.bf16.msra.mxu1 %v2212_v44  ;;  %v2299_v44 = vld [vmem:[%s3073_s1 + $0x630] ss:$8 sps:$4 sm:$0xff]  }
  0x90   :  { %1652 = vmatpush1.bf16.msra.mxu0 %v2215_v46  ;;  %1530 = vmatprep.subr.bf16.mxu1 %v2220_v47  ;;  %v2304_v46 = vld [vmem:[%s3073_s1 + $0x644] ss:$8 sps:$4 sm:$0xff]   ;;  %v2302_v47 = vld [vmem:[%s3073_s1 + $0x640] ss:$8 sps:$4 sm:$0xff]  }
  0x91   :  { %1653 = vmatprep.subr.bf16.mxu0 %v2223_v48  ;;  %v2307_v48 = vld [vmem:[%s3073_s1 + $0x654] ss:$8 sps:$4 sm:$0xff]  }
  0x93   :  { %1531 = vmatpush1.bf16.msra.mxu1 %v2218_v49  ;;  %v2305_v49 = vld [vmem:[%s3073_s1 + $0x650] ss:$8 sps:$4 sm:$0xff]  }
  0x94   :  { %1654 = vmatpush1.bf16.msra.mxu0 %v2221_v50  ;;  %1532 = vmatprep.subr.bf16.mxu1 %v2226_v52  ;;  %v2310_v50 = vld [vmem:[%s3073_s1 + $0x664] ss:$8 sps:$4 sm:$0xff]   ;;  %v2308_v52 = vld [vmem:[%s3073_s1 + $0x660] ss:$8 sps:$4 sm:$0xff]  }
  0x95   :  { %1655 = vmatprep.subr.bf16.mxu0 %v2229_v53  ;;  %v2313_v53 = vld [vmem:[%s3073_s1 + $0x674] ss:$8 sps:$4 sm:$0xff]  }
  0x97   :  { %1533 = vmatpush1.bf16.msra.mxu1 %v2224_v54  ;;  %v2311_v54 = vld [vmem:[%s3073_s1 + $0x670] ss:$8 sps:$4 sm:$0xff]  }
  0x98   :  { %1656 = vmatpush1.bf16.msra.mxu0 %v2227_v55  ;;  %1534 = vmatprep.subr.bf16.mxu1 %v2232_v56  ;;  %v2316_v55 = vld [vmem:[%s3073_s1 + $0x684] ss:$8 sps:$4 sm:$0xff]   ;;  %v2314_v56 = vld [vmem:[%s3073_s1 + $0x680] ss:$8 sps:$4 sm:$0xff]  }
  0x99   :  { %1657 = vmatprep.subr.bf16.mxu0 %v2235_v57  ;;  %v2319_v57 = vld [vmem:[%s3073_s1 + $0x694] ss:$8 sps:$4 sm:$0xff]  }
  0x9b   :  { %1535 = vmatpush1.bf16.msra.mxu1 %v2230_v58  ;;  %v2317_v58 = vld [vmem:[%s3073_s1 + $0x690] ss:$8 sps:$4 sm:$0xff]  }
  0x9c   :  { %1658 = vmatpush1.bf16.msra.mxu0 %v2233_v59  ;;  %1536 = vmatprep.subr.bf16.mxu1 %v2238_v60  ;;  %v2322_v59 = vld [vmem:[%s3073_s1 + $0x6a4] ss:$8 sps:$4 sm:$0xff]   ;;  %v2320_v60 = vld [vmem:[%s3073_s1 + $0x6a0] ss:$8 sps:$4 sm:$0xff]  }
  0x9d   :  { %1659 = vmatprep.subr.bf16.mxu0 %v2241_v61  ;;  %v2325_v61 = vld [vmem:[%s3073_s1 + $0x6b4] ss:$8 sps:$4 sm:$0xff]  }
  0x9f   :  { %1537 = vmatpush1.bf16.msra.mxu1 %v2236_v62  ;;  %v2323_v62 = vld [vmem:[%s3073_s1 + $0x6b0] ss:$8 sps:$4 sm:$0xff]  }
  0xa0   :  { %1660 = vmatpush1.bf16.msra.mxu0 %v2239_v63  ;;  %1538 = vmatprep.subr.bf16.mxu1 %v2244_v0  ;;  %v326_v63 = vrot.slane %v2969_v35, %v2488_v51 }
  0xa1   :  { %1661 = vmatprep.subr.bf16.mxu0 %v2247_v1 }
  0xa3   :  { %1539 = vmatpush1.bf16.msra.mxu1 %v2242_v2 }
  0xa4   :  { %1662 = vmatpush1.bf16.msra.mxu0 %v2245_v4  ;;  %1540 = vmatprep.subr.bf16.mxu1 %v2250_v5  ;;  %v237_v5 = vsub.s32 0, %v2473_v45 }
  0xa5   :  { %1663 = vmatprep.subr.bf16.mxu0 %v2253_v6  ;;  %v233_v6 = vld [vmem:[%s3075_s2] sm:$0x3] }
  0xa7   :  { %1541 = vmatpush1.bf16.msra.mxu1 %v2248_v7  ;;  %v241_v7 = vsub.s32 1, %v2473_v45 }
  0xa8   :  { %1664 = vmatpush1.bf16.msra.mxu0 %v2251_v8  ;;  %1542 = vmatprep.subr.bf16.mxu1 %v2256_v10  ;;  %v238_v8 = vrot.slane %v233_v6, %v237_v5 }
  0xa9   :  { %1665 = vmatprep.subr.bf16.mxu0 %v2259_v11  ;;  %v242_v10 = vrot.slane %v233_v6, %v241_v7 }
  0xab   :  { %1543 = vmatpush1.bf16.msra.mxu1 %v2254_v12 }
  0xac   :  { %1666 = vmatpush1.bf16.msra.mxu0 %v2257_v13  ;;  %1544 = vmatprep.subr.bf16.mxu1 %v2262_v16 }
  0xad   :  { %1667 = vmatprep.subr.bf16.mxu0 %v2265_v17 }
  0xaf   :  { %1545 = vmatpush1.bf16.msra.mxu1 %v2260_v18 }
  0xb0   :  { %1668 = vmatpush1.bf16.msra.mxu0 %v2263_v19  ;;  %1546 = vmatprep.subr.bf16.mxu1 %v2268_v20 }
  0xb1   :  { %1669 = vmatprep.subr.bf16.mxu0 %v2271_v22 }
  0xb3   :  { %1547 = vmatpush1.bf16.msra.mxu1 %v2266_v23 }
  0xb4   :  { %1670 = vmatpush1.bf16.msra.mxu0 %v2269_v24  ;;  %1548 = vmatprep.subr.bf16.mxu1 %v2274_v25 }
  0xb5   :  { %1671 = vmatprep.subr.bf16.mxu0 %v2277_v26 }
  0xb7   :  { %1549 = vmatpush1.bf16.msra.mxu1 %v2272_v29 }
  0xb8   :  { %1672 = vmatpush1.bf16.msra.mxu0 %v2275_v30  ;;  %1550 = vmatprep.subr.bf16.mxu1 %v2280_v31 }
  0xb9   :  { %1673 = vmatprep.subr.bf16.mxu0 %v2283_v9 }
  0xbb   :  { %1551 = vmatpush1.bf16.msra.mxu1 %v2278_v32 }
  0xbc   :  { %1674 = vmatpush1.bf16.msra.mxu0 %v2281_v33  ;;  %1552 = vmatprep.subr.bf16.mxu1 %v2286_v36 }
  0xbd   :  { %1675 = vmatprep.subr.bf16.mxu0 %v2289_v21 }
  0xbf   :  { %1553 = vmatpush1.bf16.msra.mxu1 %v2284_v14 }
  0xc0   :  { %1676 = vmatpush1.bf16.msra.mxu0 %v2287_v37 }
  0xc1   :  { %1686 = vmatprep.subr.bf16.mxu0 %v2292_v39 }
  0xc2   :  { %1555 = vmatmul.mubr.bf16.vlgmr.msra.gmra.mrb[0].mxu1 %v2562_v15  ;;  %v2301_v15 = vld [vmem:[%s3073_s1 + $0x634] ss:$8 sps:$4 sm:$0xff]  }
  0xc3   :  { %1678 = vmatmul.mubr.bf16.vlgmr.msra.gmra.mrb[0].mxu0 %v341_v40 }
  0xc4   :  { %1687 = vmatpush1.bf16.msra.mxu0 %v2290_v28  ;;  %1973 = vmatprep.mubr.msk.bf16.mxu0 %vm1436_vm0, %v340_v41 }
  0xc5   :  { %1688 = vmatprep.subr.bf16.mxu0 %v2295_v42 }
  0xc8   :  { %1689 = vmatpush1.bf16.msra.mxu0 %v2293_v34 }
  0xc9   :  { %1690 = vmatprep.subr.bf16.mxu0 %v2298_v43 }
  0xcc   :  { %1691 = vmatpush1.bf16.msra.mxu0 %v2296_v3 }
  0xcd   :  { %1692 = vmatprep.subr.bf16.mxu0 %v2301_v15 }
  0xd0   :  { %1693 = vmatpush1.bf16.msra.mxu0 %v2299_v44 }
  0xd1   :  { %1694 = vmatprep.subr.bf16.mxu0 %v2304_v46 }
  0xd4   :  { %1695 = vmatpush1.bf16.msra.mxu0 %v2302_v47 }
  0xd5   :  { %1696 = vmatprep.subr.bf16.mxu0 %v2307_v48 }
  0xd8   :  { %1697 = vmatpush1.bf16.msra.mxu0 %v2305_v49 }
  0xd9   :  { %1698 = vmatprep.subr.bf16.mxu0 %v2310_v50 }
  0xdc   :  { %1699 = vmatpush1.bf16.msra.mxu0 %v2308_v52 }
  0xdd   :  { %1700 = vmatprep.subr.bf16.mxu0 %v2313_v53 }
  0xe0   :  { %1701 = vmatpush1.bf16.msra.mxu0 %v2311_v54 }
  0xe1   :  { %1702 = vmatprep.subr.bf16.mxu0 %v2316_v55 }
  0xe4   :  { %1703 = vmatpush1.bf16.msra.mxu0 %v2314_v56 }
  0xe5   :  { %1704 = vmatprep.subr.bf16.mxu0 %v2319_v57 }
  0xe8   :  { %1705 = vmatpush1.bf16.msra.mxu0 %v2317_v58 }
  0xe9   :  { %1706 = vmatprep.subr.bf16.mxu0 %v2322_v59 }
  0xec   :  { %1707 = vmatpush1.bf16.msra.mxu0 %v2320_v60 }
  0xed   :  { %1708 = vmatprep.subr.bf16.mxu0 %v2325_v61 }
  0xf0   :  { %1709 = vmatpush1.bf16.msra.mxu0 %v2323_v62 }
  0xf3   :  { %1719 = vmatmul.mubr.bf16.vlgmr.msra.gmra.mrb[0].mxu0 %v326_v63 }
 0x195   :  { %v1556_v0 = vpop.f32.mrb[0].mxu1 }
 0x196   :  { %v1558_v1 = vpop.f32.mrb[1].mxu1  ;;  %v1975_v11 = vadd.f32 %v1556_v0, %v238_v8 }
 0x197   :  { %v1560_v2 = vpop.f32.mrb[2].mxu1  ;;  %v1977_v12 = vadd.f32 %v1558_v1, %v242_v10 }
 0x198   :  { %v1561_v4 = vpop.f32.mrb[3].mxu1 }
 0x1c6   :  { %v1720_v13 = vpop.f32.mrb[0].mxu0 }
 0x1c7   :  { %v1976_v16 = vadd.f32 %v1975_v11, %v1720_v13  ;;  %v1722_v17 = vpop.f32.mrb[1].mxu0 }
 0x1c8   :  { %v1978_v18 = vadd.f32 %v1977_v12, %v1722_v17  ;;  %v1724_v19 = vpop.f32.mrb[2].mxu0 }
 0x1c9   :  { %v1727_v20 = vmax.f32 %v1976_v16, 0.0  ;;  %v1725_v22 = vpop.f32.mrb[3].mxu0 }
 0x1ca   :  { %v1728_v23 = vmax.f32 %v1978_v18, 0.0 }
 0x1cc   :  { %v1974_v24 = vpack.c.bf16 %v1728_v23, %v1727_v20 }
 0x1ce   :  { %v1740_v25 = vrot.slane %v1974_v24, %v2488_v51 }
 0x1d0   :  { %v1747_v45 = vrot.slane %v1740_v25, %v2488_v51 }
 0x1d2   :  { %1752 = vst.msk [vmem:[%s3076_s3] sm:$0x3] %vm1751_vm3, %v1747_v45 }

</bundles_post_ra>
